<compile_context>
chip_gen: v7x
topology: tpu7x:2x2x1
jax: 0.10.0
libtpu: 0.0.40
codegen_flags: <defaults>
</compile_context>

<pallas_src>
import functools

import jax
import jax.numpy as jnp
from jax.experimental import pallas as pl
from jax.experimental.pallas import tpu as pltpu


# ----------------------------------------------------------------------------
# Tiling helper
# ----------------------------------------------------------------------------

def _row_tile(M):
    # Largest tile that divides M, keeps the sublane dim a multiple of 8 and
    # yields >= 2 grid blocks (so v7x can shard the 'parallel' axis over its
    # two TensorCores).  Falls back to a single full-size block.
    for t in (256, 128, 64, 32, 16, 8):
        if M % t == 0 and M // t >= 2:
            return t
    return M


# ----------------------------------------------------------------------------
# Pallas kernel builders (cached so identical shapes compile exactly once)
# ----------------------------------------------------------------------------

@functools.lru_cache(maxsize=None)
def _make_fused_linear(M, K, N, act, pre_ln, residual, post_ln, eps):
    """o = maybe_postLN( maybe_act( maybe_preLN(x) @ w + b ) [+ res] )."""
    TM = _row_tile(M)

    def kernel(*refs):
        it = iter(refs)
        x_ref = next(it)
        if pre_ln:
            g1_ref = next(it); bln1_ref = next(it)
        w_ref = next(it); b_ref = next(it)
        if residual:
            r_ref = next(it)
        if post_ln:
            g2_ref = next(it); bln2_ref = next(it)
        o_ref = next(it)

        x = x_ref[...].astype(jnp.float32)
        if pre_ln:
            mu = jnp.mean(x, axis=-1, keepdims=True)
            xc = x - mu
            var = jnp.mean(xc * xc, axis=-1, keepdims=True)
            x = xc * jax.lax.rsqrt(var + eps) * g1_ref[...] + bln1_ref[...]
        acc = jnp.dot(x, w_ref[...], preferred_element_type=jnp.float32)
        acc = acc + b_ref[...]
        if act == "relu":
            acc = jnp.maximum(acc, 0.0)
        elif act == "gelu":   # exact (erf) GELU, matching PyTorch activation='gelu'
            acc = 0.5 * acc * (1.0 + jax.lax.erf(acc * 0.7071067811865476))
        if residual:
            acc = acc + r_ref[...].astype(jnp.float32)
        if post_ln:
            mu = jnp.mean(acc, axis=-1, keepdims=True)
            ac = acc - mu
            var = jnp.mean(ac * ac, axis=-1, keepdims=True)
            acc = ac * jax.lax.rsqrt(var + eps) * g2_ref[...] + bln2_ref[...]
        o_ref[...] = acc.astype(o_ref.dtype)

    in_specs = [pl.BlockSpec((TM, K), lambda i: (i, 0))]
    if pre_ln:
        in_specs += [pl.BlockSpec((1, K), lambda i: (0, 0)),
                     pl.BlockSpec((1, K), lambda i: (0, 0))]
    in_specs += [pl.BlockSpec((K, N), lambda i: (0, 0)),
                 pl.BlockSpec((1, N), lambda i: (0, 0))]
    if residual:
        in_specs += [pl.BlockSpec((TM, N), lambda i: (i, 0))]
    if post_ln:
        in_specs += [pl.BlockSpec((1, N), lambda i: (0, 0)),
                     pl.BlockSpec((1, N), lambda i: (0, 0))]

    return pl.pallas_call(
        kernel,
        out_shape=jax.ShapeDtypeStruct((M, N), jnp.float32),
        grid=(M // TM,),
        in_specs=in_specs,
        out_specs=pl.BlockSpec((TM, N), lambda i: (i, 0)),
        compiler_params=pltpu.CompilerParams(dimension_semantics=("parallel",)),
    )


def fused_linear(x2d, w, b, *, act=None, pre_ln=None, residual=None,
                 post_ln=None, eps=1e-5):
    M, K = x2d.shape
    N = w.shape[1]
    fn = _make_fused_linear(M, K, N, act, pre_ln is not None,
                            residual is not None, post_ln is not None, float(eps))
    args = [x2d]
    if pre_ln is not None:
        g, bl = pre_ln
        args += [g.reshape(1, K), bl.reshape(1, K)]
    args += [w, b.reshape(1, N)]
    if residual is not None:
        args.append(residual)
    if post_ln is not None:
        g2, b2 = post_ln
        args += [g2.reshape(1, N), b2.reshape(1, N)]
    return fn(*args)


@functools.lru_cache(maxsize=None)
def _make_attention(N, nH, Tq, Tk, dh):
    """softmax(q k^T / sqrt(dh)) v — all heads of one batch row per grid step."""
    scale = 1.0 / (dh ** 0.5)

    def kernel(q_ref, k_ref, v_ref, o_ref):
        q = q_ref[0].astype(jnp.float32)          # (nH, Tq, dh)
        k = k_ref[0].astype(jnp.float32)          # (nH, Tk, dh)
        v = v_ref[0].astype(jnp.float32)          # (nH, Tk, dh)
        s = jnp.einsum("hqd,hkd->hqk", q, k,
                       preferred_element_type=jnp.float32) * scale
        m = jnp.max(s, axis=-1, keepdims=True)
        p = jnp.exp(s - m)
        denom = jnp.sum(p, axis=-1, keepdims=True)
        p = p * pl.reciprocal(denom, approx=True)     # EUP, not VPU divide
        o = jnp.einsum("hqk,hkd->hqd", p, v, preferred_element_type=jnp.float32)
        o_ref[...] = o[None].astype(o_ref.dtype)

    return pl.pallas_call(
        kernel,
        out_shape=jax.ShapeDtypeStruct((N, nH, Tq, dh), jnp.float32),
        grid=(N,),
        in_specs=[
            pl.BlockSpec((1, nH, Tq, dh), lambda i: (i, 0, 0, 0)),
            pl.BlockSpec((1, nH, Tk, dh), lambda i: (i, 0, 0, 0)),
            pl.BlockSpec((1, nH, Tk, dh), lambda i: (i, 0, 0, 0)),
        ],
        out_specs=pl.BlockSpec((1, nH, Tq, dh), lambda i: (i, 0, 0, 0)),
        compiler_params=pltpu.CompilerParams(dimension_semantics=("parallel",)),
    )


@functools.lru_cache(maxsize=None)
def _make_fused_head(M, T, K_n, D, Dff, P):
    """Channel-reduce (over K_n) -> MLP(w1,relu,w2) -> length reducer, fused.

    sc (SMEM) = [w_cr[0..K_n-1], b_cr, b_mlp2].  One (batch, C_T) row per step.
    """

    def kernel(x_ref, sc_ref, w1_ref, b1_ref, w2_ref, wlen_ref, blen_ref, o_ref):
        x = x_ref[0].astype(jnp.float32)                    # (T, K_n, D)
        red = x[:, 0, :] * sc_ref[0]
        for k in range(1, K_n):
            red = red + x[:, k, :] * sc_ref[k]
        red = red + sc_ref[K_n]                             # channel-reducer bias
        h = jnp.dot(red, w1_ref[...], preferred_element_type=jnp.float32)
        h = jnp.maximum(h + b1_ref[...], 0.0)               # ReLU
        y = jnp.sum(h * w2_ref[...], axis=1, keepdims=True) + sc_ref[K_n + 1]  # (T,1)
        out = jnp.sum(y * wlen_ref[...], axis=0, keepdims=True) + blen_ref[...]  # (1,P)
        o_ref[...] = out[None].astype(o_ref.dtype)

    return pl.pallas_call(
        kernel,
        out_shape=jax.ShapeDtypeStruct((M, 1, P), jnp.float32),
        grid=(M,),
        in_specs=[
            pl.BlockSpec((1, T, K_n, D), lambda i: (i, 0, 0, 0)),
            pl.BlockSpec(memory_space=pltpu.MemorySpace.SMEM),
            pl.BlockSpec((D, Dff), lambda i: (0, 0)),
            pl.BlockSpec((1, Dff), lambda i: (0, 0)),
            pl.BlockSpec((1, Dff), lambda i: (0, 0)),
            pl.BlockSpec((T, P), lambda i: (0, 0)),
            pl.BlockSpec((1, P), lambda i: (0, 0)),
        ],
        out_specs=pl.BlockSpec((1, 1, P), lambda i: (i, 0, 0)),
        compiler_params=pltpu.CompilerParams(dimension_semantics=("parallel",)),
    )


# ----------------------------------------------------------------------------
# Transformer building blocks (glue in JAX, compute in the kernels above)
# ----------------------------------------------------------------------------

def _heads(x2d, N, T, nheads):
    D = x2d.shape[-1]
    dh = D // nheads
    return x2d.reshape(N, T, nheads, dh).transpose(0, 2, 1, 3)   # (N, nH, T, dh)


def _unheads(x4d):
    N, nH, T, dh = x4d.shape
    return x4d.transpose(0, 2, 1, 3).reshape(N * T, nH * dh)


def _attention(q, k, v):
    N, nH, Tq, dh = q.shape
    Tk = k.shape[2]
    return _make_attention(N, nH, Tq, Tk, dh)(q, k, v)


def self_attn_core(x2d, N, T, p, nheads, pre_ln=None):
    D = x2d.shape[-1] if pre_ln is None else pre_ln[0].shape[-1]
    D = x2d.shape[-1]
    qkv = fused_linear(x2d, p["wqkv"], p["bqkv"], pre_ln=pre_ln)   # (M, 3D)
    q = _heads(qkv[:, :D], N, T, nheads)
    k = _heads(qkv[:, D:2 * D], N, T, nheads)
    v = _heads(qkv[:, 2 * D:], N, T, nheads)
    return _unheads(_attention(q, k, v))


def cross_attn_core(x2d, mem2d, N, Tq, Tk, p, nheads, pre_ln):
    D = x2d.shape[-1]
    q2d = fused_linear(x2d, p["wq"], p["bq"], pre_ln=pre_ln)       # LN(x) -> Q
    kv = fused_linear(mem2d, p["wkv"], p["bkv"])                   # raw memory -> K,V
    q = _heads(q2d, N, Tq, nheads)
    k = _heads(kv[:, :D], N, Tk, nheads)
    v = _heads(kv[:, D:], N, Tk, nheads)
    return _unheads(_attention(q, k, v))


def decoder_layer_fwd(x2d, mem2d, N, Tq, Tk, p, nheads, final_ln=None):
    # nn.TransformerDecoderLayer, norm_first=True, eval mode (dropout = identity)
    o = self_attn_core(x2d, N, Tq, p["sa"], nheads, pre_ln=p["ln1"])
    x2d = fused_linear(o, p["sa"]["wo"], p["sa"]["bo"], residual=x2d)
    o = cross_attn_core(x2d, mem2d, N, Tq, Tk, p["ca"], nheads, pre_ln=p["ln2"])
    x2d = fused_linear(o, p["ca"]["wo"], p["ca"]["bo"], residual=x2d)
    ff = fused_linear(x2d, p["ffn"]["w1"], p["ffn"]["b1"], act="gelu", pre_ln=p["ln3"])
    # final decoder LayerNorm (if any) is fused into the last residual linear
    x2d = fused_linear(ff, p["ffn"]["w2"], p["ffn"]["b2"], residual=x2d,
                       post_ln=final_ln)
    return x2d


def decoder_fwd(x, mem, dp, nheads):
    N, Tq, D = x.shape
    Tk = mem.shape[1]
    x2d = x.reshape(N * Tq, D)
    mem2d = mem.reshape(N * Tk, D)
    nl = len(dp["layers"])
    for li, lp in enumerate(dp["layers"]):
        final_ln = dp["norm"] if li == nl - 1 else None
        x2d = decoder_layer_fwd(x2d, mem2d, N, Tq, Tk, lp, nheads, final_ln)
    return x2d.reshape(N, Tq, D)


def encoder_layer_fwd(x2d, N, T, p, nheads):
    # nn.TransformerEncoderLayer, norm_first=False (post-norm), eval mode
    o = self_attn_core(x2d, N, T, p["sa"], nheads, pre_ln=None)
    x2d = fused_linear(o, p["sa"]["wo"], p["sa"]["bo"], residual=x2d,
                       post_ln=p["ln1"])
    ff = fused_linear(x2d, p["ffn"]["w1"], p["ffn"]["b1"], act="gelu")
    x2d = fused_linear(ff, p["ffn"]["w2"], p["ffn"]["b2"], residual=x2d,
                       post_ln=p["ln2"])
    return x2d


def encoder_fwd(x, ep, nheads):
    N, T, D = x.shape
    x2d = x.reshape(N * T, D)
    for lp in ep["layers"]:
        x2d = encoder_layer_fwd(x2d, N, T, lp, nheads)
    return x2d.reshape(N, T, D)   # nn.TransformerEncoder default: no final norm


# ----------------------------------------------------------------------------
# Parameter initialization (deterministic, synthetic)
# ----------------------------------------------------------------------------

def _xavier(key, shape):
    fi, fo = shape
    lim = (6.0 / (fi + fo)) ** 0.5
    return jax.random.uniform(key, shape, jnp.float32, -lim, lim)


def _init_ln(key, D):
    k1, k2 = jax.random.split(key)
    return (1.0 + 0.1 * jax.random.normal(k1, (D,), jnp.float32),
            0.1 * jax.random.normal(k2, (D,), jnp.float32))


def _init_mha(key, D):
    ks = jax.random.split(key, 8)
    wq = _xavier(ks[0], (D, D)); bq = 0.01 * jax.random.normal(ks[1], (D,), jnp.float32)
    wk = _xavier(ks[2], (D, D)); bk = 0.01 * jax.random.normal(ks[3], (D,), jnp.float32)
    wv = _xavier(ks[4], (D, D)); bv = 0.01 * jax.random.normal(ks[5], (D,), jnp.float32)
    wo = _xavier(ks[6], (D, D)); bo = 0.01 * jax.random.normal(ks[7], (D,), jnp.float32)
    return {
        "wqkv": jnp.concatenate([wq, wk, wv], axis=1),
        "bqkv": jnp.concatenate([bq, bk, bv]),
        "wq": wq, "bq": bq,
        "wkv": jnp.concatenate([wk, wv], axis=1),
        "bkv": jnp.concatenate([bk, bv]),
        "wo": wo, "bo": bo,
    }


def _init_ffn(key, D, Dff):
    ks = jax.random.split(key, 4)
    return {"w1": _xavier(ks[0], (D, Dff)),
            "b1": 0.01 * jax.random.normal(ks[1], (Dff,), jnp.float32),
            "w2": _xavier(ks[2], (Dff, D)),
            "b2": 0.01 * jax.random.normal(ks[3], (D,), jnp.float32)}


def _init_decoder_layer(key, D):
    ks = jax.random.split(key, 6)
    return {"ln1": _init_ln(ks[0], D), "ln2": _init_ln(ks[1], D), "ln3": _init_ln(ks[2], D),
            "sa": _init_mha(ks[3], D), "ca": _init_mha(ks[4], D),
            "ffn": _init_ffn(ks[5], D, 4 * D)}


def _init_decoder(key, D, n_layers):
    ks = jax.random.split(key, n_layers + 1)
    return {"layers": [_init_decoder_layer(k, D) for k in ks[:-1]],
            "norm": _init_ln(ks[-1], D)}


def _init_encoder_layer(key, D):
    ks = jax.random.split(key, 4)
    return {"ln1": _init_ln(ks[0], D), "ln2": _init_ln(ks[1], D),
            "sa": _init_mha(ks[2], D), "ffn": _init_ffn(ks[3], D, 4 * D)}


def _init_encoder(key, D, n_layers):
    return {"layers": [_init_encoder_layer(k, D) for k in jax.random.split(key, n_layers)]}


def init_crossandoutput(key, D, K_n, total_len, pred_len,
                        ts_layers=3, cross_layers=3, self_layers=3, dimred_layers=3):
    ks = jax.random.split(key, 9)
    return {
        "ts": _init_decoder(ks[0], D, ts_layers),
        "cross": _init_decoder(ks[1], D, cross_layers),
        "self": _init_decoder(ks[2], D, self_layers),
        "dimred": _init_encoder(ks[3], D, dimred_layers),
        "channel_reducer": {"w": _xavier(ks[4], (K_n, 1))[:, 0],
                            "b": 0.01 * jax.random.normal(ks[5], (1,), jnp.float32)},
        "mlp": {"w1": _xavier(ks[6], (D, 4 * D)), "b1": jnp.zeros((4 * D,), jnp.float32),
                "w2": _xavier(ks[7], (4 * D, 1)), "b2": jnp.zeros((1,), jnp.float32)},
        "length_reducer": {"w": _xavier(ks[8], (total_len, pred_len)),
                           "b": jnp.zeros((pred_len,), jnp.float32)},
    }


# ----------------------------------------------------------------------------
# CrossandOutput forward (single jax.jit over everything)
# ----------------------------------------------------------------------------

@functools.partial(jax.jit, static_argnames=("nheads", "K_n", "pred_len"))
def crossandoutput_forward(params, text_emb, temp_emb, *, nheads, K_n, pred_len):
    B, C, L, D = temp_emb.shape           # temp_emb: [B, C_T*(K_T+1), L, D]
    H = text_emb.shape[2]                 # text_emb: [B, C_T*(K_T+1), H, D]

    # --- TS self attention (TransformerDecoder with tgt = memory = temp_emb) ---
    tmp = temp_emb.reshape(B * C, L, D)
    tmp = decoder_fwd(tmp, tmp, params["ts"], nheads)
    temp2 = tmp.reshape(B, C, L, D)

    text_cat = jnp.concatenate([temp2, text_emb], axis=2)    # [B, C, L+H, D]
    temp_emb_out = temp2
    text_emb_out = text_cat

    # --- cross decoder (tgt = text, memory = temp) then self decoder ---
    tgt = text_cat.reshape(B * C, L + H, D)
    mem = temp2.reshape(B * C, L, D)
    res = decoder_fwd(tgt, mem, params["cross"], nheads)
    res = decoder_fwd(res, res, params["self"], nheads)
    res = res.reshape(B, C, L + H, D)

    # --- DimensionReducer transformer encoder ---
    x = jnp.transpose(res, (0, 2, 1, 3)).reshape(B, (L + H) * C, D)
    x = encoder_fwd(x, params["dimred"], nheads)

    # --- fused head: channel reduce (over K_n) + MLP(relu) + length reducer ---
    C_T = C // K_n
    xg = (x.reshape(B, L + H, C_T, K_n, D)
           .transpose(0, 2, 1, 3, 4)
           .reshape(B * C_T, L + H, K_n, D))
    sc = jnp.concatenate([params["channel_reducer"]["w"],
                          params["channel_reducer"]["b"],
                          params["mlp"]["b2"]]).astype(jnp.float32)
    Dff = params["mlp"]["w1"].shape[1]
    head = _make_fused_head(B * C_T, L + H, K_n, D, Dff, pred_len)
    out = head(xg, sc,
               params["mlp"]["w1"], params["mlp"]["b1"].reshape(1, Dff),
               params["mlp"]["w2"].reshape(1, Dff),          # (4D,1) -> (1,4D)
               params["length_reducer"]["w"],
               params["length_reducer"]["b"].reshape(1, pred_len))
    out = out.reshape(B, C_T, pred_len)
    return out, temp_emb_out, text_emb_out


# ----------------------------------------------------------------------------
# Main
# ----------------------------------------------------------------------------

if __name__ == "__main__":
    # Small synthetic config: d_model=32 (heads=8, head_dim=4), nref_text=2,
    # seq_len=8, pred_len=8 (so L + H == seq_len + pred_len for the length reducer).
    B, C, L, H, D = 2, 4, 8, 8, 32
    nheads = 8
    K_n = 2            # configs.nref_text
    pred_len = 8

    key = jax.random.PRNGKey(0)
    kp, kt1, kt2 = jax.random.split(key, 3)
    params = init_crossandoutput(kp, D, K_n, L + H, pred_len)

    text_emb = jax.random.normal(kt1, (B, C, H, D), jnp.float32)
    temp_emb = jax.random.normal(kt2, (B, C, L, D), jnp.float32)

    out, temp_out, text_out = crossandoutput_forward(
        params, text_emb, temp_emb, nheads=nheads, K_n=K_n, pred_len=pred_len)
    jax.block_until_ready((out, temp_out, text_out))

    assert out.shape == (B, C // K_n, pred_len)
    assert temp_out.shape == (B, C, L, D)
    assert text_out.shape == (B, C, L + H, D)
    print("KERNEL_OK")
</pallas_src>

<mosaic_0001>
module attributes {stable_mosaic.version = 11 : i64} {
  func.func @kernel(%arg0: i32, %arg1: memref<32x32xf32, #tpu.memory_space<vmem>>, %arg2: memref<1x32xf32, #tpu.memory_space<vmem>>, %arg3: memref<1x32xf32, #tpu.memory_space<vmem>>, %arg4: memref<32x96xf32, #tpu.memory_space<vmem>>, %arg5: memref<1x96xf32, #tpu.memory_space<vmem>>, %arg6: memref<32x96xf32, #tpu.memory_space<vmem>>) attributes {dimension_semantics = [#tpu.dimension_semantics<parallel>], iteration_bounds = array<i64: 2>, scalar_prefetch = 0 : i64, scratch_operands = 0 : i64, tpu.core_type = #tpu.core_type<tc>, window_params = [{transform_indices = @transform_0, window_bounds = array<i64: 32, 32>}, {pipeline_mode = #tpu.pipeline_mode<synchronous>, transform_indices = @transform_1, window_bounds = array<i64: 1, 32>}, {pipeline_mode = #tpu.pipeline_mode<synchronous>, transform_indices = @transform_2, window_bounds = array<i64: 1, 32>}, {pipeline_mode = #tpu.pipeline_mode<synchronous>, transform_indices = @transform_3, window_bounds = array<i64: 32, 96>}, {pipeline_mode = #tpu.pipeline_mode<synchronous>, transform_indices = @transform_4, window_bounds = array<i64: 1, 96>}, {transform_indices = @transform_5, window_bounds = array<i64: 32, 96>}]} {
    %c0 = arith.constant 0 : index
    %c0_0 = arith.constant 0 : index
    %0 = vector.load %arg1[%c0, %c0_0] : memref<32x32xf32, #tpu.memory_space<vmem>>, vector<32x32xf32>
    %cst = arith.constant dense<0.000000e+00> : vector<32xf32>
    %1 = vector.multi_reduction <add>, %0, %cst [1] : vector<32x32xf32> to vector<32xf32>
    %2 = vector.shape_cast %1 : vector<32xf32> to vector<32x1xf32>
    %cst_1 = arith.constant 3.200000e+01 : f32
    %3 = vector.broadcast %cst_1 : f32 to vector<32x1xf32>
    %4 = arith.divf %2, %3 : vector<32x1xf32>
    %5 = vector.broadcast %4 : vector<32x1xf32> to vector<32x32xf32>
    %6 = arith.subf %0, %5 : vector<32x32xf32>
    %7 = arith.mulf %6, %6 : vector<32x32xf32>
    %cst_2 = arith.constant dense<0.000000e+00> : vector<32xf32>
    %8 = vector.multi_reduction <add>, %7, %cst_2 [1] : vector<32x32xf32> to vector<32xf32>
    %9 = vector.shape_cast %8 : vector<32xf32> to vector<32x1xf32>
    %cst_3 = arith.constant 3.200000e+01 : f32
    %10 = vector.broadcast %cst_3 : f32 to vector<32x1xf32>
    %11 = arith.divf %9, %10 : vector<32x1xf32>
    %cst_4 = arith.constant 9.99999974E-6 : f32
    %12 = vector.broadcast %cst_4 : f32 to vector<32x1xf32>
    %13 = arith.addf %11, %12 : vector<32x1xf32>
    %14 = math.rsqrt %13 : vector<32x1xf32>
    %15 = vector.broadcast %14 : vector<32x1xf32> to vector<32x32xf32>
    %16 = arith.mulf %6, %15 : vector<32x32xf32>
    %c0_5 = arith.constant 0 : index
    %c0_6 = arith.constant 0 : index
    %17 = vector.load %arg2[%c0_5, %c0_6] : memref<1x32xf32, #tpu.memory_space<vmem>>, vector<1x32xf32>
    %18 = vector.broadcast %17 : vector<1x32xf32> to vector<32x32xf32>
    %19 = arith.mulf %16, %18 : vector<32x32xf32>
    %c0_7 = arith.constant 0 : index
    %c0_8 = arith.constant 0 : index
    %20 = vector.load %arg3[%c0_7, %c0_8] : memref<1x32xf32, #tpu.memory_space<vmem>>, vector<1x32xf32>
    %21 = vector.broadcast %20 : vector<1x32xf32> to vector<32x32xf32>
    %22 = arith.addf %19, %21 : vector<32x32xf32>
    %c0_9 = arith.constant 0 : index
    %c0_10 = arith.constant 0 : index
    %23 = vector.load %arg4[%c0_9, %c0_10] : memref<32x96xf32, #tpu.memory_space<vmem>>, vector<32x96xf32>
    %cst_11 = arith.constant dense<0.000000e+00> : vector<32x96xf32>
    %24 = tpu.matmul %22, %23, %cst_11 {dimension_numbers = #tpu.dot_dimension_numbers<[1], [0], [0], [1], [0, 0, 1, 1], [], []>} : vector<32x32xf32>, vector<32x96xf32>, vector<32x96xf32> -> vector<32x96xf32>
    %c0_12 = arith.constant 0 : index
    %c0_13 = arith.constant 0 : index
    %25 = vector.load %arg5[%c0_12, %c0_13] : memref<1x96xf32, #tpu.memory_space<vmem>>, vector<1x96xf32>
    %26 = vector.broadcast %25 : vector<1x96xf32> to vector<32x96xf32>
    %27 = arith.addf %24, %26 : vector<32x96xf32>
    %c0_14 = arith.constant 0 : index
    %c0_15 = arith.constant 0 : index
    %28 = vector.load %arg6[%c0_14, %c0_15] : memref<32x96xf32, #tpu.memory_space<vmem>>, vector<32x96xf32>
    tpu.vector_store %arg6[%c0_14, %c0_15], %27 {strides = array<i32>} : memref<32x96xf32, #tpu.memory_space<vmem>>, vector<32x96xf32>,
    return
  }
  func.func @transform_0(%arg0: i32) -> (i32, i32) {
    %c0_i32 = arith.constant 0 : i32
    %c0_i32_0 = arith.constant 0 : i32
    return %arg0, %c0_i32 : i32, i32
  }
  func.func @transform_1(%arg0: i32) -> (i32, i32) {
    %c0_i32 = arith.constant 0 : i32
    %c0_i32_0 = arith.constant 0 : i32
    %c0_i32_1 = arith.constant 0 : i32
    return %c0_i32, %c0_i32_0 : i32, i32
  }
  func.func @transform_2(%arg0: i32) -> (i32, i32) {
    %c0_i32 = arith.constant 0 : i32
    %c0_i32_0 = arith.constant 0 : i32
    %c0_i32_1 = arith.constant 0 : i32
    return %c0_i32, %c0_i32_0 : i32, i32
  }
  func.func @transform_3(%arg0: i32) -> (i32, i32) {
    %c0_i32 = arith.constant 0 : i32
    %c0_i32_0 = arith.constant 0 : i32
    %c0_i32_1 = arith.constant 0 : i32
    return %c0_i32, %c0_i32_0 : i32, i32
  }
  func.func @transform_4(%arg0: i32) -> (i32, i32) {
    %c0_i32 = arith.constant 0 : i32
    %c0_i32_0 = arith.constant 0 : i32
    %c0_i32_1 = arith.constant 0 : i32
    return %c0_i32, %c0_i32_0 : i32, i32
  }
  func.func @transform_5(%arg0: i32) -> (i32, i32) {
    %c0_i32 = arith.constant 0 : i32
    %c0_i32_0 = arith.constant 0 : i32
    return %arg0, %c0_i32 : i32, i32
  }
}

module attributes {stable_mosaic.version = 11 : i64} {
  func.func @kernel(%arg0: i32, %arg1: memref<1x8x8x4xf32, #tpu.memory_space<vmem>>, %arg2: memref<1x8x8x4xf32, #tpu.memory_space<vmem>>, %arg3: memref<1x8x8x4xf32, #tpu.memory_space<vmem>>, %arg4: memref<1x8x8x4xf32, #tpu.memory_space<vmem>>) attributes {dimension_semantics = [#tpu.dimension_semantics<parallel>], iteration_bounds = array<i64: 8>, scalar_prefetch = 0 : i64, scratch_operands = 0 : i64, tpu.core_type = #tpu.core_type<tc>, window_params = [{transform_indices = @transform_0, window_bounds = array<i64: 1, 8, 8, 4>}, {transform_indices = @transform_1, window_bounds = array<i64: 1, 8, 8, 4>}, {transform_indices = @transform_2, window_bounds = array<i64: 1, 8, 8, 4>}, {transform_indices = @transform_3, window_bounds = array<i64: 1, 8, 8, 4>}]} {
    %c0 = arith.constant 0 : index
    %c0_0 = arith.constant 0 : index
    %c0_1 = arith.constant 0 : index
    %c0_2 = arith.constant 0 : index
    %0 = vector.load %arg1[%c0, %c0_0, %c0_1, %c0_2] : memref<1x8x8x4xf32, #tpu.memory_space<vmem>>, vector<1x8x8x4xf32>
    %1 = vector.shape_cast %0 : vector<1x8x8x4xf32> to vector<8x8x4xf32>
    %c0_3 = arith.constant 0 : index
    %c0_4 = arith.constant 0 : index
    %c0_5 = arith.constant 0 : index
    %c0_6 = arith.constant 0 : index
    %2 = vector.load %arg2[%c0_3, %c0_4, %c0_5, %c0_6] : memref<1x8x8x4xf32, #tpu.memory_space<vmem>>, vector<1x8x8x4xf32>
    %3 = vector.shape_cast %2 : vector<1x8x8x4xf32> to vector<8x8x4xf32>
    %c0_7 = arith.constant 0 : index
    %c0_8 = arith.constant 0 : index
    %c0_9 = arith.constant 0 : index
    %c0_10 = arith.constant 0 : index
    %4 = vector.load %arg3[%c0_7, %c0_8, %c0_9, %c0_10] : memref<1x8x8x4xf32, #tpu.memory_space<vmem>>, vector<1x8x8x4xf32>
    %5 = vector.shape_cast %4 : vector<1x8x8x4xf32> to vector<8x8x4xf32>
    "tpu.trace_start"() <{level = 10 : i32, message = "hqd,hkd->hqk"}> : () -> ()
    %cst = arith.constant dense<0.000000e+00> : vector<8x8x8xf32>
    %6 = tpu.matmul %1, %3, %cst {dimension_numbers = #tpu.dot_dimension_numbers<[2], [2], [1], [1], [0, 0, 0, 1, 1, 1], [0], [0]>} : vector<8x8x4xf32>, vector<8x8x4xf32>, vector<8x8x8xf32> -> vector<8x8x8xf32>
    "tpu.trace_stop"() : () -> ()
    %cst_11 = arith.constant 5.000000e-01 : f32
    %7 = vector.broadcast %cst_11 : f32 to vector<8x8x8xf32>
    %8 = arith.mulf %6, %7 : vector<8x8x8xf32>
    %cst_12 = arith.constant dense<0xFF800000> : vector<8x8xf32>
    %9 = vector.multi_reduction <maximumf>, %8, %cst_12 [2] : vector<8x8x8xf32> to vector<8x8xf32>
    %10 = vector.shape_cast %9 : vector<8x8xf32> to vector<8x8x1xf32>
    %11 = vector.broadcast %10 : vector<8x8x1xf32> to vector<8x8x8xf32>
    %12 = arith.subf %8, %11 : vector<8x8x8xf32>
    %13 = math.exp %12 : vector<8x8x8xf32>
    %cst_13 = arith.constant dense<0.000000e+00> : vector<8x8xf32>
    %14 = vector.multi_reduction <add>, %13, %cst_13 [2] : vector<8x8x8xf32> to vector<8x8xf32>
    %15 = vector.shape_cast %14 : vector<8x8xf32> to vector<8x8x1xf32>
    %16 = tpu.reciprocal %15 {approx = true} : vector<8x8x1xf32> -> vector<8x8x1xf32>
    %17 = vector.broadcast %16 : vector<8x8x1xf32> to vector<8x8x8xf32>
    %18 = arith.mulf %13, %17 : vector<8x8x8xf32>
    "tpu.trace_start"() <{level = 10 : i32, message = "hqk,hkd->hqd"}> : () -> ()
    %cst_14 = arith.constant dense<0.000000e+00> : vector<8x8x4xf32>
    %19 = tpu.matmul %18, %5, %cst_14 {dimension_numbers = #tpu.dot_dimension_numbers<[2], [1], [1], [2], [0, 0, 0, 1, 1, 2], [0], [0]>} : vector<8x8x8xf32>, vector<8x8x4xf32>, vector<8x8x4xf32> -> vector<8x8x4xf32>
    "tpu.trace_stop"() : () -> ()
    %20 = vector.shape_cast %19 : vector<8x8x4xf32> to vector<1x8x8x4xf32>
    %c0_15 = arith.constant 0 : index
    %c0_16 = arith.constant 0 : index
    %c0_17 = arith.constant 0 : index
    %c0_18 = arith.constant 0 : index
    %21 = vector.load %arg4[%c0_15, %c0_16, %c0_17, %c0_18] : memref<1x8x8x4xf32, #tpu.memory_space<vmem>>, vector<1x8x8x4xf32>
    tpu.vector_store %arg4[%c0_15, %c0_16, %c0_17, %c0_18], %20 {strides = array<i32>} : memref<1x8x8x4xf32, #tpu.memory_space<vmem>>, vector<1x8x8x4xf32>,
    return
  }
  func.func @transform_0(%arg0: i32) -> (i32, i32, i32, i32) {
    %c0_i32 = arith.constant 0 : i32
    %c0_i32_0 = arith.constant 0 : i32
    %c0_i32_1 = arith.constant 0 : i32
    %c0_i32_2 = arith.constant 0 : i32
    return %arg0, %c0_i32, %c0_i32_0, %c0_i32_1 : i32, i32, i32, i32
  }
  func.func @transform_1(%arg0: i32) -> (i32, i32, i32, i32) {
    %c0_i32 = arith.constant 0 : i32
    %c0_i32_0 = arith.constant 0 : i32
    %c0_i32_1 = arith.constant 0 : i32
    %c0_i32_2 = arith.constant 0 : i32
    return %arg0, %c0_i32, %c0_i32_0, %c0_i32_1 : i32, i32, i32, i32
  }
  func.func @transform_2(%arg0: i32) -> (i32, i32, i32, i32) {
    %c0_i32 = arith.constant 0 : i32
    %c0_i32_0 = arith.constant 0 : i32
    %c0_i32_1 = arith.constant 0 : i32
    %c0_i32_2 = arith.constant 0 : i32
    return %arg0, %c0_i32, %c0_i32_0, %c0_i32_1 : i32, i32, i32, i32
  }
  func.func @transform_3(%arg0: i32) -> (i32, i32, i32, i32) {
    %c0_i32 = arith.constant 0 : i32
    %c0_i32_0 = arith.constant 0 : i32
    %c0_i32_1 = arith.constant 0 : i32
    %c0_i32_2 = arith.constant 0 : i32
    return %arg0, %c0_i32, %c0_i32_0, %c0_i32_1 : i32, i32, i32, i32
  }
}

module attributes {stable_mosaic.version = 11 : i64} {
  func.func @kernel(%arg0: i32, %arg1: memref<32x32xf32, #tpu.memory_space<vmem>>, %arg2: memref<32x32xf32, #tpu.memory_space<vmem>>, %arg3: memref<1x32xf32, #tpu.memory_space<vmem>>, %arg4: memref<32x32xf32, #tpu.memory_space<vmem>>, %arg5: memref<32x32xf32, #tpu.memory_space<vmem>>) attributes {dimension_semantics = [#tpu.dimension_semantics<parallel>], iteration_bounds = array<i64: 2>, scalar_prefetch = 0 : i64, scratch_operands = 0 : i64, tpu.core_type = #tpu.core_type<tc>, window_params = [{transform_indices = @transform_0, window_bounds = array<i64: 32, 32>}, {pipeline_mode = #tpu.pipeline_mode<synchronous>, transform_indices = @transform_1, window_bounds = array<i64: 32, 32>}, {pipeline_mode = #tpu.pipeline_mode<synchronous>, transform_indices = @transform_2, window_bounds = array<i64: 1, 32>}, {transform_indices = @transform_3, window_bounds = array<i64: 32, 32>}, {transform_indices = @transform_4, window_bounds = array<i64: 32, 32>}]} {
    %c0 = arith.constant 0 : index
    %c0_0 = arith.constant 0 : index
    %0 = vector.load %arg1[%c0, %c0_0] : memref<32x32xf32, #tpu.memory_space<vmem>>, vector<32x32xf32>
    %c0_1 = arith.constant 0 : index
    %c0_2 = arith.constant 0 : index
    %1 = vector.load %arg2[%c0_1, %c0_2] : memref<32x32xf32, #tpu.memory_space<vmem>>, vector<32x32xf32>
    %cst = arith.constant dense<0.000000e+00> : vector<32x32xf32>
    %2 = tpu.matmul %0, %1, %cst {dimension_numbers = #tpu.dot_dimension_numbers<[1], [0], [0], [1], [0, 0, 1, 1], [], []>} : vector<32x32xf32>, vector<32x32xf32>, vector<32x32xf32> -> vector<32x32xf32>
    %c0_3 = arith.constant 0 : index
    %c0_4 = arith.constant 0 : index
    %3 = vector.load %arg3[%c0_3, %c0_4] : memref<1x32xf32, #tpu.memory_space<vmem>>, vector<1x32xf32>
    %4 = vector.broadcast %3 : vector<1x32xf32> to vector<32x32xf32>
    %5 = arith.addf %2, %4 : vector<32x32xf32>
    %c0_5 = arith.constant 0 : index
    %c0_6 = arith.constant 0 : index
    %6 = vector.load %arg4[%c0_5, %c0_6] : memref<32x32xf32, #tpu.memory_space<vmem>>, vector<32x32xf32>
    %7 = arith.addf %5, %6 : vector<32x32xf32>
    %c0_7 = arith.constant 0 : index
    %c0_8 = arith.constant 0 : index
    %8 = vector.load %arg5[%c0_7, %c0_8] : memref<32x32xf32, #tpu.memory_space<vmem>>, vector<32x32xf32>
    tpu.vector_store %arg5[%c0_7, %c0_8], %7 {strides = array<i32>} : memref<32x32xf32, #tpu.memory_space<vmem>>, vector<32x32xf32>,
    return
  }
  func.func @transform_0(%arg0: i32) -> (i32, i32) {
    %c0_i32 = arith.constant 0 : i32
    %c0_i32_0 = arith.constant 0 : i32
    return %arg0, %c0_i32 : i32, i32
  }
  func.func @transform_1(%arg0: i32) -> (i32, i32) {
    %c0_i32 = arith.constant 0 : i32
    %c0_i32_0 = arith.constant 0 : i32
    %c0_i32_1 = arith.constant 0 : i32
    return %c0_i32, %c0_i32_0 : i32, i32
  }
  func.func @transform_2(%arg0: i32) -> (i32, i32) {
    %c0_i32 = arith.constant 0 : i32
    %c0_i32_0 = arith.constant 0 : i32
    %c0_i32_1 = arith.constant 0 : i32
    return %c0_i32, %c0_i32_0 : i32, i32
  }
  func.func @transform_3(%arg0: i32) -> (i32, i32) {
    %c0_i32 = arith.constant 0 : i32
    %c0_i32_0 = arith.constant 0 : i32
    return %arg0, %c0_i32 : i32, i32
  }
  func.func @transform_4(%arg0: i32) -> (i32, i32) {
    %c0_i32 = arith.constant 0 : i32
    %c0_i32_0 = arith.constant 0 : i32
    return %arg0, %c0_i32 : i32, i32
  }
}

module attributes {stable_mosaic.version = 11 : i64} {
  func.func @kernel(%arg0: i32, %arg1: memref<32x32xf32, #tpu.memory_space<vmem>>, %arg2: memref<1x32xf32, #tpu.memory_space<vmem>>, %arg3: memref<1x32xf32, #tpu.memory_space<vmem>>, %arg4: memref<32x32xf32, #tpu.memory_space<vmem>>, %arg5: memref<1x32xf32, #tpu.memory_space<vmem>>, %arg6: memref<32x32xf32, #tpu.memory_space<vmem>>) attributes {dimension_semantics = [#tpu.dimension_semantics<parallel>], iteration_bounds = array<i64: 2>, scalar_prefetch = 0 : i64, scratch_operands = 0 : i64, tpu.core_type = #tpu.core_type<tc>, window_params = [{transform_indices = @transform_0, window_bounds = array<i64: 32, 32>}, {pipeline_mode = #tpu.pipeline_mode<synchronous>, transform_indices = @transform_1, window_bounds = array<i64: 1, 32>}, {pipeline_mode = #tpu.pipeline_mode<synchronous>, transform_indices = @transform_2, window_bounds = array<i64: 1, 32>}, {pipeline_mode = #tpu.pipeline_mode<synchronous>, transform_indices = @transform_3, window_bounds = array<i64: 32, 32>}, {pipeline_mode = #tpu.pipeline_mode<synchronous>, transform_indices = @transform_4, window_bounds = array<i64: 1, 32>}, {transform_indices = @transform_5, window_bounds = array<i64: 32, 32>}]} {
    %c0 = arith.constant 0 : index
    %c0_0 = arith.constant 0 : index
    %0 = vector.load %arg1[%c0, %c0_0] : memref<32x32xf32, #tpu.memory_space<vmem>>, vector<32x32xf32>
    %cst = arith.constant dense<0.000000e+00> : vector<32xf32>
    %1 = vector.multi_reduction <add>, %0, %cst [1] : vector<32x32xf32> to vector<32xf32>
    %2 = vector.shape_cast %1 : vector<32xf32> to vector<32x1xf32>
    %cst_1 = arith.constant 3.200000e+01 : f32
    %3 = vector.broadcast %cst_1 : f32 to vector<32x1xf32>
    %4 = arith.divf %2, %3 : vector<32x1xf32>
    %5 = vector.broadcast %4 : vector<32x1xf32> to vector<32x32xf32>
    %6 = arith.subf %0, %5 : vector<32x32xf32>
    %7 = arith.mulf %6, %6 : vector<32x32xf32>
    %cst_2 = arith.constant dense<0.000000e+00> : vector<32xf32>
    %8 = vector.multi_reduction <add>, %7, %cst_2 [1] : vector<32x32xf32> to vector<32xf32>
    %9 = vector.shape_cast %8 : vector<32xf32> to vector<32x1xf32>
    %cst_3 = arith.constant 3.200000e+01 : f32
    %10 = vector.broadcast %cst_3 : f32 to vector<32x1xf32>
    %11 = arith.divf %9, %10 : vector<32x1xf32>
    %cst_4 = arith.constant 9.99999974E-6 : f32
    %12 = vector.broadcast %cst_4 : f32 to vector<32x1xf32>
    %13 = arith.addf %11, %12 : vector<32x1xf32>
    %14 = math.rsqrt %13 : vector<32x1xf32>
    %15 = vector.broadcast %14 : vector<32x1xf32> to vector<32x32xf32>
    %16 = arith.mulf %6, %15 : vector<32x32xf32>
    %c0_5 = arith.constant 0 : index
    %c0_6 = arith.constant 0 : index
    %17 = vector.load %arg2[%c0_5, %c0_6] : memref<1x32xf32, #tpu.memory_space<vmem>>, vector<1x32xf32>
    %18 = vector.broadcast %17 : vector<1x32xf32> to vector<32x32xf32>
    %19 = arith.mulf %16, %18 : vector<32x32xf32>
    %c0_7 = arith.constant 0 : index
    %c0_8 = arith.constant 0 : index
    %20 = vector.load %arg3[%c0_7, %c0_8] : memref<1x32xf32, #tpu.memory_space<vmem>>, vector<1x32xf32>
    %21 = vector.broadcast %20 : vector<1x32xf32> to vector<32x32xf32>
    %22 = arith.addf %19, %21 : vector<32x32xf32>
    %c0_9 = arith.constant 0 : index
    %c0_10 = arith.constant 0 : index
    %23 = vector.load %arg4[%c0_9, %c0_10] : memref<32x32xf32, #tpu.memory_space<vmem>>, vector<32x32xf32>
    %cst_11 = arith.constant dense<0.000000e+00> : vector<32x32xf32>
    %24 = tpu.matmul %22, %23, %cst_11 {dimension_numbers = #tpu.dot_dimension_numbers<[1], [0], [0], [1], [0, 0, 1, 1], [], []>} : vector<32x32xf32>, vector<32x32xf32>, vector<32x32xf32> -> vector<32x32xf32>
    %c0_12 = arith.constant 0 : index
    %c0_13 = arith.constant 0 : index
    %25 = vector.load %arg5[%c0_12, %c0_13] : memref<1x32xf32, #tpu.memory_space<vmem>>, vector<1x32xf32>
    %26 = vector.broadcast %25 : vector<1x32xf32> to vector<32x32xf32>
    %27 = arith.addf %24, %26 : vector<32x32xf32>
    %c0_14 = arith.constant 0 : index
    %c0_15 = arith.constant 0 : index
    %28 = vector.load %arg6[%c0_14, %c0_15] : memref<32x32xf32, #tpu.memory_space<vmem>>, vector<32x32xf32>
    tpu.vector_store %arg6[%c0_14, %c0_15], %27 {strides = array<i32>} : memref<32x32xf32, #tpu.memory_space<vmem>>, vector<32x32xf32>,
    return
  }
  func.func @transform_0(%arg0: i32) -> (i32, i32) {
    %c0_i32 = arith.constant 0 : i32
    %c0_i32_0 = arith.constant 0 : i32
    return %arg0, %c0_i32 : i32, i32
  }
  func.func @transform_1(%arg0: i32) -> (i32, i32) {
    %c0_i32 = arith.constant 0 : i32
    %c0_i32_0 = arith.constant 0 : i32
    %c0_i32_1 = arith.constant 0 : i32
    return %c0_i32, %c0_i32_0 : i32, i32
  }
  func.func @transform_2(%arg0: i32) -> (i32, i32) {
    %c0_i32 = arith.constant 0 : i32
    %c0_i32_0 = arith.constant 0 : i32
    %c0_i32_1 = arith.constant 0 : i32
    return %c0_i32, %c0_i32_0 : i32, i32
  }
  func.func @transform_3(%arg0: i32) -> (i32, i32) {
    %c0_i32 = arith.constant 0 : i32
    %c0_i32_0 = arith.constant 0 : i32
    %c0_i32_1 = arith.constant 0 : i32
    return %c0_i32, %c0_i32_0 : i32, i32
  }
  func.func @transform_4(%arg0: i32) -> (i32, i32) {
    %c0_i32 = arith.constant 0 : i32
    %c0_i32_0 = arith.constant 0 : i32
    %c0_i32_1 = arith.constant 0 : i32
    return %c0_i32, %c0_i32_0 : i32, i32
  }
  func.func @transform_5(%arg0: i32) -> (i32, i32) {
    %c0_i32 = arith.constant 0 : i32
    %c0_i32_0 = arith.constant 0 : i32
    return %arg0, %c0_i32 : i32, i32
  }
}

module attributes {stable_mosaic.version = 11 : i64} {
  func.func @kernel(%arg0: i32, %arg1: memref<32x32xf32, #tpu.memory_space<vmem>>, %arg2: memref<32x64xf32, #tpu.memory_space<vmem>>, %arg3: memref<1x64xf32, #tpu.memory_space<vmem>>, %arg4: memref<32x64xf32, #tpu.memory_space<vmem>>) attributes {dimension_semantics = [#tpu.dimension_semantics<parallel>], iteration_bounds = array<i64: 2>, scalar_prefetch = 0 : i64, scratch_operands = 0 : i64, tpu.core_type = #tpu.core_type<tc>, window_params = [{transform_indices = @transform_0, window_bounds = array<i64: 32, 32>}, {pipeline_mode = #tpu.pipeline_mode<synchronous>, transform_indices = @transform_1, window_bounds = array<i64: 32, 64>}, {pipeline_mode = #tpu.pipeline_mode<synchronous>, transform_indices = @transform_2, window_bounds = array<i64: 1, 64>}, {transform_indices = @transform_3, window_bounds = array<i64: 32, 64>}]} {
    %c0 = arith.constant 0 : index
    %c0_0 = arith.constant 0 : index
    %0 = vector.load %arg1[%c0, %c0_0] : memref<32x32xf32, #tpu.memory_space<vmem>>, vector<32x32xf32>
    %c0_1 = arith.constant 0 : index
    %c0_2 = arith.constant 0 : index
    %1 = vector.load %arg2[%c0_1, %c0_2] : memref<32x64xf32, #tpu.memory_space<vmem>>, vector<32x64xf32>
    %cst = arith.constant dense<0.000000e+00> : vector<32x64xf32>
    %2 = tpu.matmul %0, %1, %cst {dimension_numbers = #tpu.dot_dimension_numbers<[1], [0], [0], [1], [0, 0, 1, 1], [], []>} : vector<32x32xf32>, vector<32x64xf32>, vector<32x64xf32> -> vector<32x64xf32>
    %c0_3 = arith.constant 0 : index
    %c0_4 = arith.constant 0 : index
    %3 = vector.load %arg3[%c0_3, %c0_4] : memref<1x64xf32, #tpu.memory_space<vmem>>, vector<1x64xf32>
    %4 = vector.broadcast %3 : vector<1x64xf32> to vector<32x64xf32>
    %5 = arith.addf %2, %4 : vector<32x64xf32>
    %c0_5 = arith.constant 0 : index
    %c0_6 = arith.constant 0 : index
    %6 = vector.load %arg4[%c0_5, %c0_6] : memref<32x64xf32, #tpu.memory_space<vmem>>, vector<32x64xf32>
    tpu.vector_store %arg4[%c0_5, %c0_6], %5 {strides = array<i32>} : memref<32x64xf32, #tpu.memory_space<vmem>>, vector<32x64xf32>,
    return
  }
  func.func @transform_0(%arg0: i32) -> (i32, i32) {
    %c0_i32 = arith.constant 0 : i32
    %c0_i32_0 = arith.constant 0 : i32
    return %arg0, %c0_i32 : i32, i32
  }
  func.func @transform_1(%arg0: i32) -> (i32, i32) {
    %c0_i32 = arith.constant 0 : i32
    %c0_i32_0 = arith.constant 0 : i32
    %c0_i32_1 = arith.constant 0 : i32
    return %c0_i32, %c0_i32_0 : i32, i32
  }
  func.func @transform_2(%arg0: i32) -> (i32, i32) {
    %c0_i32 = arith.constant 0 : i32
    %c0_i32_0 = arith.constant 0 : i32
    %c0_i32_1 = arith.constant 0 : i32
    return %c0_i32, %c0_i32_0 : i32, i32
  }
  func.func @transform_3(%arg0: i32) -> (i32, i32) {
    %c0_i32 = arith.constant 0 : i32
    %c0_i32_0 = arith.constant 0 : i32
    return %arg0, %c0_i32 : i32, i32
  }
}

module attributes {stable_mosaic.version = 11 : i64} {
  func.func @kernel(%arg0: i32, %arg1: memref<32x32xf32, #tpu.memory_space<vmem>>, %arg2: memref<1x32xf32, #tpu.memory_space<vmem>>, %arg3: memref<1x32xf32, #tpu.memory_space<vmem>>, %arg4: memref<32x128xf32, #tpu.memory_space<vmem>>, %arg5: memref<1x128xf32, #tpu.memory_space<vmem>>, %arg6: memref<32x128xf32, #tpu.memory_space<vmem>>) attributes {dimension_semantics = [#tpu.dimension_semantics<parallel>], iteration_bounds = array<i64: 2>, scalar_prefetch = 0 : i64, scratch_operands = 0 : i64, tpu.core_type = #tpu.core_type<tc>, window_params = [{transform_indices = @transform_0, window_bounds = array<i64: 32, 32>}, {pipeline_mode = #tpu.pipeline_mode<synchronous>, transform_indices = @transform_1, window_bounds = array<i64: 1, 32>}, {pipeline_mode = #tpu.pipeline_mode<synchronous>, transform_indices = @transform_2, window_bounds = array<i64: 1, 32>}, {pipeline_mode = #tpu.pipeline_mode<synchronous>, transform_indices = @transform_3, window_bounds = array<i64: 32, 128>}, {pipeline_mode = #tpu.pipeline_mode<synchronous>, transform_indices = @transform_4, window_bounds = array<i64: 1, 128>}, {transform_indices = @transform_5, window_bounds = array<i64: 32, 128>}]} {
    %c0 = arith.constant 0 : index
    %c0_0 = arith.constant 0 : index
    %0 = vector.load %arg1[%c0, %c0_0] : memref<32x32xf32, #tpu.memory_space<vmem>>, vector<32x32xf32>
    %cst = arith.constant dense<0.000000e+00> : vector<32xf32>
    %1 = vector.multi_reduction <add>, %0, %cst [1] : vector<32x32xf32> to vector<32xf32>
    %2 = vector.shape_cast %1 : vector<32xf32> to vector<32x1xf32>
    %cst_1 = arith.constant 3.200000e+01 : f32
    %3 = vector.broadcast %cst_1 : f32 to vector<32x1xf32>
    %4 = arith.divf %2, %3 : vector<32x1xf32>
    %5 = vector.broadcast %4 : vector<32x1xf32> to vector<32x32xf32>
    %6 = arith.subf %0, %5 : vector<32x32xf32>
    %7 = arith.mulf %6, %6 : vector<32x32xf32>
    %cst_2 = arith.constant dense<0.000000e+00> : vector<32xf32>
    %8 = vector.multi_reduction <add>, %7, %cst_2 [1] : vector<32x32xf32> to vector<32xf32>
    %9 = vector.shape_cast %8 : vector<32xf32> to vector<32x1xf32>
    %cst_3 = arith.constant 3.200000e+01 : f32
    %10 = vector.broadcast %cst_3 : f32 to vector<32x1xf32>
    %11 = arith.divf %9, %10 : vector<32x1xf32>
    %cst_4 = arith.constant 9.99999974E-6 : f32
    %12 = vector.broadcast %cst_4 : f32 to vector<32x1xf32>
    %13 = arith.addf %11, %12 : vector<32x1xf32>
    %14 = math.rsqrt %13 : vector<32x1xf32>
    %15 = vector.broadcast %14 : vector<32x1xf32> to vector<32x32xf32>
    %16 = arith.mulf %6, %15 : vector<32x32xf32>
    %c0_5 = arith.constant 0 : index
    %c0_6 = arith.constant 0 : index
    %17 = vector.load %arg2[%c0_5, %c0_6] : memref<1x32xf32, #tpu.memory_space<vmem>>, vector<1x32xf32>
    %18 = vector.broadcast %17 : vector<1x32xf32> to vector<32x32xf32>
    %19 = arith.mulf %16, %18 : vector<32x32xf32>
    %c0_7 = arith.constant 0 : index
    %c0_8 = arith.constant 0 : index
    %20 = vector.load %arg3[%c0_7, %c0_8] : memref<1x32xf32, #tpu.memory_space<vmem>>, vector<1x32xf32>
    %21 = vector.broadcast %20 : vector<1x32xf32> to vector<32x32xf32>
    %22 = arith.addf %19, %21 : vector<32x32xf32>
    %c0_9 = arith.constant 0 : index
    %c0_10 = arith.constant 0 : index
    %23 = vector.load %arg4[%c0_9, %c0_10] : memref<32x128xf32, #tpu.memory_space<vmem>>, vector<32x128xf32>
    %cst_11 = arith.constant dense<0.000000e+00> : vector<32x128xf32>
    %24 = tpu.matmul %22, %23, %cst_11 {dimension_numbers = #tpu.dot_dimension_numbers<[1], [0], [0], [1], [0, 0, 1, 1], [], []>} : vector<32x32xf32>, vector<32x128xf32>, vector<32x128xf32> -> vector<32x128xf32>
    %c0_12 = arith.constant 0 : index
    %c0_13 = arith.constant 0 : index
    %25 = vector.load %arg5[%c0_12, %c0_13] : memref<1x128xf32, #tpu.memory_space<vmem>>, vector<1x128xf32>
    %26 = vector.broadcast %25 : vector<1x128xf32> to vector<32x128xf32>
    %27 = arith.addf %24, %26 : vector<32x128xf32>
    %cst_14 = arith.constant 5.000000e-01 : f32
    %28 = vector.broadcast %cst_14 : f32 to vector<32x128xf32>
    %29 = arith.mulf %28, %27 : vector<32x128xf32>
    %cst_15 = arith.constant 0.707106769 : f32
    %30 = vector.broadcast %cst_15 : f32 to vector<32x128xf32>
    %31 = arith.mulf %27, %30 : vector<32x128xf32>
    %32 = math.erf %31 : vector<32x128xf32>
    %cst_16 = arith.constant 1.000000e+00 : f32
    %33 = vector.broadcast %cst_16 : f32 to vector<32x128xf32>
    %34 = arith.addf %33, %32 : vector<32x128xf32>
    %35 = arith.mulf %29, %34 : vector<32x128xf32>
    %c0_17 = arith.constant 0 : index
    %c0_18 = arith.constant 0 : index
    %36 = vector.load %arg6[%c0_17, %c0_18] : memref<32x128xf32, #tpu.memory_space<vmem>>, vector<32x128xf32>
    tpu.vector_store %arg6[%c0_17, %c0_18], %35 {strides = array<i32>} : memref<32x128xf32, #tpu.memory_space<vmem>>, vector<32x128xf32>,
    return
  }
  func.func @transform_0(%arg0: i32) -> (i32, i32) {
    %c0_i32 = arith.constant 0 : i32
    %c0_i32_0 = arith.constant 0 : i32
    return %arg0, %c0_i32 : i32, i32
  }
  func.func @transform_1(%arg0: i32) -> (i32, i32) {
    %c0_i32 = arith.constant 0 : i32
    %c0_i32_0 = arith.constant 0 : i32
    %c0_i32_1 = arith.constant 0 : i32
    return %c0_i32, %c0_i32_0 : i32, i32
  }
  func.func @transform_2(%arg0: i32) -> (i32, i32) {
    %c0_i32 = arith.constant 0 : i32
    %c0_i32_0 = arith.constant 0 : i32
    %c0_i32_1 = arith.constant 0 : i32
    return %c0_i32, %c0_i32_0 : i32, i32
  }
  func.func @transform_3(%arg0: i32) -> (i32, i32) {
    %c0_i32 = arith.constant 0 : i32
    %c0_i32_0 = arith.constant 0 : i32
    %c0_i32_1 = arith.constant 0 : i32
    return %c0_i32, %c0_i32_0 : i32, i32
  }
  func.func @transform_4(%arg0: i32) -> (i32, i32) {
    %c0_i32 = arith.constant 0 : i32
    %c0_i32_0 = arith.constant 0 : i32
    %c0_i32_1 = arith.constant 0 : i32
    return %c0_i32, %c0_i32_0 : i32, i32
  }
  func.func @transform_5(%arg0: i32) -> (i32, i32) {
    %c0_i32 = arith.constant 0 : i32
    %c0_i32_0 = arith.constant 0 : i32
    return %arg0, %c0_i32 : i32, i32
  }
}

module attributes {stable_mosaic.version = 11 : i64} {
  func.func @kernel(%arg0: i32, %arg1: memref<32x128xf32, #tpu.memory_space<vmem>>, %arg2: memref<128x32xf32, #tpu.memory_space<vmem>>, %arg3: memref<1x32xf32, #tpu.memory_space<vmem>>, %arg4: memref<32x32xf32, #tpu.memory_space<vmem>>, %arg5: memref<32x32xf32, #tpu.memory_space<vmem>>) attributes {dimension_semantics = [#tpu.dimension_semantics<parallel>], iteration_bounds = array<i64: 2>, scalar_prefetch = 0 : i64, scratch_operands = 0 : i64, tpu.core_type = #tpu.core_type<tc>, window_params = [{transform_indices = @transform_0, window_bounds = array<i64: 32, 128>}, {pipeline_mode = #tpu.pipeline_mode<synchronous>, transform_indices = @transform_1, window_bounds = array<i64: 128, 32>}, {pipeline_mode = #tpu.pipeline_mode<synchronous>, transform_indices = @transform_2, window_bounds = array<i64: 1, 32>}, {transform_indices = @transform_3, window_bounds = array<i64: 32, 32>}, {transform_indices = @transform_4, window_bounds = array<i64: 32, 32>}]} {
    %c0 = arith.constant 0 : index
    %c0_0 = arith.constant 0 : index
    %0 = vector.load %arg1[%c0, %c0_0] : memref<32x128xf32, #tpu.memory_space<vmem>>, vector<32x128xf32>
    %c0_1 = arith.constant 0 : index
    %c0_2 = arith.constant 0 : index
    %1 = vector.load %arg2[%c0_1, %c0_2] : memref<128x32xf32, #tpu.memory_space<vmem>>, vector<128x32xf32>
    %cst = arith.constant dense<0.000000e+00> : vector<32x32xf32>
    %2 = tpu.matmul %0, %1, %cst {dimension_numbers = #tpu.dot_dimension_numbers<[1], [0], [0], [1], [0, 0, 1, 1], [], []>} : vector<32x128xf32>, vector<128x32xf32>, vector<32x32xf32> -> vector<32x32xf32>
    %c0_3 = arith.constant 0 : index
    %c0_4 = arith.constant 0 : index
    %3 = vector.load %arg3[%c0_3, %c0_4] : memref<1x32xf32, #tpu.memory_space<vmem>>, vector<1x32xf32>
    %4 = vector.broadcast %3 : vector<1x32xf32> to vector<32x32xf32>
    %5 = arith.addf %2, %4 : vector<32x32xf32>
    %c0_5 = arith.constant 0 : index
    %c0_6 = arith.constant 0 : index
    %6 = vector.load %arg4[%c0_5, %c0_6] : memref<32x32xf32, #tpu.memory_space<vmem>>, vector<32x32xf32>
    %7 = arith.addf %5, %6 : vector<32x32xf32>
    %c0_7 = arith.constant 0 : index
    %c0_8 = arith.constant 0 : index
    %8 = vector.load %arg5[%c0_7, %c0_8] : memref<32x32xf32, #tpu.memory_space<vmem>>, vector<32x32xf32>
    tpu.vector_store %arg5[%c0_7, %c0_8], %7 {strides = array<i32>} : memref<32x32xf32, #tpu.memory_space<vmem>>, vector<32x32xf32>,
    return
  }
  func.func @transform_0(%arg0: i32) -> (i32, i32) {
    %c0_i32 = arith.constant 0 : i32
    %c0_i32_0 = arith.constant 0 : i32
    return %arg0, %c0_i32 : i32, i32
  }
  func.func @transform_1(%arg0: i32) -> (i32, i32) {
    %c0_i32 = arith.constant 0 : i32
    %c0_i32_0 = arith.constant 0 : i32
    %c0_i32_1 = arith.constant 0 : i32
    return %c0_i32, %c0_i32_0 : i32, i32
  }
  func.func @transform_2(%arg0: i32) -> (i32, i32) {
    %c0_i32 = arith.constant 0 : i32
    %c0_i32_0 = arith.constant 0 : i32
    %c0_i32_1 = arith.constant 0 : i32
    return %c0_i32, %c0_i32_0 : i32, i32
  }
  func.func @transform_3(%arg0: i32) -> (i32, i32) {
    %c0_i32 = arith.constant 0 : i32
    %c0_i32_0 = arith.constant 0 : i32
    return %arg0, %c0_i32 : i32, i32
  }
  func.func @transform_4(%arg0: i32) -> (i32, i32) {
    %c0_i32 = arith.constant 0 : i32
    %c0_i32_0 = arith.constant 0 : i32
    return %arg0, %c0_i32 : i32, i32
  }
}

module attributes {stable_mosaic.version = 11 : i64} {
  func.func @kernel(%arg0: i32, %arg1: memref<64x32xf32, #tpu.memory_space<vmem>>, %arg2: memref<1x32xf32, #tpu.memory_space<vmem>>, %arg3: memref<1x32xf32, #tpu.memory_space<vmem>>, %arg4: memref<32x96xf32, #tpu.memory_space<vmem>>, %arg5: memref<1x96xf32, #tpu.memory_space<vmem>>, %arg6: memref<64x96xf32, #tpu.memory_space<vmem>>) attributes {dimension_semantics = [#tpu.dimension_semantics<parallel>], iteration_bounds = array<i64: 2>, scalar_prefetch = 0 : i64, scratch_operands = 0 : i64, tpu.core_type = #tpu.core_type<tc>, window_params = [{transform_indices = @transform_0, window_bounds = array<i64: 64, 32>}, {pipeline_mode = #tpu.pipeline_mode<synchronous>, transform_indices = @transform_1, window_bounds = array<i64: 1, 32>}, {pipeline_mode = #tpu.pipeline_mode<synchronous>, transform_indices = @transform_2, window_bounds = array<i64: 1, 32>}, {pipeline_mode = #tpu.pipeline_mode<synchronous>, transform_indices = @transform_3, window_bounds = array<i64: 32, 96>}, {pipeline_mode = #tpu.pipeline_mode<synchronous>, transform_indices = @transform_4, window_bounds = array<i64: 1, 96>}, {transform_indices = @transform_5, window_bounds = array<i64: 64, 96>}]} {
    %c0 = arith.constant 0 : index
    %c0_0 = arith.constant 0 : index
    %0 = vector.load %arg1[%c0, %c0_0] : memref<64x32xf32, #tpu.memory_space<vmem>>, vector<64x32xf32>
    %cst = arith.constant dense<0.000000e+00> : vector<64xf32>
    %1 = vector.multi_reduction <add>, %0, %cst [1] : vector<64x32xf32> to vector<64xf32>
    %2 = vector.shape_cast %1 : vector<64xf32> to vector<64x1xf32>
    %cst_1 = arith.constant 3.200000e+01 : f32
    %3 = vector.broadcast %cst_1 : f32 to vector<64x1xf32>
    %4 = arith.divf %2, %3 : vector<64x1xf32>
    %5 = vector.broadcast %4 : vector<64x1xf32> to vector<64x32xf32>
    %6 = arith.subf %0, %5 : vector<64x32xf32>
    %7 = arith.mulf %6, %6 : vector<64x32xf32>
    %cst_2 = arith.constant dense<0.000000e+00> : vector<64xf32>
    %8 = vector.multi_reduction <add>, %7, %cst_2 [1] : vector<64x32xf32> to vector<64xf32>
    %9 = vector.shape_cast %8 : vector<64xf32> to vector<64x1xf32>
    %cst_3 = arith.constant 3.200000e+01 : f32
    %10 = vector.broadcast %cst_3 : f32 to vector<64x1xf32>
    %11 = arith.divf %9, %10 : vector<64x1xf32>
    %cst_4 = arith.constant 9.99999974E-6 : f32
    %12 = vector.broadcast %cst_4 : f32 to vector<64x1xf32>
    %13 = arith.addf %11, %12 : vector<64x1xf32>
    %14 = math.rsqrt %13 : vector<64x1xf32>
    %15 = vector.broadcast %14 : vector<64x1xf32> to vector<64x32xf32>
    %16 = arith.mulf %6, %15 : vector<64x32xf32>
    %c0_5 = arith.constant 0 : index
    %c0_6 = arith.constant 0 : index
    %17 = vector.load %arg2[%c0_5, %c0_6] : memref<1x32xf32, #tpu.memory_space<vmem>>, vector<1x32xf32>
    %18 = vector.broadcast %17 : vector<1x32xf32> to vector<64x32xf32>
    %19 = arith.mulf %16, %18 : vector<64x32xf32>
    %c0_7 = arith.constant 0 : index
    %c0_8 = arith.constant 0 : index
    %20 = vector.load %arg3[%c0_7, %c0_8] : memref<1x32xf32, #tpu.memory_space<vmem>>, vector<1x32xf32>
    %21 = vector.broadcast %20 : vector<1x32xf32> to vector<64x32xf32>
    %22 = arith.addf %19, %21 : vector<64x32xf32>
    %c0_9 = arith.constant 0 : index
    %c0_10 = arith.constant 0 : index
    %23 = vector.load %arg4[%c0_9, %c0_10] : memref<32x96xf32, #tpu.memory_space<vmem>>, vector<32x96xf32>
    %cst_11 = arith.constant dense<0.000000e+00> : vector<64x96xf32>
    %24 = tpu.matmul %22, %23, %cst_11 {dimension_numbers = #tpu.dot_dimension_numbers<[1], [0], [0], [1], [0, 0, 1, 1], [], []>} : vector<64x32xf32>, vector<32x96xf32>, vector<64x96xf32> -> vector<64x96xf32>
    %c0_12 = arith.constant 0 : index
    %c0_13 = arith.constant 0 : index
    %25 = vector.load %arg5[%c0_12, %c0_13] : memref<1x96xf32, #tpu.memory_space<vmem>>, vector<1x96xf32>
    %26 = vector.broadcast %25 : vector<1x96xf32> to vector<64x96xf32>
    %27 = arith.addf %24, %26 : vector<64x96xf32>
    %c0_14 = arith.constant 0 : index
    %c0_15 = arith.constant 0 : index
    %28 = vector.load %arg6[%c0_14, %c0_15] : memref<64x96xf32, #tpu.memory_space<vmem>>, vector<64x96xf32>
    tpu.vector_store %arg6[%c0_14, %c0_15], %27 {strides = array<i32>} : memref<64x96xf32, #tpu.memory_space<vmem>>, vector<64x96xf32>,
    return
  }
  func.func @transform_0(%arg0: i32) -> (i32, i32) {
    %c0_i32 = arith.constant 0 : i32
    %c0_i32_0 = arith.constant 0 : i32
    return %arg0, %c0_i32 : i32, i32
  }
  func.func @transform_1(%arg0: i32) -> (i32, i32) {
    %c0_i32 = arith.constant 0 : i32
    %c0_i32_0 = arith.constant 0 : i32
    %c0_i32_1 = arith.constant 0 : i32
    return %c0_i32, %c0_i32_0 : i32, i32
  }
  func.func @transform_2(%arg0: i32) -> (i32, i32) {
    %c0_i32 = arith.constant 0 : i32
    %c0_i32_0 = arith.constant 0 : i32
    %c0_i32_1 = arith.constant 0 : i32
    return %c0_i32, %c0_i32_0 : i32, i32
  }
  func.func @transform_3(%arg0: i32) -> (i32, i32) {
    %c0_i32 = arith.constant 0 : i32
    %c0_i32_0 = arith.constant 0 : i32
    %c0_i32_1 = arith.constant 0 : i32
    return %c0_i32, %c0_i32_0 : i32, i32
  }
  func.func @transform_4(%arg0: i32) -> (i32, i32) {
    %c0_i32 = arith.constant 0 : i32
    %c0_i32_0 = arith.constant 0 : i32
    %c0_i32_1 = arith.constant 0 : i32
    return %c0_i32, %c0_i32_0 : i32, i32
  }
  func.func @transform_5(%arg0: i32) -> (i32, i32) {
    %c0_i32 = arith.constant 0 : i32
    %c0_i32_0 = arith.constant 0 : i32
    return %arg0, %c0_i32 : i32, i32
  }
}

module attributes {stable_mosaic.version = 11 : i64} {
  func.func @kernel(%arg0: i32, %arg1: memref<32x128xf32, #tpu.memory_space<vmem>>, %arg2: memref<128x32xf32, #tpu.memory_space<vmem>>, %arg3: memref<1x32xf32, #tpu.memory_space<vmem>>, %arg4: memref<32x32xf32, #tpu.memory_space<vmem>>, %arg5: memref<1x32xf32, #tpu.memory_space<vmem>>, %arg6: memref<1x32xf32, #tpu.memory_space<vmem>>, %arg7: memref<32x32xf32, #tpu.memory_space<vmem>>) attributes {dimension_semantics = [#tpu.dimension_semantics<parallel>], iteration_bounds = array<i64: 2>, scalar_prefetch = 0 : i64, scratch_operands = 0 : i64, tpu.core_type = #tpu.core_type<tc>, window_params = [{transform_indices = @transform_0, window_bounds = array<i64: 32, 128>}, {pipeline_mode = #tpu.pipeline_mode<synchronous>, transform_indices = @transform_1, window_bounds = array<i64: 128, 32>}, {pipeline_mode = #tpu.pipeline_mode<synchronous>, transform_indices = @transform_2, window_bounds = array<i64: 1, 32>}, {transform_indices = @transform_3, window_bounds = array<i64: 32, 32>}, {pipeline_mode = #tpu.pipeline_mode<synchronous>, transform_indices = @transform_4, window_bounds = array<i64: 1, 32>}, {pipeline_mode = #tpu.pipeline_mode<synchronous>, transform_indices = @transform_5, window_bounds = array<i64: 1, 32>}, {transform_indices = @transform_6, window_bounds = array<i64: 32, 32>}]} {
    %c0 = arith.constant 0 : index
    %c0_0 = arith.constant 0 : index
    %0 = vector.load %arg1[%c0, %c0_0] : memref<32x128xf32, #tpu.memory_space<vmem>>, vector<32x128xf32>
    %c0_1 = arith.constant 0 : index
    %c0_2 = arith.constant 0 : index
    %1 = vector.load %arg2[%c0_1, %c0_2] : memref<128x32xf32, #tpu.memory_space<vmem>>, vector<128x32xf32>
    %cst = arith.constant dense<0.000000e+00> : vector<32x32xf32>
    %2 = tpu.matmul %0, %1, %cst {dimension_numbers = #tpu.dot_dimension_numbers<[1], [0], [0], [1], [0, 0, 1, 1], [], []>} : vector<32x128xf32>, vector<128x32xf32>, vector<32x32xf32> -> vector<32x32xf32>
    %c0_3 = arith.constant 0 : index
    %c0_4 = arith.constant 0 : index
    %3 = vector.load %arg3[%c0_3, %c0_4] : memref<1x32xf32, #tpu.memory_space<vmem>>, vector<1x32xf32>
    %4 = vector.broadcast %3 : vector<1x32xf32> to vector<32x32xf32>
    %5 = arith.addf %2, %4 : vector<32x32xf32>
    %c0_5 = arith.constant 0 : index
    %c0_6 = arith.constant 0 : index
    %6 = vector.load %arg4[%c0_5, %c0_6] : memref<32x32xf32, #tpu.memory_space<vmem>>, vector<32x32xf32>
    %7 = arith.addf %5, %6 : vector<32x32xf32>
    %cst_7 = arith.constant dense<0.000000e+00> : vector<32xf32>
    %8 = vector.multi_reduction <add>, %7, %cst_7 [1] : vector<32x32xf32> to vector<32xf32>
    %9 = vector.shape_cast %8 : vector<32xf32> to vector<32x1xf32>
    %cst_8 = arith.constant 3.200000e+01 : f32
    %10 = vector.broadcast %cst_8 : f32 to vector<32x1xf32>
    %11 = arith.divf %9, %10 : vector<32x1xf32>
    %12 = vector.broadcast %11 : vector<32x1xf32> to vector<32x32xf32>
    %13 = arith.subf %7, %12 : vector<32x32xf32>
    %14 = arith.mulf %13, %13 : vector<32x32xf32>
    %cst_9 = arith.constant dense<0.000000e+00> : vector<32xf32>
    %15 = vector.multi_reduction <add>, %14, %cst_9 [1] : vector<32x32xf32> to vector<32xf32>
    %16 = vector.shape_cast %15 : vector<32xf32> to vector<32x1xf32>
    %cst_10 = arith.constant 3.200000e+01 : f32
    %17 = vector.broadcast %cst_10 : f32 to vector<32x1xf32>
    %18 = arith.divf %16, %17 : vector<32x1xf32>
    %cst_11 = arith.constant 9.99999974E-6 : f32
    %19 = vector.broadcast %cst_11 : f32 to vector<32x1xf32>
    %20 = arith.addf %18, %19 : vector<32x1xf32>
    %21 = math.rsqrt %20 : vector<32x1xf32>
    %22 = vector.broadcast %21 : vector<32x1xf32> to vector<32x32xf32>
    %23 = arith.mulf %13, %22 : vector<32x32xf32>
    %c0_12 = arith.constant 0 : index
    %c0_13 = arith.constant 0 : index
    %24 = vector.load %arg5[%c0_12, %c0_13] : memref<1x32xf32, #tpu.memory_space<vmem>>, vector<1x32xf32>
    %25 = vector.broadcast %24 : vector<1x32xf32> to vector<32x32xf32>
    %26 = arith.mulf %23, %25 : vector<32x32xf32>
    %c0_14 = arith.constant 0 : index
    %c0_15 = arith.constant 0 : index
    %27 = vector.load %arg6[%c0_14, %c0_15] : memref<1x32xf32, #tpu.memory_space<vmem>>, vector<1x32xf32>
    %28 = vector.broadcast %27 : vector<1x32xf32> to vector<32x32xf32>
    %29 = arith.addf %26, %28 : vector<32x32xf32>
    %c0_16 = arith.constant 0 : index
    %c0_17 = arith.constant 0 : index
    %30 = vector.load %arg7[%c0_16, %c0_17] : memref<32x32xf32, #tpu.memory_space<vmem>>, vector<32x32xf32>
    tpu.vector_store %arg7[%c0_16, %c0_17], %29 {strides = array<i32>} : memref<32x32xf32, #tpu.memory_space<vmem>>, vector<32x32xf32>,
    return
  }
  func.func @transform_0(%arg0: i32) -> (i32, i32) {
    %c0_i32 = arith.constant 0 : i32
    %c0_i32_0 = arith.constant 0 : i32
    return %arg0, %c0_i32 : i32, i32
  }
  func.func @transform_1(%arg0: i32) -> (i32, i32) {
    %c0_i32 = arith.constant 0 : i32
    %c0_i32_0 = arith.constant 0 : i32
    %c0_i32_1 = arith.constant 0 : i32
    return %c0_i32, %c0_i32_0 : i32, i32
  }
  func.func @transform_2(%arg0: i32) -> (i32, i32) {
    %c0_i32 = arith.constant 0 : i32
    %c0_i32_0 = arith.constant 0 : i32
    %c0_i32_1 = arith.constant 0 : i32
    return %c0_i32, %c0_i32_0 : i32, i32
  }
  func.func @transform_3(%arg0: i32) -> (i32, i32) {
    %c0_i32 = arith.constant 0 : i32
    %c0_i32_0 = arith.constant 0 : i32
    return %arg0, %c0_i32 : i32, i32
  }
  func.func @transform_4(%arg0: i32) -> (i32, i32) {
    %c0_i32 = arith.constant 0 : i32
    %c0_i32_0 = arith.constant 0 : i32
    %c0_i32_1 = arith.constant 0 : i32
    return %c0_i32, %c0_i32_0 : i32, i32
  }
  func.func @transform_5(%arg0: i32) -> (i32, i32) {
    %c0_i32 = arith.constant 0 : i32
    %c0_i32_0 = arith.constant 0 : i32
    %c0_i32_1 = arith.constant 0 : i32
    return %c0_i32, %c0_i32_0 : i32, i32
  }
  func.func @transform_6(%arg0: i32) -> (i32, i32) {
    %c0_i32 = arith.constant 0 : i32
    %c0_i32_0 = arith.constant 0 : i32
    return %arg0, %c0_i32 : i32, i32
  }
}

module attributes {stable_mosaic.version = 11 : i64} {
  func.func @kernel(%arg0: i32, %arg1: memref<1x8x16x4xf32, #tpu.memory_space<vmem>>, %arg2: memref<1x8x16x4xf32, #tpu.memory_space<vmem>>, %arg3: memref<1x8x16x4xf32, #tpu.memory_space<vmem>>, %arg4: memref<1x8x16x4xf32, #tpu.memory_space<vmem>>) attributes {dimension_semantics = [#tpu.dimension_semantics<parallel>], iteration_bounds = array<i64: 8>, scalar_prefetch = 0 : i64, scratch_operands = 0 : i64, tpu.core_type = #tpu.core_type<tc>, window_params = [{transform_indices = @transform_0, window_bounds = array<i64: 1, 8, 16, 4>}, {transform_indices = @transform_1, window_bounds = array<i64: 1, 8, 16, 4>}, {transform_indices = @transform_2, window_bounds = array<i64: 1, 8, 16, 4>}, {transform_indices = @transform_3, window_bounds = array<i64: 1, 8, 16, 4>}]} {
    %c0 = arith.constant 0 : index
    %c0_0 = arith.constant 0 : index
    %c0_1 = arith.constant 0 : index
    %c0_2 = arith.constant 0 : index
    %0 = vector.load %arg1[%c0, %c0_0, %c0_1, %c0_2] : memref<1x8x16x4xf32, #tpu.memory_space<vmem>>, vector<1x8x16x4xf32>
    %1 = vector.shape_cast %0 : vector<1x8x16x4xf32> to vector<8x16x4xf32>
    %c0_3 = arith.constant 0 : index
    %c0_4 = arith.constant 0 : index
    %c0_5 = arith.constant 0 : index
    %c0_6 = arith.constant 0 : index
    %2 = vector.load %arg2[%c0_3, %c0_4, %c0_5, %c0_6] : memref<1x8x16x4xf32, #tpu.memory_space<vmem>>, vector<1x8x16x4xf32>
    %3 = vector.shape_cast %2 : vector<1x8x16x4xf32> to vector<8x16x4xf32>
    %c0_7 = arith.constant 0 : index
    %c0_8 = arith.constant 0 : index
    %c0_9 = arith.constant 0 : index
    %c0_10 = arith.constant 0 : index
    %4 = vector.load %arg3[%c0_7, %c0_8, %c0_9, %c0_10] : memref<1x8x16x4xf32, #tpu.memory_space<vmem>>, vector<1x8x16x4xf32>
    %5 = vector.shape_cast %4 : vector<1x8x16x4xf32> to vector<8x16x4xf32>
    "tpu.trace_start"() <{level = 10 : i32, message = "hqd,hkd->hqk"}> : () -> ()
    %cst = arith.constant dense<0.000000e+00> : vector<8x16x16xf32>
    %6 = tpu.matmul %1, %3, %cst {dimension_numbers = #tpu.dot_dimension_numbers<[2], [2], [1], [1], [0, 0, 0, 1, 1, 1], [0], [0]>} : vector<8x16x4xf32>, vector<8x16x4xf32>, vector<8x16x16xf32> -> vector<8x16x16xf32>
    "tpu.trace_stop"() : () -> ()
    %cst_11 = arith.constant 5.000000e-01 : f32
    %7 = vector.broadcast %cst_11 : f32 to vector<8x16x16xf32>
    %8 = arith.mulf %6, %7 : vector<8x16x16xf32>
    %cst_12 = arith.constant dense<0xFF800000> : vector<8x16xf32>
    %9 = vector.multi_reduction <maximumf>, %8, %cst_12 [2] : vector<8x16x16xf32> to vector<8x16xf32>
    %10 = vector.shape_cast %9 : vector<8x16xf32> to vector<8x16x1xf32>
    %11 = vector.broadcast %10 : vector<8x16x1xf32> to vector<8x16x16xf32>
    %12 = arith.subf %8, %11 : vector<8x16x16xf32>
    %13 = math.exp %12 : vector<8x16x16xf32>
    %cst_13 = arith.constant dense<0.000000e+00> : vector<8x16xf32>
    %14 = vector.multi_reduction <add>, %13, %cst_13 [2] : vector<8x16x16xf32> to vector<8x16xf32>
    %15 = vector.shape_cast %14 : vector<8x16xf32> to vector<8x16x1xf32>
    %16 = tpu.reciprocal %15 {approx = true} : vector<8x16x1xf32> -> vector<8x16x1xf32>
    %17 = vector.broadcast %16 : vector<8x16x1xf32> to vector<8x16x16xf32>
    %18 = arith.mulf %13, %17 : vector<8x16x16xf32>
    "tpu.trace_start"() <{level = 10 : i32, message = "hqk,hkd->hqd"}> : () -> ()
    %cst_14 = arith.constant dense<0.000000e+00> : vector<8x16x4xf32>
    %19 = tpu.matmul %18, %5, %cst_14 {dimension_numbers = #tpu.dot_dimension_numbers<[2], [1], [1], [2], [0, 0, 0, 1, 1, 2], [0], [0]>} : vector<8x16x16xf32>, vector<8x16x4xf32>, vector<8x16x4xf32> -> vector<8x16x4xf32>
    "tpu.trace_stop"() : () -> ()
    %20 = vector.shape_cast %19 : vector<8x16x4xf32> to vector<1x8x16x4xf32>
    %c0_15 = arith.constant 0 : index
    %c0_16 = arith.constant 0 : index
    %c0_17 = arith.constant 0 : index
    %c0_18 = arith.constant 0 : index
    %21 = vector.load %arg4[%c0_15, %c0_16, %c0_17, %c0_18] : memref<1x8x16x4xf32, #tpu.memory_space<vmem>>, vector<1x8x16x4xf32>
    tpu.vector_store %arg4[%c0_15, %c0_16, %c0_17, %c0_18], %20 {strides = array<i32>} : memref<1x8x16x4xf32, #tpu.memory_space<vmem>>, vector<1x8x16x4xf32>,
    return
  }
  func.func @transform_0(%arg0: i32) -> (i32, i32, i32, i32) {
    %c0_i32 = arith.constant 0 : i32
    %c0_i32_0 = arith.constant 0 : i32
    %c0_i32_1 = arith.constant 0 : i32
    %c0_i32_2 = arith.constant 0 : i32
    return %arg0, %c0_i32, %c0_i32_0, %c0_i32_1 : i32, i32, i32, i32
  }
  func.func @transform_1(%arg0: i32) -> (i32, i32, i32, i32) {
    %c0_i32 = arith.constant 0 : i32
    %c0_i32_0 = arith.constant 0 : i32
    %c0_i32_1 = arith.constant 0 : i32
    %c0_i32_2 = arith.constant 0 : i32
    return %arg0, %c0_i32, %c0_i32_0, %c0_i32_1 : i32, i32, i32, i32
  }
  func.func @transform_2(%arg0: i32) -> (i32, i32, i32, i32) {
    %c0_i32 = arith.constant 0 : i32
    %c0_i32_0 = arith.constant 0 : i32
    %c0_i32_1 = arith.constant 0 : i32
    %c0_i32_2 = arith.constant 0 : i32
    return %arg0, %c0_i32, %c0_i32_0, %c0_i32_1 : i32, i32, i32, i32
  }
  func.func @transform_3(%arg0: i32) -> (i32, i32, i32, i32) {
    %c0_i32 = arith.constant 0 : i32
    %c0_i32_0 = arith.constant 0 : i32
    %c0_i32_1 = arith.constant 0 : i32
    %c0_i32_2 = arith.constant 0 : i32
    return %arg0, %c0_i32, %c0_i32_0, %c0_i32_1 : i32, i32, i32, i32
  }
}

module attributes {stable_mosaic.version = 11 : i64} {
  func.func @kernel(%arg0: i32, %arg1: memref<64x32xf32, #tpu.memory_space<vmem>>, %arg2: memref<32x32xf32, #tpu.memory_space<vmem>>, %arg3: memref<1x32xf32, #tpu.memory_space<vmem>>, %arg4: memref<64x32xf32, #tpu.memory_space<vmem>>, %arg5: memref<64x32xf32, #tpu.memory_space<vmem>>) attributes {dimension_semantics = [#tpu.dimension_semantics<parallel>], iteration_bounds = array<i64: 2>, scalar_prefetch = 0 : i64, scratch_operands = 0 : i64, tpu.core_type = #tpu.core_type<tc>, window_params = [{transform_indices = @transform_0, window_bounds = array<i64: 64, 32>}, {pipeline_mode = #tpu.pipeline_mode<synchronous>, transform_indices = @transform_1, window_bounds = array<i64: 32, 32>}, {pipeline_mode = #tpu.pipeline_mode<synchronous>, transform_indices = @transform_2, window_bounds = array<i64: 1, 32>}, {transform_indices = @transform_3, window_bounds = array<i64: 64, 32>}, {transform_indices = @transform_4, window_bounds = array<i64: 64, 32>}]} {
    %c0 = arith.constant 0 : index
    %c0_0 = arith.constant 0 : index
    %0 = vector.load %arg1[%c0, %c0_0] : memref<64x32xf32, #tpu.memory_space<vmem>>, vector<64x32xf32>
    %c0_1 = arith.constant 0 : index
    %c0_2 = arith.constant 0 : index
    %1 = vector.load %arg2[%c0_1, %c0_2] : memref<32x32xf32, #tpu.memory_space<vmem>>, vector<32x32xf32>
    %cst = arith.constant dense<0.000000e+00> : vector<64x32xf32>
    %2 = tpu.matmul %0, %1, %cst {dimension_numbers = #tpu.dot_dimension_numbers<[1], [0], [0], [1], [0, 0, 1, 1], [], []>} : vector<64x32xf32>, vector<32x32xf32>, vector<64x32xf32> -> vector<64x32xf32>
    %c0_3 = arith.constant 0 : index
    %c0_4 = arith.constant 0 : index
    %3 = vector.load %arg3[%c0_3, %c0_4] : memref<1x32xf32, #tpu.memory_space<vmem>>, vector<1x32xf32>
    %4 = vector.broadcast %3 : vector<1x32xf32> to vector<64x32xf32>
    %5 = arith.addf %2, %4 : vector<64x32xf32>
    %c0_5 = arith.constant 0 : index
    %c0_6 = arith.constant 0 : index
    %6 = vector.load %arg4[%c0_5, %c0_6] : memref<64x32xf32, #tpu.memory_space<vmem>>, vector<64x32xf32>
    %7 = arith.addf %5, %6 : vector<64x32xf32>
    %c0_7 = arith.constant 0 : index
    %c0_8 = arith.constant 0 : index
    %8 = vector.load %arg5[%c0_7, %c0_8] : memref<64x32xf32, #tpu.memory_space<vmem>>, vector<64x32xf32>
    tpu.vector_store %arg5[%c0_7, %c0_8], %7 {strides = array<i32>} : memref<64x32xf32, #tpu.memory_space<vmem>>, vector<64x32xf32>,
    return
  }
  func.func @transform_0(%arg0: i32) -> (i32, i32) {
    %c0_i32 = arith.constant 0 : i32
    %c0_i32_0 = arith.constant 0 : i32
    return %arg0, %c0_i32 : i32, i32
  }
  func.func @transform_1(%arg0: i32) -> (i32, i32) {
    %c0_i32 = arith.constant 0 : i32
    %c0_i32_0 = arith.constant 0 : i32
    %c0_i32_1 = arith.constant 0 : i32
    return %c0_i32, %c0_i32_0 : i32, i32
  }
  func.func @transform_2(%arg0: i32) -> (i32, i32) {
    %c0_i32 = arith.constant 0 : i32
    %c0_i32_0 = arith.constant 0 : i32
    %c0_i32_1 = arith.constant 0 : i32
    return %c0_i32, %c0_i32_0 : i32, i32
  }
  func.func @transform_3(%arg0: i32) -> (i32, i32) {
    %c0_i32 = arith.constant 0 : i32
    %c0_i32_0 = arith.constant 0 : i32
    return %arg0, %c0_i32 : i32, i32
  }
  func.func @transform_4(%arg0: i32) -> (i32, i32) {
    %c0_i32 = arith.constant 0 : i32
    %c0_i32_0 = arith.constant 0 : i32
    return %arg0, %c0_i32 : i32, i32
  }
}

module attributes {stable_mosaic.version = 11 : i64} {
  func.func @kernel(%arg0: i32, %arg1: memref<64x32xf32, #tpu.memory_space<vmem>>, %arg2: memref<1x32xf32, #tpu.memory_space<vmem>>, %arg3: memref<1x32xf32, #tpu.memory_space<vmem>>, %arg4: memref<32x32xf32, #tpu.memory_space<vmem>>, %arg5: memref<1x32xf32, #tpu.memory_space<vmem>>, %arg6: memref<64x32xf32, #tpu.memory_space<vmem>>) attributes {dimension_semantics = [#tpu.dimension_semantics<parallel>], iteration_bounds = array<i64: 2>, scalar_prefetch = 0 : i64, scratch_operands = 0 : i64, tpu.core_type = #tpu.core_type<tc>, window_params = [{transform_indices = @transform_0, window_bounds = array<i64: 64, 32>}, {pipeline_mode = #tpu.pipeline_mode<synchronous>, transform_indices = @transform_1, window_bounds = array<i64: 1, 32>}, {pipeline_mode = #tpu.pipeline_mode<synchronous>, transform_indices = @transform_2, window_bounds = array<i64: 1, 32>}, {pipeline_mode = #tpu.pipeline_mode<synchronous>, transform_indices = @transform_3, window_bounds = array<i64: 32, 32>}, {pipeline_mode = #tpu.pipeline_mode<synchronous>, transform_indices = @transform_4, window_bounds = array<i64: 1, 32>}, {transform_indices = @transform_5, window_bounds = array<i64: 64, 32>}]} {
    %c0 = arith.constant 0 : index
    %c0_0 = arith.constant 0 : index
    %0 = vector.load %arg1[%c0, %c0_0] : memref<64x32xf32, #tpu.memory_space<vmem>>, vector<64x32xf32>
    %cst = arith.constant dense<0.000000e+00> : vector<64xf32>
    %1 = vector.multi_reduction <add>, %0, %cst [1] : vector<64x32xf32> to vector<64xf32>
    %2 = vector.shape_cast %1 : vector<64xf32> to vector<64x1xf32>
    %cst_1 = arith.constant 3.200000e+01 : f32
    %3 = vector.broadcast %cst_1 : f32 to vector<64x1xf32>
    %4 = arith.divf %2, %3 : vector<64x1xf32>
    %5 = vector.broadcast %4 : vector<64x1xf32> to vector<64x32xf32>
    %6 = arith.subf %0, %5 : vector<64x32xf32>
    %7 = arith.mulf %6, %6 : vector<64x32xf32>
    %cst_2 = arith.constant dense<0.000000e+00> : vector<64xf32>
    %8 = vector.multi_reduction <add>, %7, %cst_2 [1] : vector<64x32xf32> to vector<64xf32>
    %9 = vector.shape_cast %8 : vector<64xf32> to vector<64x1xf32>
    %cst_3 = arith.constant 3.200000e+01 : f32
    %10 = vector.broadcast %cst_3 : f32 to vector<64x1xf32>
    %11 = arith.divf %9, %10 : vector<64x1xf32>
    %cst_4 = arith.constant 9.99999974E-6 : f32
    %12 = vector.broadcast %cst_4 : f32 to vector<64x1xf32>
    %13 = arith.addf %11, %12 : vector<64x1xf32>
    %14 = math.rsqrt %13 : vector<64x1xf32>
    %15 = vector.broadcast %14 : vector<64x1xf32> to vector<64x32xf32>
    %16 = arith.mulf %6, %15 : vector<64x32xf32>
    %c0_5 = arith.constant 0 : index
    %c0_6 = arith.constant 0 : index
    %17 = vector.load %arg2[%c0_5, %c0_6] : memref<1x32xf32, #tpu.memory_space<vmem>>, vector<1x32xf32>
    %18 = vector.broadcast %17 : vector<1x32xf32> to vector<64x32xf32>
    %19 = arith.mulf %16, %18 : vector<64x32xf32>
    %c0_7 = arith.constant 0 : index
    %c0_8 = arith.constant 0 : index
    %20 = vector.load %arg3[%c0_7, %c0_8] : memref<1x32xf32, #tpu.memory_space<vmem>>, vector<1x32xf32>
    %21 = vector.broadcast %20 : vector<1x32xf32> to vector<64x32xf32>
    %22 = arith.addf %19, %21 : vector<64x32xf32>
    %c0_9 = arith.constant 0 : index
    %c0_10 = arith.constant 0 : index
    %23 = vector.load %arg4[%c0_9, %c0_10] : memref<32x32xf32, #tpu.memory_space<vmem>>, vector<32x32xf32>
    %cst_11 = arith.constant dense<0.000000e+00> : vector<64x32xf32>
    %24 = tpu.matmul %22, %23, %cst_11 {dimension_numbers = #tpu.dot_dimension_numbers<[1], [0], [0], [1], [0, 0, 1, 1], [], []>} : vector<64x32xf32>, vector<32x32xf32>, vector<64x32xf32> -> vector<64x32xf32>
    %c0_12 = arith.constant 0 : index
    %c0_13 = arith.constant 0 : index
    %25 = vector.load %arg5[%c0_12, %c0_13] : memref<1x32xf32, #tpu.memory_space<vmem>>, vector<1x32xf32>
    %26 = vector.broadcast %25 : vector<1x32xf32> to vector<64x32xf32>
    %27 = arith.addf %24, %26 : vector<64x32xf32>
    %c0_14 = arith.constant 0 : index
    %c0_15 = arith.constant 0 : index
    %28 = vector.load %arg6[%c0_14, %c0_15] : memref<64x32xf32, #tpu.memory_space<vmem>>, vector<64x32xf32>
    tpu.vector_store %arg6[%c0_14, %c0_15], %27 {strides = array<i32>} : memref<64x32xf32, #tpu.memory_space<vmem>>, vector<64x32xf32>,
    return
  }
  func.func @transform_0(%arg0: i32) -> (i32, i32) {
    %c0_i32 = arith.constant 0 : i32
    %c0_i32_0 = arith.constant 0 : i32
    return %arg0, %c0_i32 : i32, i32
  }
  func.func @transform_1(%arg0: i32) -> (i32, i32) {
    %c0_i32 = arith.constant 0 : i32
    %c0_i32_0 = arith.constant 0 : i32
    %c0_i32_1 = arith.constant 0 : i32
    return %c0_i32, %c0_i32_0 : i32, i32
  }
  func.func @transform_2(%arg0: i32) -> (i32, i32) {
    %c0_i32 = arith.constant 0 : i32
    %c0_i32_0 = arith.constant 0 : i32
    %c0_i32_1 = arith.constant 0 : i32
    return %c0_i32, %c0_i32_0 : i32, i32
  }
  func.func @transform_3(%arg0: i32) -> (i32, i32) {
    %c0_i32 = arith.constant 0 : i32
    %c0_i32_0 = arith.constant 0 : i32
    %c0_i32_1 = arith.constant 0 : i32
    return %c0_i32, %c0_i32_0 : i32, i32
  }
  func.func @transform_4(%arg0: i32) -> (i32, i32) {
    %c0_i32 = arith.constant 0 : i32
    %c0_i32_0 = arith.constant 0 : i32
    %c0_i32_1 = arith.constant 0 : i32
    return %c0_i32, %c0_i32_0 : i32, i32
  }
  func.func @transform_5(%arg0: i32) -> (i32, i32) {
    %c0_i32 = arith.constant 0 : i32
    %c0_i32_0 = arith.constant 0 : i32
    return %arg0, %c0_i32 : i32, i32
  }
}

module attributes {stable_mosaic.version = 11 : i64} {
  func.func @kernel(%arg0: i32, %arg1: memref<1x8x16x4xf32, #tpu.memory_space<vmem>>, %arg2: memref<1x8x8x4xf32, #tpu.memory_space<vmem>>, %arg3: memref<1x8x8x4xf32, #tpu.memory_space<vmem>>, %arg4: memref<1x8x16x4xf32, #tpu.memory_space<vmem>>) attributes {dimension_semantics = [#tpu.dimension_semantics<parallel>], iteration_bounds = array<i64: 8>, scalar_prefetch = 0 : i64, scratch_operands = 0 : i64, tpu.core_type = #tpu.core_type<tc>, window_params = [{transform_indices = @transform_0, window_bounds = array<i64: 1, 8, 16, 4>}, {transform_indices = @transform_1, window_bounds = array<i64: 1, 8, 8, 4>}, {transform_indices = @transform_2, window_bounds = array<i64: 1, 8, 8, 4>}, {transform_indices = @transform_3, window_bounds = array<i64: 1, 8, 16, 4>}]} {
    %c0 = arith.constant 0 : index
    %c0_0 = arith.constant 0 : index
    %c0_1 = arith.constant 0 : index
    %c0_2 = arith.constant 0 : index
    %0 = vector.load %arg1[%c0, %c0_0, %c0_1, %c0_2] : memref<1x8x16x4xf32, #tpu.memory_space<vmem>>, vector<1x8x16x4xf32>
    %1 = vector.shape_cast %0 : vector<1x8x16x4xf32> to vector<8x16x4xf32>
    %c0_3 = arith.constant 0 : index
    %c0_4 = arith.constant 0 : index
    %c0_5 = arith.constant 0 : index
    %c0_6 = arith.constant 0 : index
    %2 = vector.load %arg2[%c0_3, %c0_4, %c0_5, %c0_6] : memref<1x8x8x4xf32, #tpu.memory_space<vmem>>, vector<1x8x8x4xf32>
    %3 = vector.shape_cast %2 : vector<1x8x8x4xf32> to vector<8x8x4xf32>
    %c0_7 = arith.constant 0 : index
    %c0_8 = arith.constant 0 : index
    %c0_9 = arith.constant 0 : index
    %c0_10 = arith.constant 0 : index
    %4 = vector.load %arg3[%c0_7, %c0_8, %c0_9, %c0_10] : memref<1x8x8x4xf32, #tpu.memory_space<vmem>>, vector<1x8x8x4xf32>
    %5 = vector.shape_cast %4 : vector<1x8x8x4xf32> to vector<8x8x4xf32>
    "tpu.trace_start"() <{level = 10 : i32, message = "hqd,hkd->hqk"}> : () -> ()
    %cst = arith.constant dense<0.000000e+00> : vector<8x16x8xf32>
    %6 = tpu.matmul %1, %3, %cst {dimension_numbers = #tpu.dot_dimension_numbers<[2], [2], [1], [1], [0, 0, 0, 1, 1, 1], [0], [0]>} : vector<8x16x4xf32>, vector<8x8x4xf32>, vector<8x16x8xf32> -> vector<8x16x8xf32>
    "tpu.trace_stop"() : () -> ()
    %cst_11 = arith.constant 5.000000e-01 : f32
    %7 = vector.broadcast %cst_11 : f32 to vector<8x16x8xf32>
    %8 = arith.mulf %6, %7 : vector<8x16x8xf32>
    %cst_12 = arith.constant dense<0xFF800000> : vector<8x16xf32>
    %9 = vector.multi_reduction <maximumf>, %8, %cst_12 [2] : vector<8x16x8xf32> to vector<8x16xf32>
    %10 = vector.shape_cast %9 : vector<8x16xf32> to vector<8x16x1xf32>
    %11 = vector.broadcast %10 : vector<8x16x1xf32> to vector<8x16x8xf32>
    %12 = arith.subf %8, %11 : vector<8x16x8xf32>
    %13 = math.exp %12 : vector<8x16x8xf32>
    %cst_13 = arith.constant dense<0.000000e+00> : vector<8x16xf32>
    %14 = vector.multi_reduction <add>, %13, %cst_13 [2] : vector<8x16x8xf32> to vector<8x16xf32>
    %15 = vector.shape_cast %14 : vector<8x16xf32> to vector<8x16x1xf32>
    %16 = tpu.reciprocal %15 {approx = true} : vector<8x16x1xf32> -> vector<8x16x1xf32>
    %17 = vector.broadcast %16 : vector<8x16x1xf32> to vector<8x16x8xf32>
    %18 = arith.mulf %13, %17 : vector<8x16x8xf32>
    "tpu.trace_start"() <{level = 10 : i32, message = "hqk,hkd->hqd"}> : () -> ()
    %cst_14 = arith.constant dense<0.000000e+00> : vector<8x16x4xf32>
    %19 = tpu.matmul %18, %5, %cst_14 {dimension_numbers = #tpu.dot_dimension_numbers<[2], [1], [1], [2], [0, 0, 0, 1, 1, 2], [0], [0]>} : vector<8x16x8xf32>, vector<8x8x4xf32>, vector<8x16x4xf32> -> vector<8x16x4xf32>
    "tpu.trace_stop"() : () -> ()
    %20 = vector.shape_cast %19 : vector<8x16x4xf32> to vector<1x8x16x4xf32>
    %c0_15 = arith.constant 0 : index
    %c0_16 = arith.constant 0 : index
    %c0_17 = arith.constant 0 : index
    %c0_18 = arith.constant 0 : index
    %21 = vector.load %arg4[%c0_15, %c0_16, %c0_17, %c0_18] : memref<1x8x16x4xf32, #tpu.memory_space<vmem>>, vector<1x8x16x4xf32>
    tpu.vector_store %arg4[%c0_15, %c0_16, %c0_17, %c0_18], %20 {strides = array<i32>} : memref<1x8x16x4xf32, #tpu.memory_space<vmem>>, vector<1x8x16x4xf32>,
    return
  }
  func.func @transform_0(%arg0: i32) -> (i32, i32, i32, i32) {
    %c0_i32 = arith.constant 0 : i32
    %c0_i32_0 = arith.constant 0 : i32
    %c0_i32_1 = arith.constant 0 : i32
    %c0_i32_2 = arith.constant 0 : i32
    return %arg0, %c0_i32, %c0_i32_0, %c0_i32_1 : i32, i32, i32, i32
  }
  func.func @transform_1(%arg0: i32) -> (i32, i32, i32, i32) {
    %c0_i32 = arith.constant 0 : i32
    %c0_i32_0 = arith.constant 0 : i32
    %c0_i32_1 = arith.constant 0 : i32
    %c0_i32_2 = arith.constant 0 : i32
    return %arg0, %c0_i32, %c0_i32_0, %c0_i32_1 : i32, i32, i32, i32
  }
  func.func @transform_2(%arg0: i32) -> (i32, i32, i32, i32) {
    %c0_i32 = arith.constant 0 : i32
    %c0_i32_0 = arith.constant 0 : i32
    %c0_i32_1 = arith.constant 0 : i32
    %c0_i32_2 = arith.constant 0 : i32
    return %arg0, %c0_i32, %c0_i32_0, %c0_i32_1 : i32, i32, i32, i32
  }
  func.func @transform_3(%arg0: i32) -> (i32, i32, i32, i32) {
    %c0_i32 = arith.constant 0 : i32
    %c0_i32_0 = arith.constant 0 : i32
    %c0_i32_1 = arith.constant 0 : i32
    %c0_i32_2 = arith.constant 0 : i32
    return %arg0, %c0_i32, %c0_i32_0, %c0_i32_1 : i32, i32, i32, i32
  }
}

module attributes {stable_mosaic.version = 11 : i64} {
  func.func @kernel(%arg0: i32, %arg1: memref<64x32xf32, #tpu.memory_space<vmem>>, %arg2: memref<1x32xf32, #tpu.memory_space<vmem>>, %arg3: memref<1x32xf32, #tpu.memory_space<vmem>>, %arg4: memref<32x128xf32, #tpu.memory_space<vmem>>, %arg5: memref<1x128xf32, #tpu.memory_space<vmem>>, %arg6: memref<64x128xf32, #tpu.memory_space<vmem>>) attributes {dimension_semantics = [#tpu.dimension_semantics<parallel>], iteration_bounds = array<i64: 2>, scalar_prefetch = 0 : i64, scratch_operands = 0 : i64, tpu.core_type = #tpu.core_type<tc>, window_params = [{transform_indices = @transform_0, window_bounds = array<i64: 64, 32>}, {pipeline_mode = #tpu.pipeline_mode<synchronous>, transform_indices = @transform_1, window_bounds = array<i64: 1, 32>}, {pipeline_mode = #tpu.pipeline_mode<synchronous>, transform_indices = @transform_2, window_bounds = array<i64: 1, 32>}, {pipeline_mode = #tpu.pipeline_mode<synchronous>, transform_indices = @transform_3, window_bounds = array<i64: 32, 128>}, {pipeline_mode = #tpu.pipeline_mode<synchronous>, transform_indices = @transform_4, window_bounds = array<i64: 1, 128>}, {transform_indices = @transform_5, window_bounds = array<i64: 64, 128>}]} {
    %c0 = arith.constant 0 : index
    %c0_0 = arith.constant 0 : index
    %0 = vector.load %arg1[%c0, %c0_0] : memref<64x32xf32, #tpu.memory_space<vmem>>, vector<64x32xf32>
    %cst = arith.constant dense<0.000000e+00> : vector<64xf32>
    %1 = vector.multi_reduction <add>, %0, %cst [1] : vector<64x32xf32> to vector<64xf32>
    %2 = vector.shape_cast %1 : vector<64xf32> to vector<64x1xf32>
    %cst_1 = arith.constant 3.200000e+01 : f32
    %3 = vector.broadcast %cst_1 : f32 to vector<64x1xf32>
    %4 = arith.divf %2, %3 : vector<64x1xf32>
    %5 = vector.broadcast %4 : vector<64x1xf32> to vector<64x32xf32>
    %6 = arith.subf %0, %5 : vector<64x32xf32>
    %7 = arith.mulf %6, %6 : vector<64x32xf32>
    %cst_2 = arith.constant dense<0.000000e+00> : vector<64xf32>
    %8 = vector.multi_reduction <add>, %7, %cst_2 [1] : vector<64x32xf32> to vector<64xf32>
    %9 = vector.shape_cast %8 : vector<64xf32> to vector<64x1xf32>
    %cst_3 = arith.constant 3.200000e+01 : f32
    %10 = vector.broadcast %cst_3 : f32 to vector<64x1xf32>
    %11 = arith.divf %9, %10 : vector<64x1xf32>
    %cst_4 = arith.constant 9.99999974E-6 : f32
    %12 = vector.broadcast %cst_4 : f32 to vector<64x1xf32>
    %13 = arith.addf %11, %12 : vector<64x1xf32>
    %14 = math.rsqrt %13 : vector<64x1xf32>
    %15 = vector.broadcast %14 : vector<64x1xf32> to vector<64x32xf32>
    %16 = arith.mulf %6, %15 : vector<64x32xf32>
    %c0_5 = arith.constant 0 : index
    %c0_6 = arith.constant 0 : index
    %17 = vector.load %arg2[%c0_5, %c0_6] : memref<1x32xf32, #tpu.memory_space<vmem>>, vector<1x32xf32>
    %18 = vector.broadcast %17 : vector<1x32xf32> to vector<64x32xf32>
    %19 = arith.mulf %16, %18 : vector<64x32xf32>
    %c0_7 = arith.constant 0 : index
    %c0_8 = arith.constant 0 : index
    %20 = vector.load %arg3[%c0_7, %c0_8] : memref<1x32xf32, #tpu.memory_space<vmem>>, vector<1x32xf32>
    %21 = vector.broadcast %20 : vector<1x32xf32> to vector<64x32xf32>
    %22 = arith.addf %19, %21 : vector<64x32xf32>
    %c0_9 = arith.constant 0 : index
    %c0_10 = arith.constant 0 : index
    %23 = vector.load %arg4[%c0_9, %c0_10] : memref<32x128xf32, #tpu.memory_space<vmem>>, vector<32x128xf32>
    %cst_11 = arith.constant dense<0.000000e+00> : vector<64x128xf32>
    %24 = tpu.matmul %22, %23, %cst_11 {dimension_numbers = #tpu.dot_dimension_numbers<[1], [0], [0], [1], [0, 0, 1, 1], [], []>} : vector<64x32xf32>, vector<32x128xf32>, vector<64x128xf32> -> vector<64x128xf32>
    %c0_12 = arith.constant 0 : index
    %c0_13 = arith.constant 0 : index
    %25 = vector.load %arg5[%c0_12, %c0_13] : memref<1x128xf32, #tpu.memory_space<vmem>>, vector<1x128xf32>
    %26 = vector.broadcast %25 : vector<1x128xf32> to vector<64x128xf32>
    %27 = arith.addf %24, %26 : vector<64x128xf32>
    %cst_14 = arith.constant 5.000000e-01 : f32
    %28 = vector.broadcast %cst_14 : f32 to vector<64x128xf32>
    %29 = arith.mulf %28, %27 : vector<64x128xf32>
    %cst_15 = arith.constant 0.707106769 : f32
    %30 = vector.broadcast %cst_15 : f32 to vector<64x128xf32>
    %31 = arith.mulf %27, %30 : vector<64x128xf32>
    %32 = math.erf %31 : vector<64x128xf32>
    %cst_16 = arith.constant 1.000000e+00 : f32
    %33 = vector.broadcast %cst_16 : f32 to vector<64x128xf32>
    %34 = arith.addf %33, %32 : vector<64x128xf32>
    %35 = arith.mulf %29, %34 : vector<64x128xf32>
    %c0_17 = arith.constant 0 : index
    %c0_18 = arith.constant 0 : index
    %36 = vector.load %arg6[%c0_17, %c0_18] : memref<64x128xf32, #tpu.memory_space<vmem>>, vector<64x128xf32>
    tpu.vector_store %arg6[%c0_17, %c0_18], %35 {strides = array<i32>} : memref<64x128xf32, #tpu.memory_space<vmem>>, vector<64x128xf32>,
    return
  }
  func.func @transform_0(%arg0: i32) -> (i32, i32) {
    %c0_i32 = arith.constant 0 : i32
    %c0_i32_0 = arith.constant 0 : i32
    return %arg0, %c0_i32 : i32, i32
  }
  func.func @transform_1(%arg0: i32) -> (i32, i32) {
    %c0_i32 = arith.constant 0 : i32
    %c0_i32_0 = arith.constant 0 : i32
    %c0_i32_1 = arith.constant 0 : i32
    return %c0_i32, %c0_i32_0 : i32, i32
  }
  func.func @transform_2(%arg0: i32) -> (i32, i32) {
    %c0_i32 = arith.constant 0 : i32
    %c0_i32_0 = arith.constant 0 : i32
    %c0_i32_1 = arith.constant 0 : i32
    return %c0_i32, %c0_i32_0 : i32, i32
  }
  func.func @transform_3(%arg0: i32) -> (i32, i32) {
    %c0_i32 = arith.constant 0 : i32
    %c0_i32_0 = arith.constant 0 : i32
    %c0_i32_1 = arith.constant 0 : i32
    return %c0_i32, %c0_i32_0 : i32, i32
  }
  func.func @transform_4(%arg0: i32) -> (i32, i32) {
    %c0_i32 = arith.constant 0 : i32
    %c0_i32_0 = arith.constant 0 : i32
    %c0_i32_1 = arith.constant 0 : i32
    return %c0_i32, %c0_i32_0 : i32, i32
  }
  func.func @transform_5(%arg0: i32) -> (i32, i32) {
    %c0_i32 = arith.constant 0 : i32
    %c0_i32_0 = arith.constant 0 : i32
    return %arg0, %c0_i32 : i32, i32
  }
}

module attributes {stable_mosaic.version = 11 : i64} {
  func.func @kernel(%arg0: i32, %arg1: memref<64x128xf32, #tpu.memory_space<vmem>>, %arg2: memref<128x32xf32, #tpu.memory_space<vmem>>, %arg3: memref<1x32xf32, #tpu.memory_space<vmem>>, %arg4: memref<64x32xf32, #tpu.memory_space<vmem>>, %arg5: memref<64x32xf32, #tpu.memory_space<vmem>>) attributes {dimension_semantics = [#tpu.dimension_semantics<parallel>], iteration_bounds = array<i64: 2>, scalar_prefetch = 0 : i64, scratch_operands = 0 : i64, tpu.core_type = #tpu.core_type<tc>, window_params = [{transform_indices = @transform_0, window_bounds = array<i64: 64, 128>}, {pipeline_mode = #tpu.pipeline_mode<synchronous>, transform_indices = @transform_1, window_bounds = array<i64: 128, 32>}, {pipeline_mode = #tpu.pipeline_mode<synchronous>, transform_indices = @transform_2, window_bounds = array<i64: 1, 32>}, {transform_indices = @transform_3, window_bounds = array<i64: 64, 32>}, {transform_indices = @transform_4, window_bounds = array<i64: 64, 32>}]} {
    %c0 = arith.constant 0 : index
    %c0_0 = arith.constant 0 : index
    %0 = vector.load %arg1[%c0, %c0_0] : memref<64x128xf32, #tpu.memory_space<vmem>>, vector<64x128xf32>
    %c0_1 = arith.constant 0 : index
    %c0_2 = arith.constant 0 : index
    %1 = vector.load %arg2[%c0_1, %c0_2] : memref<128x32xf32, #tpu.memory_space<vmem>>, vector<128x32xf32>
    %cst = arith.constant dense<0.000000e+00> : vector<64x32xf32>
    %2 = tpu.matmul %0, %1, %cst {dimension_numbers = #tpu.dot_dimension_numbers<[1], [0], [0], [1], [0, 0, 1, 1], [], []>} : vector<64x128xf32>, vector<128x32xf32>, vector<64x32xf32> -> vector<64x32xf32>
    %c0_3 = arith.constant 0 : index
    %c0_4 = arith.constant 0 : index
    %3 = vector.load %arg3[%c0_3, %c0_4] : memref<1x32xf32, #tpu.memory_space<vmem>>, vector<1x32xf32>
    %4 = vector.broadcast %3 : vector<1x32xf32> to vector<64x32xf32>
    %5 = arith.addf %2, %4 : vector<64x32xf32>
    %c0_5 = arith.constant 0 : index
    %c0_6 = arith.constant 0 : index
    %6 = vector.load %arg4[%c0_5, %c0_6] : memref<64x32xf32, #tpu.memory_space<vmem>>, vector<64x32xf32>
    %7 = arith.addf %5, %6 : vector<64x32xf32>
    %c0_7 = arith.constant 0 : index
    %c0_8 = arith.constant 0 : index
    %8 = vector.load %arg5[%c0_7, %c0_8] : memref<64x32xf32, #tpu.memory_space<vmem>>, vector<64x32xf32>
    tpu.vector_store %arg5[%c0_7, %c0_8], %7 {strides = array<i32>} : memref<64x32xf32, #tpu.memory_space<vmem>>, vector<64x32xf32>,
    return
  }
  func.func @transform_0(%arg0: i32) -> (i32, i32) {
    %c0_i32 = arith.constant 0 : i32
    %c0_i32_0 = arith.constant 0 : i32
    return %arg0, %c0_i32 : i32, i32
  }
  func.func @transform_1(%arg0: i32) -> (i32, i32) {
    %c0_i32 = arith.constant 0 : i32
    %c0_i32_0 = arith.constant 0 : i32
    %c0_i32_1 = arith.constant 0 : i32
    return %c0_i32, %c0_i32_0 : i32, i32
  }
  func.func @transform_2(%arg0: i32) -> (i32, i32) {
    %c0_i32 = arith.constant 0 : i32
    %c0_i32_0 = arith.constant 0 : i32
    %c0_i32_1 = arith.constant 0 : i32
    return %c0_i32, %c0_i32_0 : i32, i32
  }
  func.func @transform_3(%arg0: i32) -> (i32, i32) {
    %c0_i32 = arith.constant 0 : i32
    %c0_i32_0 = arith.constant 0 : i32
    return %arg0, %c0_i32 : i32, i32
  }
  func.func @transform_4(%arg0: i32) -> (i32, i32) {
    %c0_i32 = arith.constant 0 : i32
    %c0_i32_0 = arith.constant 0 : i32
    return %arg0, %c0_i32 : i32, i32
  }
}

module attributes {stable_mosaic.version = 11 : i64} {
  func.func @kernel(%arg0: i32, %arg1: memref<64x128xf32, #tpu.memory_space<vmem>>, %arg2: memref<128x32xf32, #tpu.memory_space<vmem>>, %arg3: memref<1x32xf32, #tpu.memory_space<vmem>>, %arg4: memref<64x32xf32, #tpu.memory_space<vmem>>, %arg5: memref<1x32xf32, #tpu.memory_space<vmem>>, %arg6: memref<1x32xf32, #tpu.memory_space<vmem>>, %arg7: memref<64x32xf32, #tpu.memory_space<vmem>>) attributes {dimension_semantics = [#tpu.dimension_semantics<parallel>], iteration_bounds = array<i64: 2>, scalar_prefetch = 0 : i64, scratch_operands = 0 : i64, tpu.core_type = #tpu.core_type<tc>, window_params = [{transform_indices = @transform_0, window_bounds = array<i64: 64, 128>}, {pipeline_mode = #tpu.pipeline_mode<synchronous>, transform_indices = @transform_1, window_bounds = array<i64: 128, 32>}, {pipeline_mode = #tpu.pipeline_mode<synchronous>, transform_indices = @transform_2, window_bounds = array<i64: 1, 32>}, {transform_indices = @transform_3, window_bounds = array<i64: 64, 32>}, {pipeline_mode = #tpu.pipeline_mode<synchronous>, transform_indices = @transform_4, window_bounds = array<i64: 1, 32>}, {pipeline_mode = #tpu.pipeline_mode<synchronous>, transform_indices = @transform_5, window_bounds = array<i64: 1, 32>}, {transform_indices = @transform_6, window_bounds = array<i64: 64, 32>}]} {
    %c0 = arith.constant 0 : index
    %c0_0 = arith.constant 0 : index
    %0 = vector.load %arg1[%c0, %c0_0] : memref<64x128xf32, #tpu.memory_space<vmem>>, vector<64x128xf32>
    %c0_1 = arith.constant 0 : index
    %c0_2 = arith.constant 0 : index
    %1 = vector.load %arg2[%c0_1, %c0_2] : memref<128x32xf32, #tpu.memory_space<vmem>>, vector<128x32xf32>
    %cst = arith.constant dense<0.000000e+00> : vector<64x32xf32>
    %2 = tpu.matmul %0, %1, %cst {dimension_numbers = #tpu.dot_dimension_numbers<[1], [0], [0], [1], [0, 0, 1, 1], [], []>} : vector<64x128xf32>, vector<128x32xf32>, vector<64x32xf32> -> vector<64x32xf32>
    %c0_3 = arith.constant 0 : index
    %c0_4 = arith.constant 0 : index
    %3 = vector.load %arg3[%c0_3, %c0_4] : memref<1x32xf32, #tpu.memory_space<vmem>>, vector<1x32xf32>
    %4 = vector.broadcast %3 : vector<1x32xf32> to vector<64x32xf32>
    %5 = arith.addf %2, %4 : vector<64x32xf32>
    %c0_5 = arith.constant 0 : index
    %c0_6 = arith.constant 0 : index
    %6 = vector.load %arg4[%c0_5, %c0_6] : memref<64x32xf32, #tpu.memory_space<vmem>>, vector<64x32xf32>
    %7 = arith.addf %5, %6 : vector<64x32xf32>
    %cst_7 = arith.constant dense<0.000000e+00> : vector<64xf32>
    %8 = vector.multi_reduction <add>, %7, %cst_7 [1] : vector<64x32xf32> to vector<64xf32>
    %9 = vector.shape_cast %8 : vector<64xf32> to vector<64x1xf32>
    %cst_8 = arith.constant 3.200000e+01 : f32
    %10 = vector.broadcast %cst_8 : f32 to vector<64x1xf32>
    %11 = arith.divf %9, %10 : vector<64x1xf32>
    %12 = vector.broadcast %11 : vector<64x1xf32> to vector<64x32xf32>
    %13 = arith.subf %7, %12 : vector<64x32xf32>
    %14 = arith.mulf %13, %13 : vector<64x32xf32>
    %cst_9 = arith.constant dense<0.000000e+00> : vector<64xf32>
    %15 = vector.multi_reduction <add>, %14, %cst_9 [1] : vector<64x32xf32> to vector<64xf32>
    %16 = vector.shape_cast %15 : vector<64xf32> to vector<64x1xf32>
    %cst_10 = arith.constant 3.200000e+01 : f32
    %17 = vector.broadcast %cst_10 : f32 to vector<64x1xf32>
    %18 = arith.divf %16, %17 : vector<64x1xf32>
    %cst_11 = arith.constant 9.99999974E-6 : f32
    %19 = vector.broadcast %cst_11 : f32 to vector<64x1xf32>
    %20 = arith.addf %18, %19 : vector<64x1xf32>
    %21 = math.rsqrt %20 : vector<64x1xf32>
    %22 = vector.broadcast %21 : vector<64x1xf32> to vector<64x32xf32>
    %23 = arith.mulf %13, %22 : vector<64x32xf32>
    %c0_12 = arith.constant 0 : index
    %c0_13 = arith.constant 0 : index
    %24 = vector.load %arg5[%c0_12, %c0_13] : memref<1x32xf32, #tpu.memory_space<vmem>>, vector<1x32xf32>
    %25 = vector.broadcast %24 : vector<1x32xf32> to vector<64x32xf32>
    %26 = arith.mulf %23, %25 : vector<64x32xf32>
    %c0_14 = arith.constant 0 : index
    %c0_15 = arith.constant 0 : index
    %27 = vector.load %arg6[%c0_14, %c0_15] : memref<1x32xf32, #tpu.memory_space<vmem>>, vector<1x32xf32>
    %28 = vector.broadcast %27 : vector<1x32xf32> to vector<64x32xf32>
    %29 = arith.addf %26, %28 : vector<64x32xf32>
    %c0_16 = arith.constant 0 : index
    %c0_17 = arith.constant 0 : index
    %30 = vector.load %arg7[%c0_16, %c0_17] : memref<64x32xf32, #tpu.memory_space<vmem>>, vector<64x32xf32>
    tpu.vector_store %arg7[%c0_16, %c0_17], %29 {strides = array<i32>} : memref<64x32xf32, #tpu.memory_space<vmem>>, vector<64x32xf32>,
    return
  }
  func.func @transform_0(%arg0: i32) -> (i32, i32) {
    %c0_i32 = arith.constant 0 : i32
    %c0_i32_0 = arith.constant 0 : i32
    return %arg0, %c0_i32 : i32, i32
  }
  func.func @transform_1(%arg0: i32) -> (i32, i32) {
    %c0_i32 = arith.constant 0 : i32
    %c0_i32_0 = arith.constant 0 : i32
    %c0_i32_1 = arith.constant 0 : i32
    return %c0_i32, %c0_i32_0 : i32, i32
  }
  func.func @transform_2(%arg0: i32) -> (i32, i32) {
    %c0_i32 = arith.constant 0 : i32
    %c0_i32_0 = arith.constant 0 : i32
    %c0_i32_1 = arith.constant 0 : i32
    return %c0_i32, %c0_i32_0 : i32, i32
  }
  func.func @transform_3(%arg0: i32) -> (i32, i32) {
    %c0_i32 = arith.constant 0 : i32
    %c0_i32_0 = arith.constant 0 : i32
    return %arg0, %c0_i32 : i32, i32
  }
  func.func @transform_4(%arg0: i32) -> (i32, i32) {
    %c0_i32 = arith.constant 0 : i32
    %c0_i32_0 = arith.constant 0 : i32
    %c0_i32_1 = arith.constant 0 : i32
    return %c0_i32, %c0_i32_0 : i32, i32
  }
  func.func @transform_5(%arg0: i32) -> (i32, i32) {
    %c0_i32 = arith.constant 0 : i32
    %c0_i32_0 = arith.constant 0 : i32
    %c0_i32_1 = arith.constant 0 : i32
    return %c0_i32, %c0_i32_0 : i32, i32
  }
  func.func @transform_6(%arg0: i32) -> (i32, i32) {
    %c0_i32 = arith.constant 0 : i32
    %c0_i32_0 = arith.constant 0 : i32
    return %arg0, %c0_i32 : i32, i32
  }
}

module attributes {stable_mosaic.version = 11 : i64} {
  func.func @kernel(%arg0: i32, %arg1: memref<64x32xf32, #tpu.memory_space<vmem>>, %arg2: memref<32x64xf32, #tpu.memory_space<vmem>>, %arg3: memref<1x64xf32, #tpu.memory_space<vmem>>, %arg4: memref<64x64xf32, #tpu.memory_space<vmem>>) attributes {dimension_semantics = [#tpu.dimension_semantics<parallel>], iteration_bounds = array<i64: 2>, scalar_prefetch = 0 : i64, scratch_operands = 0 : i64, tpu.core_type = #tpu.core_type<tc>, window_params = [{transform_indices = @transform_0, window_bounds = array<i64: 64, 32>}, {pipeline_mode = #tpu.pipeline_mode<synchronous>, transform_indices = @transform_1, window_bounds = array<i64: 32, 64>}, {pipeline_mode = #tpu.pipeline_mode<synchronous>, transform_indices = @transform_2, window_bounds = array<i64: 1, 64>}, {transform_indices = @transform_3, window_bounds = array<i64: 64, 64>}]} {
    %c0 = arith.constant 0 : index
    %c0_0 = arith.constant 0 : index
    %0 = vector.load %arg1[%c0, %c0_0] : memref<64x32xf32, #tpu.memory_space<vmem>>, vector<64x32xf32>
    %c0_1 = arith.constant 0 : index
    %c0_2 = arith.constant 0 : index
    %1 = vector.load %arg2[%c0_1, %c0_2] : memref<32x64xf32, #tpu.memory_space<vmem>>, vector<32x64xf32>
    %cst = arith.constant dense<0.000000e+00> : vector<64x64xf32>
    %2 = tpu.matmul %0, %1, %cst {dimension_numbers = #tpu.dot_dimension_numbers<[1], [0], [0], [1], [0, 0, 1, 1], [], []>} : vector<64x32xf32>, vector<32x64xf32>, vector<64x64xf32> -> vector<64x64xf32>
    %c0_3 = arith.constant 0 : index
    %c0_4 = arith.constant 0 : index
    %3 = vector.load %arg3[%c0_3, %c0_4] : memref<1x64xf32, #tpu.memory_space<vmem>>, vector<1x64xf32>
    %4 = vector.broadcast %3 : vector<1x64xf32> to vector<64x64xf32>
    %5 = arith.addf %2, %4 : vector<64x64xf32>
    %c0_5 = arith.constant 0 : index
    %c0_6 = arith.constant 0 : index
    %6 = vector.load %arg4[%c0_5, %c0_6] : memref<64x64xf32, #tpu.memory_space<vmem>>, vector<64x64xf32>
    tpu.vector_store %arg4[%c0_5, %c0_6], %5 {strides = array<i32>} : memref<64x64xf32, #tpu.memory_space<vmem>>, vector<64x64xf32>,
    return
  }
  func.func @transform_0(%arg0: i32) -> (i32, i32) {
    %c0_i32 = arith.constant 0 : i32
    %c0_i32_0 = arith.constant 0 : i32
    return %arg0, %c0_i32 : i32, i32
  }
  func.func @transform_1(%arg0: i32) -> (i32, i32) {
    %c0_i32 = arith.constant 0 : i32
    %c0_i32_0 = arith.constant 0 : i32
    %c0_i32_1 = arith.constant 0 : i32
    return %c0_i32, %c0_i32_0 : i32, i32
  }
  func.func @transform_2(%arg0: i32) -> (i32, i32) {
    %c0_i32 = arith.constant 0 : i32
    %c0_i32_0 = arith.constant 0 : i32
    %c0_i32_1 = arith.constant 0 : i32
    return %c0_i32, %c0_i32_0 : i32, i32
  }
  func.func @transform_3(%arg0: i32) -> (i32, i32) {
    %c0_i32 = arith.constant 0 : i32
    %c0_i32_0 = arith.constant 0 : i32
    return %arg0, %c0_i32 : i32, i32
  }
}

module attributes {stable_mosaic.version = 11 : i64} {
  func.func @kernel(%arg0: i32, %arg1: memref<64x32xf32, #tpu.memory_space<vmem>>, %arg2: memref<32x96xf32, #tpu.memory_space<vmem>>, %arg3: memref<1x96xf32, #tpu.memory_space<vmem>>, %arg4: memref<64x96xf32, #tpu.memory_space<vmem>>) attributes {dimension_semantics = [#tpu.dimension_semantics<parallel>], iteration_bounds = array<i64: 2>, scalar_prefetch = 0 : i64, scratch_operands = 0 : i64, tpu.core_type = #tpu.core_type<tc>, window_params = [{transform_indices = @transform_0, window_bounds = array<i64: 64, 32>}, {pipeline_mode = #tpu.pipeline_mode<synchronous>, transform_indices = @transform_1, window_bounds = array<i64: 32, 96>}, {pipeline_mode = #tpu.pipeline_mode<synchronous>, transform_indices = @transform_2, window_bounds = array<i64: 1, 96>}, {transform_indices = @transform_3, window_bounds = array<i64: 64, 96>}]} {
    %c0 = arith.constant 0 : index
    %c0_0 = arith.constant 0 : index
    %0 = vector.load %arg1[%c0, %c0_0] : memref<64x32xf32, #tpu.memory_space<vmem>>, vector<64x32xf32>
    %c0_1 = arith.constant 0 : index
    %c0_2 = arith.constant 0 : index
    %1 = vector.load %arg2[%c0_1, %c0_2] : memref<32x96xf32, #tpu.memory_space<vmem>>, vector<32x96xf32>
    %cst = arith.constant dense<0.000000e+00> : vector<64x96xf32>
    %2 = tpu.matmul %0, %1, %cst {dimension_numbers = #tpu.dot_dimension_numbers<[1], [0], [0], [1], [0, 0, 1, 1], [], []>} : vector<64x32xf32>, vector<32x96xf32>, vector<64x96xf32> -> vector<64x96xf32>
    %c0_3 = arith.constant 0 : index
    %c0_4 = arith.constant 0 : index
    %3 = vector.load %arg3[%c0_3, %c0_4] : memref<1x96xf32, #tpu.memory_space<vmem>>, vector<1x96xf32>
    %4 = vector.broadcast %3 : vector<1x96xf32> to vector<64x96xf32>
    %5 = arith.addf %2, %4 : vector<64x96xf32>
    %c0_5 = arith.constant 0 : index
    %c0_6 = arith.constant 0 : index
    %6 = vector.load %arg4[%c0_5, %c0_6] : memref<64x96xf32, #tpu.memory_space<vmem>>, vector<64x96xf32>
    tpu.vector_store %arg4[%c0_5, %c0_6], %5 {strides = array<i32>} : memref<64x96xf32, #tpu.memory_space<vmem>>, vector<64x96xf32>,
    return
  }
  func.func @transform_0(%arg0: i32) -> (i32, i32) {
    %c0_i32 = arith.constant 0 : i32
    %c0_i32_0 = arith.constant 0 : i32
    return %arg0, %c0_i32 : i32, i32
  }
  func.func @transform_1(%arg0: i32) -> (i32, i32) {
    %c0_i32 = arith.constant 0 : i32
    %c0_i32_0 = arith.constant 0 : i32
    %c0_i32_1 = arith.constant 0 : i32
    return %c0_i32, %c0_i32_0 : i32, i32
  }
  func.func @transform_2(%arg0: i32) -> (i32, i32) {
    %c0_i32 = arith.constant 0 : i32
    %c0_i32_0 = arith.constant 0 : i32
    %c0_i32_1 = arith.constant 0 : i32
    return %c0_i32, %c0_i32_0 : i32, i32
  }
  func.func @transform_3(%arg0: i32) -> (i32, i32) {
    %c0_i32 = arith.constant 0 : i32
    %c0_i32_0 = arith.constant 0 : i32
    return %arg0, %c0_i32 : i32, i32
  }
}

module attributes {stable_mosaic.version = 11 : i64} {
  func.func @kernel(%arg0: i32, %arg1: memref<1x8x64x4xf32, #tpu.memory_space<vmem>>, %arg2: memref<1x8x64x4xf32, #tpu.memory_space<vmem>>, %arg3: memref<1x8x64x4xf32, #tpu.memory_space<vmem>>, %arg4: memref<1x8x64x4xf32, #tpu.memory_space<vmem>>) attributes {dimension_semantics = [#tpu.dimension_semantics<parallel>], iteration_bounds = array<i64: 2>, scalar_prefetch = 0 : i64, scratch_operands = 0 : i64, tpu.core_type = #tpu.core_type<tc>, window_params = [{transform_indices = @transform_0, window_bounds = array<i64: 1, 8, 64, 4>}, {transform_indices = @transform_1, window_bounds = array<i64: 1, 8, 64, 4>}, {transform_indices = @transform_2, window_bounds = array<i64: 1, 8, 64, 4>}, {transform_indices = @transform_3, window_bounds = array<i64: 1, 8, 64, 4>}]} {
    %c0 = arith.constant 0 : index
    %c0_0 = arith.constant 0 : index
    %c0_1 = arith.constant 0 : index
    %c0_2 = arith.constant 0 : index
    %0 = vector.load %arg1[%c0, %c0_0, %c0_1, %c0_2] : memref<1x8x64x4xf32, #tpu.memory_space<vmem>>, vector<1x8x64x4xf32>
    %1 = vector.shape_cast %0 : vector<1x8x64x4xf32> to vector<8x64x4xf32>
    %c0_3 = arith.constant 0 : index
    %c0_4 = arith.constant 0 : index
    %c0_5 = arith.constant 0 : index
    %c0_6 = arith.constant 0 : index
    %2 = vector.load %arg2[%c0_3, %c0_4, %c0_5, %c0_6] : memref<1x8x64x4xf32, #tpu.memory_space<vmem>>, vector<1x8x64x4xf32>
    %3 = vector.shape_cast %2 : vector<1x8x64x4xf32> to vector<8x64x4xf32>
    %c0_7 = arith.constant 0 : index
    %c0_8 = arith.constant 0 : index
    %c0_9 = arith.constant 0 : index
    %c0_10 = arith.constant 0 : index
    %4 = vector.load %arg3[%c0_7, %c0_8, %c0_9, %c0_10] : memref<1x8x64x4xf32, #tpu.memory_space<vmem>>, vector<1x8x64x4xf32>
    %5 = vector.shape_cast %4 : vector<1x8x64x4xf32> to vector<8x64x4xf32>
    "tpu.trace_start"() <{level = 10 : i32, message = "hqd,hkd->hqk"}> : () -> ()
    %cst = arith.constant dense<0.000000e+00> : vector<8x64x64xf32>
    %6 = tpu.matmul %1, %3, %cst {dimension_numbers = #tpu.dot_dimension_numbers<[2], [2], [1], [1], [0, 0, 0, 1, 1, 1], [0], [0]>} : vector<8x64x4xf32>, vector<8x64x4xf32>, vector<8x64x64xf32> -> vector<8x64x64xf32>
    "tpu.trace_stop"() : () -> ()
    %cst_11 = arith.constant 5.000000e-01 : f32
    %7 = vector.broadcast %cst_11 : f32 to vector<8x64x64xf32>
    %8 = arith.mulf %6, %7 : vector<8x64x64xf32>
    %cst_12 = arith.constant dense<0xFF800000> : vector<8x64xf32>
    %9 = vector.multi_reduction <maximumf>, %8, %cst_12 [2] : vector<8x64x64xf32> to vector<8x64xf32>
    %10 = vector.shape_cast %9 : vector<8x64xf32> to vector<8x64x1xf32>
    %11 = vector.broadcast %10 : vector<8x64x1xf32> to vector<8x64x64xf32>
    %12 = arith.subf %8, %11 : vector<8x64x64xf32>
    %13 = math.exp %12 : vector<8x64x64xf32>
    %cst_13 = arith.constant dense<0.000000e+00> : vector<8x64xf32>
    %14 = vector.multi_reduction <add>, %13, %cst_13 [2] : vector<8x64x64xf32> to vector<8x64xf32>
    %15 = vector.shape_cast %14 : vector<8x64xf32> to vector<8x64x1xf32>
    %16 = tpu.reciprocal %15 {approx = true} : vector<8x64x1xf32> -> vector<8x64x1xf32>
    %17 = vector.broadcast %16 : vector<8x64x1xf32> to vector<8x64x64xf32>
    %18 = arith.mulf %13, %17 : vector<8x64x64xf32>
    "tpu.trace_start"() <{level = 10 : i32, message = "hqk,hkd->hqd"}> : () -> ()
    %cst_14 = arith.constant dense<0.000000e+00> : vector<8x64x4xf32>
    %19 = tpu.matmul %18, %5, %cst_14 {dimension_numbers = #tpu.dot_dimension_numbers<[2], [1], [1], [2], [0, 0, 0, 1, 1, 2], [0], [0]>} : vector<8x64x64xf32>, vector<8x64x4xf32>, vector<8x64x4xf32> -> vector<8x64x4xf32>
    "tpu.trace_stop"() : () -> ()
    %20 = vector.shape_cast %19 : vector<8x64x4xf32> to vector<1x8x64x4xf32>
    %c0_15 = arith.constant 0 : index
    %c0_16 = arith.constant 0 : index
    %c0_17 = arith.constant 0 : index
    %c0_18 = arith.constant 0 : index
    %21 = vector.load %arg4[%c0_15, %c0_16, %c0_17, %c0_18] : memref<1x8x64x4xf32, #tpu.memory_space<vmem>>, vector<1x8x64x4xf32>
    tpu.vector_store %arg4[%c0_15, %c0_16, %c0_17, %c0_18], %20 {strides = array<i32>} : memref<1x8x64x4xf32, #tpu.memory_space<vmem>>, vector<1x8x64x4xf32>,
    return
  }
  func.func @transform_0(%arg0: i32) -> (i32, i32, i32, i32) {
    %c0_i32 = arith.constant 0 : i32
    %c0_i32_0 = arith.constant 0 : i32
    %c0_i32_1 = arith.constant 0 : i32
    %c0_i32_2 = arith.constant 0 : i32
    return %arg0, %c0_i32, %c0_i32_0, %c0_i32_1 : i32, i32, i32, i32
  }
  func.func @transform_1(%arg0: i32) -> (i32, i32, i32, i32) {
    %c0_i32 = arith.constant 0 : i32
    %c0_i32_0 = arith.constant 0 : i32
    %c0_i32_1 = arith.constant 0 : i32
    %c0_i32_2 = arith.constant 0 : i32
    return %arg0, %c0_i32, %c0_i32_0, %c0_i32_1 : i32, i32, i32, i32
  }
  func.func @transform_2(%arg0: i32) -> (i32, i32, i32, i32) {
    %c0_i32 = arith.constant 0 : i32
    %c0_i32_0 = arith.constant 0 : i32
    %c0_i32_1 = arith.constant 0 : i32
    %c0_i32_2 = arith.constant 0 : i32
    return %arg0, %c0_i32, %c0_i32_0, %c0_i32_1 : i32, i32, i32, i32
  }
  func.func @transform_3(%arg0: i32) -> (i32, i32, i32, i32) {
    %c0_i32 = arith.constant 0 : i32
    %c0_i32_0 = arith.constant 0 : i32
    %c0_i32_1 = arith.constant 0 : i32
    %c0_i32_2 = arith.constant 0 : i32
    return %arg0, %c0_i32, %c0_i32_0, %c0_i32_1 : i32, i32, i32, i32
  }
}

module attributes {stable_mosaic.version = 11 : i64} {
  func.func @kernel(%arg0: i32, %arg1: memref<64x32xf32, #tpu.memory_space<vmem>>, %arg2: memref<32x32xf32, #tpu.memory_space<vmem>>, %arg3: memref<1x32xf32, #tpu.memory_space<vmem>>, %arg4: memref<64x32xf32, #tpu.memory_space<vmem>>, %arg5: memref<1x32xf32, #tpu.memory_space<vmem>>, %arg6: memref<1x32xf32, #tpu.memory_space<vmem>>, %arg7: memref<64x32xf32, #tpu.memory_space<vmem>>) attributes {dimension_semantics = [#tpu.dimension_semantics<parallel>], iteration_bounds = array<i64: 2>, scalar_prefetch = 0 : i64, scratch_operands = 0 : i64, tpu.core_type = #tpu.core_type<tc>, window_params = [{transform_indices = @transform_0, window_bounds = array<i64: 64, 32>}, {pipeline_mode = #tpu.pipeline_mode<synchronous>, transform_indices = @transform_1, window_bounds = array<i64: 32, 32>}, {pipeline_mode = #tpu.pipeline_mode<synchronous>, transform_indices = @transform_2, window_bounds = array<i64: 1, 32>}, {transform_indices = @transform_3, window_bounds = array<i64: 64, 32>}, {pipeline_mode = #tpu.pipeline_mode<synchronous>, transform_indices = @transform_4, window_bounds = array<i64: 1, 32>}, {pipeline_mode = #tpu.pipeline_mode<synchronous>, transform_indices = @transform_5, window_bounds = array<i64: 1, 32>}, {transform_indices = @transform_6, window_bounds = array<i64: 64, 32>}]} {
    %c0 = arith.constant 0 : index
    %c0_0 = arith.constant 0 : index
    %0 = vector.load %arg1[%c0, %c0_0] : memref<64x32xf32, #tpu.memory_space<vmem>>, vector<64x32xf32>
    %c0_1 = arith.constant 0 : index
    %c0_2 = arith.constant 0 : index
    %1 = vector.load %arg2[%c0_1, %c0_2] : memref<32x32xf32, #tpu.memory_space<vmem>>, vector<32x32xf32>
    %cst = arith.constant dense<0.000000e+00> : vector<64x32xf32>
    %2 = tpu.matmul %0, %1, %cst {dimension_numbers = #tpu.dot_dimension_numbers<[1], [0], [0], [1], [0, 0, 1, 1], [], []>} : vector<64x32xf32>, vector<32x32xf32>, vector<64x32xf32> -> vector<64x32xf32>
    %c0_3 = arith.constant 0 : index
    %c0_4 = arith.constant 0 : index
    %3 = vector.load %arg3[%c0_3, %c0_4] : memref<1x32xf32, #tpu.memory_space<vmem>>, vector<1x32xf32>
    %4 = vector.broadcast %3 : vector<1x32xf32> to vector<64x32xf32>
    %5 = arith.addf %2, %4 : vector<64x32xf32>
    %c0_5 = arith.constant 0 : index
    %c0_6 = arith.constant 0 : index
    %6 = vector.load %arg4[%c0_5, %c0_6] : memref<64x32xf32, #tpu.memory_space<vmem>>, vector<64x32xf32>
    %7 = arith.addf %5, %6 : vector<64x32xf32>
    %cst_7 = arith.constant dense<0.000000e+00> : vector<64xf32>
    %8 = vector.multi_reduction <add>, %7, %cst_7 [1] : vector<64x32xf32> to vector<64xf32>
    %9 = vector.shape_cast %8 : vector<64xf32> to vector<64x1xf32>
    %cst_8 = arith.constant 3.200000e+01 : f32
    %10 = vector.broadcast %cst_8 : f32 to vector<64x1xf32>
    %11 = arith.divf %9, %10 : vector<64x1xf32>
    %12 = vector.broadcast %11 : vector<64x1xf32> to vector<64x32xf32>
    %13 = arith.subf %7, %12 : vector<64x32xf32>
    %14 = arith.mulf %13, %13 : vector<64x32xf32>
    %cst_9 = arith.constant dense<0.000000e+00> : vector<64xf32>
    %15 = vector.multi_reduction <add>, %14, %cst_9 [1] : vector<64x32xf32> to vector<64xf32>
    %16 = vector.shape_cast %15 : vector<64xf32> to vector<64x1xf32>
    %cst_10 = arith.constant 3.200000e+01 : f32
    %17 = vector.broadcast %cst_10 : f32 to vector<64x1xf32>
    %18 = arith.divf %16, %17 : vector<64x1xf32>
    %cst_11 = arith.constant 9.99999974E-6 : f32
    %19 = vector.broadcast %cst_11 : f32 to vector<64x1xf32>
    %20 = arith.addf %18, %19 : vector<64x1xf32>
    %21 = math.rsqrt %20 : vector<64x1xf32>
    %22 = vector.broadcast %21 : vector<64x1xf32> to vector<64x32xf32>
    %23 = arith.mulf %13, %22 : vector<64x32xf32>
    %c0_12 = arith.constant 0 : index
    %c0_13 = arith.constant 0 : index
    %24 = vector.load %arg5[%c0_12, %c0_13] : memref<1x32xf32, #tpu.memory_space<vmem>>, vector<1x32xf32>
    %25 = vector.broadcast %24 : vector<1x32xf32> to vector<64x32xf32>
    %26 = arith.mulf %23, %25 : vector<64x32xf32>
    %c0_14 = arith.constant 0 : index
    %c0_15 = arith.constant 0 : index
    %27 = vector.load %arg6[%c0_14, %c0_15] : memref<1x32xf32, #tpu.memory_space<vmem>>, vector<1x32xf32>
    %28 = vector.broadcast %27 : vector<1x32xf32> to vector<64x32xf32>
    %29 = arith.addf %26, %28 : vector<64x32xf32>
    %c0_16 = arith.constant 0 : index
    %c0_17 = arith.constant 0 : index
    %30 = vector.load %arg7[%c0_16, %c0_17] : memref<64x32xf32, #tpu.memory_space<vmem>>, vector<64x32xf32>
    tpu.vector_store %arg7[%c0_16, %c0_17], %29 {strides = array<i32>} : memref<64x32xf32, #tpu.memory_space<vmem>>, vector<64x32xf32>,
    return
  }
  func.func @transform_0(%arg0: i32) -> (i32, i32) {
    %c0_i32 = arith.constant 0 : i32
    %c0_i32_0 = arith.constant 0 : i32
    return %arg0, %c0_i32 : i32, i32
  }
  func.func @transform_1(%arg0: i32) -> (i32, i32) {
    %c0_i32 = arith.constant 0 : i32
    %c0_i32_0 = arith.constant 0 : i32
    %c0_i32_1 = arith.constant 0 : i32
    return %c0_i32, %c0_i32_0 : i32, i32
  }
  func.func @transform_2(%arg0: i32) -> (i32, i32) {
    %c0_i32 = arith.constant 0 : i32
    %c0_i32_0 = arith.constant 0 : i32
    %c0_i32_1 = arith.constant 0 : i32
    return %c0_i32, %c0_i32_0 : i32, i32
  }
  func.func @transform_3(%arg0: i32) -> (i32, i32) {
    %c0_i32 = arith.constant 0 : i32
    %c0_i32_0 = arith.constant 0 : i32
    return %arg0, %c0_i32 : i32, i32
  }
  func.func @transform_4(%arg0: i32) -> (i32, i32) {
    %c0_i32 = arith.constant 0 : i32
    %c0_i32_0 = arith.constant 0 : i32
    %c0_i32_1 = arith.constant 0 : i32
    return %c0_i32, %c0_i32_0 : i32, i32
  }
  func.func @transform_5(%arg0: i32) -> (i32, i32) {
    %c0_i32 = arith.constant 0 : i32
    %c0_i32_0 = arith.constant 0 : i32
    %c0_i32_1 = arith.constant 0 : i32
    return %c0_i32, %c0_i32_0 : i32, i32
  }
  func.func @transform_6(%arg0: i32) -> (i32, i32) {
    %c0_i32 = arith.constant 0 : i32
    %c0_i32_0 = arith.constant 0 : i32
    return %arg0, %c0_i32 : i32, i32
  }
}

module attributes {stable_mosaic.version = 11 : i64} {
  func.func @kernel(%arg0: i32, %arg1: memref<64x32xf32, #tpu.memory_space<vmem>>, %arg2: memref<32x128xf32, #tpu.memory_space<vmem>>, %arg3: memref<1x128xf32, #tpu.memory_space<vmem>>, %arg4: memref<64x128xf32, #tpu.memory_space<vmem>>) attributes {dimension_semantics = [#tpu.dimension_semantics<parallel>], iteration_bounds = array<i64: 2>, scalar_prefetch = 0 : i64, scratch_operands = 0 : i64, tpu.core_type = #tpu.core_type<tc>, window_params = [{transform_indices = @transform_0, window_bounds = array<i64: 64, 32>}, {pipeline_mode = #tpu.pipeline_mode<synchronous>, transform_indices = @transform_1, window_bounds = array<i64: 32, 128>}, {pipeline_mode = #tpu.pipeline_mode<synchronous>, transform_indices = @transform_2, window_bounds = array<i64: 1, 128>}, {transform_indices = @transform_3, window_bounds = array<i64: 64, 128>}]} {
    %c0 = arith.constant 0 : index
    %c0_0 = arith.constant 0 : index
    %0 = vector.load %arg1[%c0, %c0_0] : memref<64x32xf32, #tpu.memory_space<vmem>>, vector<64x32xf32>
    %c0_1 = arith.constant 0 : index
    %c0_2 = arith.constant 0 : index
    %1 = vector.load %arg2[%c0_1, %c0_2] : memref<32x128xf32, #tpu.memory_space<vmem>>, vector<32x128xf32>
    %cst = arith.constant dense<0.000000e+00> : vector<64x128xf32>
    %2 = tpu.matmul %0, %1, %cst {dimension_numbers = #tpu.dot_dimension_numbers<[1], [0], [0], [1], [0, 0, 1, 1], [], []>} : vector<64x32xf32>, vector<32x128xf32>, vector<64x128xf32> -> vector<64x128xf32>
    %c0_3 = arith.constant 0 : index
    %c0_4 = arith.constant 0 : index
    %3 = vector.load %arg3[%c0_3, %c0_4] : memref<1x128xf32, #tpu.memory_space<vmem>>, vector<1x128xf32>
    %4 = vector.broadcast %3 : vector<1x128xf32> to vector<64x128xf32>
    %5 = arith.addf %2, %4 : vector<64x128xf32>
    %cst_5 = arith.constant 5.000000e-01 : f32
    %6 = vector.broadcast %cst_5 : f32 to vector<64x128xf32>
    %7 = arith.mulf %6, %5 : vector<64x128xf32>
    %cst_6 = arith.constant 0.707106769 : f32
    %8 = vector.broadcast %cst_6 : f32 to vector<64x128xf32>
    %9 = arith.mulf %5, %8 : vector<64x128xf32>
    %10 = math.erf %9 : vector<64x128xf32>
    %cst_7 = arith.constant 1.000000e+00 : f32
    %11 = vector.broadcast %cst_7 : f32 to vector<64x128xf32>
    %12 = arith.addf %11, %10 : vector<64x128xf32>
    %13 = arith.mulf %7, %12 : vector<64x128xf32>
    %c0_8 = arith.constant 0 : index
    %c0_9 = arith.constant 0 : index
    %14 = vector.load %arg4[%c0_8, %c0_9] : memref<64x128xf32, #tpu.memory_space<vmem>>, vector<64x128xf32>
    tpu.vector_store %arg4[%c0_8, %c0_9], %13 {strides = array<i32>} : memref<64x128xf32, #tpu.memory_space<vmem>>, vector<64x128xf32>,
    return
  }
  func.func @transform_0(%arg0: i32) -> (i32, i32) {
    %c0_i32 = arith.constant 0 : i32
    %c0_i32_0 = arith.constant 0 : i32
    return %arg0, %c0_i32 : i32, i32
  }
  func.func @transform_1(%arg0: i32) -> (i32, i32) {
    %c0_i32 = arith.constant 0 : i32
    %c0_i32_0 = arith.constant 0 : i32
    %c0_i32_1 = arith.constant 0 : i32
    return %c0_i32, %c0_i32_0 : i32, i32
  }
  func.func @transform_2(%arg0: i32) -> (i32, i32) {
    %c0_i32 = arith.constant 0 : i32
    %c0_i32_0 = arith.constant 0 : i32
    %c0_i32_1 = arith.constant 0 : i32
    return %c0_i32, %c0_i32_0 : i32, i32
  }
  func.func @transform_3(%arg0: i32) -> (i32, i32) {
    %c0_i32 = arith.constant 0 : i32
    %c0_i32_0 = arith.constant 0 : i32
    return %arg0, %c0_i32 : i32, i32
  }
}

module attributes {stable_mosaic.version = 11 : i64} {
  func.func @kernel(%arg0: i32, %arg1: memref<1x16x2x32xf32, #tpu.memory_space<vmem>>, %arg2: memref<4xf32, #tpu.memory_space<smem>>, %arg3: memref<32x128xf32, #tpu.memory_space<vmem>>, %arg4: memref<1x128xf32, #tpu.memory_space<vmem>>, %arg5: memref<1x128xf32, #tpu.memory_space<vmem>>, %arg6: memref<16x8xf32, #tpu.memory_space<vmem>>, %arg7: memref<1x8xf32, #tpu.memory_space<vmem>>, %arg8: memref<1x1x8xf32, #tpu.memory_space<vmem>>) attributes {dimension_semantics = [#tpu.dimension_semantics<parallel>], iteration_bounds = array<i64: 4>, scalar_prefetch = 0 : i64, scratch_operands = 0 : i64, tpu.core_type = #tpu.core_type<tc>, window_params = [{transform_indices = @transform_0, window_bounds = array<i64: 1, 16, 2, 32>}, {transform_indices = @transform_1, window_bounds = array<i64: 4>}, {pipeline_mode = #tpu.pipeline_mode<synchronous>, transform_indices = @transform_2, window_bounds = array<i64: 32, 128>}, {pipeline_mode = #tpu.pipeline_mode<synchronous>, transform_indices = @transform_3, window_bounds = array<i64: 1, 128>}, {pipeline_mode = #tpu.pipeline_mode<synchronous>, transform_indices = @transform_4, window_bounds = array<i64: 1, 128>}, {pipeline_mode = #tpu.pipeline_mode<synchronous>, transform_indices = @transform_5, window_bounds = array<i64: 16, 8>}, {pipeline_mode = #tpu.pipeline_mode<synchronous>, transform_indices = @transform_6, window_bounds = array<i64: 1, 8>}, {transform_indices = @transform_7, window_bounds = array<i64: 1, 1, 8>}]} {
    %c0 = arith.constant 0 : index
    %c0_0 = arith.constant 0 : index
    %c0_1 = arith.constant 0 : index
    %c0_2 = arith.constant 0 : index
    %0 = vector.load %arg1[%c0, %c0_0, %c0_1, %c0_2] : memref<1x16x2x32xf32, #tpu.memory_space<vmem>>, vector<1x16x2x32xf32>
    %1 = vector.shape_cast %0 : vector<1x16x2x32xf32> to vector<16x2x32xf32>
    %2 = vector.extract_strided_slice %1 {offsets = [0, 0, 0], sizes = [16, 1, 32], strides = [1, 1, 1]} : vector<16x2x32xf32> to vector<16x1x32xf32>
    %3 = vector.shape_cast %2 : vector<16x1x32xf32> to vector<16x32xf32>
    %c0_3 = arith.constant 0 : index
    %4 = memref.load %arg2[%c0_3] : memref<4xf32, #tpu.memory_space<smem>>
    %5 = vector.broadcast %4 : f32 to vector<16x32xf32>
    %6 = arith.mulf %3, %5 : vector<16x32xf32>
    %7 = vector.extract_strided_slice %1 {offsets = [0, 1, 0], sizes = [16, 1, 32], strides = [1, 1, 1]} : vector<16x2x32xf32> to vector<16x1x32xf32>
    %8 = vector.shape_cast %7 : vector<16x1x32xf32> to vector<16x32xf32>
    %c1 = arith.constant 1 : index
    %9 = memref.load %arg2[%c1] : memref<4xf32, #tpu.memory_space<smem>>
    %10 = vector.broadcast %9 : f32 to vector<16x32xf32>
    %11 = arith.mulf %8, %10 : vector<16x32xf32>
    %12 = arith.addf %6, %11 : vector<16x32xf32>
    %c2 = arith.constant 2 : index
    %13 = memref.load %arg2[%c2] : memref<4xf32, #tpu.memory_space<smem>>
    %14 = vector.broadcast %13 : f32 to vector<16x32xf32>
    %15 = arith.addf %12, %14 : vector<16x32xf32>
    %c0_4 = arith.constant 0 : index
    %c0_5 = arith.constant 0 : index
    %16 = vector.load %arg3[%c0_4, %c0_5] : memref<32x128xf32, #tpu.memory_space<vmem>>, vector<32x128xf32>
    %cst = arith.constant dense<0.000000e+00> : vector<16x128xf32>
    %17 = tpu.matmul %15, %16, %cst {dimension_numbers = #tpu.dot_dimension_numbers<[1], [0], [0], [1], [0, 0, 1, 1], [], []>} : vector<16x32xf32>, vector<32x128xf32>, vector<16x128xf32> -> vector<16x128xf32>
    %c0_6 = arith.constant 0 : index
    %c0_7 = arith.constant 0 : index
    %18 = vector.load %arg4[%c0_6, %c0_7] : memref<1x128xf32, #tpu.memory_space<vmem>>, vector<1x128xf32>
    %19 = vector.broadcast %18 : vector<1x128xf32> to vector<16x128xf32>
    %20 = arith.addf %17, %19 : vector<16x128xf32>
    %cst_8 = arith.constant 0.000000e+00 : f32
    %21 = vector.broadcast %cst_8 : f32 to vector<16x128xf32>
    %22 = arith.maximumf %20, %21 : vector<16x128xf32>
    %c0_9 = arith.constant 0 : index
    %c0_10 = arith.constant 0 : index
    %23 = vector.load %arg5[%c0_9, %c0_10] : memref<1x128xf32, #tpu.memory_space<vmem>>, vector<1x128xf32>
    %24 = vector.broadcast %23 : vector<1x128xf32> to vector<16x128xf32>
    %25 = arith.mulf %22, %24 : vector<16x128xf32>
    %cst_11 = arith.constant dense<0.000000e+00> : vector<16xf32>
    %26 = vector.multi_reduction <add>, %25, %cst_11 [1] : vector<16x128xf32> to vector<16xf32>
    %27 = vector.shape_cast %26 : vector<16xf32> to vector<16x1xf32>
    %c3 = arith.constant 3 : index
    %28 = memref.load %arg2[%c3] : memref<4xf32, #tpu.memory_space<smem>>
    %29 = vector.broadcast %28 : f32 to vector<16x1xf32>
    %30 = arith.addf %27, %29 : vector<16x1xf32>
    %c0_12 = arith.constant 0 : index
    %c0_13 = arith.constant 0 : index
    %31 = vector.load %arg6[%c0_12, %c0_13] : memref<16x8xf32, #tpu.memory_space<vmem>>, vector<16x8xf32>
    %32 = vector.broadcast %30 : vector<16x1xf32> to vector<16x8xf32>
    %33 = arith.mulf %32, %31 : vector<16x8xf32>
    %cst_14 = arith.constant dense<0.000000e+00> : vector<8xf32>
    %34 = vector.multi_reduction <add>, %33, %cst_14 [0] : vector<16x8xf32> to vector<8xf32>
    %35 = vector.shape_cast %34 : vector<8xf32> to vector<1x8xf32>
    %c0_15 = arith.constant 0 : index
    %c0_16 = arith.constant 0 : index
    %36 = vector.load %arg7[%c0_15, %c0_16] : memref<1x8xf32, #tpu.memory_space<vmem>>, vector<1x8xf32>
    %37 = arith.addf %35, %36 : vector<1x8xf32>
    %38 = vector.shape_cast %37 : vector<1x8xf32> to vector<1x1x8xf32>
    %c0_17 = arith.constant 0 : index
    %c0_18 = arith.constant 0 : index
    %c0_19 = arith.constant 0 : index
    %39 = vector.load %arg8[%c0_17, %c0_18, %c0_19] : memref<1x1x8xf32, #tpu.memory_space<vmem>>, vector<1x1x8xf32>
    tpu.vector_store %arg8[%c0_17, %c0_18, %c0_19], %38 {strides = array<i32>} : memref<1x1x8xf32, #tpu.memory_space<vmem>>, vector<1x1x8xf32>,
    return
  }
  func.func @transform_0(%arg0: i32) -> (i32, i32, i32, i32) {
    %c0_i32 = arith.constant 0 : i32
    %c0_i32_0 = arith.constant 0 : i32
    %c0_i32_1 = arith.constant 0 : i32
    %c0_i32_2 = arith.constant 0 : i32
    return %arg0, %c0_i32, %c0_i32_0, %c0_i32_1 : i32, i32, i32, i32
  }
  func.func @transform_1(%arg0: i32) -> i32 {
    %c0_i32 = arith.constant 0 : i32
    %c0_i32_0 = arith.constant 0 : i32
    return %c0_i32 : i32
  }
  func.func @transform_2(%arg0: i32) -> (i32, i32) {
    %c0_i32 = arith.constant 0 : i32
    %c0_i32_0 = arith.constant 0 : i32
    %c0_i32_1 = arith.constant 0 : i32
    return %c0_i32, %c0_i32_0 : i32, i32
  }
  func.func @transform_3(%arg0: i32) -> (i32, i32) {
    %c0_i32 = arith.constant 0 : i32
    %c0_i32_0 = arith.constant 0 : i32
    %c0_i32_1 = arith.constant 0 : i32
    return %c0_i32, %c0_i32_0 : i32, i32
  }
  func.func @transform_4(%arg0: i32) -> (i32, i32) {
    %c0_i32 = arith.constant 0 : i32
    %c0_i32_0 = arith.constant 0 : i32
    %c0_i32_1 = arith.constant 0 : i32
    return %c0_i32, %c0_i32_0 : i32, i32
  }
  func.func @transform_5(%arg0: i32) -> (i32, i32) {
    %c0_i32 = arith.constant 0 : i32
    %c0_i32_0 = arith.constant 0 : i32
    %c0_i32_1 = arith.constant 0 : i32
    return %c0_i32, %c0_i32_0 : i32, i32
  }
  func.func @transform_6(%arg0: i32) -> (i32, i32) {
    %c0_i32 = arith.constant 0 : i32
    %c0_i32_0 = arith.constant 0 : i32
    %c0_i32_1 = arith.constant 0 : i32
    return %c0_i32, %c0_i32_0 : i32, i32
  }
  func.func @transform_7(%arg0: i32) -> (i32, i32, i32) {
    %c0_i32 = arith.constant 0 : i32
    %c0_i32_0 = arith.constant 0 : i32
    %c0_i32_1 = arith.constant 0 : i32
    return %arg0, %c0_i32, %c0_i32_0 : i32, i32, i32
  }
}

</mosaic_0001>

<bundles_post_ra>
// kernel: crossandoutput_forward.97
= control target key start
LH: loop header
LB: loop body
LE: loop exit
PB: predicated region body
PF: predicated region fallthrough
CT: control target
= control target key end

     0   :  { %s583_s18 = smov 0   ;;  %s640_s0 = inlined_call_operand.vmem [shape: f32[64,32], index: 0, kind: input, shape index: {}]   ;;  %s641_s1 = inlined_call_operand.vmem [shape: f32[1,32], index: 1, kind: input, shape index: {}]   ;;  %s642_s2 = inlined_call_operand.vmem [shape: f32[1,32], index: 2, kind: input, shape index: {}]   ;;  %s643_s3 = inlined_call_operand.vmem [shape: f32[32,96], index: 3, kind: input, shape index: {}]   ;;  %s644_s4 = inlined_call_operand.vmem [shape: f32[1,96], index: 4, kind: input, shape index: {}]   ;;  %s645_s5 = inlined_call_operand.vmem [shape: f32[64,96], index: 5, kind: output, shape index: {}]  }
   0x1 LB: > { %s477_s19 = sadd.s32 4294967295, %s551_s18   ;;  %p481_p0 = scmp.ge.s32.totalorder %s551_s18, 1  ;;  %s551_s18 = sphi %s583_s18, %s15_s18  }
   0x2   : > { %p188_p1 = scmp.lt.s32.totalorder %s551_s18, 3 }
   0x4   : > { %p189_p2 = pnand %p481_p0, %p188_p1 }
   0x5   : > { %s482_s20 = sshll.u32 (!%p189_p2), %s477_s19, 2  ;;  %vm232_vm0 = vcmask (!%p189_p2), 261120   ;;  %v308_v28 = vld [vmem:[%s643_s3] sm:$0xff] (!%p189_p2)  ;;  %v309_v29 = vld [vmem:[%s643_s3 + $0x8] sm:$0xff] (!%p189_p2)  ;;  %v310_v30 = vld [vmem:[%s643_s3 + $0x10] sm:$0xff] (!%p189_p2)  ;;  %vm416_vm1 = vcmask (!%p189_p2), 785408  }
   0x6   : > { %192 = sbr.rel (%p189_p2) target bundleno = 554 (0x22a), region = 40  ;;  %p217_p3 = scmp.lt.s32.totalorder (!%p189_p2), %s482_s20, 7  ;;  %v517_v31 = vpack.c.bf16 (!%p189_p2), %v309_v29, %v308_v28  ;;  %v311_v32 = vld [vmem:[%s643_s3 + $0x18] sm:$0xff] (!%p189_p2)  ;;  %v486_v47 = vld [vmem:[%s641_s1] ss:$0 sm:$0xff] (!%p189_p2) }
   0x7   : > { %v521_v33 = vpack.c.bf16 (!%p189_p2), %v311_v32, %v310_v30  ;;  %v487_v49 = vld [vmem:[%s642_s2] ss:$0 sm:$0xff] (!%p189_p2) }
   0x8   : > { %518 = vmatprep.subr.bf16.mxu0 (!%p189_p2), %v517_v31  ;;  %525 = vmatprep.subr.bf16.mxu1 (!%p189_p2), %v517_v31 }
   0x9   : > { %520 = vmatpush3.bf16.msra.mxu0 (!%p189_p2), %v517_v31  ;;  %527 = vmatpush3.bf16.msra.mxu1 (!%p189_p2), %v517_v31 }
   0xa   : > { %522 = vmatprep.subr.bf16.mxu0 (!%p189_p2), %v521_v33  ;;  %526 = vmatprep.subr.bf16.mxu1 (!%p189_p2), %v521_v33 }
   0xd   : > { %s647_s20 = smov (!%p217_p3, %s482_s20), 7  ;;  %524 = vmatpush3.bf16.msra.mxu0 %v521_v33  ;;  %528 = vmatpush3.bf16.msra.mxu1 %v521_v33 }
   0xe   : > { %s483_s21 = sshll.u32 %s647_s20, 3 }
   0xf   : > { %s220_s24 = scalar_lea.vmem %s640_s0, %s483_s21  ;;  %s226_s16 = scalar_lea.vmem %s645_s5, %s483_s21 }
  0x10   : > { %v228_v0 = vld [vmem:[%s220_s24] sm:$0xff]  ;;  %v230_v1 = vld [vmem:[%s220_s24 + $0x10] sm:$0xff]  ;;  %v229_v2 = vld [vmem:[%s220_s24 + $0x8] sm:$0xff] }
  0x11   : > { %v233_v3 = vsel %vm232_vm0, %v228_v0, 0.0  ;;  %v239_v4 = vsel %vm232_vm0, %v230_v1, 0.0  ;;  %v231_v5 = vld [vmem:[%s220_s24 + $0x18] sm:$0xff]  ;;  %v236_v6 = vsel %vm232_vm0, %v229_v2, 0.0 }
  0x12   : > { %234 = vadd.xlane.f32.xlu0 %v233_v3  ;;  %240 = vadd.xlane.f32.xlu1 %v239_v4  ;;  %v242_v7 = vsel %vm232_vm0, %v231_v5, 0.0 }
  0x16   : > { %237 = vadd.xlane.f32.xlu0 %v236_v6  ;;  %243 = vadd.xlane.f32.xlu1 %v242_v7 }
  0x9f   : > { %v235_v8 = vpop.xlane.xlu0 %234  ;;  %v241_v9 = vpop.xlane.xlu1 %240 }
  0xa0   : > { %v246_v10 = vmul.f32 0.03125, %v235_v8  ;;  %v248_v11 = vmul.f32 0.03125, %v241_v9 }
  0xa2   : > { %v250_v12 = vsub.f32 %v228_v0, %v246_v10  ;;  %v252_v13 = vsub.f32 %v230_v1, %v248_v11  ;;  %v488_v0 = vld [vmem:[%s644_s4] ss:$0 sm:$0xff] }
  0xa3   : > { %v238_v14 = vpop.xlane.xlu0 %237  ;;  %v244_v15 = vpop.xlane.xlu1 %243 }
  0xa4   : > { %v247_v16 = vmul.f32 0.03125, %v238_v14  ;;  %v249_v17 = vmul.f32 0.03125, %v244_v15  ;;  %v254_v18 = vmul.f32 %v250_v12, %v250_v12  ;;  %v256_v19 = vmul.f32 %v252_v13, %v252_v13 }
  0xa6   : > { %v251_v20 = vsub.f32 %v229_v2, %v247_v16  ;;  %v253_v21 = vsub.f32 %v231_v5, %v249_v17  ;;  %v258_v22 = vsel %vm232_vm0, %v254_v18, 0.0  ;;  %v264_v23 = vsel %vm232_vm0, %v256_v19, 0.0 }
  0xa7   : > { %259 = vadd.xlane.f32.xlu0 %v258_v22 }
  0xa8   : > { %v255_v24 = vmul.f32 %v251_v20, %v251_v20  ;;  %v257_v25 = vmul.f32 %v253_v21, %v253_v21 }
  0xaa   : > { %v261_v26 = vsel %vm232_vm0, %v255_v24, 0.0  ;;  %v267_v27 = vsel %vm232_vm0, %v257_v25, 0.0 }
  0xab   : > { %265 = vadd.xlane.f32.xlu0 %v264_v23  ;;  %262 = vadd.xlane.f32.xlu1 %v261_v26 }
  0xaf   : > { %268 = vadd.xlane.f32.xlu1 %v267_v27 }
 0x134   : > { %v260_v34 = vpop.xlane.xlu0 %259 }
 0x135   : > { %v270_v35 = vmul.f32 0.03125, %v260_v34 }
 0x137   : > { %v274_v36 = vadd.f32 1e-05, %v270_v35 }
 0x138   : > { %v263_v37 = vpop.xlane.xlu1 %262  ;;  %v266_v38 = vpop.xlane.xlu0 %265 }
 0x139   : > { %537 = vrsqrt.f32 %v274_v36  ;;  %v271_v39 = vmul.f32 0.03125, %v263_v37  ;;  %v272_v40 = vmul.f32 0.03125, %v266_v38 }
 0x13b   : > { %v275_v41 = vadd.f32 1e-05, %v271_v39  ;;  %v276_v42 = vadd.f32 1e-05, %v272_v40 }
 0x13c   : > { %v269_v43 = vpop.xlane.xlu1 %268 }
 0x13d   : > { %539 = vrsqrt.f32 %v275_v41  ;;  %v273_v44 = vmul.f32 0.03125, %v269_v43 }
 0x13e   : > { %541 = vrsqrt.f32 %v276_v42 }
 0x13f   : > { %v277_v45 = vadd.f32 1e-05, %v273_v44 }
 0x141   : > { %543 = vrsqrt.f32 %v277_v45 }
 0x143   : > { %v538_v46 = vpop.eup %537 }
 0x144   : > { %v282_v48 = vmul.f32 %v538_v46, %v250_v12 }
 0x146   : > { %v293_v50 = vmul.f32 %v486_v47, %v282_v48 }
 0x147   : > { %v540_v51 = vpop.eup %539 }
 0x148   : > { %v542_v52 = vpop.eup %541  ;;  %v304_v53 = vadd.f32 %v487_v49, %v293_v50  ;;  %v283_v54 = vmul.f32 %v540_v51, %v251_v20 }
 0x149   : > { %v284_v55 = vmul.f32 %v542_v52, %v252_v13 }
 0x14a   : > { %511 = vmatprep.mubr.msk.f32.mxu0 %vm232_vm0, %v304_v53  ;;  %v294_v56 = vmul.f32 %v486_v47, %v283_v54 }
 0x14b   : > { %v544_v57 = vpop.eup %543  ;;  %v295_v58 = vmul.f32 %v486_v47, %v284_v55 }
 0x14c   : > { %v305_v59 = vadd.f32 %v487_v49, %v294_v56  ;;  %v285_v60 = vmul.f32 %v544_v57, %v253_v21 }
 0x14d   : > { %v306_v61 = vadd.f32 %v487_v49, %v295_v58 }
 0x14e   : > { %512 = vmatmul.mubr.msk.f32.vlgmr.msra.gmra.mrb[0].mxu0 %vm232_vm0, %v305_v59  ;;  %v296_v62 = vmul.f32 %v486_v47, %v285_v60 }
 0x14f   : > { %514 = vmatprep.mubr.msk.f32.mxu1 %vm232_vm0, %v306_v61 }
 0x150   : > { %v307_v63 = vadd.f32 %v487_v49, %v296_v62 }
 0x152   : > { %515 = vmatmul.mubr.msk.f32.vlgmr.msra.gmra.mrb[0].mxu1 %vm232_vm0, %v307_v63 }
 0x221   : > { %v513_v1 = vpop.f32.mrb[0].mxu0 }
 0x222   : > { %v397_v2 = vpop.f32.mrb[1].mxu0  ;;  %v403_v4 = vadd.f32 %v513_v1, %v488_v0 }
 0x223   : > { %v398_v3 = vadd.f32 %v488_v0, %v397_v2 }
 0x224   : > { %418 = vst.msk [vmem:[%s226_s16 + $0x8] sm:$0xff] %vm416_vm1, %v403_v4 }
 0x225   : > { %417 = vst.msk [vmem:[%s226_s16] sm:$0xff] %vm416_vm1, %v398_v3  ;;  %v516_v5 = vpop.f32.mrb[0].mxu1 }
 0x226   : > { %v407_v6 = vpop.f32.mrb[1].mxu1  ;;  %v413_v8 = vadd.f32 %v516_v5, %v488_v0 }
 0x227   : > { %v408_v7 = vadd.f32 %v488_v0, %v407_v6 }
 0x228   : > { %420 = vst.msk [vmem:[%s226_s16 + $0x18] sm:$0xff] %vm416_vm1, %v413_v8 }
 0x229   : > { %419 = vst.msk [vmem:[%s226_s16 + $0x10] sm:$0xff] %vm416_vm1, %v408_v7 }
 0x22a PF: > { %s15_s18 = sadd.s32 1, %s551_s18  }
 0x22b   : > { %p12_p4 = scmp.ge.s32.totalorder %s15_s18, 4  }
 0x22d   :  { %14 = sbr.rel (!%p12_p4) target bundleno = 1 (0x1), region = 70 }

// kernel: crossandoutput_forward.99
= control target key start
LH: loop header
LB: loop body
LE: loop exit
PB: predicated region body
PF: predicated region fallthrough
CT: control target
= control target key end

     0   :  { %s509_s15 = smov 0   ;;  %s552_s0 = inlined_call_operand.vmem [shape: f32[64,32], index: 0, kind: input, shape index: {}]   ;;  %s553_s1 = inlined_call_operand.vmem [shape: f32[32,32], index: 1, kind: input, shape index: {}]   ;;  %s554_s2 = inlined_call_operand.vmem [shape: f32[1,32], index: 2, kind: input, shape index: {}]   ;;  %s555_s3 = inlined_call_operand.vmem [shape: f32[64,32], index: 3, kind: input, shape index: {}]   ;;  %s556_s4 = inlined_call_operand.vmem [shape: f32[64,32], index: 4, kind: output, shape index: {}]  }
   0x1 LB: > { %s416_s16 = sadd.s32 4294967295, %s482_s15   ;;  %p420_p0 = scmp.ge.s32.totalorder %s482_s15, 1  ;;  %s482_s15 = sphi %s509_s15, %s14_s15  }
   0x2   : > { %p174_p1 = scmp.lt.s32.totalorder %s482_s15, 3 }
   0x4   : > { %p175_p2 = pnand %p420_p0, %p174_p1 }
   0x5   : > { %v227_v0 = vld [vmem:[%s553_s1] sm:$0xff] (!%p175_p2)  ;;  %v228_v1 = vld [vmem:[%s553_s1 + $0x8] sm:$0xff] (!%p175_p2)  ;;  %v229_v2 = vld [vmem:[%s553_s1 + $0x10] sm:$0xff] (!%p175_p2)  ;;  %s421_s23 = sshll.u32 (!%p175_p2), %s416_s16, 2  ;;  %vm238_vm0 = vcmask (!%p175_p2), 261120  }
   0x6   : > { %178 = sbr.rel (%p175_p2) target bundleno = 236 (0xec), region = 36  ;;  %v456_v3 = vpack.c.bf16 (!%p175_p2), %v228_v1, %v227_v0  ;;  %v230_v4 = vld [vmem:[%s553_s1 + $0x18] sm:$0xff] (!%p175_p2)  ;;  %p206_p3 = scmp.lt.s32.totalorder (!%p175_p2), %s421_s23, 7  ;;  %v427_v10 = vld [vmem:[%s554_s2] ss:$0 sm:$0xff] (!%p175_p2) }
   0x7   : > { %v460_v5 = vpack.c.bf16 (!%p175_p2), %v230_v4, %v229_v2 }
   0x8   : > { %457 = vmatprep.subr.bf16.mxu0 (!%p175_p2), %v456_v3  ;;  %464 = vmatprep.subr.bf16.mxu1 (!%p175_p2), %v456_v3 }
   0x9   : > { %459 = vmatpush3.bf16.msra.mxu0 (!%p175_p2), %v456_v3  ;;  %466 = vmatpush3.bf16.msra.mxu1 (!%p175_p2), %v456_v3 }
   0xa   : > { %461 = vmatprep.subr.bf16.mxu0 (!%p175_p2), %v460_v5  ;;  %465 = vmatprep.subr.bf16.mxu1 (!%p175_p2), %v460_v5 }
   0xd   : > { %s558_s23 = smov (!%p206_p3, %s421_s23), 7  ;;  %463 = vmatpush3.bf16.msra.mxu0 %v460_v5  ;;  %467 = vmatpush3.bf16.msra.mxu1 %v460_v5 }
   0xe   : > { %s422_s26 = sshll.u32 %s558_s23, 3 }
   0xf   : > { %s209_s29 = scalar_lea.vmem %s552_s0, %s422_s26  ;;  %s215_s6 = scalar_lea.vmem %s555_s3, %s422_s26 }
  0x10   : > { %v223_v6 = vld [vmem:[%s209_s29] sm:$0xff]  ;;  %v225_v7 = vld [vmem:[%s209_s29 + $0x10] sm:$0xff]  ;;  %v224_v8 = vld [vmem:[%s209_s29 + $0x8] sm:$0xff]  ;;  %s221_s11 = scalar_lea.vmem %s556_s4, %s422_s26 }
  0x11   : > { %v226_v9 = vld [vmem:[%s209_s29 + $0x18] sm:$0xff]  ;;  %450 = vmatprep.mubr.msk.f32.mxu0 %vm238_vm0, %v223_v6  ;;  %453 = vmatprep.mubr.msk.f32.mxu1 %vm238_vm0, %v225_v7  ;;  %v337_v12 = vld [vmem:[%s215_s6 + $0x8] sm:$0xff]  ;;  %v336_v17 = vld [vmem:[%s215_s6] sm:$0xff] }
  0x12   : > { %451 = vmatmul.mubr.msk.f32.vlgmr.msra.gmra.mrb[0].mxu0 %vm238_vm0, %v224_v8  ;;  %454 = vmatmul.mubr.msk.f32.vlgmr.msra.gmra.mrb[0].mxu1 %vm238_vm0, %v226_v9  ;;  %v339_v14 = vld [vmem:[%s215_s6 + $0x18] sm:$0xff]  ;;  %v338_v20 = vld [vmem:[%s215_s6 + $0x10] sm:$0xff] }
  0xe5   : > { %v452_v11 = vpop.f32.mrb[0].mxu0  ;;  %v455_v13 = vpop.f32.mrb[0].mxu1 }
  0xe6   : > { %v323_v15 = vadd.f32 %v452_v11, %v427_v10  ;;  %v317_v16 = vpop.f32.mrb[1].mxu0  ;;  %v333_v18 = vadd.f32 %v455_v13, %v427_v10  ;;  %v327_v19 = vpop.f32.mrb[1].mxu1 }
  0xe7   : > { %v318_v21 = vadd.f32 %v427_v10, %v317_v16  ;;  %v328_v22 = vadd.f32 %v427_v10, %v327_v19 }
  0xe8   : > { %v341_v23 = vadd.f32 %v337_v12, %v323_v15  ;;  %v343_v24 = vadd.f32 %v339_v14, %v333_v18 }
  0xe9   : > { %v340_v25 = vadd.f32 %v336_v17, %v318_v21  ;;  %v342_v26 = vadd.f32 %v338_v20, %v328_v22 }
  0xea   : > { %345 = vst.msk [vmem:[%s221_s11 + $0x8] sm:$0xff] %vm238_vm0, %v341_v23  ;;  %347 = vst.msk [vmem:[%s221_s11 + $0x18] sm:$0xff] %vm238_vm0, %v343_v24 }
  0xeb   : > { %344 = vst.msk [vmem:[%s221_s11] sm:$0xff] %vm238_vm0, %v340_v25  ;;  %346 = vst.msk [vmem:[%s221_s11 + $0x10] sm:$0xff] %vm238_vm0, %v342_v26 }
  0xec PF: > { %s14_s15 = sadd.s32 1, %s482_s15  }
  0xed   : > { %p11_p4 = scmp.ge.s32.totalorder %s14_s15, 4  }
  0xef   :  { %13 = sbr.rel (!%p11_p4) target bundleno = 1 (0x1), region = 69 }

// kernel: crossandoutput_forward.98
= control target key start
LH: loop header
LB: loop body
LE: loop exit
PB: predicated region body
PF: predicated region fallthrough
CT: control target
= control target key end

     0   :  { %s1839_s12 = smov 0   ;;  %s2006_s0 = inlined_call_operand.vmem [shape: f32[8,8,8,4], index: 0, kind: input, shape index: {}]   ;;  %s2007_s1 = inlined_call_operand.vmem [shape: f32[8,8,8,4], index: 1, kind: input, shape index: {}]   ;;  %s2008_s2 = inlined_call_operand.vmem [shape: f32[8,8,8,4], index: 2, kind: input, shape index: {}]   ;;  %s2009_s3 = inlined_call_operand.vmem [shape: f32[8,8,8,4], index: 3, kind: output, shape index: {}]  }
   0x1 LB: > { %s1612_s13 = sadd.s32 4294967295, %s1815_s12   ;;  %p1616_p0 = scmp.ge.s32.totalorder %s1815_s12, 1  ;;  %s1815_s12 = sphi %s1839_s12, %s13_s12  }
   0x2   : > { %p157_p1 = scmp.lt.s32.totalorder %s1815_s12, 9 }
   0x4   : > { %p158_p2 = pnand %p1616_p0, %p157_p1 }
   0x5   : > { %p191_p3 = scmp.lt.s32.totalorder (!%p158_p2), %s1612_s13, 7  ;;  %v1817_v0 = vmov (!%p158_p2), 0.0   ;;  %vm1818_vm0 = vmmov (!%p158_p2), 0   ;;  %vm235_vm1 = vcmask (!%p158_p2), 31744   ;;  %vm852_vm2 = vcmask (!%p158_p2), 64512  }
   0x6   : > { %161 = sbr.rel (%p158_p2) target bundleno = 777 (0x309), region = 32  ;;  %1687 = vmatprep.subr.mxu0 (!%p158_p2), %v1817_v0  ;;  %1689 = vmatprep.mubr.msk.f32.mxu0 (!%p158_p2), %vm1818_vm0, %v1817_v0 }
   0x7   : > { %1692 = vmatprep.subr.mxu1 (!%p158_p2), %v1817_v0  ;;  %1694 = vmatprep.mubr.msk.f32.mxu1 (!%p158_p2), %vm1818_vm0, %v1817_v0 }
   0xd   : > { %s2011_s13 = smov (!%p191_p3, %s1612_s13), 7 }
   0xe   : > { %s1853_s14 = sshll.u32 %s2011_s13, 6 }
   0xf   : > { %s1859_s17 = scalar_lea.vmem %s2007_s1, %s1853_s14  ;;  %s1865_s20 = scalar_lea.vmem %s2006_s0, %s1853_s14 }
  0x10   : > { %v219_v1 = vld [vmem:[%s1859_s17] sm:$0xff]  ;;  %v220_v2 = vld [vmem:[%s1859_s17 + $0x8] sm:$0xff]  ;;  %v221_v5 = vld [vmem:[%s1859_s17 + $0x10] sm:$0xff]  ;;  %s1952_s23 = scalar_lea.vmem %s2008_s2, %s1853_s14  ;;  %s210_s26 = scalar_lea.vmem %s2009_s3, %s1853_s14 }
  0x11   : > { %1688 = vmatpush3.xpose.msk.msra.mxu0 %vm235_vm1, %v219_v1  ;;  %v211_v3 = vld [vmem:[%s1865_s20] sm:$0xff]  ;;  %1693 = vmatpush3.xpose.msk.msra.mxu1 %vm235_vm1, %v220_v2  ;;  %v212_v4 = vld [vmem:[%s1865_s20 + $0x8] sm:$0xff]  ;;  %v222_v6 = vld [vmem:[%s1859_s17 + $0x18] sm:$0xff] }
  0x12   : > { %1697 = vmatprep.subr.mxu0 %v1817_v0  ;;  %1702 = vmatprep.subr.mxu1 %v1817_v0  ;;  %v213_v7 = vld [vmem:[%s1865_s20 + $0x10] sm:$0xff]  ;;  %v223_v8 = vld [vmem:[%s1859_s17 + $0x20] sm:$0xff]  ;;  %v214_v9 = vld [vmem:[%s1865_s20 + $0x18] sm:$0xff] }
  0x13   : > { %v224_v10 = vld [vmem:[%s1859_s17 + $0x28] sm:$0xff]  ;;  %v215_v11 = vld [vmem:[%s1865_s20 + $0x20] sm:$0xff]  ;;  %v225_v12 = vld [vmem:[%s1859_s17 + $0x30] sm:$0xff] }
  0x14   : > { %1690 = vmatmul.mubr.msk.f32.vlgmr.msra.gmra.mrb[0].mxu0 %vm235_vm1, %v211_v3  ;;  %1695 = vmatmul.mubr.msk.f32.vlgmr.msra.gmra.mrb[0].mxu1 %vm235_vm1, %v212_v4  ;;  %v216_v13 = vld [vmem:[%s1865_s20 + $0x28] sm:$0xff]  ;;  %v226_v14 = vld [vmem:[%s1859_s17 + $0x38] sm:$0xff]  ;;  %v217_v15 = vld [vmem:[%s1865_s20 + $0x30] sm:$0xff] }
  0x15   : > { %1698 = vmatpush3.xpose.msk.msra.mxu0 %vm235_vm1, %v221_v5  ;;  %1699 = vmatprep.mubr.msk.f32.mxu0 %vm1818_vm0, %v1817_v0  ;;  %v218_v16 = vld [vmem:[%s1865_s20 + $0x38] sm:$0xff] }
  0x16   : > { %1707 = vmatprep.subr.mxu0 %v1817_v0  ;;  %1703 = vmatpush3.xpose.msk.msra.mxu1 %vm235_vm1, %v222_v6 }
  0x17   : > { %1704 = vmatprep.mubr.msk.f32.mxu1 %vm1818_vm0, %v1817_v0  ;;  %1712 = vmatprep.subr.mxu1 %v1817_v0 }
  0x18   : > { %1700 = vmatmul.mubr.msk.f32.vlgmr.msra.gmra.mrb[2].mxu0 %vm235_vm1, %v213_v7 }
  0x19   : > { %1708 = vmatpush3.xpose.msk.msra.mxu0 %vm235_vm1, %v223_v8  ;;  %1709 = vmatprep.mubr.msk.f32.mxu0 %vm1818_vm0, %v1817_v0 }
  0x1a   : > { %1705 = vmatmul.mubr.msk.f32.vlgmr.msra.gmra.mrb[2].mxu1 %vm235_vm1, %v214_v9  ;;  %1717 = vmatprep.subr.mxu0 %v1817_v0 }
  0x1b   : > { %1713 = vmatpush3.xpose.msk.msra.mxu1 %vm235_vm1, %v224_v10  ;;  %1714 = vmatprep.mubr.msk.f32.mxu1 %vm1818_vm0, %v1817_v0 }
  0x1c   : > { %1710 = vmatmul.mubr.msk.f32.vlgmr.msra.gmra.mrb[4].mxu0 %vm235_vm1, %v215_v11  ;;  %1722 = vmatprep.subr.mxu1 %v1817_v0 }
  0x1d   : > { %1718 = vmatpush3.xpose.msk.msra.mxu0 %vm235_vm1, %v225_v12  ;;  %1719 = vmatprep.mubr.msk.f32.mxu0 %vm1818_vm0, %v1817_v0 }
  0x1e   : > { %1715 = vmatmul.mubr.msk.f32.vlgmr.msra.gmra.mrb[4].mxu1 %vm235_vm1, %v216_v13  ;;  %1727 = vmatprep.subr.mxu0 %v1817_v0 }
  0x1f   : > { %1723 = vmatpush3.xpose.msk.msra.mxu1 %vm235_vm1, %v226_v14  ;;  %1724 = vmatprep.mubr.msk.f32.mxu1 %vm1818_vm0, %v1817_v0 }
  0x20   : > { %1720 = vmatmul.mubr.msk.f32.vlgmr.msra.gmra.mrb[6].mxu0 %vm235_vm1, %v217_v15  ;;  %1732 = vmatprep.subr.mxu1 %v1817_v0 }
  0x21   : > { %1729 = vmatprep.mubr.msk.f32.mxu0 %vm1818_vm0, %v1817_v0 }
  0x22   : > { %1725 = vmatmul.mubr.msk.f32.vlgmr.msra.gmra.mrb[6].mxu1 %vm235_vm1, %v218_v16 }
  0x23   : > { %1734 = vmatprep.mubr.msk.f32.mxu1 %vm1818_vm0, %v1817_v0 }
  0xe7   : > { %v308_v17 = vpop.f32.mrb[0].mxu0  ;;  %v384_v18 = vpop.f32.mrb[0].mxu1 }
  0xe8   : > { %v844_v19 = vmul.f32 0.5, %v308_v17  ;;  %v1691_v20 = vpop.f32.mrb[1].mxu0  ;;  %v845_v21 = vmul.f32 0.5, %v384_v18  ;;  %v1696_v22 = vpop.f32.mrb[1].mxu1 }
  0xea   : > { %v853_v23 = vsel %vm852_vm2, %v844_v19, -inf  ;;  %v856_v27 = vsel %vm852_vm2, %v845_v21, -inf }
  0xeb   : > { %854 = vmax.xlane.f32.xlu0 %v853_v23  ;;  %v460_v24 = vpop.f32.mrb[2].mxu0 }
  0xec   : > { %v846_v25 = vmul.f32 0.5, %v460_v24  ;;  %v1701_v26 = vpop.f32.mrb[3].mxu0 }
  0xed   : > { %v536_v28 = vpop.f32.mrb[2].mxu1  ;;  %v227_v26 = vld [vmem:[%s1952_s23] sm:$0xff] }
  0xee   : > { %v847_v29 = vmul.f32 0.5, %v536_v28  ;;  %v859_v30 = vsel %vm852_vm2, %v846_v25, -inf  ;;  %v1706_v31 = vpop.f32.mrb[3].mxu1  ;;  %1728 = vmatpush3.msra.mxu0 %v227_v26 }
  0xef   : > { %857 = vmax.xlane.f32.xlu0 %v856_v27  ;;  %860 = vmax.xlane.f32.xlu1 %v859_v30  ;;  %v612_v32 = vpop.f32.mrb[4].mxu0  ;;  %v228_v27 = vld [vmem:[%s1952_s23 + $0x8] sm:$0xff] }
  0xf0   : > { %v848_v33 = vmul.f32 0.5, %v612_v32  ;;  %v1711_v34 = vpop.f32.mrb[5].mxu0  ;;  %v862_v35 = vsel %vm852_vm2, %v847_v29, -inf  ;;  %1737 = vmatprep.subr.mxu0 %v1817_v0  ;;  %1733 = vmatpush3.msra.mxu1 %v228_v27 }
  0xf1   : > { %v688_v36 = vpop.f32.mrb[4].mxu1  ;;  %1742 = vmatprep.subr.mxu1 %v1817_v0 }
  0xf2   : > { %v849_v37 = vmul.f32 0.5, %v688_v36  ;;  %v865_v38 = vsel %vm852_vm2, %v848_v33, -inf  ;;  %v1716_v39 = vpop.f32.mrb[5].mxu1  ;;  %v229_v36 = vld [vmem:[%s1952_s23 + $0x10] sm:$0xff] }
  0xf3   : > { %863 = vmax.xlane.f32.xlu1 %v862_v35  ;;  %866 = vmax.xlane.f32.xlu0 %v865_v38  ;;  %v764_v40 = vpop.f32.mrb[6].mxu0 }
  0xf4   : > { %v850_v41 = vmul.f32 0.5, %v764_v40  ;;  %v868_v42 = vsel %vm852_vm2, %v849_v37, -inf  ;;  %v1721_v43 = vpop.f32.mrb[7].mxu0 }
  0xf5   : > { %v840_v44 = vpop.f32.mrb[6].mxu1 }
  0xf6   : > { %v851_v45 = vmul.f32 0.5, %v840_v44  ;;  %v871_v46 = vsel %vm852_vm2, %v850_v41, -inf  ;;  %v1726_v47 = vpop.f32.mrb[7].mxu1  ;;  %v231_v44 = vld [vmem:[%s1952_s23 + $0x20] sm:$0xff] }
  0xf7   : > { %869 = vmax.xlane.f32.xlu1 %v868_v42  ;;  %872 = vmax.xlane.f32.xlu0 %v871_v46  ;;  %v230_v42 = vld [vmem:[%s1952_s23 + $0x18] sm:$0xff] }
  0xf8   : > { %v874_v48 = vsel %vm852_vm2, %v851_v45, -inf }
  0xfb   : > { %875 = vmax.xlane.f32.xlu1 %v874_v48  ;;  %v232_v48 = vld [vmem:[%s1952_s23 + $0x28] sm:$0xff] }
 0x178   : > { %v855_v49 = vpop.xlane.xlu0 %854 }
 0x179   : > { %v877_v50 = vsub.f32 %v844_v19, %v855_v49 }
 0x17b   : > { %v885_v51 = vmul.f32 1.442695, %v877_v50  ;;  %v233_v50 = vld [vmem:[%s1952_s23 + $0x30] sm:$0xff] }
 0x17c   : > { %v858_v52 = vpop.xlane.xlu0 %857  ;;  %v861_v53 = vpop.xlane.xlu1 %860 }
 0x17d   : > { %1777 = vpow2.f32 %v885_v51  ;;  %v878_v54 = vsub.f32 %v845_v21, %v858_v52  ;;  %v879_v55 = vsub.f32 %v846_v25, %v861_v53 }
 0x17f   : > { %v887_v56 = vmul.f32 1.442695, %v878_v54  ;;  %v889_v57 = vmul.f32 1.442695, %v879_v55  ;;  %v234_v54 = vld [vmem:[%s1952_s23 + $0x38] sm:$0xff] }
 0x180   : > { %v864_v58 = vpop.xlane.xlu1 %863  ;;  %v867_v59 = vpop.xlane.xlu0 %866 }
 0x181   : > { %1779 = vpow2.f32 %v887_v56  ;;  %v880_v60 = vsub.f32 %v847_v29, %v864_v58  ;;  %v881_v61 = vsub.f32 %v848_v33, %v867_v59 }
 0x182   : > { %1781 = vpow2.f32 %v889_v57 }
 0x183   : > { %v891_v62 = vmul.f32 1.442695, %v880_v60  ;;  %v893_v63 = vmul.f32 1.442695, %v881_v61 }
 0x184   : > { %v870_v1 = vpop.xlane.xlu1 %869  ;;  %v873_v2 = vpop.xlane.xlu0 %872 }
 0x185   : > { %1783 = vpow2.f32 %v891_v62  ;;  %v882_v3 = vsub.f32 %v849_v37, %v870_v1  ;;  %v883_v4 = vsub.f32 %v850_v41, %v873_v2 }
 0x186   : > { %1785 = vpow2.f32 %v893_v63 }
 0x187   : > { %v1778_v5 = vpop.eup %1777  ;;  %v895_v6 = vmul.f32 1.442695, %v882_v3  ;;  %v897_v7 = vmul.f32 1.442695, %v883_v4 }
 0x188   : > { %v876_v8 = vpop.xlane.xlu1 %875  ;;  %v901_v9 = vsel %vm852_vm2, %v1778_v5, 0.0 }
 0x189   : > { %1787 = vpow2.f32 %v895_v6  ;;  %v884_v10 = vsub.f32 %v851_v45, %v876_v8  ;;  %902 = vadd.xlane.f32.xlu0 %v901_v9 }
 0x18a   : > { %1789 = vpow2.f32 %v897_v7 }
 0x18b   : > { %v1780_v11 = vpop.eup %1779  ;;  %v899_v12 = vmul.f32 1.442695, %v884_v10 }
 0x18c   : > { %v1782_v13 = vpop.eup %1781  ;;  %v904_v14 = vsel %vm852_vm2, %v1780_v11, 0.0 }
 0x18d   : > { %1791 = vpow2.f32 %v899_v12  ;;  %905 = vadd.xlane.f32.xlu1 %v904_v14  ;;  %v907_v15 = vsel %vm852_vm2, %v1782_v13, 0.0 }
 0x18e   : > { %908 = vadd.xlane.f32.xlu0 %v907_v15 }
 0x18f   : > { %v1784_v16 = vpop.eup %1783 }
 0x190   : > { %v1786_v17 = vpop.eup %1785  ;;  %v910_v18 = vsel %vm852_vm2, %v1784_v16, 0.0 }
 0x191   : > { %911 = vadd.xlane.f32.xlu1 %v910_v18  ;;  %v913_v19 = vsel %vm852_vm2, %v1786_v17, 0.0 }
 0x192   : > { %914 = vadd.xlane.f32.xlu0 %v913_v19 }
 0x193   : > { %v1936_v20 = vpop.eup %1787 }
 0x194   : > { %v1938_v21 = vpop.eup %1789  ;;  %v916_v22 = vsel %vm852_vm2, %v1936_v20, 0.0 }
 0x195   : > { %917 = vadd.xlane.f32.xlu1 %v916_v22  ;;  %v919_v23 = vsel %vm852_vm2, %v1938_v21, 0.0 }
 0x196   : > { %920 = vadd.xlane.f32.xlu0 %v919_v23 }
 0x197   : > { %v1944_v24 = vpop.eup %1791 }
 0x198   : > { %v922_v25 = vsel %vm852_vm2, %v1944_v24, 0.0 }
 0x199   : > { %923 = vadd.xlane.f32.xlu1 %v922_v25 }
 0x216   : > { %v903_v28 = vpop.xlane.xlu0 %902 }
 0x217   : > { %1793 = vrcp.f32 %v903_v28 }
 0x21a   : > { %v906_v29 = vpop.xlane.xlu1 %905 }
 0x21b   : > { %1795 = vrcp.f32 %v906_v29  ;;  %v909_v30 = vpop.xlane.xlu0 %908 }
 0x21c   : > { %1797 = vrcp.f32 %v909_v30 }
 0x21e   : > { %v912_v31 = vpop.xlane.xlu1 %911 }
 0x21f   : > { %1799 = vrcp.f32 %v912_v31  ;;  %v915_v32 = vpop.xlane.xlu0 %914 }
 0x220   : > { %1801 = vrcp.f32 %v915_v32 }
 0x221   : > { %v1794_v33 = vpop.eup %1793 }
 0x222   : > { %v933_v34 = vmul.f32 %v1794_v33, %v1778_v5  ;;  %v918_v35 = vpop.xlane.xlu1 %917 }
 0x223   : > { %1803 = vrcp.f32 %v918_v35  ;;  %v921_v37 = vpop.xlane.xlu0 %920 }
 0x224   : > { %1805 = vrcp.f32 %v921_v37  ;;  %1730 = vmatmul.mubr.msk.f32.vlgmr.msra.gmra.mrb[8].mxu0 %vm852_vm2, %v933_v34 }
 0x225   : > { %v1796_v38 = vpop.eup %1795  ;;  %1738 = vmatpush3.msra.mxu0 %v229_v36  ;;  %1739 = vmatprep.mubr.msk.f32.mxu0 %vm1818_vm0, %v1817_v0 }
 0x226   : > { %v1798_v39 = vpop.eup %1797  ;;  %v934_v40 = vmul.f32 %v1796_v38, %v1780_v11  ;;  %v924_v41 = vpop.xlane.xlu1 %923  ;;  %1747 = vmatprep.subr.mxu0 %v1817_v0 }
 0x227   : > { %v935_v43 = vmul.f32 %v1798_v39, %v1782_v13  ;;  %1807 = vrcp.f32 %v924_v41 }
 0x228   : > { %1735 = vmatmul.mubr.msk.f32.vlgmr.msra.gmra.mrb[8].mxu1 %vm852_vm2, %v934_v40 }
 0x229   : > { %v1800_v45 = vpop.eup %1799  ;;  %1740 = vmatmul.mubr.msk.f32.vlgmr.msra.gmra.mrb[10].mxu0 %vm852_vm2, %v935_v43  ;;  %1743 = vmatpush3.msra.mxu1 %v230_v42 }
 0x22a   : > { %v1802_v46 = vpop.eup %1801  ;;  %v936_v47 = vmul.f32 %v1800_v45, %v1784_v16  ;;  %1744 = vmatprep.mubr.msk.f32.mxu1 %vm1818_vm0, %v1817_v0  ;;  %1748 = vmatpush3.msra.mxu0 %v231_v44 }
 0x22b   : > { %v937_v49 = vmul.f32 %v1802_v46, %v1786_v17  ;;  %1749 = vmatprep.mubr.msk.f32.mxu0 %vm1818_vm0, %v1817_v0  ;;  %1752 = vmatprep.subr.mxu1 %v1817_v0 }
 0x22c   : > { %1745 = vmatmul.mubr.msk.f32.vlgmr.msra.gmra.mrb[10].mxu1 %vm852_vm2, %v936_v47  ;;  %1757 = vmatprep.subr.mxu0 %v1817_v0 }
 0x22d   : > { %v1804_v51 = vpop.eup %1803  ;;  %1750 = vmatmul.mubr.msk.f32.vlgmr.msra.gmra.mrb[12].mxu0 %vm852_vm2, %v937_v49  ;;  %1753 = vmatpush3.msra.mxu1 %v232_v48 }
 0x22e   : > { %v1806_v52 = vpop.eup %1805  ;;  %v938_v53 = vmul.f32 %v1804_v51, %v1936_v20  ;;  %1754 = vmatprep.mubr.msk.f32.mxu1 %vm1818_vm0, %v1817_v0  ;;  %1758 = vmatpush3.msra.mxu0 %v233_v50 }
 0x22f   : > { %v939_v55 = vmul.f32 %v1806_v52, %v1938_v21  ;;  %1759 = vmatprep.mubr.msk.f32.mxu0 %vm1818_vm0, %v1817_v0  ;;  %1762 = vmatprep.subr.mxu1 %v1817_v0 }
 0x230   : > { %1755 = vmatmul.mubr.msk.f32.vlgmr.msra.gmra.mrb[12].mxu1 %vm852_vm2, %v938_v53 }
 0x231   : > { %v1808_v56 = vpop.eup %1807  ;;  %1760 = vmatmul.mubr.msk.f32.vlgmr.msra.gmra.mrb[14].mxu0 %vm852_vm2, %v939_v55  ;;  %1763 = vmatpush3.msra.mxu1 %v234_v54 }
 0x232   : > { %v940_v57 = vmul.f32 %v1808_v56, %v1944_v24  ;;  %1764 = vmatprep.mubr.msk.f32.mxu1 %vm1818_vm0, %v1817_v0 }
 0x234   : > { %1765 = vmatmul.mubr.msk.f32.vlgmr.msra.gmra.mrb[14].mxu1 %vm852_vm2, %v940_v57 }
 0x2f7   : > { %v1010_v58 = vpop.f32.mrb[8].mxu0 }
 0x2f8   : > { %1525 = vst.msk [vmem:[%s210_s26] sm:$0xff] %vm235_vm1, %v1010_v58  ;;  %v1731_v59 = vpop.f32.mrb[9].mxu0 }
 0x2fb   : > { %v1083_v60 = vpop.f32.mrb[8].mxu1 }
 0x2fc   : > { %1526 = vst.msk [vmem:[%s210_s26 + $0x8] sm:$0xff] %vm235_vm1, %v1083_v60  ;;  %v1156_v61 = vpop.f32.mrb[10].mxu0  ;;  %v1736_v62 = vpop.f32.mrb[9].mxu1 }
 0x2fd   : > { %1527 = vst.msk [vmem:[%s210_s26 + $0x10] sm:$0xff] %vm235_vm1, %v1156_v61  ;;  %v1741_v63 = vpop.f32.mrb[11].mxu0 }
 0x2ff   : > { %v1229_v1 = vpop.f32.mrb[10].mxu1 }
 0x300   : > { %1528 = vst.msk [vmem:[%s210_s26 + $0x18] sm:$0xff] %vm235_vm1, %v1229_v1  ;;  %v1302_v0 = vpop.f32.mrb[12].mxu0  ;;  %v1746_v2 = vpop.f32.mrb[11].mxu1 }
 0x301   : > { %1529 = vst.msk [vmem:[%s210_s26 + $0x20] sm:$0xff] %vm235_vm1, %v1302_v0  ;;  %v1751_v3 = vpop.f32.mrb[13].mxu0 }
 0x303   : > { %v1375_v4 = vpop.f32.mrb[12].mxu1 }
 0x304   : > { %1530 = vst.msk [vmem:[%s210_s26 + $0x28] sm:$0xff] %vm235_vm1, %v1375_v4  ;;  %v1448_v5 = vpop.f32.mrb[14].mxu0  ;;  %v1756_v6 = vpop.f32.mrb[13].mxu1 }
 0x305   : > { %1531 = vst.msk [vmem:[%s210_s26 + $0x30] sm:$0xff] %vm235_vm1, %v1448_v5  ;;  %v1761_v7 = vpop.f32.mrb[15].mxu0 }
 0x307   : > { %v1521_v8 = vpop.f32.mrb[14].mxu1 }
 0x308   : > { %1532 = vst.msk [vmem:[%s210_s26 + $0x38] sm:$0xff] %vm235_vm1, %v1521_v8  ;;  %v1766_v9 = vpop.f32.mrb[15].mxu1 }
 0x309 PF: > { %s13_s12 = sadd.s32 1, %s1815_s12  }
 0x30a   : > { %p10_p4 = scmp.ge.s32.totalorder %s13_s12, 10  }
 0x30c   :  { %12 = sbr.rel (!%p10_p4) target bundleno = 1 (0x1), region = 68 }

// kernel: crossandoutput_forward.100
= control target key start
LH: loop header
LB: loop body
LE: loop exit
PB: predicated region body
PF: predicated region fallthrough
CT: control target
= control target key end

     0   :  { %s582_s18 = smov 0   ;;  %s643_s0 = inlined_call_operand.vmem [shape: f32[64,32], index: 0, kind: input, shape index: {}]   ;;  %s644_s1 = inlined_call_operand.vmem [shape: f32[1,32], index: 1, kind: input, shape index: {}]   ;;  %s645_s2 = inlined_call_operand.vmem [shape: f32[1,32], index: 2, kind: input, shape index: {}]   ;;  %s646_s3 = inlined_call_operand.vmem [shape: f32[32,32], index: 3, kind: input, shape index: {}]   ;;  %s647_s4 = inlined_call_operand.vmem [shape: f32[1,32], index: 4, kind: input, shape index: {}]   ;;  %s648_s5 = inlined_call_operand.vmem [shape: f32[64,32], index: 5, kind: output, shape index: {}]  }
   0x1 LB: > { %s476_s19 = sadd.s32 4294967295, %s550_s18   ;;  %p480_p0 = scmp.ge.s32.totalorder %s550_s18, 1  ;;  %s550_s18 = sphi %s582_s18, %s15_s18  }
   0x2   : > { %p188_p1 = scmp.lt.s32.totalorder %s550_s18, 3 }
   0x4   : > { %p189_p2 = pnand %p480_p0, %p188_p1 }
   0x5   : > { %s481_s20 = sshll.u32 (!%p189_p2), %s476_s19, 2  ;;  %vm232_vm0 = vcmask (!%p189_p2), 261120   ;;  %v308_v28 = vld [vmem:[%s646_s3] sm:$0xff] (!%p189_p2)  ;;  %v309_v29 = vld [vmem:[%s646_s3 + $0x8] sm:$0xff] (!%p189_p2)  ;;  %v310_v30 = vld [vmem:[%s646_s3 + $0x10] sm:$0xff] (!%p189_p2) }
   0x6   : > { %192 = sbr.rel (%p189_p2) target bundleno = 554 (0x22a), region = 40  ;;  %p217_p3 = scmp.lt.s32.totalorder (!%p189_p2), %s481_s20, 7  ;;  %v516_v31 = vpack.c.bf16 (!%p189_p2), %v309_v29, %v308_v28  ;;  %v311_v32 = vld [vmem:[%s646_s3 + $0x18] sm:$0xff] (!%p189_p2)  ;;  %v485_v47 = vld [vmem:[%s644_s1] ss:$0 sm:$0xff] (!%p189_p2) }
   0x7   : > { %v520_v33 = vpack.c.bf16 (!%p189_p2), %v311_v32, %v310_v30  ;;  %v486_v49 = vld [vmem:[%s645_s2] ss:$0 sm:$0xff] (!%p189_p2) }
   0x8   : > { %517 = vmatprep.subr.bf16.mxu0 (!%p189_p2), %v516_v31  ;;  %524 = vmatprep.subr.bf16.mxu1 (!%p189_p2), %v516_v31 }
   0x9   : > { %519 = vmatpush3.bf16.msra.mxu0 (!%p189_p2), %v516_v31  ;;  %526 = vmatpush3.bf16.msra.mxu1 (!%p189_p2), %v516_v31 }
   0xa   : > { %521 = vmatprep.subr.bf16.mxu0 (!%p189_p2), %v520_v33  ;;  %525 = vmatprep.subr.bf16.mxu1 (!%p189_p2), %v520_v33 }
   0xd   : > { %s650_s20 = smov (!%p217_p3, %s481_s20), 7  ;;  %523 = vmatpush3.bf16.msra.mxu0 %v520_v33  ;;  %527 = vmatpush3.bf16.msra.mxu1 %v520_v33 }
   0xe   : > { %s482_s21 = sshll.u32 %s650_s20, 3 }
   0xf   : > { %s220_s24 = scalar_lea.vmem %s643_s0, %s482_s21  ;;  %s226_s16 = scalar_lea.vmem %s648_s5, %s482_s21 }
  0x10   : > { %v228_v0 = vld [vmem:[%s220_s24] sm:$0xff]  ;;  %v230_v1 = vld [vmem:[%s220_s24 + $0x10] sm:$0xff]  ;;  %v229_v2 = vld [vmem:[%s220_s24 + $0x8] sm:$0xff] }
  0x11   : > { %v233_v3 = vsel %vm232_vm0, %v228_v0, 0.0  ;;  %v239_v4 = vsel %vm232_vm0, %v230_v1, 0.0  ;;  %v231_v5 = vld [vmem:[%s220_s24 + $0x18] sm:$0xff]  ;;  %v236_v6 = vsel %vm232_vm0, %v229_v2, 0.0 }
  0x12   : > { %234 = vadd.xlane.f32.xlu0 %v233_v3  ;;  %240 = vadd.xlane.f32.xlu1 %v239_v4  ;;  %v242_v7 = vsel %vm232_vm0, %v231_v5, 0.0 }
  0x16   : > { %237 = vadd.xlane.f32.xlu0 %v236_v6  ;;  %243 = vadd.xlane.f32.xlu1 %v242_v7 }
  0x9f   : > { %v235_v8 = vpop.xlane.xlu0 %234  ;;  %v241_v9 = vpop.xlane.xlu1 %240 }
  0xa0   : > { %v246_v10 = vmul.f32 0.03125, %v235_v8  ;;  %v248_v11 = vmul.f32 0.03125, %v241_v9 }
  0xa2   : > { %v250_v12 = vsub.f32 %v228_v0, %v246_v10  ;;  %v252_v13 = vsub.f32 %v230_v1, %v248_v11  ;;  %v487_v0 = vld [vmem:[%s647_s4] ss:$0 sm:$0xff] }
  0xa3   : > { %v238_v14 = vpop.xlane.xlu0 %237  ;;  %v244_v15 = vpop.xlane.xlu1 %243 }
  0xa4   : > { %v247_v16 = vmul.f32 0.03125, %v238_v14  ;;  %v249_v17 = vmul.f32 0.03125, %v244_v15  ;;  %v254_v18 = vmul.f32 %v250_v12, %v250_v12  ;;  %v256_v19 = vmul.f32 %v252_v13, %v252_v13 }
  0xa6   : > { %v251_v20 = vsub.f32 %v229_v2, %v247_v16  ;;  %v253_v21 = vsub.f32 %v231_v5, %v249_v17  ;;  %v258_v22 = vsel %vm232_vm0, %v254_v18, 0.0  ;;  %v264_v23 = vsel %vm232_vm0, %v256_v19, 0.0 }
  0xa7   : > { %259 = vadd.xlane.f32.xlu0 %v258_v22 }
  0xa8   : > { %v255_v24 = vmul.f32 %v251_v20, %v251_v20  ;;  %v257_v25 = vmul.f32 %v253_v21, %v253_v21 }
  0xaa   : > { %v261_v26 = vsel %vm232_vm0, %v255_v24, 0.0  ;;  %v267_v27 = vsel %vm232_vm0, %v257_v25, 0.0 }
  0xab   : > { %265 = vadd.xlane.f32.xlu0 %v264_v23  ;;  %262 = vadd.xlane.f32.xlu1 %v261_v26 }
  0xaf   : > { %268 = vadd.xlane.f32.xlu1 %v267_v27 }
 0x134   : > { %v260_v34 = vpop.xlane.xlu0 %259 }
 0x135   : > { %v270_v35 = vmul.f32 0.03125, %v260_v34 }
 0x137   : > { %v274_v36 = vadd.f32 1e-05, %v270_v35 }
 0x138   : > { %v263_v37 = vpop.xlane.xlu1 %262  ;;  %v266_v38 = vpop.xlane.xlu0 %265 }
 0x139   : > { %536 = vrsqrt.f32 %v274_v36  ;;  %v271_v39 = vmul.f32 0.03125, %v263_v37  ;;  %v272_v40 = vmul.f32 0.03125, %v266_v38 }
 0x13b   : > { %v275_v41 = vadd.f32 1e-05, %v271_v39  ;;  %v276_v42 = vadd.f32 1e-05, %v272_v40 }
 0x13c   : > { %v269_v43 = vpop.xlane.xlu1 %268 }
 0x13d   : > { %538 = vrsqrt.f32 %v275_v41  ;;  %v273_v44 = vmul.f32 0.03125, %v269_v43 }
 0x13e   : > { %540 = vrsqrt.f32 %v276_v42 }
 0x13f   : > { %v277_v45 = vadd.f32 1e-05, %v273_v44 }
 0x141   : > { %542 = vrsqrt.f32 %v277_v45 }
 0x143   : > { %v537_v46 = vpop.eup %536 }
 0x144   : > { %v282_v48 = vmul.f32 %v537_v46, %v250_v12 }
 0x146   : > { %v293_v50 = vmul.f32 %v485_v47, %v282_v48 }
 0x147   : > { %v539_v51 = vpop.eup %538 }
 0x148   : > { %v541_v52 = vpop.eup %540  ;;  %v304_v53 = vadd.f32 %v486_v49, %v293_v50  ;;  %v283_v54 = vmul.f32 %v539_v51, %v251_v20 }
 0x149   : > { %v284_v55 = vmul.f32 %v541_v52, %v252_v13 }
 0x14a   : > { %510 = vmatprep.mubr.msk.f32.mxu0 %vm232_vm0, %v304_v53  ;;  %v294_v56 = vmul.f32 %v485_v47, %v283_v54 }
 0x14b   : > { %v543_v57 = vpop.eup %542  ;;  %v295_v58 = vmul.f32 %v485_v47, %v284_v55 }
 0x14c   : > { %v305_v59 = vadd.f32 %v486_v49, %v294_v56  ;;  %v285_v60 = vmul.f32 %v543_v57, %v253_v21 }
 0x14d   : > { %v306_v61 = vadd.f32 %v486_v49, %v295_v58 }
 0x14e   : > { %511 = vmatmul.mubr.msk.f32.vlgmr.msra.gmra.mrb[0].mxu0 %vm232_vm0, %v305_v59  ;;  %v296_v62 = vmul.f32 %v485_v47, %v285_v60 }
 0x14f   : > { %513 = vmatprep.mubr.msk.f32.mxu1 %vm232_vm0, %v306_v61 }
 0x150   : > { %v307_v63 = vadd.f32 %v486_v49, %v296_v62 }
 0x152   : > { %514 = vmatmul.mubr.msk.f32.vlgmr.msra.gmra.mrb[0].mxu1 %vm232_vm0, %v307_v63 }
 0x221   : > { %v512_v1 = vpop.f32.mrb[0].mxu0 }
 0x222   : > { %v397_v2 = vpop.f32.mrb[1].mxu0  ;;  %v403_v4 = vadd.f32 %v512_v1, %v487_v0 }
 0x223   : > { %v398_v3 = vadd.f32 %v487_v0, %v397_v2 }
 0x224   : > { %417 = vst.msk [vmem:[%s226_s16 + $0x8] sm:$0xff] %vm232_vm0, %v403_v4 }
 0x225   : > { %416 = vst.msk [vmem:[%s226_s16] sm:$0xff] %vm232_vm0, %v398_v3  ;;  %v515_v5 = vpop.f32.mrb[0].mxu1 }
 0x226   : > { %v407_v6 = vpop.f32.mrb[1].mxu1  ;;  %v413_v8 = vadd.f32 %v515_v5, %v487_v0 }
 0x227   : > { %v408_v7 = vadd.f32 %v487_v0, %v407_v6 }
 0x228   : > { %419 = vst.msk [vmem:[%s226_s16 + $0x18] sm:$0xff] %vm232_vm0, %v413_v8 }
 0x229   : > { %418 = vst.msk [vmem:[%s226_s16 + $0x10] sm:$0xff] %vm232_vm0, %v408_v7 }
 0x22a PF: > { %s15_s18 = sadd.s32 1, %s550_s18  }
 0x22b   : > { %p12_p4 = scmp.ge.s32.totalorder %s15_s18, 4  }
 0x22d   :  { %14 = sbr.rel (!%p12_p4) target bundleno = 1 (0x1), region = 70 }

// kernel: crossandoutput_forward.101
= control target key start
LH: loop header
LB: loop body
LE: loop exit
PB: predicated region body
PF: predicated region fallthrough
CT: control target
= control target key end

     0   :  { %s434_s12 = smov 0   ;;  %s466_s0 = inlined_call_operand.vmem [shape: f32[64,32], index: 0, kind: input, shape index: {}]   ;;  %s467_s1 = inlined_call_operand.vmem [shape: f32[32,64], index: 1, kind: input, shape index: {}]   ;;  %s468_s2 = inlined_call_operand.vmem [shape: f32[1,64], index: 2, kind: input, shape index: {}]   ;;  %s469_s3 = inlined_call_operand.vmem [shape: f32[64,64], index: 3, kind: output, shape index: {}]  }
   0x1 LB: > { %s348_s13 = sadd.s32 4294967295, %s412_s12   ;;  %p352_p0 = scmp.ge.s32.totalorder %s412_s12, 1  ;;  %s412_s12 = sphi %s434_s12, %s13_s12  }
   0x2   : > { %p138_p1 = scmp.lt.s32.totalorder %s412_s12, 3 }
   0x4   : > { %p139_p2 = pnand %p352_p0, %p138_p1 }
   0x5   : > { %v178_v0 = vld [vmem:[%s467_s1] sm:$0xff] (!%p139_p2)  ;;  %v179_v1 = vld [vmem:[%s467_s1 + $0x8] sm:$0xff] (!%p139_p2)  ;;  %v180_v2 = vld [vmem:[%s467_s1 + $0x10] sm:$0xff] (!%p139_p2)  ;;  %s353_s20 = sshll.u32 (!%p139_p2), %s348_s13, 2  ;;  %vm189_vm0 = vcmask (!%p139_p2), 261120   ;;  %vm287_vm1 = vcmask (!%p139_p2), 523264  }
   0x6   : > { %142 = sbr.rel (%p139_p2) target bundleno = 234 (0xea), region = 32  ;;  %v386_v3 = vpack.c.bf16 (!%p139_p2), %v179_v1, %v178_v0  ;;  %v181_v4 = vld [vmem:[%s467_s1 + $0x18] sm:$0xff] (!%p139_p2)  ;;  %p163_p3 = scmp.lt.s32.totalorder (!%p139_p2), %s353_s20, 7  ;;  %v357_v10 = vld [vmem:[%s468_s2] ss:$0 sm:$0xff] (!%p139_p2) }
   0x7   : > { %v390_v5 = vpack.c.bf16 (!%p139_p2), %v181_v4, %v180_v2 }
   0x8   : > { %387 = vmatprep.subr.bf16.mxu0 (!%p139_p2), %v386_v3  ;;  %394 = vmatprep.subr.bf16.mxu1 (!%p139_p2), %v386_v3 }
   0x9   : > { %389 = vmatpush3.bf16.msra.mxu0 (!%p139_p2), %v386_v3  ;;  %396 = vmatpush3.bf16.msra.mxu1 (!%p139_p2), %v386_v3 }
   0xa   : > { %391 = vmatprep.subr.bf16.mxu0 (!%p139_p2), %v390_v5  ;;  %395 = vmatprep.subr.bf16.mxu1 (!%p139_p2), %v390_v5 }
   0xd   : > { %s471_s20 = smov (!%p163_p3, %s353_s20), 7  ;;  %393 = vmatpush3.bf16.msra.mxu0 %v390_v5  ;;  %397 = vmatpush3.bf16.msra.mxu1 %v390_v5 }
   0xe   : > { %s354_s23 = sshll.u32 %s471_s20, 3 }
   0xf   : > { %s166_s26 = scalar_lea.vmem %s466_s0, %s354_s23  ;;  %s172_s4 = scalar_lea.vmem %s469_s3, %s354_s23 }
  0x10   : > { %v174_v6 = vld [vmem:[%s166_s26] sm:$0xff]  ;;  %v176_v7 = vld [vmem:[%s166_s26 + $0x10] sm:$0xff]  ;;  %v175_v8 = vld [vmem:[%s166_s26 + $0x8] sm:$0xff] }
  0x11   : > { %v177_v9 = vld [vmem:[%s166_s26 + $0x18] sm:$0xff]  ;;  %380 = vmatprep.mubr.msk.f32.mxu0 %vm189_vm0, %v174_v6  ;;  %383 = vmatprep.mubr.msk.f32.mxu1 %vm189_vm0, %v176_v7 }
  0x12   : > { %381 = vmatmul.mubr.msk.f32.vlgmr.msra.gmra.mrb[0].mxu0 %vm189_vm0, %v175_v8  ;;  %384 = vmatmul.mubr.msk.f32.vlgmr.msra.gmra.mrb[0].mxu1 %vm189_vm0, %v177_v9 }
  0xe5   : > { %v382_v11 = vpop.f32.mrb[0].mxu0  ;;  %v385_v12 = vpop.f32.mrb[0].mxu1 }
  0xe6   : > { %v268_v13 = vpop.f32.mrb[1].mxu0  ;;  %v278_v14 = vpop.f32.mrb[1].mxu1  ;;  %v274_v17 = vadd.f32 %v382_v11, %v357_v10  ;;  %v284_v18 = vadd.f32 %v385_v12, %v357_v10 }
  0xe7   : > { %v269_v15 = vadd.f32 %v357_v10, %v268_v13  ;;  %v279_v16 = vadd.f32 %v357_v10, %v278_v14 }
  0xe8   : > { %289 = vst.msk [vmem:[%s172_s4 + $0x8] sm:$0xff] %vm287_vm1, %v274_v17  ;;  %291 = vst.msk [vmem:[%s172_s4 + $0x18] sm:$0xff] %vm287_vm1, %v284_v18 }
  0xe9   : > { %288 = vst.msk [vmem:[%s172_s4] sm:$0xff] %vm287_vm1, %v269_v15  ;;  %290 = vst.msk [vmem:[%s172_s4 + $0x10] sm:$0xff] %vm287_vm1, %v279_v16 }
  0xea PF: > { %s13_s12 = sadd.s32 1, %s412_s12  }
  0xeb   : > { %p10_p4 = scmp.ge.s32.totalorder %s13_s12, 4  }
  0xed   :  { %12 = sbr.rel (!%p10_p4) target bundleno = 1 (0x1), region = 62 }

// kernel: crossandoutput_forward.104
= control target key start
LH: loop header
LB: loop body
LE: loop exit
PB: predicated region body
PF: predicated region fallthrough
CT: control target
= control target key end

     0   :  { %s610_s18 = smov 0   ;;  %s667_s0 = inlined_call_operand.vmem [shape: f32[64,32], index: 0, kind: input, shape index: {}]   ;;  %s668_s1 = inlined_call_operand.vmem [shape: f32[1,32], index: 1, kind: input, shape index: {}]   ;;  %s669_s2 = inlined_call_operand.vmem [shape: f32[1,32], index: 2, kind: input, shape index: {}]   ;;  %s670_s3 = inlined_call_operand.vmem [shape: f32[32,128], index: 3, kind: input, shape index: {}]   ;;  %s671_s4 = inlined_call_operand.vmem [shape: f32[1,128], index: 4, kind: input, shape index: {}]   ;;  %s672_s5 = inlined_call_operand.vmem [shape: f32[64,128], index: 5, kind: output, shape index: {}]  }
   0x1 LB: > { %s496_s19 = sadd.s32 4294967295, %s578_s18   ;;  %p500_p0 = scmp.ge.s32.totalorder %s578_s18, 1  ;;  %s578_s18 = sphi %s610_s18, %s15_s18  }
   0x2   : > { %p188_p1 = scmp.lt.s32.totalorder %s578_s18, 3 }
   0x4   : > { %p189_p2 = pnand %p500_p0, %p188_p1 }
   0x5   : > { %s501_s20 = sshll.u32 (!%p189_p2), %s496_s19, 2  ;;  %vm232_vm0 = vcmask (!%p189_p2), 261120   ;;  %v308_v28 = vld [vmem:[%s670_s3] sm:$0xff] (!%p189_p2)  ;;  %v309_v29 = vld [vmem:[%s670_s3 + $0x8] sm:$0xff] (!%p189_p2)  ;;  %v310_v30 = vld [vmem:[%s670_s3 + $0x10] sm:$0xff] (!%p189_p2) }
   0x6   : > { %192 = sbr.rel (%p189_p2) target bundleno = 571 (0x23b), region = 40  ;;  %p217_p3 = scmp.lt.s32.totalorder (!%p189_p2), %s501_s20, 7  ;;  %v536_v31 = vpack.c.bf16 (!%p189_p2), %v309_v29, %v308_v28  ;;  %v311_v32 = vld [vmem:[%s670_s3 + $0x18] sm:$0xff] (!%p189_p2)  ;;  %v505_v47 = vld [vmem:[%s668_s1] ss:$0 sm:$0xff] (!%p189_p2) }
   0x7   : > { %v540_v33 = vpack.c.bf16 (!%p189_p2), %v311_v32, %v310_v30  ;;  %v506_v49 = vld [vmem:[%s669_s2] ss:$0 sm:$0xff] (!%p189_p2) }
   0x8   : > { %537 = vmatprep.subr.bf16.mxu0 (!%p189_p2), %v536_v31  ;;  %544 = vmatprep.subr.bf16.mxu1 (!%p189_p2), %v536_v31 }
   0x9   : > { %539 = vmatpush3.bf16.msra.mxu0 (!%p189_p2), %v536_v31  ;;  %546 = vmatpush3.bf16.msra.mxu1 (!%p189_p2), %v536_v31 }
   0xa   : > { %541 = vmatprep.subr.bf16.mxu0 (!%p189_p2), %v540_v33  ;;  %545 = vmatprep.subr.bf16.mxu1 (!%p189_p2), %v540_v33 }
   0xd   : > { %s674_s20 = smov (!%p217_p3, %s501_s20), 7  ;;  %543 = vmatpush3.bf16.msra.mxu0 %v540_v33  ;;  %547 = vmatpush3.bf16.msra.mxu1 %v540_v33 }
   0xe   : > { %s502_s21 = sshll.u32 %s674_s20, 3 }
   0xf   : > { %s220_s24 = scalar_lea.vmem %s667_s0, %s502_s21  ;;  %s226_s16 = scalar_lea.vmem %s672_s5, %s502_s21 }
  0x10   : > { %v228_v0 = vld [vmem:[%s220_s24] sm:$0xff]  ;;  %v230_v1 = vld [vmem:[%s220_s24 + $0x10] sm:$0xff]  ;;  %v229_v2 = vld [vmem:[%s220_s24 + $0x8] sm:$0xff] }
  0x11   : > { %v233_v3 = vsel %vm232_vm0, %v228_v0, 0.0  ;;  %v239_v4 = vsel %vm232_vm0, %v230_v1, 0.0  ;;  %v231_v5 = vld [vmem:[%s220_s24 + $0x18] sm:$0xff]  ;;  %v236_v6 = vsel %vm232_vm0, %v229_v2, 0.0 }
  0x12   : > { %234 = vadd.xlane.f32.xlu0 %v233_v3  ;;  %240 = vadd.xlane.f32.xlu1 %v239_v4  ;;  %v242_v7 = vsel %vm232_vm0, %v231_v5, 0.0 }
  0x16   : > { %237 = vadd.xlane.f32.xlu0 %v236_v6  ;;  %243 = vadd.xlane.f32.xlu1 %v242_v7 }
  0x9f   : > { %v235_v8 = vpop.xlane.xlu0 %234  ;;  %v241_v9 = vpop.xlane.xlu1 %240 }
  0xa0   : > { %v246_v10 = vmul.f32 0.03125, %v235_v8  ;;  %v248_v11 = vmul.f32 0.03125, %v241_v9 }
  0xa2   : > { %v250_v12 = vsub.f32 %v228_v0, %v246_v10  ;;  %v252_v13 = vsub.f32 %v230_v1, %v248_v11  ;;  %v507_v0 = vld [vmem:[%s671_s4] ss:$0 sm:$0xff] }
  0xa3   : > { %v238_v14 = vpop.xlane.xlu0 %237  ;;  %v244_v15 = vpop.xlane.xlu1 %243 }
  0xa4   : > { %v247_v16 = vmul.f32 0.03125, %v238_v14  ;;  %v249_v17 = vmul.f32 0.03125, %v244_v15  ;;  %v254_v18 = vmul.f32 %v250_v12, %v250_v12  ;;  %v256_v19 = vmul.f32 %v252_v13, %v252_v13 }
  0xa6   : > { %v251_v20 = vsub.f32 %v229_v2, %v247_v16  ;;  %v253_v21 = vsub.f32 %v231_v5, %v249_v17  ;;  %v258_v22 = vsel %vm232_vm0, %v254_v18, 0.0  ;;  %v264_v23 = vsel %vm232_vm0, %v256_v19, 0.0 }
  0xa7   : > { %259 = vadd.xlane.f32.xlu0 %v258_v22 }
  0xa8   : > { %v255_v24 = vmul.f32 %v251_v20, %v251_v20  ;;  %v257_v25 = vmul.f32 %v253_v21, %v253_v21 }
  0xaa   : > { %v261_v26 = vsel %vm232_vm0, %v255_v24, 0.0  ;;  %v267_v27 = vsel %vm232_vm0, %v257_v25, 0.0 }
  0xab   : > { %265 = vadd.xlane.f32.xlu0 %v264_v23  ;;  %262 = vadd.xlane.f32.xlu1 %v261_v26 }
  0xaf   : > { %268 = vadd.xlane.f32.xlu1 %v267_v27 }
 0x134   : > { %v260_v34 = vpop.xlane.xlu0 %259 }
 0x135   : > { %v270_v35 = vmul.f32 0.03125, %v260_v34 }
 0x137   : > { %v274_v36 = vadd.f32 1e-05, %v270_v35 }
 0x138   : > { %v263_v37 = vpop.xlane.xlu1 %262  ;;  %v266_v38 = vpop.xlane.xlu0 %265 }
 0x139   : > { %556 = vrsqrt.f32 %v274_v36  ;;  %v271_v39 = vmul.f32 0.03125, %v263_v37  ;;  %v272_v40 = vmul.f32 0.03125, %v266_v38 }
 0x13b   : > { %v275_v41 = vadd.f32 1e-05, %v271_v39  ;;  %v276_v42 = vadd.f32 1e-05, %v272_v40 }
 0x13c   : > { %v269_v43 = vpop.xlane.xlu1 %268 }
 0x13d   : > { %558 = vrsqrt.f32 %v275_v41  ;;  %v273_v44 = vmul.f32 0.03125, %v269_v43 }
 0x13e   : > { %560 = vrsqrt.f32 %v276_v42 }
 0x13f   : > { %v277_v45 = vadd.f32 1e-05, %v273_v44 }
 0x141   : > { %562 = vrsqrt.f32 %v277_v45 }
 0x143   : > { %v557_v46 = vpop.eup %556 }
 0x144   : > { %v282_v48 = vmul.f32 %v557_v46, %v250_v12 }
 0x146   : > { %v293_v50 = vmul.f32 %v505_v47, %v282_v48 }
 0x147   : > { %v559_v51 = vpop.eup %558 }
 0x148   : > { %v561_v52 = vpop.eup %560  ;;  %v304_v53 = vadd.f32 %v506_v49, %v293_v50  ;;  %v283_v54 = vmul.f32 %v559_v51, %v251_v20 }
 0x149   : > { %v284_v55 = vmul.f32 %v561_v52, %v252_v13 }
 0x14a   : > { %530 = vmatprep.mubr.msk.f32.mxu0 %vm232_vm0, %v304_v53  ;;  %v294_v56 = vmul.f32 %v505_v47, %v283_v54 }
 0x14b   : > { %v563_v57 = vpop.eup %562  ;;  %v295_v58 = vmul.f32 %v505_v47, %v284_v55 }
 0x14c   : > { %v305_v59 = vadd.f32 %v506_v49, %v294_v56  ;;  %v285_v60 = vmul.f32 %v563_v57, %v253_v21 }
 0x14d   : > { %v306_v61 = vadd.f32 %v506_v49, %v295_v58 }
 0x14e   : > { %531 = vmatmul.mubr.msk.f32.vlgmr.msra.gmra.mrb[0].mxu0 %vm232_vm0, %v305_v59  ;;  %v296_v62 = vmul.f32 %v505_v47, %v285_v60 }
 0x14f   : > { %533 = vmatprep.mubr.msk.f32.mxu1 %vm232_vm0, %v306_v61 }
 0x150   : > { %v307_v63 = vadd.f32 %v506_v49, %v296_v62 }
 0x152   : > { %534 = vmatmul.mubr.msk.f32.vlgmr.msra.gmra.mrb[0].mxu1 %vm232_vm0, %v307_v63 }
 0x221   : > { %v532_v1 = vpop.f32.mrb[0].mxu0 }
 0x222   : > { %v403_v2 = vadd.f32 %v532_v1, %v507_v0  ;;  %v397_v3 = vpop.f32.mrb[1].mxu0 }
 0x223   : > { %v398_v4 = vadd.f32 %v507_v0, %v397_v3 }
 0x224   : > { %v421_v5 = vmul.f32 0.70710677, %v403_v2  ;;  %v417_v18 = vmul.f32 0.5, %v403_v2 }
 0x225   : > { %v420_v6 = vmul.f32 0.70710677, %v398_v4  ;;  %v535_v7 = vpop.f32.mrb[0].mxu1  ;;  %v416_v16 = vmul.f32 0.5, %v398_v4 }
 0x226   : > { %564 = verf.f32 %v421_v5  ;;  %v413_v8 = vadd.f32 %v535_v7, %v507_v0  ;;  %v407_v9 = vpop.f32.mrb[1].mxu1 }
 0x227   : > { %566 = verf.f32 %v420_v6  ;;  %v408_v10 = vadd.f32 %v507_v0, %v407_v9 }
 0x228   : > { %v423_v11 = vmul.f32 0.70710677, %v413_v8  ;;  %v419_v26 = vmul.f32 0.5, %v413_v8 }
 0x229   : > { %v422_v12 = vmul.f32 0.70710677, %v408_v10  ;;  %v418_v24 = vmul.f32 0.5, %v408_v10 }
 0x22a   : > { %568 = verf.f32 %v423_v11 }
 0x22b   : > { %570 = verf.f32 %v422_v12 }
 0x230   : > { %v565_v13 = vpop.eup %564 }
 0x231   : > { %v567_v14 = vpop.eup %566  ;;  %v429_v15 = vadd.f32 1.0, %v565_v13 }
 0x232   : > { %v428_v17 = vadd.f32 1.0, %v567_v14 }
 0x233   : > { %v433_v22 = vmul.f32 %v429_v15, %v417_v18 }
 0x234   : > { %v569_v19 = vpop.eup %568  ;;  %v432_v20 = vmul.f32 %v428_v17, %v416_v16 }
 0x235   : > { %v571_v21 = vpop.eup %570  ;;  %v431_v23 = vadd.f32 1.0, %v569_v19  ;;  %437 = vst [vmem:[%s226_s16 + $0x8] sm:$0xff] %v433_v22 }
 0x236   : > { %436 = vst [vmem:[%s226_s16] sm:$0xff] %v432_v20  ;;  %v430_v25 = vadd.f32 1.0, %v571_v21 }
 0x237   : > { %v435_v28 = vmul.f32 %v431_v23, %v419_v26 }
 0x238   : > { %v434_v27 = vmul.f32 %v430_v25, %v418_v24 }
 0x239   : > { %439 = vst [vmem:[%s226_s16 + $0x18] sm:$0xff] %v435_v28 }
 0x23a   : > { %438 = vst [vmem:[%s226_s16 + $0x10] sm:$0xff] %v434_v27 }
 0x23b PF: > { %s15_s18 = sadd.s32 1, %s578_s18  }
 0x23c   : > { %p12_p4 = scmp.ge.s32.totalorder %s15_s18, 4  }
 0x23e   :  { %14 = sbr.rel (!%p12_p4) target bundleno = 1 (0x1), region = 70 }

// kernel: crossandoutput_forward.105
= control target key start
LH: loop header
LB: loop body
LE: loop exit
PB: predicated region body
PF: predicated region fallthrough
CT: control target
= control target key end

     0   :  { %s577_s15 = smov 0   ;;  %s659_s0 = inlined_call_operand.vmem [shape: f32[64,128], index: 0, kind: input, shape index: {}]   ;;  %s660_s1 = inlined_call_operand.vmem [shape: f32[128,32], index: 1, kind: input, shape index: {}]   ;;  %s661_s2 = inlined_call_operand.vmem [shape: f32[1,32], index: 2, kind: input, shape index: {}]   ;;  %s662_s3 = inlined_call_operand.vmem [shape: f32[64,32], index: 3, kind: input, shape index: {}]   ;;  %s663_s4 = inlined_call_operand.vmem [shape: f32[64,32], index: 4, kind: output, shape index: {}]  }
   0x1 LB: > { %s416_s16 = sadd.s32 4294967295, %s550_s15   ;;  %p420_p0 = scmp.ge.s32.totalorder %s550_s15, 1  ;;  %s550_s15 = sphi %s577_s15, %s14_s15  }
   0x2   : > { %p174_p1 = scmp.lt.s32.totalorder %s550_s15, 3 }
   0x4   : > { %p175_p2 = pnand %p420_p0, %p174_p1 }
   0x5   : > { %v227_v0 = vld [vmem:[%s660_s1] sm:$0xff] (!%p175_p2)  ;;  %v228_v1 = vld [vmem:[%s660_s1 + $0x8] sm:$0xff] (!%p175_p2)  ;;  %v229_v2 = vld [vmem:[%s660_s1 + $0x10] sm:$0xff] (!%p175_p2)  ;;  %s421_s23 = sshll.u32 (!%p175_p2), %s416_s16, 2  ;;  %vm343_vm0 = vcmask (!%p175_p2), 261120  }
   0x6   : > { %178 = sbr.rel (%p175_p2) target bundleno = 259 (0x103), region = 36  ;;  %v488_v3 = vpack.c.bf16 (!%p175_p2), %v228_v1, %v227_v0  ;;  %v230_v4 = vld [vmem:[%s660_s1 + $0x18] sm:$0xff] (!%p175_p2)  ;;  %p206_p3 = scmp.lt.s32.totalorder (!%p175_p2), %s421_s23, 7  ;;  %v231_v6 = vld [vmem:[%s660_s1 + $0x20] sm:$0xff] (!%p175_p2)  ;;  %v232_v7 = vld [vmem:[%s660_s1 + $0x28] sm:$0xff] (!%p175_p2) }
   0x7   : > { %v492_v5 = vpack.c.bf16 (!%p175_p2), %v230_v4, %v229_v2  ;;  %v496_v8 = vpack.c.bf16 (!%p175_p2), %v232_v7, %v231_v6  ;;  %v233_v9 = vld [vmem:[%s660_s1 + $0x30] sm:$0xff] (!%p175_p2)  ;;  %v234_v10 = vld [vmem:[%s660_s1 + $0x38] sm:$0xff] (!%p175_p2)  ;;  %v235_v14 = vld [vmem:[%s660_s1 + $0x40] sm:$0xff] (!%p175_p2) }
   0x8   : > { %489 = vmatprep.subr.bf16.mxu0 (!%p175_p2), %v488_v3  ;;  %520 = vmatprep.subr.bf16.mxu1 (!%p175_p2), %v488_v3  ;;  %v500_v13 = vpack.c.bf16 (!%p175_p2), %v234_v10, %v233_v9  ;;  %v236_v15 = vld [vmem:[%s660_s1 + $0x48] sm:$0xff] (!%p175_p2)  ;;  %v237_v17 = vld [vmem:[%s660_s1 + $0x50] sm:$0xff] (!%p175_p2)  ;;  %v238_v18 = vld [vmem:[%s660_s1 + $0x58] sm:$0xff] (!%p175_p2) }
   0x9   : > { %491 = vmatpush3.bf16.msra.mxu0 (!%p175_p2), %v488_v3  ;;  %528 = vmatpush3.bf16.msra.mxu1 (!%p175_p2), %v488_v3  ;;  %v504_v16 = vpack.c.bf16 (!%p175_p2), %v236_v15, %v235_v14  ;;  %v508_v19 = vpack.c.bf16 (!%p175_p2), %v238_v18, %v237_v17  ;;  %v239_v20 = vld [vmem:[%s660_s1 + $0x60] sm:$0xff] (!%p175_p2)  ;;  %v240_v21 = vld [vmem:[%s660_s1 + $0x68] sm:$0xff] (!%p175_p2)  ;;  %v241_v23 = vld [vmem:[%s660_s1 + $0x70] sm:$0xff] (!%p175_p2) }
   0xa   : > { %493 = vmatprep.subr.bf16.mxu0 (!%p175_p2), %v492_v5  ;;  %521 = vmatprep.subr.bf16.mxu1 (!%p175_p2), %v492_v5  ;;  %v512_v22 = vpack.c.bf16 (!%p175_p2), %v240_v21, %v239_v20  ;;  %v242_v24 = vld [vmem:[%s660_s1 + $0x78] sm:$0xff] (!%p175_p2)  ;;  %v427_v28 = vld [vmem:[%s661_s2] ss:$0 sm:$0xff] (!%p175_p2) }
   0xb   : > { %v516_v25 = vpack.c.bf16 (!%p175_p2), %v242_v24, %v241_v23 }
   0xd   : > { %s665_s23 = smov (!%p206_p3, %s421_s23), 7  ;;  %495 = vmatpush3.bf16.msra.mxu0 %v492_v5  ;;  %529 = vmatpush3.bf16.msra.mxu1 %v492_v5 }
   0xe   : > { %s603_s30 = sshll.u32 %s665_s23, 3  ;;  %497 = vmatprep.subr.bf16.mxu0 %v496_v8  ;;  %522 = vmatprep.subr.bf16.mxu1 %v496_v8 }
   0xf   : > { %s615_s11 = scalar_lea.vmem %s659_s0, %s603_s30  ;;  %s215_s6 = scalar_lea.vmem %s662_s3, %s603_s30 }
  0x10   : > { %v223_v11 = vld [vmem:[%s615_s11] sm:$0xff]  ;;  %v225_v12 = vld [vmem:[%s615_s11 + $0x10] sm:$0xff]  ;;  %v224_v26 = vld [vmem:[%s615_s11 + $0x8] sm:$0xff] }
  0x11   : > { %482 = vmatprep.mubr.f32.mxu0 %v223_v11  ;;  %485 = vmatprep.mubr.f32.mxu1 %v225_v12  ;;  %v226_v27 = vld [vmem:[%s615_s11 + $0x18] sm:$0xff]  ;;  %v336_v30 = vld [vmem:[%s215_s6 + $0x8] sm:$0xff]  ;;  %v335_v35 = vld [vmem:[%s215_s6] sm:$0xff]  ;;  %s221_s11 = scalar_lea.vmem %s663_s4, %s603_s30 }
  0x12   : > { %499 = vmatpush3.bf16.msra.mxu0 %v496_v8  ;;  %530 = vmatpush3.bf16.msra.mxu1 %v496_v8  ;;  %v338_v32 = vld [vmem:[%s215_s6 + $0x18] sm:$0xff]  ;;  %v337_v38 = vld [vmem:[%s215_s6 + $0x10] sm:$0xff] }
  0x13   : > { %501 = vmatprep.subr.bf16.mxu0 %v500_v13  ;;  %523 = vmatprep.subr.bf16.mxu1 %v500_v13 }
  0x16   : > { %503 = vmatpush3.bf16.msra.mxu0 %v500_v13  ;;  %531 = vmatpush3.bf16.msra.mxu1 %v500_v13 }
  0x17   : > { %505 = vmatprep.subr.bf16.mxu0 %v504_v16  ;;  %524 = vmatprep.subr.bf16.mxu1 %v504_v16 }
  0x1a   : > { %507 = vmatpush3.bf16.msra.mxu0 %v504_v16  ;;  %532 = vmatpush3.bf16.msra.mxu1 %v504_v16 }
  0x1b   : > { %509 = vmatprep.subr.bf16.mxu0 %v508_v19  ;;  %525 = vmatprep.subr.bf16.mxu1 %v508_v19 }
  0x1e   : > { %511 = vmatpush3.bf16.msra.mxu0 %v508_v19  ;;  %533 = vmatpush3.bf16.msra.mxu1 %v508_v19 }
  0x1f   : > { %513 = vmatprep.subr.bf16.mxu0 %v512_v22  ;;  %526 = vmatprep.subr.bf16.mxu1 %v512_v22 }
  0x22   : > { %515 = vmatpush3.bf16.msra.mxu0 %v512_v22  ;;  %534 = vmatpush3.bf16.msra.mxu1 %v512_v22 }
  0x23   : > { %517 = vmatprep.subr.bf16.mxu0 %v516_v25  ;;  %527 = vmatprep.subr.bf16.mxu1 %v516_v25 }
  0x26   : > { %519 = vmatpush3.bf16.msra.mxu0 %v516_v25  ;;  %535 = vmatpush3.bf16.msra.mxu1 %v516_v25 }
  0x29   : > { %483 = vmatmul.mubr.f32.vlgmr.msra.gmra.mrb[0].mxu0 %v224_v26  ;;  %486 = vmatmul.mubr.f32.vlgmr.msra.gmra.mrb[0].mxu1 %v226_v27 }
  0xfc   : > { %v484_v29 = vpop.f32.mrb[0].mxu0  ;;  %v487_v31 = vpop.f32.mrb[0].mxu1 }
  0xfd   : > { %v322_v33 = vadd.f32 %v484_v29, %v427_v28  ;;  %v316_v34 = vpop.f32.mrb[1].mxu0  ;;  %v332_v36 = vadd.f32 %v487_v31, %v427_v28  ;;  %v326_v37 = vpop.f32.mrb[1].mxu1 }
  0xfe   : > { %v317_v39 = vadd.f32 %v427_v28, %v316_v34  ;;  %v327_v40 = vadd.f32 %v427_v28, %v326_v37 }
  0xff   : > { %v340_v41 = vadd.f32 %v336_v30, %v322_v33  ;;  %v342_v42 = vadd.f32 %v338_v32, %v332_v36 }
 0x100   : > { %v339_v43 = vadd.f32 %v335_v35, %v317_v39  ;;  %v341_v44 = vadd.f32 %v337_v38, %v327_v40 }
 0x101   : > { %345 = vst.msk [vmem:[%s221_s11 + $0x8] sm:$0xff] %vm343_vm0, %v340_v41  ;;  %347 = vst.msk [vmem:[%s221_s11 + $0x18] sm:$0xff] %vm343_vm0, %v342_v42 }
 0x102   : > { %344 = vst.msk [vmem:[%s221_s11] sm:$0xff] %vm343_vm0, %v339_v43  ;;  %346 = vst.msk [vmem:[%s221_s11 + $0x10] sm:$0xff] %vm343_vm0, %v341_v44 }
 0x103 PF: > { %s14_s15 = sadd.s32 1, %s550_s15  }
 0x104   : > { %p11_p4 = scmp.ge.s32.totalorder %s14_s15, 4  }
 0x106   :  { %13 = sbr.rel (!%p11_p4) target bundleno = 1 (0x1), region = 69 }

// kernel: crossandoutput_forward.124
= control target key start
LH: loop header
LB: loop body
LE: loop exit
PB: predicated region body
PF: predicated region fallthrough
CT: control target
= control target key end

     0   :  { %s705_s18 = smov 0   ;;  %s822_s0 = inlined_call_operand.vmem [shape: f32[128,32], index: 0, kind: input, shape index: {}]   ;;  %s823_s1 = inlined_call_operand.vmem [shape: f32[1,32], index: 1, kind: input, shape index: {}]   ;;  %s824_s2 = inlined_call_operand.vmem [shape: f32[1,32], index: 2, kind: input, shape index: {}]   ;;  %s825_s3 = inlined_call_operand.vmem [shape: f32[32,96], index: 3, kind: input, shape index: {}]   ;;  %s826_s4 = inlined_call_operand.vmem [shape: f32[1,96], index: 4, kind: input, shape index: {}]   ;;  %s827_s5 = inlined_call_operand.vmem [shape: f32[128,96], index: 5, kind: output, shape index: {}]  }
   0x1 LB: > { %s577_s19 = sadd.s32 4294967295, %s673_s18   ;;  %p581_p0 = scmp.ge.s32.totalorder %s673_s18, 1  ;;  %s673_s18 = sphi %s705_s18, %s15_s18  }
   0x2   : > { %p188_p1 = scmp.lt.s32.totalorder %s673_s18, 3 }
   0x4   : > { %p189_p2 = pnand %p581_p0, %p188_p1 }
   0x5   : > { %s582_s20 = sshll.u32 (!%p189_p2), %s577_s19, 3  ;;  %vm236_vm0 = vcmask (!%p189_p2), 261120   ;;  %v372_v56 = vld [vmem:[%s825_s3] sm:$0xff] (!%p189_p2)  ;;  %v373_v57 = vld [vmem:[%s825_s3 + $0x8] sm:$0xff] (!%p189_p2)  ;;  %v374_v59 = vld [vmem:[%s825_s3 + $0x10] sm:$0xff] (!%p189_p2)  ;;  %vm512_vm1 = vcmask (!%p189_p2), 785408  }
   0x6   : > { %192 = sbr.rel (%p189_p2) target bundleno = 562 (0x232), region = 40  ;;  %p217_p3 = scmp.lt.s32.totalorder (!%p189_p2), %s582_s20, 15  ;;  %v631_v58 = vpack.c.bf16 (!%p189_p2), %v373_v57, %v372_v56  ;;  %v375_v60 = vld [vmem:[%s825_s3 + $0x18] sm:$0xff] (!%p189_p2) }
   0x7   : > { %v635_v61 = vpack.c.bf16 (!%p189_p2), %v375_v60, %v374_v59 }
   0x8   : > { %632 = vmatprep.subr.bf16.mxu0 (!%p189_p2), %v631_v58  ;;  %639 = vmatprep.subr.bf16.mxu1 (!%p189_p2), %v631_v58 }
   0x9   : > { %634 = vmatpush3.bf16.msra.mxu0 (!%p189_p2), %v631_v58  ;;  %641 = vmatpush3.bf16.msra.mxu1 (!%p189_p2), %v631_v58 }
   0xa   : > { %636 = vmatprep.subr.bf16.mxu0 (!%p189_p2), %v635_v61  ;;  %640 = vmatprep.subr.bf16.mxu1 (!%p189_p2), %v635_v61 }
   0xd   : > { %s829_s20 = smov (!%p217_p3, %s582_s20), 15  ;;  %638 = vmatpush3.bf16.msra.mxu0 %v635_v61  ;;  %642 = vmatpush3.bf16.msra.mxu1 %v635_v61 }
   0xe   : > { %s583_s21 = sshll.u32 %s829_s20, 3 }
   0xf   : > { %s220_s24 = scalar_lea.vmem %s822_s0, %s583_s21  ;;  %s226_s16 = scalar_lea.vmem %s827_s5, %s583_s21 }
  0x10   : > { %v228_v0 = vld [vmem:[%s220_s24] sm:$0xff]  ;;  %v229_v1 = vld [vmem:[%s220_s24 + $0x8] sm:$0xff]  ;;  %v230_v8 = vld [vmem:[%s220_s24 + $0x10] sm:$0xff] }
  0x11   : > { %v232_v2 = vld [vmem:[%s220_s24 + $0x20] sm:$0xff]  ;;  %v237_v3 = vsel %vm236_vm0, %v228_v0, 0.0  ;;  %v240_v4 = vsel %vm236_vm0, %v229_v1, 0.0  ;;  %v233_v5 = vld [vmem:[%s220_s24 + $0x28] sm:$0xff]  ;;  %v234_v9 = vld [vmem:[%s220_s24 + $0x30] sm:$0xff]  ;;  %v243_v10 = vsel %vm236_vm0, %v230_v8, 0.0 }
  0x12   : > { %238 = vadd.xlane.f32.xlu0 %v237_v3  ;;  %241 = vadd.xlane.f32.xlu1 %v240_v4  ;;  %v249_v6 = vsel %vm236_vm0, %v232_v2, 0.0  ;;  %v252_v7 = vsel %vm236_vm0, %v233_v5, 0.0  ;;  %v255_v11 = vsel %vm236_vm0, %v234_v9, 0.0  ;;  %v231_v12 = vld [vmem:[%s220_s24 + $0x18] sm:$0xff] }
  0x13   : > { %v235_v13 = vld [vmem:[%s220_s24 + $0x38] sm:$0xff]  ;;  %v246_v14 = vsel %vm236_vm0, %v231_v12, 0.0 }
  0x14   : > { %v258_v15 = vsel %vm236_vm0, %v235_v13, 0.0 }
  0x16   : > { %250 = vadd.xlane.f32.xlu0 %v249_v6  ;;  %253 = vadd.xlane.f32.xlu1 %v252_v7 }
  0x1a   : > { %244 = vadd.xlane.f32.xlu0 %v243_v10  ;;  %256 = vadd.xlane.f32.xlu1 %v255_v11 }
  0x1e   : > { %247 = vadd.xlane.f32.xlu0 %v246_v14  ;;  %259 = vadd.xlane.f32.xlu1 %v258_v15 }
  0x9f   : > { %v239_v16 = vpop.xlane.xlu0 %238  ;;  %v242_v17 = vpop.xlane.xlu1 %241 }
  0xa0   : > { %v262_v18 = vmul.f32 0.03125, %v239_v16  ;;  %v263_v19 = vmul.f32 0.03125, %v242_v17 }
  0xa2   : > { %v729_v20 = vsub.f32 %v228_v0, %v262_v18  ;;  %v731_v21 = vsub.f32 %v229_v1, %v263_v19 }
  0xa3   : > { %v251_v22 = vpop.xlane.xlu0 %250  ;;  %v254_v23 = vpop.xlane.xlu1 %253 }
  0xa4   : > { %v266_v24 = vmul.f32 0.03125, %v251_v22  ;;  %v267_v25 = vmul.f32 0.03125, %v254_v23  ;;  %v278_v26 = vmul.f32 %v729_v20, %v729_v20  ;;  %v279_v27 = vmul.f32 %v731_v21, %v731_v21  ;;  %v586_v22 = vld [vmem:[%s823_s1] ss:$0 sm:$0xff] }
  0xa6   : > { %v737_v28 = vsub.f32 %v232_v2, %v266_v24  ;;  %v739_v29 = vsub.f32 %v233_v5, %v267_v25  ;;  %v286_v30 = vsel %vm236_vm0, %v278_v26, 0.0  ;;  %v289_v33 = vsel %vm236_vm0, %v279_v27, 0.0  ;;  %v587_v26 = vld [vmem:[%s824_s2] ss:$0 sm:$0xff] }
  0xa7   : > { %287 = vadd.xlane.f32.xlu0 %v286_v30  ;;  %v245_v31 = vpop.xlane.xlu0 %244  ;;  %v257_v32 = vpop.xlane.xlu1 %256 }
  0xa8   : > { %v264_v34 = vmul.f32 0.03125, %v245_v31  ;;  %v268_v35 = vmul.f32 0.03125, %v257_v32  ;;  %v282_v36 = vmul.f32 %v737_v28, %v737_v28  ;;  %v283_v37 = vmul.f32 %v739_v29, %v739_v29 }
  0xaa   : > { %v747_v38 = vsub.f32 %v230_v8, %v264_v34  ;;  %v749_v39 = vsub.f32 %v234_v9, %v268_v35  ;;  %v298_v40 = vsel %vm236_vm0, %v282_v36, 0.0  ;;  %v301_v43 = vsel %vm236_vm0, %v283_v37, 0.0 }
  0xab   : > { %290 = vadd.xlane.f32.xlu0 %v289_v33  ;;  %299 = vadd.xlane.f32.xlu1 %v298_v40  ;;  %v248_v41 = vpop.xlane.xlu0 %247  ;;  %v260_v42 = vpop.xlane.xlu1 %259 }
  0xac   : > { %v265_v44 = vmul.f32 0.03125, %v248_v41  ;;  %v269_v45 = vmul.f32 0.03125, %v260_v42  ;;  %v280_v46 = vmul.f32 %v747_v38, %v747_v38  ;;  %v284_v47 = vmul.f32 %v749_v39, %v749_v39 }
  0xae   : > { %v757_v48 = vsub.f32 %v231_v12, %v265_v44  ;;  %v759_v49 = vsub.f32 %v235_v13, %v269_v45  ;;  %v292_v50 = vsel %vm236_vm0, %v280_v46, 0.0  ;;  %v304_v51 = vsel %vm236_vm0, %v284_v47, 0.0 }
  0xaf   : > { %302 = vadd.xlane.f32.xlu1 %v301_v43  ;;  %293 = vadd.xlane.f32.xlu0 %v292_v50 }
  0xb0   : > { %v281_v52 = vmul.f32 %v757_v48, %v757_v48  ;;  %v285_v53 = vmul.f32 %v759_v49, %v759_v49 }
  0xb2   : > { %v295_v54 = vsel %vm236_vm0, %v281_v52, 0.0  ;;  %v307_v55 = vsel %vm236_vm0, %v285_v53, 0.0 }
  0xb3   : > { %305 = vadd.xlane.f32.xlu1 %v304_v51  ;;  %296 = vadd.xlane.f32.xlu0 %v295_v54 }
  0xb7   : > { %308 = vadd.xlane.f32.xlu1 %v307_v55 }
 0x134   : > { %v288_v62 = vpop.xlane.xlu0 %287 }
 0x135   : > { %v310_v63 = vmul.f32 0.03125, %v288_v62 }
 0x137   : > { %v318_v0 = vadd.f32 1e-05, %v310_v63 }
 0x138   : > { %v300_v1 = vpop.xlane.xlu1 %299  ;;  %v291_v2 = vpop.xlane.xlu0 %290 }
 0x139   : > { %651 = vrsqrt.f32 %v318_v0  ;;  %v314_v3 = vmul.f32 0.03125, %v300_v1  ;;  %v311_v4 = vmul.f32 0.03125, %v291_v2 }
 0x13b   : > { %v322_v5 = vadd.f32 1e-05, %v314_v3  ;;  %v319_v6 = vadd.f32 1e-05, %v311_v4 }
 0x13c   : > { %v303_v7 = vpop.xlane.xlu1 %302  ;;  %v294_v8 = vpop.xlane.xlu0 %293 }
 0x13d   : > { %653 = vrsqrt.f32 %v322_v5  ;;  %v315_v9 = vmul.f32 0.03125, %v303_v7  ;;  %v312_v10 = vmul.f32 0.03125, %v294_v8 }
 0x13e   : > { %655 = vrsqrt.f32 %v319_v6 }
 0x13f   : > { %v323_v11 = vadd.f32 1e-05, %v315_v9  ;;  %v320_v12 = vadd.f32 1e-05, %v312_v10 }
 0x140   : > { %v306_v13 = vpop.xlane.xlu1 %305  ;;  %v297_v14 = vpop.xlane.xlu0 %296 }
 0x141   : > { %657 = vrsqrt.f32 %v323_v11  ;;  %v316_v15 = vmul.f32 0.03125, %v306_v13  ;;  %v313_v16 = vmul.f32 0.03125, %v297_v14 }
 0x142   : > { %659 = vrsqrt.f32 %v320_v12 }
 0x143   : > { %v652_v17 = vpop.eup %651  ;;  %v324_v18 = vadd.f32 1e-05, %v316_v15  ;;  %v321_v19 = vadd.f32 1e-05, %v313_v16 }
 0x144   : > { %v309_v23 = vpop.xlane.xlu1 %308  ;;  %v334_v24 = vmul.f32 %v652_v17, %v729_v20 }
 0x145   : > { %661 = vrsqrt.f32 %v324_v18  ;;  %v317_v25 = vmul.f32 0.03125, %v309_v23 }
 0x146   : > { %663 = vrsqrt.f32 %v321_v19  ;;  %v349_v27 = vmul.f32 %v586_v22, %v334_v24 }
 0x147   : > { %v654_v30 = vpop.eup %653  ;;  %v325_v31 = vadd.f32 1e-05, %v317_v25 }
 0x148   : > { %v656_v32 = vpop.eup %655  ;;  %v364_v33 = vadd.f32 %v587_v26, %v349_v27  ;;  %v338_v34 = vmul.f32 %v654_v30, %v737_v28 }
 0x149   : > { %665 = vrsqrt.f32 %v325_v31  ;;  %v335_v35 = vmul.f32 %v656_v32, %v731_v21 }
 0x14a   : > { %619 = vmatprep.mubr.msk.f32.mxu0 %vm236_vm0, %v364_v33  ;;  %v353_v20 = vmul.f32 %v586_v22, %v338_v34 }
 0x14b   : > { %v658_v36 = vpop.eup %657  ;;  %v350_v37 = vmul.f32 %v586_v22, %v335_v35 }
 0x14c   : > { %v660_v40 = vpop.eup %659  ;;  %v368_v41 = vadd.f32 %v587_v26, %v353_v20  ;;  %v339_v42 = vmul.f32 %v658_v36, %v739_v29 }
 0x14d   : > { %v365_v43 = vadd.f32 %v587_v26, %v350_v37  ;;  %v336_v44 = vmul.f32 %v660_v40, %v747_v38 }
 0x14e   : > { %625 = vmatprep.mubr.msk.f32.mxu1 %vm236_vm0, %v368_v41  ;;  %v354_v45 = vmul.f32 %v586_v22, %v339_v42 }
 0x14f   : > { %v662_v46 = vpop.eup %661  ;;  %620 = vmatmul.mubr.msk.f32.vlgmr.msra.gmra.mrb[0].mxu0 %vm236_vm0, %v365_v43  ;;  %v351_v28 = vmul.f32 %v586_v22, %v336_v44 }
 0x150   : > { %v664_v21 = vpop.eup %663  ;;  %v369_v47 = vadd.f32 %v587_v26, %v354_v45  ;;  %v340_v50 = vmul.f32 %v662_v46, %v749_v39 }
 0x151   : > { %v366_v51 = vadd.f32 %v587_v26, %v351_v28  ;;  %v337_v52 = vmul.f32 %v664_v21, %v757_v48  ;;  %v588_v48 = vld [vmem:[%s826_s4] ss:$0 sm:$0xff] }
 0x152   : > { %626 = vmatmul.mubr.msk.f32.vlgmr.msra.gmra.mrb[0].mxu1 %vm236_vm0, %v369_v47  ;;  %v355_v29 = vmul.f32 %v586_v22, %v340_v50 }
 0x153   : > { %v666_v53 = vpop.eup %665  ;;  %622 = vmatprep.mubr.msk.f32.mxu0 %vm236_vm0, %v366_v51  ;;  %v352_v38 = vmul.f32 %v586_v22, %v337_v52 }
 0x154   : > { %v370_v54 = vadd.f32 %v587_v26, %v355_v29  ;;  %v341_v55 = vmul.f32 %v666_v53, %v759_v49 }
 0x155   : > { %v367_v56 = vadd.f32 %v587_v26, %v352_v38 }
 0x156   : > { %628 = vmatprep.mubr.msk.f32.mxu1 %vm236_vm0, %v370_v54  ;;  %v356_v57 = vmul.f32 %v586_v22, %v341_v55 }
 0x157   : > { %623 = vmatmul.mubr.msk.f32.gmra.mrb[2].mxu0 %vm236_vm0, %v367_v56 }
 0x158   : > { %v371_v39 = vadd.f32 %v587_v26, %v356_v57 }
 0x15a   : > { %629 = vmatmul.mubr.msk.f32.gmra.mrb[2].mxu1 %vm236_vm0, %v371_v39 }
 0x222   : > { %v621_v58 = vpop.f32.mrb[0].mxu0 }
 0x223   : > { %v479_v49 = vadd.f32 %v621_v58, %v588_v48  ;;  %v473_v59 = vpop.f32.mrb[1].mxu0 }
 0x224   : > { %v474_v60 = vadd.f32 %v588_v48, %v473_v59 }
 0x225   : > { %514 = vst.msk [vmem:[%s226_s16 + $0x8] sm:$0xff] %vm512_vm1, %v479_v49  ;;  %v627_v61 = vpop.f32.mrb[0].mxu1 }
 0x226   : > { %513 = vst.msk [vmem:[%s226_s16] sm:$0xff] %vm512_vm1, %v474_v60  ;;  %v499_v62 = vadd.f32 %v627_v61, %v588_v48  ;;  %v493_v63 = vpop.f32.mrb[1].mxu1 }
 0x227   : > { %v494_v0 = vadd.f32 %v588_v48, %v493_v63 }
 0x228   : > { %518 = vst.msk [vmem:[%s226_s16 + $0x28] sm:$0xff] %vm512_vm1, %v499_v62 }
 0x229   : > { %517 = vst.msk [vmem:[%s226_s16 + $0x20] sm:$0xff] %vm512_vm1, %v494_v0 }
 0x22a   : > { %v624_v1 = vpop.f32.mrb[2].mxu0 }
 0x22b   : > { %v489_v2 = vadd.f32 %v624_v1, %v588_v48  ;;  %v483_v3 = vpop.f32.mrb[3].mxu0 }
 0x22c   : > { %v484_v4 = vadd.f32 %v588_v48, %v483_v3 }
 0x22d   : > { %516 = vst.msk [vmem:[%s226_s16 + $0x18] sm:$0xff] %vm512_vm1, %v489_v2  ;;  %v630_v5 = vpop.f32.mrb[2].mxu1 }
 0x22e   : > { %515 = vst.msk [vmem:[%s226_s16 + $0x10] sm:$0xff] %vm512_vm1, %v484_v4  ;;  %v509_v6 = vadd.f32 %v630_v5, %v588_v48  ;;  %v503_v7 = vpop.f32.mrb[3].mxu1 }
 0x22f   : > { %v504_v8 = vadd.f32 %v588_v48, %v503_v7 }
 0x230   : > { %520 = vst.msk [vmem:[%s226_s16 + $0x38] sm:$0xff] %vm512_vm1, %v509_v6 }
 0x231   : > { %519 = vst.msk [vmem:[%s226_s16 + $0x30] sm:$0xff] %vm512_vm1, %v504_v8 }
 0x232 PF: > { %s15_s18 = sadd.s32 1, %s673_s18  }
 0x233   : > { %p12_p4 = scmp.ge.s32.totalorder %s15_s18, 4  }
 0x235   :  { %14 = sbr.rel (!%p12_p4) target bundleno = 1 (0x1), region = 70 }

// kernel: crossandoutput_forward.123
= control target key start
LH: loop header
LB: loop body
LE: loop exit
PB: predicated region body
PF: predicated region fallthrough
CT: control target
= control target key end

     0   :  { %s726_s21 = smov 0   ;;  %s826_s0 = inlined_call_operand.vmem [shape: f32[64,128], index: 0, kind: input, shape index: {}]   ;;  %s827_s1 = inlined_call_operand.vmem [shape: f32[128,32], index: 1, kind: input, shape index: {}]   ;;  %s828_s2 = inlined_call_operand.vmem [shape: f32[1,32], index: 2, kind: input, shape index: {}]   ;;  %s829_s3 = inlined_call_operand.vmem [shape: f32[64,32], index: 3, kind: input, shape index: {}]   ;;  %s830_s4 = inlined_call_operand.vmem [shape: f32[1,32], index: 4, kind: input, shape index: {}]   ;;  %s831_s5 = inlined_call_operand.vmem [shape: f32[1,32], index: 5, kind: input, shape index: {}]   ;;  %s832_s6 = inlined_call_operand.vmem [shape: f32[64,32], index: 6, kind: output, shape index: {}]  }
   0x1 LB: > { %s545_s22 = sadd.s32 4294967295, %s689_s21   ;;  %p549_p0 = scmp.ge.s32.totalorder %s689_s21, 1  ;;  %s689_s21 = sphi %s726_s21, %s16_s21  }
   0x2   : > { %p224_p1 = scmp.lt.s32.totalorder %s689_s21, 3 }
   0x4   : > { %p225_p2 = pnand %p549_p0, %p224_p1 }
   0x5   : > { %v281_v0 = vld [vmem:[%s827_s1] sm:$0xff] (!%p225_p2)  ;;  %v282_v1 = vld [vmem:[%s827_s1 + $0x8] sm:$0xff] (!%p225_p2)  ;;  %v283_v2 = vld [vmem:[%s827_s1 + $0x10] sm:$0xff] (!%p225_p2)  ;;  %s550_s29 = sshll.u32 (!%p225_p2), %s545_s22, 2  ;;  %vm397_vm0 = vcmask (!%p225_p2), 261120  }
   0x6   : > { %228 = sbr.rel (%p225_p2) target bundleno = 580 (0x244), region = 44  ;;  %v619_v3 = vpack.c.bf16 (!%p225_p2), %v282_v1, %v281_v0  ;;  %v284_v4 = vld [vmem:[%s827_s1 + $0x18] sm:$0xff] (!%p225_p2)  ;;  %p260_p3 = scmp.lt.s32.totalorder (!%p225_p2), %s550_s29, 7  ;;  %v285_v6 = vld [vmem:[%s827_s1 + $0x20] sm:$0xff] (!%p225_p2)  ;;  %v286_v7 = vld [vmem:[%s827_s1 + $0x28] sm:$0xff] (!%p225_p2) }
   0x7   : > { %v623_v5 = vpack.c.bf16 (!%p225_p2), %v284_v4, %v283_v2  ;;  %v627_v8 = vpack.c.bf16 (!%p225_p2), %v286_v7, %v285_v6  ;;  %v287_v9 = vld [vmem:[%s827_s1 + $0x30] sm:$0xff] (!%p225_p2)  ;;  %v288_v10 = vld [vmem:[%s827_s1 + $0x38] sm:$0xff] (!%p225_p2)  ;;  %v289_v14 = vld [vmem:[%s827_s1 + $0x40] sm:$0xff] (!%p225_p2) }
   0x8   : > { %620 = vmatprep.subr.bf16.mxu0 (!%p225_p2), %v619_v3  ;;  %651 = vmatprep.subr.bf16.mxu1 (!%p225_p2), %v619_v3  ;;  %v631_v13 = vpack.c.bf16 (!%p225_p2), %v288_v10, %v287_v9  ;;  %v290_v15 = vld [vmem:[%s827_s1 + $0x48] sm:$0xff] (!%p225_p2)  ;;  %v291_v17 = vld [vmem:[%s827_s1 + $0x50] sm:$0xff] (!%p225_p2)  ;;  %v292_v18 = vld [vmem:[%s827_s1 + $0x58] sm:$0xff] (!%p225_p2) }
   0x9   : > { %622 = vmatpush3.bf16.msra.mxu0 (!%p225_p2), %v619_v3  ;;  %659 = vmatpush3.bf16.msra.mxu1 (!%p225_p2), %v619_v3  ;;  %v635_v16 = vpack.c.bf16 (!%p225_p2), %v290_v15, %v289_v14  ;;  %v639_v19 = vpack.c.bf16 (!%p225_p2), %v292_v18, %v291_v17  ;;  %v293_v20 = vld [vmem:[%s827_s1 + $0x60] sm:$0xff] (!%p225_p2)  ;;  %v294_v21 = vld [vmem:[%s827_s1 + $0x68] sm:$0xff] (!%p225_p2)  ;;  %v295_v23 = vld [vmem:[%s827_s1 + $0x70] sm:$0xff] (!%p225_p2) }
   0xa   : > { %624 = vmatprep.subr.bf16.mxu0 (!%p225_p2), %v623_v5  ;;  %652 = vmatprep.subr.bf16.mxu1 (!%p225_p2), %v623_v5  ;;  %v643_v22 = vpack.c.bf16 (!%p225_p2), %v294_v21, %v293_v20  ;;  %v296_v24 = vld [vmem:[%s827_s1 + $0x78] sm:$0xff] (!%p225_p2)  ;;  %v556_v28 = vld [vmem:[%s828_s2] ss:$0 sm:$0xff] (!%p225_p2) }
   0xb   : > { %v647_v25 = vpack.c.bf16 (!%p225_p2), %v296_v24, %v295_v23  ;;  %v557_v18 = vld [vmem:[%s830_s4] ss:$0 sm:$0xff] (!%p225_p2) }
   0xc   : > { %v558_v20 = vld [vmem:[%s831_s5] ss:$0 sm:$0xff] (!%p225_p2) }
   0xd   : > { %s834_s29 = smov (!%p260_p3, %s550_s29), 7  ;;  %626 = vmatpush3.bf16.msra.mxu0 %v623_v5  ;;  %660 = vmatpush3.bf16.msra.mxu1 %v623_v5 }
   0xe   : > { %s752_s12 = sshll.u32 %s834_s29, 3  ;;  %628 = vmatprep.subr.bf16.mxu0 %v627_v8  ;;  %653 = vmatprep.subr.bf16.mxu1 %v627_v8 }
   0xf   : > { %s764_s19 = scalar_lea.vmem %s826_s0, %s752_s12  ;;  %s269_s16 = scalar_lea.vmem %s829_s3, %s752_s12 }
  0x10   : > { %v277_v11 = vld [vmem:[%s764_s19] sm:$0xff]  ;;  %v279_v12 = vld [vmem:[%s764_s19 + $0x10] sm:$0xff]  ;;  %v278_v26 = vld [vmem:[%s764_s19 + $0x8] sm:$0xff]  ;;  %s275_s26 = scalar_lea.vmem %s832_s6, %s752_s12 }
  0x11   : > { %613 = vmatprep.mubr.f32.mxu0 %v277_v11  ;;  %616 = vmatprep.mubr.f32.mxu1 %v279_v12  ;;  %v280_v27 = vld [vmem:[%s764_s19 + $0x18] sm:$0xff]  ;;  %v391_v34 = vld [vmem:[%s269_s16 + $0x10] sm:$0xff]  ;;  %v389_v35 = vld [vmem:[%s269_s16] sm:$0xff] }
  0x12   : > { %630 = vmatpush3.bf16.msra.mxu0 %v627_v8  ;;  %661 = vmatpush3.bf16.msra.mxu1 %v627_v8  ;;  %v392_v36 = vld [vmem:[%s269_s16 + $0x18] sm:$0xff]  ;;  %v390_v40 = vld [vmem:[%s269_s16 + $0x8] sm:$0xff] }
  0x13   : > { %632 = vmatprep.subr.bf16.mxu0 %v631_v13  ;;  %654 = vmatprep.subr.bf16.mxu1 %v631_v13 }
  0x16   : > { %634 = vmatpush3.bf16.msra.mxu0 %v631_v13  ;;  %662 = vmatpush3.bf16.msra.mxu1 %v631_v13 }
  0x17   : > { %636 = vmatprep.subr.bf16.mxu0 %v635_v16  ;;  %655 = vmatprep.subr.bf16.mxu1 %v635_v16 }
  0x1a   : > { %638 = vmatpush3.bf16.msra.mxu0 %v635_v16  ;;  %663 = vmatpush3.bf16.msra.mxu1 %v635_v16 }
  0x1b   : > { %640 = vmatprep.subr.bf16.mxu0 %v639_v19  ;;  %656 = vmatprep.subr.bf16.mxu1 %v639_v19 }
  0x1e   : > { %642 = vmatpush3.bf16.msra.mxu0 %v639_v19  ;;  %664 = vmatpush3.bf16.msra.mxu1 %v639_v19 }
  0x1f   : > { %644 = vmatprep.subr.bf16.mxu0 %v643_v22  ;;  %657 = vmatprep.subr.bf16.mxu1 %v643_v22 }
  0x22   : > { %646 = vmatpush3.bf16.msra.mxu0 %v643_v22  ;;  %665 = vmatpush3.bf16.msra.mxu1 %v643_v22 }
  0x23   : > { %648 = vmatprep.subr.bf16.mxu0 %v647_v25  ;;  %658 = vmatprep.subr.bf16.mxu1 %v647_v25 }
  0x26   : > { %650 = vmatpush3.bf16.msra.mxu0 %v647_v25  ;;  %666 = vmatpush3.bf16.msra.mxu1 %v647_v25 }
  0x29   : > { %614 = vmatmul.mubr.f32.vlgmr.msra.gmra.mrb[0].mxu0 %v278_v26  ;;  %617 = vmatmul.mubr.f32.vlgmr.msra.gmra.mrb[0].mxu1 %v280_v27 }
  0xfc   : > { %v615_v29 = vpop.f32.mrb[0].mxu0  ;;  %v618_v30 = vpop.f32.mrb[0].mxu1 }
  0xfd   : > { %v386_v31 = vadd.f32 %v618_v30, %v556_v28  ;;  %v370_v32 = vpop.f32.mrb[1].mxu0  ;;  %v380_v33 = vpop.f32.mrb[1].mxu1  ;;  %v376_v37 = vadd.f32 %v615_v29, %v556_v28 }
  0xfe   : > { %v371_v38 = vadd.f32 %v556_v28, %v370_v32  ;;  %v381_v39 = vadd.f32 %v556_v28, %v380_v33 }
  0xff   : > { %v396_v43 = vadd.f32 %v392_v36, %v386_v31  ;;  %v394_v46 = vadd.f32 %v390_v40, %v376_v37 }
 0x100   : > { %v395_v41 = vadd.f32 %v391_v34, %v381_v39  ;;  %v393_v42 = vadd.f32 %v389_v35, %v371_v38 }
 0x101   : > { %v407_v47 = vsel %vm397_vm0, %v396_v43, 0.0  ;;  %v401_v48 = vsel %vm397_vm0, %v394_v46, 0.0 }
 0x102   : > { %v404_v44 = vsel %vm397_vm0, %v395_v41, 0.0  ;;  %v398_v45 = vsel %vm397_vm0, %v393_v42, 0.0 }
 0x103   : > { %405 = vadd.xlane.f32.xlu1 %v404_v44  ;;  %399 = vadd.xlane.f32.xlu0 %v398_v45 }
 0x107   : > { %408 = vadd.xlane.f32.xlu1 %v407_v47  ;;  %402 = vadd.xlane.f32.xlu0 %v401_v48 }
 0x190   : > { %v406_v49 = vpop.xlane.xlu1 %405  ;;  %v400_v50 = vpop.xlane.xlu0 %399 }
 0x191   : > { %v413_v51 = vmul.f32 0.03125, %v406_v49  ;;  %v411_v52 = vmul.f32 0.03125, %v400_v50 }
 0x193   : > { %v417_v53 = vsub.f32 %v395_v41, %v413_v51  ;;  %v415_v54 = vsub.f32 %v393_v42, %v411_v52 }
 0x194   : > { %v409_v55 = vpop.xlane.xlu1 %408  ;;  %v403_v56 = vpop.xlane.xlu0 %402 }
 0x195   : > { %v414_v57 = vmul.f32 0.03125, %v409_v55  ;;  %v412_v58 = vmul.f32 0.03125, %v403_v56  ;;  %v419_v59 = vmul.f32 %v415_v54, %v415_v54  ;;  %v421_v63 = vmul.f32 %v417_v53, %v417_v53 }
 0x197   : > { %v418_v60 = vsub.f32 %v396_v43, %v414_v57  ;;  %v416_v61 = vsub.f32 %v394_v46, %v412_v58  ;;  %v423_v62 = vsel %vm397_vm0, %v419_v59, 0.0  ;;  %v429_v1 = vsel %vm397_vm0, %v421_v63, 0.0 }
 0x198   : > { %424 = vadd.xlane.f32.xlu0 %v423_v62 }
 0x199   : > { %v420_v0 = vmul.f32 %v416_v61, %v416_v61  ;;  %v422_v3 = vmul.f32 %v418_v60, %v418_v60 }
 0x19b   : > { %v426_v2 = vsel %vm397_vm0, %v420_v0, 0.0  ;;  %v432_v4 = vsel %vm397_vm0, %v422_v3, 0.0 }
 0x19c   : > { %430 = vadd.xlane.f32.xlu0 %v429_v1  ;;  %427 = vadd.xlane.f32.xlu1 %v426_v2 }
 0x1a0   : > { %433 = vadd.xlane.f32.xlu1 %v432_v4 }
 0x225   : > { %v425_v5 = vpop.xlane.xlu0 %424 }
 0x226   : > { %v435_v6 = vmul.f32 0.03125, %v425_v5 }
 0x228   : > { %v439_v7 = vadd.f32 1e-05, %v435_v6 }
 0x229   : > { %v428_v8 = vpop.xlane.xlu1 %427  ;;  %v431_v9 = vpop.xlane.xlu0 %430 }
 0x22a   : > { %675 = vrsqrt.f32 %v439_v7  ;;  %v436_v10 = vmul.f32 0.03125, %v428_v8  ;;  %v437_v11 = vmul.f32 0.03125, %v431_v9 }
 0x22c   : > { %v440_v12 = vadd.f32 1e-05, %v436_v10  ;;  %v441_v13 = vadd.f32 1e-05, %v437_v11 }
 0x22d   : > { %v434_v14 = vpop.xlane.xlu1 %433 }
 0x22e   : > { %677 = vrsqrt.f32 %v440_v12  ;;  %v438_v15 = vmul.f32 0.03125, %v434_v14 }
 0x22f   : > { %679 = vrsqrt.f32 %v441_v13 }
 0x230   : > { %v442_v16 = vadd.f32 1e-05, %v438_v15 }
 0x232   : > { %681 = vrsqrt.f32 %v442_v16 }
 0x234   : > { %v676_v17 = vpop.eup %675 }
 0x235   : > { %v447_v19 = vmul.f32 %v676_v17, %v415_v54 }
 0x237   : > { %v458_v21 = vmul.f32 %v557_v18, %v447_v19 }
 0x238   : > { %v678_v22 = vpop.eup %677 }
 0x239   : > { %v680_v23 = vpop.eup %679  ;;  %v469_v24 = vadd.f32 %v558_v20, %v458_v21  ;;  %v448_v25 = vmul.f32 %v678_v22, %v416_v61 }
 0x23a   : > { %v449_v26 = vmul.f32 %v680_v23, %v417_v53 }
 0x23b   : > { %473 = vst.msk [vmem:[%s275_s26] sm:$0xff] %vm397_vm0, %v469_v24  ;;  %v459_v27 = vmul.f32 %v557_v18, %v448_v25 }
 0x23c   : > { %v682_v28 = vpop.eup %681  ;;  %v460_v29 = vmul.f32 %v557_v18, %v449_v26 }
 0x23d   : > { %v470_v30 = vadd.f32 %v558_v20, %v459_v27  ;;  %v450_v31 = vmul.f32 %v682_v28, %v418_v60 }
 0x23e   : > { %v471_v32 = vadd.f32 %v558_v20, %v460_v29 }
 0x23f   : > { %474 = vst.msk [vmem:[%s275_s26 + $0x8] sm:$0xff] %vm397_vm0, %v470_v30  ;;  %v461_v33 = vmul.f32 %v557_v18, %v450_v31 }
 0x240   : > { %475 = vst.msk [vmem:[%s275_s26 + $0x10] sm:$0xff] %vm397_vm0, %v471_v32 }
 0x241   : > { %v472_v34 = vadd.f32 %v558_v20, %v461_v33 }
 0x243   : > { %476 = vst.msk [vmem:[%s275_s26 + $0x18] sm:$0xff] %vm397_vm0, %v472_v34 }
 0x244 PF: > { %s16_s21 = sadd.s32 1, %s689_s21  }
 0x245   : > { %p13_p4 = scmp.ge.s32.totalorder %s16_s21, 4  }
 0x247   :  { %15 = sbr.rel (!%p13_p4) target bundleno = 1 (0x1), region = 77 }

// kernel: crossandoutput_forward.126
= control target key start
LH: loop header
LB: loop body
LE: loop exit
PB: predicated region body
PF: predicated region fallthrough
CT: control target
= control target key end

     0   :  { %s571_s15 = smov 0   ;;  %s627_s0 = inlined_call_operand.vmem [shape: f32[128,32], index: 0, kind: input, shape index: {}]   ;;  %s628_s1 = inlined_call_operand.vmem [shape: f32[32,32], index: 1, kind: input, shape index: {}]   ;;  %s629_s2 = inlined_call_operand.vmem [shape: f32[1,32], index: 2, kind: input, shape index: {}]   ;;  %s630_s3 = inlined_call_operand.vmem [shape: f32[128,32], index: 3, kind: input, shape index: {}]   ;;  %s631_s4 = inlined_call_operand.vmem [shape: f32[128,32], index: 4, kind: output, shape index: {}]  }
   0x1 LB: > { %s464_s16 = sadd.s32 4294967295, %s544_s15   ;;  %p468_p0 = scmp.ge.s32.totalorder %s544_s15, 1  ;;  %s544_s15 = sphi %s571_s15, %s14_s15  }
   0x2   : > { %p174_p1 = scmp.lt.s32.totalorder %s544_s15, 3 }
   0x4   : > { %p175_p2 = pnand %p468_p0, %p174_p1 }
   0x5   : > { %v231_v0 = vld [vmem:[%s628_s1] sm:$0xff] (!%p175_p2)  ;;  %v232_v1 = vld [vmem:[%s628_s1 + $0x8] sm:$0xff] (!%p175_p2)  ;;  %v233_v2 = vld [vmem:[%s628_s1 + $0x10] sm:$0xff] (!%p175_p2)  ;;  %s469_s23 = sshll.u32 (!%p175_p2), %s464_s16, 3  ;;  %vm242_vm0 = vcmask (!%p175_p2), 261120  }
   0x6   : > { %178 = sbr.rel (%p175_p2) target bundleno = 241 (0xf1), region = 36  ;;  %v518_v3 = vpack.c.bf16 (!%p175_p2), %v232_v1, %v231_v0  ;;  %v234_v4 = vld [vmem:[%s628_s1 + $0x18] sm:$0xff] (!%p175_p2)  ;;  %p206_p3 = scmp.lt.s32.totalorder (!%p175_p2), %s469_s23, 15  ;;  %v475_v14 = vld [vmem:[%s629_s2] ss:$0 sm:$0xff] (!%p175_p2) }
   0x7   : > { %v522_v5 = vpack.c.bf16 (!%p175_p2), %v234_v4, %v233_v2 }
   0x8   : > { %519 = vmatprep.subr.bf16.mxu0 (!%p175_p2), %v518_v3  ;;  %526 = vmatprep.subr.bf16.mxu1 (!%p175_p2), %v518_v3 }
   0x9   : > { %521 = vmatpush3.bf16.msra.mxu0 (!%p175_p2), %v518_v3  ;;  %528 = vmatpush3.bf16.msra.mxu1 (!%p175_p2), %v518_v3 }
   0xa   : > { %523 = vmatprep.subr.bf16.mxu0 (!%p175_p2), %v522_v5  ;;  %527 = vmatprep.subr.bf16.mxu1 (!%p175_p2), %v522_v5 }
   0xd   : > { %s633_s23 = smov (!%p206_p3, %s469_s23), 15  ;;  %525 = vmatpush3.bf16.msra.mxu0 %v522_v5  ;;  %529 = vmatpush3.bf16.msra.mxu1 %v522_v5 }
   0xe   : > { %s591_s26 = sshll.u32 %s633_s23, 3 }
   0xf   : > { %s209_s29 = scalar_lea.vmem %s627_s0, %s591_s26  ;;  %s215_s6 = scalar_lea.vmem %s630_s3, %s591_s26 }
  0x10   : > { %v223_v6 = vld [vmem:[%s209_s29] sm:$0xff]  ;;  %v224_v8 = vld [vmem:[%s209_s29 + $0x8] sm:$0xff]  ;;  %v225_v10 = vld [vmem:[%s209_s29 + $0x10] sm:$0xff]  ;;  %s221_s11 = scalar_lea.vmem %s631_s4, %s591_s26 }
  0x11   : > { %v227_v7 = vld [vmem:[%s209_s29 + $0x20] sm:$0xff]  ;;  %v228_v9 = vld [vmem:[%s209_s29 + $0x28] sm:$0xff]  ;;  %506 = vmatprep.mubr.msk.f32.mxu0 %vm242_vm0, %v223_v6  ;;  %v229_v11 = vld [vmem:[%s209_s29 + $0x30] sm:$0xff] }
  0x12   : > { %512 = vmatprep.mubr.msk.f32.mxu1 %vm242_vm0, %v227_v7  ;;  %507 = vmatmul.mubr.msk.f32.vlgmr.msra.gmra.mrb[0].mxu0 %vm242_vm0, %v224_v8  ;;  %v226_v12 = vld [vmem:[%s209_s29 + $0x18] sm:$0xff]  ;;  %v373_v16 = vld [vmem:[%s215_s6 + $0x8] sm:$0xff]  ;;  %v372_v22 = vld [vmem:[%s215_s6] sm:$0xff] }
  0x13   : > { %513 = vmatmul.mubr.msk.f32.vlgmr.msra.gmra.mrb[0].mxu1 %vm242_vm0, %v228_v9  ;;  %509 = vmatprep.mubr.msk.f32.mxu0 %vm242_vm0, %v225_v10  ;;  %v230_v13 = vld [vmem:[%s209_s29 + $0x38] sm:$0xff]  ;;  %v377_v18 = vld [vmem:[%s215_s6 + $0x28] sm:$0xff]  ;;  %v376_v24 = vld [vmem:[%s215_s6 + $0x20] sm:$0xff] }
  0x14   : > { %515 = vmatprep.mubr.msk.f32.mxu1 %vm242_vm0, %v229_v11  ;;  %v375_v32 = vld [vmem:[%s215_s6 + $0x18] sm:$0xff]  ;;  %v374_v38 = vld [vmem:[%s215_s6 + $0x10] sm:$0xff] }
  0x15   : > { %v379_v34 = vld [vmem:[%s215_s6 + $0x38] sm:$0xff]  ;;  %v378_v40 = vld [vmem:[%s215_s6 + $0x30] sm:$0xff] }
  0x16   : > { %510 = vmatmul.mubr.msk.f32.gmra.mrb[2].mxu0 %vm242_vm0, %v226_v12 }
  0x17   : > { %516 = vmatmul.mubr.msk.f32.gmra.mrb[2].mxu1 %vm242_vm0, %v230_v13 }
  0xe5   : > { %v508_v15 = vpop.f32.mrb[0].mxu0 }
  0xe6   : > { %v514_v17 = vpop.f32.mrb[0].mxu1  ;;  %v339_v19 = vadd.f32 %v508_v15, %v475_v14  ;;  %v333_v21 = vpop.f32.mrb[1].mxu0 }
  0xe7   : > { %v359_v20 = vadd.f32 %v514_v17, %v475_v14  ;;  %v353_v23 = vpop.f32.mrb[1].mxu1  ;;  %v334_v25 = vadd.f32 %v475_v14, %v333_v21 }
  0xe8   : > { %v354_v26 = vadd.f32 %v475_v14, %v353_v23  ;;  %v381_v27 = vadd.f32 %v373_v16, %v339_v19 }
  0xe9   : > { %v385_v28 = vadd.f32 %v377_v18, %v359_v20  ;;  %v380_v29 = vadd.f32 %v372_v22, %v334_v25  ;;  %v511_v31 = vpop.f32.mrb[2].mxu0 }
  0xea   : > { %v384_v30 = vadd.f32 %v376_v24, %v354_v26  ;;  %v517_v33 = vpop.f32.mrb[2].mxu1  ;;  %389 = vst.msk [vmem:[%s221_s11 + $0x8] sm:$0xff] %vm242_vm0, %v381_v27  ;;  %v349_v35 = vadd.f32 %v511_v31, %v475_v14  ;;  %v343_v37 = vpop.f32.mrb[3].mxu0 }
  0xeb   : > { %393 = vst.msk [vmem:[%s221_s11 + $0x28] sm:$0xff] %vm242_vm0, %v385_v28  ;;  %v369_v36 = vadd.f32 %v517_v33, %v475_v14  ;;  %v363_v39 = vpop.f32.mrb[3].mxu1  ;;  %388 = vst.msk [vmem:[%s221_s11] sm:$0xff] %vm242_vm0, %v380_v29  ;;  %v344_v41 = vadd.f32 %v475_v14, %v343_v37 }
  0xec   : > { %392 = vst.msk [vmem:[%s221_s11 + $0x20] sm:$0xff] %vm242_vm0, %v384_v30  ;;  %v364_v42 = vadd.f32 %v475_v14, %v363_v39  ;;  %v383_v43 = vadd.f32 %v375_v32, %v349_v35 }
  0xed   : > { %v387_v44 = vadd.f32 %v379_v34, %v369_v36  ;;  %v382_v45 = vadd.f32 %v374_v38, %v344_v41 }
  0xee   : > { %v386_v46 = vadd.f32 %v378_v40, %v364_v42  ;;  %391 = vst.msk [vmem:[%s221_s11 + $0x18] sm:$0xff] %vm242_vm0, %v383_v43 }
  0xef   : > { %395 = vst.msk [vmem:[%s221_s11 + $0x38] sm:$0xff] %vm242_vm0, %v387_v44  ;;  %390 = vst.msk [vmem:[%s221_s11 + $0x10] sm:$0xff] %vm242_vm0, %v382_v45 }
  0xf0   : > { %394 = vst.msk [vmem:[%s221_s11 + $0x30] sm:$0xff] %vm242_vm0, %v386_v46 }
  0xf1 PF: > { %s14_s15 = sadd.s32 1, %s544_s15  }
  0xf2   : > { %p11_p4 = scmp.ge.s32.totalorder %s14_s15, 4  }
  0xf4   :  { %13 = sbr.rel (!%p11_p4) target bundleno = 1 (0x1), region = 69 }

// kernel: crossandoutput_forward.125
= control target key start
LH: loop header
LB: loop body
LE: loop exit
PB: predicated region body
PF: predicated region fallthrough
CT: control target
= control target key end

     0   :  { %s2315_s12 = smov 0   ;;  %s2662_s0 = inlined_call_operand.vmem [shape: f32[8,8,16,4], index: 0, kind: input, shape index: {}]   ;;  %s2663_s1 = inlined_call_operand.vmem [shape: f32[8,8,16,4], index: 1, kind: input, shape index: {}]   ;;  %s2664_s2 = inlined_call_operand.vmem [shape: f32[8,8,16,4], index: 2, kind: input, shape index: {}]   ;;  %s2665_s3 = inlined_call_operand.vmem [shape: f32[8,8,16,4], index: 3, kind: output, shape index: {}]  }
   0x1 LB: > { %s1892_s13 = sadd.s32 4294967295, %s2293_s12   ;;  %p1896_p0 = scmp.ge.s32.totalorder %s2293_s12, 1  ;;  %s2293_s12 = sphi %s2315_s12, %s13_s12  }
   0x2   : > { %p157_p1 = scmp.lt.s32.totalorder %s2293_s12, 9 }
   0x4   : > { %p158_p2 = pnand %p1896_p0, %p157_p1 }
   0x5   : > { %p191_p3 = scmp.lt.s32.totalorder (!%p158_p2), %s1892_s13, 7  ;;  %vm259_vm0 = vcmask (!%p158_p2), 31744   ;;  %vm972_vm2 = vcmask (!%p158_p2), 130048  }
   0x6   : > { %161 = sbr.rel (%p158_p2) target bundleno = 801 (0x321), region = 32  ;;  %vm2333_vm1 = vmpackc.low (!%p158_p2), %vm259_vm0, %vm259_vm0 }
   0xd   : > { %s2669_s13 = smov (!%p191_p3, %s1892_s13), 7 }
   0xe   : > { %s2323_s14 = sshll.u32 %s2669_s13, 7 }
   0xf   : > { %s2329_s17 = scalar_lea.vmem %s2663_s1, %s2323_s14  ;;  %s2341_s20 = scalar_lea.vmem %s2662_s0, %s2323_s14 }
  0x10   : > { %v227_v1 = vld [vmem:[%s2329_s17] sm:$0xff]  ;;  %v228_v2 = vld [vmem:[%s2329_s17 + $0x8] sm:$0xff]  ;;  %v229_v3 = vld [vmem:[%s2329_s17 + $0x10] sm:$0xff]  ;;  %s2561_s23 = scalar_lea.vmem %s2664_s2, %s2323_s14  ;;  %s2625_s26 = scalar_lea.vmem %s2665_s3, %s2323_s14 }
  0x11   : > { %v2135_v4 = vpack.c.bf16 %v228_v2, %v227_v1  ;;  %v230_v5 = vld [vmem:[%s2329_s17 + $0x18] sm:$0xff]  ;;  %v211_v6 = vld [vmem:[%s2341_s20] sm:$0xff]  ;;  %v213_v8 = vld [vmem:[%s2341_s20 + $0x10] sm:$0xff] }
  0x12   : > { %v2141_v7 = vpack.c.bf16 %v230_v5, %v229_v3  ;;  %2027 = vmatprep.mubr.msk.f32.mxu0 %vm259_vm0, %v211_v6  ;;  %v231_v9 = vld [vmem:[%s2329_s17 + $0x20] sm:$0xff]  ;;  %v232_v10 = vld [vmem:[%s2329_s17 + $0x28] sm:$0xff]  ;;  %2034 = vmatprep.mubr.msk.f32.mxu1 %vm259_vm0, %v213_v8  ;;  %v233_v12 = vld [vmem:[%s2329_s17 + $0x30] sm:$0xff] }
  0x13   : > { %2137 = vmatprep.subr.msk.bf16.mxu0 %vm2333_vm1, %v2135_v4  ;;  %v2147_v11 = vpack.c.bf16 %v232_v10, %v231_v9  ;;  %v234_v13 = vld [vmem:[%s2329_s17 + $0x38] sm:$0xff]  ;;  %v235_v15 = vld [vmem:[%s2329_s17 + $0x40] sm:$0xff]  ;;  %v236_v16 = vld [vmem:[%s2329_s17 + $0x48] sm:$0xff] }
  0x14   : > { %2143 = vmatprep.subr.msk.bf16.mxu1 %vm2333_vm1, %v2141_v7  ;;  %2140 = vmatpush3.bf16.xpose.msk.msra.mxu0 %vm2333_vm1, %v2135_v4  ;;  %v2153_v14 = vpack.c.bf16 %v234_v13, %v233_v12  ;;  %v212_v17 = vld [vmem:[%s2341_s20 + $0x8] sm:$0xff]  ;;  %v237_v18 = vld [vmem:[%s2329_s17 + $0x50] sm:$0xff]  ;;  %v238_v19 = vld [vmem:[%s2329_s17 + $0x58] sm:$0xff]  ;;  %v2159_v22 = vpack.c.bf16 %v236_v16, %v235_v15 }
  0x15   : > { %2146 = vmatpush3.bf16.xpose.msk.msra.mxu1 %vm2333_vm1, %v2141_v7  ;;  %2149 = vmatprep.subr.msk.bf16.mxu0 %vm2333_vm1, %v2147_v11  ;;  %v214_v20 = vld [vmem:[%s2341_s20 + $0x18] sm:$0xff]  ;;  %v217_v21 = vld [vmem:[%s2341_s20 + $0x30] sm:$0xff]  ;;  %v215_v23 = vld [vmem:[%s2341_s20 + $0x20] sm:$0xff]  ;;  %v2165_v24 = vpack.c.bf16 %v238_v19, %v237_v18 }
  0x16   : > { %2155 = vmatprep.subr.msk.bf16.mxu1 %vm2333_vm1, %v2153_v14  ;;  %v239_v25 = vld [vmem:[%s2329_s17 + $0x60] sm:$0xff]  ;;  %v240_v26 = vld [vmem:[%s2329_s17 + $0x68] sm:$0xff]  ;;  %v241_v28 = vld [vmem:[%s2329_s17 + $0x70] sm:$0xff] }
  0x17   : > { %v216_v27 = vld [vmem:[%s2341_s20 + $0x28] sm:$0xff]  ;;  %v242_v29 = vld [vmem:[%s2329_s17 + $0x78] sm:$0xff]  ;;  %v221_v31 = vld [vmem:[%s2341_s20 + $0x50] sm:$0xff]  ;;  %v2171_v32 = vpack.c.bf16 %v240_v26, %v239_v25 }
  0x18   : > { %v218_v30 = vld [vmem:[%s2341_s20 + $0x38] sm:$0xff]  ;;  %v219_v33 = vld [vmem:[%s2341_s20 + $0x40] sm:$0xff]  ;;  %v2177_v34 = vpack.c.bf16 %v242_v29, %v241_v28  ;;  %v220_v35 = vld [vmem:[%s2341_s20 + $0x48] sm:$0xff] }
  0x19   : > { %v222_v36 = vld [vmem:[%s2341_s20 + $0x58] sm:$0xff]  ;;  %v223_v37 = vld [vmem:[%s2341_s20 + $0x60] sm:$0xff]  ;;  %v225_v38 = vld [vmem:[%s2341_s20 + $0x70] sm:$0xff] }
  0x1a   : > { %v224_v39 = vld [vmem:[%s2341_s20 + $0x68] sm:$0xff]  ;;  %v226_v40 = vld [vmem:[%s2341_s20 + $0x78] sm:$0xff] }
  0x1b   : > { %2028 = vmatmul.mubr.msk.f32.vlgmr.msra.gmra.mrb[0].mxu0 %vm259_vm0, %v212_v17 }
  0x1c   : > { %2035 = vmatmul.mubr.msk.f32.vlgmr.msra.gmra.mrb[0].mxu1 %vm259_vm0, %v214_v20  ;;  %2152 = vmatpush3.bf16.xpose.msk.msra.mxu0 %vm2333_vm1, %v2147_v11 }
  0x1d   : > { %2158 = vmatpush3.bf16.xpose.msk.msra.mxu1 %vm2333_vm1, %v2153_v14  ;;  %2048 = vmatprep.mubr.msk.f32.mxu1 %vm259_vm0, %v217_v21 }
  0x1e   : > { %2041 = vmatprep.mubr.msk.f32.mxu0 %vm259_vm0, %v215_v23  ;;  %2161 = vmatprep.subr.msk.bf16.mxu0 %vm2333_vm1, %v2159_v22 }
  0x1f   : > { %2167 = vmatprep.subr.msk.bf16.mxu1 %vm2333_vm1, %v2165_v24 }
  0x23   : > { %2042 = vmatmul.mubr.msk.f32.vlgmr.msra.gmra.mrb[2].mxu0 %vm259_vm0, %v216_v27 }
  0x24   : > { %2049 = vmatmul.mubr.msk.f32.vlgmr.msra.gmra.mrb[2].mxu1 %vm259_vm0, %v218_v30  ;;  %2164 = vmatpush3.bf16.xpose.msk.msra.mxu0 %vm2333_vm1, %v2159_v22 }
  0x25   : > { %2170 = vmatpush3.bf16.xpose.msk.msra.mxu1 %vm2333_vm1, %v2165_v24  ;;  %2062 = vmatprep.mubr.msk.f32.mxu1 %vm259_vm0, %v221_v31 }
  0x26   : > { %2055 = vmatprep.mubr.msk.f32.mxu0 %vm259_vm0, %v219_v33  ;;  %2173 = vmatprep.subr.msk.bf16.mxu0 %vm2333_vm1, %v2171_v32 }
  0x27   : > { %2179 = vmatprep.subr.msk.bf16.mxu1 %vm2333_vm1, %v2177_v34 }
  0x2b   : > { %2056 = vmatmul.mubr.msk.f32.vlgmr.msra.gmra.mrb[4].mxu0 %vm259_vm0, %v220_v35 }
  0x2c   : > { %2063 = vmatmul.mubr.msk.f32.vlgmr.msra.gmra.mrb[4].mxu1 %vm259_vm0, %v222_v36  ;;  %2176 = vmatpush3.bf16.xpose.msk.msra.mxu0 %vm2333_vm1, %v2171_v32 }
  0x2d   : > { %2182 = vmatpush3.bf16.xpose.msk.msra.mxu1 %vm2333_vm1, %v2177_v34  ;;  %2069 = vmatprep.mubr.msk.f32.mxu0 %vm259_vm0, %v223_v37 }
  0x2e   : > { %2076 = vmatprep.mubr.msk.f32.mxu1 %vm259_vm0, %v225_v38 }
  0x33   : > { %2070 = vmatmul.mubr.msk.f32.vlgmr.msra.gmra.mrb[6].mxu0 %vm259_vm0, %v224_v39 }
  0x34   : > { %2077 = vmatmul.mubr.msk.f32.vlgmr.msra.gmra.mrb[6].mxu1 %vm259_vm0, %v226_v40 }
  0xee   : > { %v2029_v41 = vpop.f32.mrb[0].mxu0 }
  0xef   : > { %v2423_v42 = vmul.f32 0.5, %v2029_v41  ;;  %v338_v43 = vpop.f32.mrb[1].mxu0  ;;  %v2036_v44 = vpop.f32.mrb[0].mxu1 }
  0xf0   : > { %v2425_v45 = vmul.f32 0.5, %v338_v43  ;;  %v2427_v46 = vmul.f32 0.5, %v2036_v44  ;;  %v425_v47 = vpop.f32.mrb[1].mxu1 }
  0xf1   : > { %v2429_v48 = vmul.f32 0.5, %v425_v47  ;;  %v976_v49 = vsel %vm972_vm2, %v2423_v42, -inf }
  0xf2   : > { %977 = vmax.xlane.f32.xlu1 %v976_v49  ;;  %v973_v50 = vsel %vm972_vm2, %v2425_v45, -inf  ;;  %v982_v51 = vsel %vm972_vm2, %v2427_v46, -inf }
  0xf3   : > { %974 = vmax.xlane.f32.xlu0 %v973_v50  ;;  %v979_v52 = vsel %vm972_vm2, %v2429_v48, -inf }
  0xf6   : > { %983 = vmax.xlane.f32.xlu1 %v982_v51  ;;  %v2043_v53 = vpop.f32.mrb[2].mxu0 }
  0xf7   : > { %v2050_v54 = vpop.f32.mrb[2].mxu1  ;;  %980 = vmax.xlane.f32.xlu0 %v979_v52  ;;  %v2439_v55 = vmul.f32 0.5, %v2043_v53  ;;  %v512_v56 = vpop.f32.mrb[3].mxu0 }
  0xf8   : > { %v2441_v57 = vmul.f32 0.5, %v2050_v54  ;;  %v599_v58 = vpop.f32.mrb[3].mxu1  ;;  %v2443_v59 = vmul.f32 0.5, %v512_v56 }
  0xf9   : > { %v2445_v60 = vmul.f32 0.5, %v599_v58  ;;  %v988_v61 = vsel %vm972_vm2, %v2439_v55, -inf }
  0xfa   : > { %v994_v62 = vsel %vm972_vm2, %v2441_v57, -inf  ;;  %v985_v0 = vsel %vm972_vm2, %v2443_v59, -inf }
  0xfb   : > { %995 = vmax.xlane.f32.xlu1 %v994_v62  ;;  %989 = vmax.xlane.f32.xlu0 %v988_v61  ;;  %v991_v63 = vsel %vm972_vm2, %v2445_v60, -inf }
  0xfe   : > { %v2057_v1 = vpop.f32.mrb[4].mxu0 }
  0xff   : > { %v2064_v2 = vpop.f32.mrb[4].mxu1  ;;  %992 = vmax.xlane.f32.xlu1 %v991_v63  ;;  %986 = vmax.xlane.f32.xlu0 %v985_v0  ;;  %v2455_v3 = vmul.f32 0.5, %v2057_v1  ;;  %v686_v4 = vpop.f32.mrb[5].mxu0 }
 0x100   : > { %v2457_v5 = vmul.f32 0.5, %v2064_v2  ;;  %v773_v6 = vpop.f32.mrb[5].mxu1  ;;  %v2459_v7 = vmul.f32 0.5, %v686_v4 }
 0x101   : > { %v2461_v8 = vmul.f32 0.5, %v773_v6  ;;  %v1000_v9 = vsel %vm972_vm2, %v2455_v3, -inf }
 0x102   : > { %v1006_v10 = vsel %vm972_vm2, %v2457_v5, -inf  ;;  %v997_v12 = vsel %vm972_vm2, %v2459_v7, -inf }
 0x103   : > { %1007 = vmax.xlane.f32.xlu1 %v1006_v10  ;;  %1001 = vmax.xlane.f32.xlu0 %v1000_v9  ;;  %v1003_v11 = vsel %vm972_vm2, %v2461_v8, -inf }
 0x106   : > { %v2071_v13 = vpop.f32.mrb[6].mxu0 }
 0x107   : > { %v2078_v14 = vpop.f32.mrb[6].mxu1  ;;  %1004 = vmax.xlane.f32.xlu1 %v1003_v11  ;;  %998 = vmax.xlane.f32.xlu0 %v997_v12  ;;  %v860_v15 = vpop.f32.mrb[7].mxu0  ;;  %v2475_v19 = vmul.f32 0.5, %v2071_v13 }
 0x108   : > { %v947_v16 = vpop.f32.mrb[7].mxu1  ;;  %v2471_v17 = vmul.f32 0.5, %v860_v15  ;;  %v2479_v21 = vmul.f32 0.5, %v2078_v14 }
 0x109   : > { %v2473_v18 = vmul.f32 0.5, %v947_v16  ;;  %v1012_v23 = vsel %vm972_vm2, %v2475_v19, -inf }
 0x10a   : > { %v1009_v20 = vsel %vm972_vm2, %v2471_v17, -inf  ;;  %v1018_v24 = vsel %vm972_vm2, %v2479_v21, -inf }
 0x10b   : > { %v1015_v22 = vsel %vm972_vm2, %v2473_v18, -inf  ;;  %1010 = vmax.xlane.f32.xlu0 %v1009_v20 }
 0x10c   : > { %1016 = vmax.xlane.f32.xlu1 %v1015_v22 }
 0x10f   : > { %1013 = vmax.xlane.f32.xlu0 %v1012_v23 }
 0x110   : > { %1019 = vmax.xlane.f32.xlu1 %v1018_v24 }
 0x17f   : > { %v978_v25 = vpop.xlane.xlu1 %977 }
 0x180   : > { %v1022_v26 = vsub.f32 %v2423_v42, %v978_v25  ;;  %v975_v27 = vpop.xlane.xlu0 %974 }
 0x181   : > { %v1021_v28 = vsub.f32 %v2425_v45, %v975_v27 }
 0x182   : > { %v1039_v29 = vmul.f32 1.442695, %v1022_v26 }
 0x183   : > { %v1037_v30 = vmul.f32 1.442695, %v1021_v28  ;;  %v984_v31 = vpop.xlane.xlu1 %983 }
 0x184   : > { %2223 = vpow2.f32 %v1039_v29  ;;  %v1024_v32 = vsub.f32 %v2427_v46, %v984_v31  ;;  %v981_v33 = vpop.xlane.xlu0 %980 }
 0x185   : > { %v1023_v34 = vsub.f32 %v2429_v48, %v981_v33  ;;  %2225 = vpow2.f32 %v1037_v30 }
 0x186   : > { %v1043_v35 = vmul.f32 1.442695, %v1024_v32 }
 0x187   : > { %v1041_v36 = vmul.f32 1.442695, %v1023_v34 }
 0x188   : > { %2227 = vpow2.f32 %v1043_v35  ;;  %v996_v37 = vpop.xlane.xlu1 %995  ;;  %v990_v38 = vpop.xlane.xlu0 %989 }
 0x189   : > { %v1028_v39 = vsub.f32 %v2441_v57, %v996_v37  ;;  %v1026_v40 = vsub.f32 %v2439_v55, %v990_v38  ;;  %2229 = vpow2.f32 %v1041_v36  ;;  %v243_v36 = vld [vmem:[%s2561_s23] sm:$0xff]  ;;  %v244_v37 = vld [vmem:[%s2561_s23 + $0x8] sm:$0xff] }
 0x18b   : > { %v1051_v41 = vmul.f32 1.442695, %v1028_v39  ;;  %v1047_v42 = vmul.f32 1.442695, %v1026_v40  ;;  %v2183_v40 = vpack.c.bf16 %v244_v37, %v243_v36 }
 0x18c   : > { %v993_v43 = vpop.xlane.xlu1 %992  ;;  %v987_v44 = vpop.xlane.xlu0 %986 }
 0x18d   : > { %2231 = vpow2.f32 %v1051_v41  ;;  %v1027_v45 = vsub.f32 %v2445_v60, %v993_v43  ;;  %v1025_v46 = vsub.f32 %v2443_v59, %v987_v44  ;;  %2184 = vmatprep.subr.bf16.mxu0 %v2183_v40  ;;  %v245_v43 = vld [vmem:[%s2561_s23 + $0x10] sm:$0xff]  ;;  %v246_v44 = vld [vmem:[%s2561_s23 + $0x18] sm:$0xff] }
 0x18e   : > { %v2495_v47 = vpop.eup %2223  ;;  %2233 = vpow2.f32 %v1047_v42  ;;  %2186 = vmatpush3.bf16.msra.mxu0 %v2183_v40 }
 0x18f   : > { %v1049_v48 = vmul.f32 1.442695, %v1027_v45  ;;  %v1045_v49 = vmul.f32 1.442695, %v1025_v46  ;;  %v1072_v50 = vsel %vm972_vm2, %v2495_v47, 0.0  ;;  %v2499_v51 = vpop.eup %2225  ;;  %v2187_v46 = vpack.c.bf16 %v246_v44, %v245_v43 }
 0x190   : > { %v1008_v52 = vpop.xlane.xlu1 %1007  ;;  %v1002_v53 = vpop.xlane.xlu0 %1001  ;;  %1073 = vadd.xlane.f32.xlu0 %v1072_v50  ;;  %v1069_v60 = vsel %vm972_vm2, %v2499_v51, 0.0 }
 0x191   : > { %2235 = vpow2.f32 %v1049_v48  ;;  %v1032_v54 = vsub.f32 %v2457_v5, %v1008_v52  ;;  %v1030_v55 = vsub.f32 %v2455_v3, %v1002_v53  ;;  %2188 = vmatprep.subr.bf16.mxu1 %v2187_v46  ;;  %v247_v48 = vld [vmem:[%s2561_s23 + $0x20] sm:$0xff]  ;;  %v249_v52 = vld [vmem:[%s2561_s23 + $0x30] sm:$0xff]  ;;  %v250_v53 = vld [vmem:[%s2561_s23 + $0x38] sm:$0xff] }
 0x192   : > { %v2503_v56 = vpop.eup %2227  ;;  %2237 = vpow2.f32 %v1045_v49  ;;  %2190 = vmatpush3.bf16.msra.mxu1 %v2187_v46  ;;  %v248_v49 = vld [vmem:[%s2561_s23 + $0x28] sm:$0xff] }
 0x193   : > { %v1059_v57 = vmul.f32 1.442695, %v1032_v54  ;;  %v1055_v58 = vmul.f32 1.442695, %v1030_v55  ;;  %v1078_v59 = vsel %vm972_vm2, %v2503_v56, 0.0  ;;  %v2509_v61 = vpop.eup %2229  ;;  %v2191_v50 = vpack.c.bf16 %v248_v49, %v247_v48 }
 0x194   : > { %v1005_v62 = vpop.xlane.xlu1 %1004  ;;  %1079 = vadd.xlane.f32.xlu1 %v1078_v59  ;;  %v999_v63 = vpop.xlane.xlu0 %998  ;;  %1070 = vadd.xlane.f32.xlu0 %v1069_v60  ;;  %v1075_v5 = vsel %vm972_vm2, %v2509_v61, 0.0  ;;  %v2195_v54 = vpack.c.bf16 %v250_v53, %v249_v52 }
 0x195   : > { %2239 = vpow2.f32 %v1059_v57  ;;  %v1031_v0 = vsub.f32 %v2461_v8, %v1005_v62  ;;  %v1029_v1 = vsub.f32 %v2459_v7, %v999_v63  ;;  %2192 = vmatprep.subr.bf16.mxu0 %v2191_v50 }
 0x196   : > { %2241 = vpow2.f32 %v1055_v58  ;;  %2196 = vmatprep.subr.bf16.mxu1 %v2195_v54 }
 0x197   : > { %v2513_v2 = vpop.eup %2231  ;;  %v1057_v3 = vmul.f32 1.442695, %v1031_v0  ;;  %v1053_v4 = vmul.f32 1.442695, %v1029_v1  ;;  %v251_v1 = vld [vmem:[%s2561_s23 + $0x40] sm:$0xff] }
 0x198   : > { %v2517_v6 = vpop.eup %2233  ;;  %1076 = vadd.xlane.f32.xlu1 %v1075_v5  ;;  %v1011_v9 = vpop.xlane.xlu0 %1010  ;;  %v1090_v14 = vsel %vm972_vm2, %v2513_v2, 0.0 }
 0x199   : > { %2243 = vpow2.f32 %v1057_v3  ;;  %v1017_v10 = vpop.xlane.xlu1 %1016  ;;  %v1033_v11 = vsub.f32 %v2471_v17, %v1011_v9  ;;  %v1084_v8 = vsel %vm972_vm2, %v2517_v6, 0.0  ;;  %v252_v3 = vld [vmem:[%s2561_s23 + $0x48] sm:$0xff] }
 0x19a   : > { %2245 = vpow2.f32 %v1053_v4  ;;  %v1035_v7 = vsub.f32 %v2473_v18, %v1017_v10  ;;  %1085 = vadd.xlane.f32.xlu0 %v1084_v8 }
 0x19b   : > { %v2523_v12 = vpop.eup %2235  ;;  %v1061_v13 = vmul.f32 1.442695, %v1033_v11 }
 0x19c   : > { %v2527_v15 = vpop.eup %2237  ;;  %v1065_v16 = vmul.f32 1.442695, %v1035_v7  ;;  %1091 = vadd.xlane.f32.xlu1 %v1090_v14  ;;  %v1014_v20 = vpop.xlane.xlu0 %1013  ;;  %v1087_v26 = vsel %vm972_vm2, %v2523_v12, 0.0  ;;  %v2199_v7 = vpack.c.bf16 %v252_v3, %v251_v1  ;;  %v254_v14 = vld [vmem:[%s2561_s23 + $0x58] sm:$0xff] }
 0x19d   : > { %2247 = vpow2.f32 %v1061_v13  ;;  %v1020_v17 = vpop.xlane.xlu1 %1019  ;;  %v1034_v22 = vsub.f32 %v2475_v19, %v1014_v20  ;;  %v1081_v23 = vsel %vm972_vm2, %v2527_v15, 0.0  ;;  %v253_v13 = vld [vmem:[%s2561_s23 + $0x50] sm:$0xff] }
 0x19e   : > { %2249 = vpow2.f32 %v1065_v16  ;;  %v1036_v18 = vsub.f32 %v2479_v21, %v1020_v17  ;;  %1082 = vadd.xlane.f32.xlu0 %v1081_v23 }
 0x19f   : > { %v2533_v24 = vpop.eup %2239  ;;  %v1063_v25 = vmul.f32 1.442695, %v1034_v22 }
 0x1a0   : > { %v2537_v27 = vpop.eup %2241  ;;  %v1067_v28 = vmul.f32 1.442695, %v1036_v18  ;;  %1088 = vadd.xlane.f32.xlu1 %v1087_v26  ;;  %v1102_v21 = vsel %vm972_vm2, %v2533_v24, 0.0 }
 0x1a1   : > { %2251 = vpow2.f32 %v1063_v25  ;;  %v1096_v19 = vsel %vm972_vm2, %v2537_v27, 0.0  ;;  %v255_v25 = vld [vmem:[%s2561_s23 + $0x60] sm:$0xff] }
 0x1a2   : > { %2253 = vpow2.f32 %v1067_v28  ;;  %1097 = vadd.xlane.f32.xlu0 %v1096_v19 }
 0x1a3   : > { %v2541_v29 = vpop.eup %2243 }
 0x1a4   : > { %v2545_v30 = vpop.eup %2245  ;;  %1103 = vadd.xlane.f32.xlu1 %v1102_v21  ;;  %v1099_v33 = vsel %vm972_vm2, %v2541_v29, 0.0  ;;  %v257_v21 = vld [vmem:[%s2561_s23 + $0x70] sm:$0xff] }
 0x1a5   : > { %v1093_v31 = vsel %vm972_vm2, %v2545_v30, 0.0 }
 0x1a6   : > { %1094 = vadd.xlane.f32.xlu0 %v1093_v31  ;;  %v258_v31 = vld [vmem:[%s2561_s23 + $0x78] sm:$0xff] }
 0x1a7   : > { %v2549_v32 = vpop.eup %2247 }
 0x1a8   : > { %v2553_v34 = vpop.eup %2249  ;;  %1100 = vadd.xlane.f32.xlu1 %v1099_v33  ;;  %v1105_v35 = vsel %vm972_vm2, %v2549_v32, 0.0 }
 0x1a9   : > { %v1111_v39 = vsel %vm972_vm2, %v2553_v34, 0.0 }
 0x1aa   : > { %1106 = vadd.xlane.f32.xlu0 %v1105_v35 }
 0x1ab   : > { %v2565_v38 = vpop.eup %2251 }
 0x1ac   : > { %v2569_v41 = vpop.eup %2253  ;;  %1112 = vadd.xlane.f32.xlu1 %v1111_v39  ;;  %v1108_v42 = vsel %vm972_vm2, %v2565_v38, 0.0 }
 0x1ad   : > { %v1114_v45 = vsel %vm972_vm2, %v2569_v41, 0.0 }
 0x1ae   : > { %1109 = vadd.xlane.f32.xlu0 %v1108_v42  ;;  %v2211_v42 = vpack.c.bf16 %v258_v31, %v257_v21 }
 0x1b0   : > { %1115 = vadd.xlane.f32.xlu1 %v1114_v45 }
 0x21d   : > { %v1074_v55 = vpop.xlane.xlu0 %1073 }
 0x21e   : > { %2255 = vrcp.f32 %v1074_v55 }
 0x221   : > { %v1080_v57 = vpop.xlane.xlu1 %1079  ;;  %v1071_v58 = vpop.xlane.xlu0 %1070 }
 0x222   : > { %2257 = vrcp.f32 %v1071_v58 }
 0x223   : > { %2259 = vrcp.f32 %v1080_v57 }
 0x225   : > { %v1077_v59 = vpop.xlane.xlu1 %1076 }
 0x226   : > { %2261 = vrcp.f32 %v1077_v59 }
 0x227   : > { %v1086_v60 = vpop.xlane.xlu0 %1085 }
 0x228   : > { %2263 = vrcp.f32 %v1086_v60  ;;  %v2256_v0 = vpop.eup %2255 }
 0x229   : > { %v1092_v62 = vpop.xlane.xlu1 %1091  ;;  %v1134_v11 = vmul.f32 %v2256_v0, %v2495_v47 }
 0x22b   : > { %v1083_v63 = vpop.xlane.xlu0 %1082 }
 0x22c   : > { %2265 = vrcp.f32 %v1083_v63  ;;  %v2258_v4 = vpop.eup %2257 }
 0x22d   : > { %2267 = vrcp.f32 %v1092_v62  ;;  %v1089_v5 = vpop.xlane.xlu1 %1088  ;;  %v1133_v9 = vmul.f32 %v2258_v4, %v2499_v51  ;;  %v2260_v10 = vpop.eup %2259  ;;  %v2203_v51 = vpack.c.bf16 %v254_v14, %v253_v13 }
 0x22e   : > { %2269 = vrcp.f32 %v1089_v5  ;;  %v1136_v22 = vmul.f32 %v2260_v10, %v2503_v56 }
 0x22f   : > { %v1098_v8 = vpop.xlane.xlu0 %1097  ;;  %2083 = vmatprep.mubr.msk.f32.mxu0 %vm972_vm2, %v1133_v9 }
 0x230   : > { %v2262_v16 = vpop.eup %2261  ;;  %2084 = vmatmul.mubr.msk.f32.vlgmr.msra.gmra.mrb[8].mxu0 %vm972_vm2, %v1134_v11  ;;  %2271 = vrcp.f32 %v1098_v8 }
 0x231   : > { %v1104_v20 = vpop.xlane.xlu1 %1103  ;;  %v1135_v17 = vmul.f32 %v2262_v16, %v2509_v61  ;;  %2194 = vmatpush3.bf16.msra.mxu0 %v2191_v50  ;;  %v256_v61 = vld [vmem:[%s2561_s23 + $0x68] sm:$0xff] }
 0x232   : > { %2200 = vmatprep.subr.bf16.mxu0 %v2199_v7  ;;  %v2264_v23 = vpop.eup %2263  ;;  %v2207_v36 = vpack.c.bf16 %v256_v61, %v255_v25 }
 0x233   : > { %v1095_v47 = vpop.xlane.xlu0 %1094  ;;  %2090 = vmatprep.mubr.msk.f32.mxu1 %vm972_vm2, %v1135_v17  ;;  %v1138_v35 = vmul.f32 %v2264_v23, %v2517_v6 }
 0x234   : > { %2273 = vrcp.f32 %v1095_v47  ;;  %2091 = vmatmul.mubr.msk.f32.vlgmr.msra.gmra.mrb[8].mxu1 %vm972_vm2, %v1136_v22 }
 0x235   : > { %2275 = vrcp.f32 %v1104_v20  ;;  %v1101_v18 = vpop.xlane.xlu1 %1100  ;;  %2198 = vmatpush3.bf16.msra.mxu1 %v2195_v54 }
 0x236   : > { %v2266_v26 = vpop.eup %2265  ;;  %2277 = vrcp.f32 %v1101_v18  ;;  %2204 = vmatprep.subr.bf16.mxu1 %v2203_v51 }
 0x237   : > { %v2268_v56 = vpop.eup %2267  ;;  %v1107_v28 = vpop.xlane.xlu0 %1106  ;;  %v1137_v19 = vmul.f32 %v2266_v26, %v2527_v15 }
 0x238   : > { %v2270_v33 = vpop.eup %2269  ;;  %2279 = vrcp.f32 %v1107_v28  ;;  %v1140_v40 = vmul.f32 %v2268_v56, %v2513_v2 }
 0x239   : > { %2097 = vmatprep.mubr.msk.f32.mxu0 %vm972_vm2, %v1137_v19  ;;  %v1113_v37 = vpop.xlane.xlu1 %1112  ;;  %v1139_v39 = vmul.f32 %v2270_v33, %v2523_v12 }
 0x23a   : > { %2281 = vrcp.f32 %v1113_v37  ;;  %2098 = vmatmul.mubr.msk.f32.vlgmr.msra.gmra.mrb[10].mxu0 %vm972_vm2, %v1138_v35  ;;  %v2272_v6 = vpop.eup %2271 }
 0x23b   : > { %v1110_v43 = vpop.xlane.xlu0 %1109  ;;  %2104 = vmatprep.mubr.msk.f32.mxu1 %vm972_vm2, %v1139_v39  ;;  %2202 = vmatpush3.bf16.msra.mxu0 %v2199_v7  ;;  %v1142_v46 = vmul.f32 %v2272_v6, %v2537_v27 }
 0x23c   : > { %2283 = vrcp.f32 %v1110_v43  ;;  %2105 = vmatmul.mubr.msk.f32.vlgmr.msra.gmra.mrb[10].mxu1 %vm972_vm2, %v1140_v40  ;;  %2208 = vmatprep.subr.bf16.mxu0 %v2207_v36 }
 0x23d   : > { %v1116_v15 = vpop.xlane.xlu1 %1115  ;;  %2206 = vmatpush3.bf16.msra.mxu1 %v2203_v51 }
 0x23e   : > { %v2274_v44 = vpop.eup %2273  ;;  %2285 = vrcp.f32 %v1116_v15  ;;  %2212 = vmatprep.subr.bf16.mxu1 %v2211_v42 }
 0x23f   : > { %v2276_v12 = vpop.eup %2275  ;;  %v1141_v2 = vmul.f32 %v2274_v44, %v2545_v30 }
 0x240   : > { %v2278_v45 = vpop.eup %2277  ;;  %v1144_v50 = vmul.f32 %v2276_v12, %v2533_v24 }
 0x241   : > { %2111 = vmatprep.mubr.msk.f32.mxu0 %vm972_vm2, %v1141_v2  ;;  %v1143_v48 = vmul.f32 %v2278_v45, %v2541_v29 }
 0x242   : > { %v2280_v49 = vpop.eup %2279  ;;  %2112 = vmatmul.mubr.msk.f32.vlgmr.msra.gmra.mrb[12].mxu0 %vm972_vm2, %v1142_v46 }
 0x243   : > { %2118 = vmatprep.mubr.msk.f32.mxu1 %vm972_vm2, %v1143_v48  ;;  %v1145_v52 = vmul.f32 %v2280_v49, %v2549_v32  ;;  %2210 = vmatpush3.bf16.msra.mxu0 %v2207_v36 }
 0x244   : > { %v2282_v53 = vpop.eup %2281  ;;  %2119 = vmatmul.mubr.msk.f32.vlgmr.msra.gmra.mrb[12].mxu1 %vm972_vm2, %v1144_v50 }
 0x245   : > { %2125 = vmatprep.mubr.msk.f32.mxu0 %vm972_vm2, %v1145_v52  ;;  %2214 = vmatpush3.bf16.msra.mxu1 %v2211_v42  ;;  %v1147_v27 = vmul.f32 %v2282_v53, %v2553_v34 }
 0x246   : > { %v2284_v29 = vpop.eup %2283 }
 0x247   : > { %v1146_v30 = vmul.f32 %v2284_v29, %v2565_v38  ;;  %2132 = vmatprep.mubr.msk.f32.mxu1 %vm972_vm2, %v1147_v27 }
 0x248   : > { %v2286_v24 = vpop.eup %2285 }
 0x249   : > { %v1148_v54 = vmul.f32 %v2286_v24, %v2569_v41  ;;  %2126 = vmatmul.mubr.msk.f32.vlgmr.msra.gmra.mrb[14].mxu0 %vm972_vm2, %v1146_v30 }
 0x24b   : > { %2133 = vmatmul.mubr.msk.f32.vlgmr.msra.gmra.mrb[14].mxu1 %vm972_vm2, %v1148_v54 }
 0x303   : > { %v2085_v32 = vpop.f32.mrb[8].mxu0 }
 0x304   : > { %1798 = vst.msk [vmem:[%s2625_s26 + $0x8] sm:$0xff] %vm259_vm0, %v2085_v32  ;;  %v1221_v34 = vpop.f32.mrb[9].mxu0 }
 0x305   : > { %1797 = vst.msk [vmem:[%s2625_s26] sm:$0xff] %vm259_vm0, %v1221_v34 }
 0x307   : > { %v2092_v38 = vpop.f32.mrb[8].mxu1 }
 0x308   : > { %1800 = vst.msk [vmem:[%s2625_s26 + $0x18] sm:$0xff] %vm259_vm0, %v2092_v38  ;;  %v1302_v41 = vpop.f32.mrb[9].mxu1 }
 0x309   : > { %1799 = vst.msk [vmem:[%s2625_s26 + $0x10] sm:$0xff] %vm259_vm0, %v1302_v41 }
 0x30d   : > { %v2099_v55 = vpop.f32.mrb[10].mxu0 }
 0x30e   : > { %1802 = vst.msk [vmem:[%s2625_s26 + $0x28] sm:$0xff] %vm259_vm0, %v2099_v55  ;;  %v1383_v57 = vpop.f32.mrb[11].mxu0 }
 0x30f   : > { %1801 = vst.msk [vmem:[%s2625_s26 + $0x20] sm:$0xff] %vm259_vm0, %v1383_v57  ;;  %v2106_v58 = vpop.f32.mrb[10].mxu1 }
 0x310   : > { %1804 = vst.msk [vmem:[%s2625_s26 + $0x38] sm:$0xff] %vm259_vm0, %v2106_v58  ;;  %v1464_v59 = vpop.f32.mrb[11].mxu1 }
 0x311   : > { %1803 = vst.msk [vmem:[%s2625_s26 + $0x30] sm:$0xff] %vm259_vm0, %v1464_v59 }
 0x315   : > { %v2113_v60 = vpop.f32.mrb[12].mxu0 }
 0x316   : > { %1806 = vst.msk [vmem:[%s2625_s26 + $0x48] sm:$0xff] %vm259_vm0, %v2113_v60  ;;  %v1545_v62 = vpop.f32.mrb[13].mxu0 }
 0x317   : > { %1805 = vst.msk [vmem:[%s2625_s26 + $0x40] sm:$0xff] %vm259_vm0, %v1545_v62  ;;  %v2120_v63 = vpop.f32.mrb[12].mxu1 }
 0x318   : > { %1808 = vst.msk [vmem:[%s2625_s26 + $0x58] sm:$0xff] %vm259_vm0, %v2120_v63  ;;  %v1626_v0 = vpop.f32.mrb[13].mxu1 }
 0x319   : > { %1807 = vst.msk [vmem:[%s2625_s26 + $0x50] sm:$0xff] %vm259_vm0, %v1626_v0 }
 0x31c   : > { %v2127_v1 = vpop.f32.mrb[14].mxu0 }
 0x31d   : > { %1810 = vst.msk [vmem:[%s2625_s26 + $0x68] sm:$0xff] %vm259_vm0, %v2127_v1  ;;  %v1707_v3 = vpop.f32.mrb[15].mxu0 }
 0x31e   : > { %1809 = vst.msk [vmem:[%s2625_s26 + $0x60] sm:$0xff] %vm259_vm0, %v1707_v3  ;;  %v2134_v4 = vpop.f32.mrb[14].mxu1 }
 0x31f   : > { %1812 = vst.msk [vmem:[%s2625_s26 + $0x78] sm:$0xff] %vm259_vm0, %v2134_v4  ;;  %v1788_v5 = vpop.f32.mrb[15].mxu1 }
 0x320   : > { %1811 = vst.msk [vmem:[%s2625_s26 + $0x70] sm:$0xff] %vm259_vm0, %v1788_v5 }
 0x321 PF: > { %s13_s12 = sadd.s32 1, %s2293_s12  }
 0x322   : > { %p10_p4 = scmp.ge.s32.totalorder %s13_s12, 10  }
 0x324   :  { %12 = sbr.rel (!%p10_p4) target bundleno = 1 (0x1), region = 68 }

// kernel: crossandoutput_forward.127
= control target key start
LH: loop header
LB: loop body
LE: loop exit
PB: predicated region body
PF: predicated region fallthrough
CT: control target
= control target key end

     0   :  { %s704_s18 = smov 0   ;;  %s821_s0 = inlined_call_operand.vmem [shape: f32[128,32], index: 0, kind: input, shape index: {}]   ;;  %s822_s1 = inlined_call_operand.vmem [shape: f32[1,32], index: 1, kind: input, shape index: {}]   ;;  %s823_s2 = inlined_call_operand.vmem [shape: f32[1,32], index: 2, kind: input, shape index: {}]   ;;  %s824_s3 = inlined_call_operand.vmem [shape: f32[32,32], index: 3, kind: input, shape index: {}]   ;;  %s825_s4 = inlined_call_operand.vmem [shape: f32[1,32], index: 4, kind: input, shape index: {}]   ;;  %s826_s5 = inlined_call_operand.vmem [shape: f32[128,32], index: 5, kind: output, shape index: {}]  }
   0x1 LB: > { %s576_s19 = sadd.s32 4294967295, %s672_s18   ;;  %p580_p0 = scmp.ge.s32.totalorder %s672_s18, 1  ;;  %s672_s18 = sphi %s704_s18, %s15_s18  }
   0x2   : > { %p188_p1 = scmp.lt.s32.totalorder %s672_s18, 3 }
   0x4   : > { %p189_p2 = pnand %p580_p0, %p188_p1 }
   0x5   : > { %s581_s20 = sshll.u32 (!%p189_p2), %s576_s19, 3  ;;  %vm236_vm0 = vcmask (!%p189_p2), 261120   ;;  %v372_v56 = vld [vmem:[%s824_s3] sm:$0xff] (!%p189_p2)  ;;  %v373_v57 = vld [vmem:[%s824_s3 + $0x8] sm:$0xff] (!%p189_p2)  ;;  %v374_v59 = vld [vmem:[%s824_s3 + $0x10] sm:$0xff] (!%p189_p2) }
   0x6   : > { %192 = sbr.rel (%p189_p2) target bundleno = 562 (0x232), region = 40  ;;  %p217_p3 = scmp.lt.s32.totalorder (!%p189_p2), %s581_s20, 15  ;;  %v630_v58 = vpack.c.bf16 (!%p189_p2), %v373_v57, %v372_v56  ;;  %v375_v60 = vld [vmem:[%s824_s3 + $0x18] sm:$0xff] (!%p189_p2) }
   0x7   : > { %v634_v61 = vpack.c.bf16 (!%p189_p2), %v375_v60, %v374_v59 }
   0x8   : > { %631 = vmatprep.subr.bf16.mxu0 (!%p189_p2), %v630_v58  ;;  %638 = vmatprep.subr.bf16.mxu1 (!%p189_p2), %v630_v58 }
   0x9   : > { %633 = vmatpush3.bf16.msra.mxu0 (!%p189_p2), %v630_v58  ;;  %640 = vmatpush3.bf16.msra.mxu1 (!%p189_p2), %v630_v58 }
   0xa   : > { %635 = vmatprep.subr.bf16.mxu0 (!%p189_p2), %v634_v61  ;;  %639 = vmatprep.subr.bf16.mxu1 (!%p189_p2), %v634_v61 }
   0xd   : > { %s828_s20 = smov (!%p217_p3, %s581_s20), 15  ;;  %637 = vmatpush3.bf16.msra.mxu0 %v634_v61  ;;  %641 = vmatpush3.bf16.msra.mxu1 %v634_v61 }
   0xe   : > { %s582_s21 = sshll.u32 %s828_s20, 3 }
   0xf   : > { %s220_s24 = scalar_lea.vmem %s821_s0, %s582_s21  ;;  %s226_s16 = scalar_lea.vmem %s826_s5, %s582_s21 }
  0x10   : > { %v228_v0 = vld [vmem:[%s220_s24] sm:$0xff]  ;;  %v229_v1 = vld [vmem:[%s220_s24 + $0x8] sm:$0xff]  ;;  %v230_v8 = vld [vmem:[%s220_s24 + $0x10] sm:$0xff] }
  0x11   : > { %v232_v2 = vld [vmem:[%s220_s24 + $0x20] sm:$0xff]  ;;  %v237_v3 = vsel %vm236_vm0, %v228_v0, 0.0  ;;  %v240_v4 = vsel %vm236_vm0, %v229_v1, 0.0  ;;  %v233_v5 = vld [vmem:[%s220_s24 + $0x28] sm:$0xff]  ;;  %v234_v9 = vld [vmem:[%s220_s24 + $0x30] sm:$0xff]  ;;  %v243_v10 = vsel %vm236_vm0, %v230_v8, 0.0 }
  0x12   : > { %238 = vadd.xlane.f32.xlu0 %v237_v3  ;;  %241 = vadd.xlane.f32.xlu1 %v240_v4  ;;  %v249_v6 = vsel %vm236_vm0, %v232_v2, 0.0  ;;  %v252_v7 = vsel %vm236_vm0, %v233_v5, 0.0  ;;  %v255_v11 = vsel %vm236_vm0, %v234_v9, 0.0  ;;  %v231_v12 = vld [vmem:[%s220_s24 + $0x18] sm:$0xff] }
  0x13   : > { %v235_v13 = vld [vmem:[%s220_s24 + $0x38] sm:$0xff]  ;;  %v246_v14 = vsel %vm236_vm0, %v231_v12, 0.0 }
  0x14   : > { %v258_v15 = vsel %vm236_vm0, %v235_v13, 0.0 }
  0x16   : > { %250 = vadd.xlane.f32.xlu0 %v249_v6  ;;  %253 = vadd.xlane.f32.xlu1 %v252_v7 }
  0x1a   : > { %244 = vadd.xlane.f32.xlu0 %v243_v10  ;;  %256 = vadd.xlane.f32.xlu1 %v255_v11 }
  0x1e   : > { %247 = vadd.xlane.f32.xlu0 %v246_v14  ;;  %259 = vadd.xlane.f32.xlu1 %v258_v15 }
  0x9f   : > { %v239_v16 = vpop.xlane.xlu0 %238  ;;  %v242_v17 = vpop.xlane.xlu1 %241 }
  0xa0   : > { %v262_v18 = vmul.f32 0.03125, %v239_v16  ;;  %v263_v19 = vmul.f32 0.03125, %v242_v17 }
  0xa2   : > { %v728_v20 = vsub.f32 %v228_v0, %v262_v18  ;;  %v730_v21 = vsub.f32 %v229_v1, %v263_v19 }
  0xa3   : > { %v251_v22 = vpop.xlane.xlu0 %250  ;;  %v254_v23 = vpop.xlane.xlu1 %253 }
  0xa4   : > { %v266_v24 = vmul.f32 0.03125, %v251_v22  ;;  %v267_v25 = vmul.f32 0.03125, %v254_v23  ;;  %v278_v26 = vmul.f32 %v728_v20, %v728_v20  ;;  %v279_v27 = vmul.f32 %v730_v21, %v730_v21  ;;  %v585_v22 = vld [vmem:[%s822_s1] ss:$0 sm:$0xff] }
  0xa6   : > { %v736_v28 = vsub.f32 %v232_v2, %v266_v24  ;;  %v738_v29 = vsub.f32 %v233_v5, %v267_v25  ;;  %v286_v30 = vsel %vm236_vm0, %v278_v26, 0.0  ;;  %v289_v33 = vsel %vm236_vm0, %v279_v27, 0.0  ;;  %v586_v26 = vld [vmem:[%s823_s2] ss:$0 sm:$0xff] }
  0xa7   : > { %287 = vadd.xlane.f32.xlu0 %v286_v30  ;;  %v245_v31 = vpop.xlane.xlu0 %244  ;;  %v257_v32 = vpop.xlane.xlu1 %256 }
  0xa8   : > { %v264_v34 = vmul.f32 0.03125, %v245_v31  ;;  %v268_v35 = vmul.f32 0.03125, %v257_v32  ;;  %v282_v36 = vmul.f32 %v736_v28, %v736_v28  ;;  %v283_v37 = vmul.f32 %v738_v29, %v738_v29 }
  0xaa   : > { %v746_v38 = vsub.f32 %v230_v8, %v264_v34  ;;  %v748_v39 = vsub.f32 %v234_v9, %v268_v35  ;;  %v298_v40 = vsel %vm236_vm0, %v282_v36, 0.0  ;;  %v301_v43 = vsel %vm236_vm0, %v283_v37, 0.0 }
  0xab   : > { %290 = vadd.xlane.f32.xlu0 %v289_v33  ;;  %299 = vadd.xlane.f32.xlu1 %v298_v40  ;;  %v248_v41 = vpop.xlane.xlu0 %247  ;;  %v260_v42 = vpop.xlane.xlu1 %259 }
  0xac   : > { %v265_v44 = vmul.f32 0.03125, %v248_v41  ;;  %v269_v45 = vmul.f32 0.03125, %v260_v42  ;;  %v280_v46 = vmul.f32 %v746_v38, %v746_v38  ;;  %v284_v47 = vmul.f32 %v748_v39, %v748_v39 }
  0xae   : > { %v756_v48 = vsub.f32 %v231_v12, %v265_v44  ;;  %v758_v49 = vsub.f32 %v235_v13, %v269_v45  ;;  %v292_v50 = vsel %vm236_vm0, %v280_v46, 0.0  ;;  %v304_v51 = vsel %vm236_vm0, %v284_v47, 0.0 }
  0xaf   : > { %302 = vadd.xlane.f32.xlu1 %v301_v43  ;;  %293 = vadd.xlane.f32.xlu0 %v292_v50 }
  0xb0   : > { %v281_v52 = vmul.f32 %v756_v48, %v756_v48  ;;  %v285_v53 = vmul.f32 %v758_v49, %v758_v49 }
  0xb2   : > { %v295_v54 = vsel %vm236_vm0, %v281_v52, 0.0  ;;  %v307_v55 = vsel %vm236_vm0, %v285_v53, 0.0 }
  0xb3   : > { %305 = vadd.xlane.f32.xlu1 %v304_v51  ;;  %296 = vadd.xlane.f32.xlu0 %v295_v54 }
  0xb7   : > { %308 = vadd.xlane.f32.xlu1 %v307_v55 }
 0x134   : > { %v288_v62 = vpop.xlane.xlu0 %287 }
 0x135   : > { %v310_v63 = vmul.f32 0.03125, %v288_v62 }
 0x137   : > { %v318_v0 = vadd.f32 1e-05, %v310_v63 }
 0x138   : > { %v300_v1 = vpop.xlane.xlu1 %299  ;;  %v291_v2 = vpop.xlane.xlu0 %290 }
 0x139   : > { %650 = vrsqrt.f32 %v318_v0  ;;  %v314_v3 = vmul.f32 0.03125, %v300_v1  ;;  %v311_v4 = vmul.f32 0.03125, %v291_v2 }
 0x13b   : > { %v322_v5 = vadd.f32 1e-05, %v314_v3  ;;  %v319_v6 = vadd.f32 1e-05, %v311_v4 }
 0x13c   : > { %v303_v7 = vpop.xlane.xlu1 %302  ;;  %v294_v8 = vpop.xlane.xlu0 %293 }
 0x13d   : > { %652 = vrsqrt.f32 %v322_v5  ;;  %v315_v9 = vmul.f32 0.03125, %v303_v7  ;;  %v312_v10 = vmul.f32 0.03125, %v294_v8 }
 0x13e   : > { %654 = vrsqrt.f32 %v319_v6 }
 0x13f   : > { %v323_v11 = vadd.f32 1e-05, %v315_v9  ;;  %v320_v12 = vadd.f32 1e-05, %v312_v10 }
 0x140   : > { %v306_v13 = vpop.xlane.xlu1 %305  ;;  %v297_v14 = vpop.xlane.xlu0 %296 }
 0x141   : > { %656 = vrsqrt.f32 %v323_v11  ;;  %v316_v15 = vmul.f32 0.03125, %v306_v13  ;;  %v313_v16 = vmul.f32 0.03125, %v297_v14 }
 0x142   : > { %658 = vrsqrt.f32 %v320_v12 }
 0x143   : > { %v651_v17 = vpop.eup %650  ;;  %v324_v18 = vadd.f32 1e-05, %v316_v15  ;;  %v321_v19 = vadd.f32 1e-05, %v313_v16 }
 0x144   : > { %v309_v23 = vpop.xlane.xlu1 %308  ;;  %v334_v24 = vmul.f32 %v651_v17, %v728_v20 }
 0x145   : > { %660 = vrsqrt.f32 %v324_v18  ;;  %v317_v25 = vmul.f32 0.03125, %v309_v23 }
 0x146   : > { %662 = vrsqrt.f32 %v321_v19  ;;  %v349_v27 = vmul.f32 %v585_v22, %v334_v24 }
 0x147   : > { %v653_v30 = vpop.eup %652  ;;  %v325_v31 = vadd.f32 1e-05, %v317_v25 }
 0x148   : > { %v655_v32 = vpop.eup %654  ;;  %v364_v33 = vadd.f32 %v586_v26, %v349_v27  ;;  %v338_v34 = vmul.f32 %v653_v30, %v736_v28 }
 0x149   : > { %664 = vrsqrt.f32 %v325_v31  ;;  %v335_v35 = vmul.f32 %v655_v32, %v730_v21 }
 0x14a   : > { %618 = vmatprep.mubr.msk.f32.mxu0 %vm236_vm0, %v364_v33  ;;  %v353_v20 = vmul.f32 %v585_v22, %v338_v34 }
 0x14b   : > { %v657_v36 = vpop.eup %656  ;;  %v350_v37 = vmul.f32 %v585_v22, %v335_v35 }
 0x14c   : > { %v659_v40 = vpop.eup %658  ;;  %v368_v41 = vadd.f32 %v586_v26, %v353_v20  ;;  %v339_v42 = vmul.f32 %v657_v36, %v738_v29 }
 0x14d   : > { %v365_v43 = vadd.f32 %v586_v26, %v350_v37  ;;  %v336_v44 = vmul.f32 %v659_v40, %v746_v38 }
 0x14e   : > { %624 = vmatprep.mubr.msk.f32.mxu1 %vm236_vm0, %v368_v41  ;;  %v354_v45 = vmul.f32 %v585_v22, %v339_v42 }
 0x14f   : > { %v661_v46 = vpop.eup %660  ;;  %619 = vmatmul.mubr.msk.f32.vlgmr.msra.gmra.mrb[0].mxu0 %vm236_vm0, %v365_v43  ;;  %v351_v28 = vmul.f32 %v585_v22, %v336_v44 }
 0x150   : > { %v663_v21 = vpop.eup %662  ;;  %v369_v47 = vadd.f32 %v586_v26, %v354_v45  ;;  %v340_v50 = vmul.f32 %v661_v46, %v748_v39 }
 0x151   : > { %v366_v51 = vadd.f32 %v586_v26, %v351_v28  ;;  %v337_v52 = vmul.f32 %v663_v21, %v756_v48  ;;  %v587_v48 = vld [vmem:[%s825_s4] ss:$0 sm:$0xff] }
 0x152   : > { %625 = vmatmul.mubr.msk.f32.vlgmr.msra.gmra.mrb[0].mxu1 %vm236_vm0, %v369_v47  ;;  %v355_v29 = vmul.f32 %v585_v22, %v340_v50 }
 0x153   : > { %v665_v53 = vpop.eup %664  ;;  %621 = vmatprep.mubr.msk.f32.mxu0 %vm236_vm0, %v366_v51  ;;  %v352_v38 = vmul.f32 %v585_v22, %v337_v52 }
 0x154   : > { %v370_v54 = vadd.f32 %v586_v26, %v355_v29  ;;  %v341_v55 = vmul.f32 %v665_v53, %v758_v49 }
 0x155   : > { %v367_v56 = vadd.f32 %v586_v26, %v352_v38 }
 0x156   : > { %627 = vmatprep.mubr.msk.f32.mxu1 %vm236_vm0, %v370_v54  ;;  %v356_v57 = vmul.f32 %v585_v22, %v341_v55 }
 0x157   : > { %622 = vmatmul.mubr.msk.f32.gmra.mrb[2].mxu0 %vm236_vm0, %v367_v56 }
 0x158   : > { %v371_v39 = vadd.f32 %v586_v26, %v356_v57 }
 0x15a   : > { %628 = vmatmul.mubr.msk.f32.gmra.mrb[2].mxu1 %vm236_vm0, %v371_v39 }
 0x222   : > { %v620_v58 = vpop.f32.mrb[0].mxu0 }
 0x223   : > { %v479_v49 = vadd.f32 %v620_v58, %v587_v48  ;;  %v473_v59 = vpop.f32.mrb[1].mxu0 }
 0x224   : > { %v474_v60 = vadd.f32 %v587_v48, %v473_v59 }
 0x225   : > { %513 = vst.msk [vmem:[%s226_s16 + $0x8] sm:$0xff] %vm236_vm0, %v479_v49  ;;  %v626_v61 = vpop.f32.mrb[0].mxu1 }
 0x226   : > { %512 = vst.msk [vmem:[%s226_s16] sm:$0xff] %vm236_vm0, %v474_v60  ;;  %v499_v62 = vadd.f32 %v626_v61, %v587_v48  ;;  %v493_v63 = vpop.f32.mrb[1].mxu1 }
 0x227   : > { %v494_v0 = vadd.f32 %v587_v48, %v493_v63 }
 0x228   : > { %517 = vst.msk [vmem:[%s226_s16 + $0x28] sm:$0xff] %vm236_vm0, %v499_v62 }
 0x229   : > { %516 = vst.msk [vmem:[%s226_s16 + $0x20] sm:$0xff] %vm236_vm0, %v494_v0 }
 0x22a   : > { %v623_v1 = vpop.f32.mrb[2].mxu0 }
 0x22b   : > { %v489_v2 = vadd.f32 %v623_v1, %v587_v48  ;;  %v483_v3 = vpop.f32.mrb[3].mxu0 }
 0x22c   : > { %v484_v4 = vadd.f32 %v587_v48, %v483_v3 }
 0x22d   : > { %515 = vst.msk [vmem:[%s226_s16 + $0x18] sm:$0xff] %vm236_vm0, %v489_v2  ;;  %v629_v5 = vpop.f32.mrb[2].mxu1 }
 0x22e   : > { %514 = vst.msk [vmem:[%s226_s16 + $0x10] sm:$0xff] %vm236_vm0, %v484_v4  ;;  %v509_v6 = vadd.f32 %v629_v5, %v587_v48  ;;  %v503_v7 = vpop.f32.mrb[3].mxu1 }
 0x22f   : > { %v504_v8 = vadd.f32 %v587_v48, %v503_v7 }
 0x230   : > { %519 = vst.msk [vmem:[%s226_s16 + $0x38] sm:$0xff] %vm236_vm0, %v509_v6 }
 0x231   : > { %518 = vst.msk [vmem:[%s226_s16 + $0x30] sm:$0xff] %vm236_vm0, %v504_v8 }
 0x232 PF: > { %s15_s18 = sadd.s32 1, %s672_s18  }
 0x233   : > { %p12_p4 = scmp.ge.s32.totalorder %s15_s18, 4  }
 0x235   :  { %14 = sbr.rel (!%p12_p4) target bundleno = 1 (0x1), region = 70 }

// kernel: crossandoutput_forward.131
= control target key start
LH: loop header
LB: loop body
LE: loop exit
PB: predicated region body
PF: predicated region fallthrough
CT: control target
= control target key end

     0   :  { %s760_s18 = smov 0   ;;  %s879_s0 = inlined_call_operand.vmem [shape: f32[128,32], index: 0, kind: input, shape index: {}]   ;;  %s880_s1 = inlined_call_operand.vmem [shape: f32[1,32], index: 1, kind: input, shape index: {}]   ;;  %s881_s2 = inlined_call_operand.vmem [shape: f32[1,32], index: 2, kind: input, shape index: {}]   ;;  %s882_s3 = inlined_call_operand.vmem [shape: f32[32,128], index: 3, kind: input, shape index: {}]   ;;  %s883_s4 = inlined_call_operand.vmem [shape: f32[1,128], index: 4, kind: input, shape index: {}]   ;;  %s884_s5 = inlined_call_operand.vmem [shape: f32[128,128], index: 5, kind: output, shape index: {}]  }
   0x1 LB: > { %s616_s19 = sadd.s32 4294967295, %s728_s18   ;;  %p620_p0 = scmp.ge.s32.totalorder %s728_s18, 1  ;;  %s728_s18 = sphi %s760_s18, %s15_s18  }
   0x2   : > { %p188_p1 = scmp.lt.s32.totalorder %s728_s18, 3 }
   0x4   : > { %p189_p2 = pnand %p620_p0, %p188_p1 }
   0x5   : > { %s621_s20 = sshll.u32 (!%p189_p2), %s616_s19, 3  ;;  %vm236_vm0 = vcmask (!%p189_p2), 261120   ;;  %v372_v56 = vld [vmem:[%s882_s3] sm:$0xff] (!%p189_p2)  ;;  %v373_v57 = vld [vmem:[%s882_s3 + $0x8] sm:$0xff] (!%p189_p2)  ;;  %v374_v59 = vld [vmem:[%s882_s3 + $0x10] sm:$0xff] (!%p189_p2) }
   0x6   : > { %192 = sbr.rel (%p189_p2) target bundleno = 579 (0x243), region = 40  ;;  %p217_p3 = scmp.lt.s32.totalorder (!%p189_p2), %s621_s20, 15  ;;  %v670_v58 = vpack.c.bf16 (!%p189_p2), %v373_v57, %v372_v56  ;;  %v375_v60 = vld [vmem:[%s882_s3 + $0x18] sm:$0xff] (!%p189_p2) }
   0x7   : > { %v674_v61 = vpack.c.bf16 (!%p189_p2), %v375_v60, %v374_v59 }
   0x8   : > { %671 = vmatprep.subr.bf16.mxu0 (!%p189_p2), %v670_v58  ;;  %678 = vmatprep.subr.bf16.mxu1 (!%p189_p2), %v670_v58 }
   0x9   : > { %673 = vmatpush3.bf16.msra.mxu0 (!%p189_p2), %v670_v58  ;;  %680 = vmatpush3.bf16.msra.mxu1 (!%p189_p2), %v670_v58 }
   0xa   : > { %675 = vmatprep.subr.bf16.mxu0 (!%p189_p2), %v674_v61  ;;  %679 = vmatprep.subr.bf16.mxu1 (!%p189_p2), %v674_v61 }
   0xd   : > { %s886_s20 = smov (!%p217_p3, %s621_s20), 15  ;;  %677 = vmatpush3.bf16.msra.mxu0 %v674_v61  ;;  %681 = vmatpush3.bf16.msra.mxu1 %v674_v61 }
   0xe   : > { %s622_s21 = sshll.u32 %s886_s20, 3 }
   0xf   : > { %s220_s24 = scalar_lea.vmem %s879_s0, %s622_s21  ;;  %s866_s16 = scalar_lea.vmem %s884_s5, %s622_s21 }
  0x10   : > { %v228_v0 = vld [vmem:[%s220_s24] sm:$0xff]  ;;  %v229_v1 = vld [vmem:[%s220_s24 + $0x8] sm:$0xff]  ;;  %v230_v8 = vld [vmem:[%s220_s24 + $0x10] sm:$0xff] }
  0x11   : > { %v232_v2 = vld [vmem:[%s220_s24 + $0x20] sm:$0xff]  ;;  %v237_v3 = vsel %vm236_vm0, %v228_v0, 0.0  ;;  %v240_v4 = vsel %vm236_vm0, %v229_v1, 0.0  ;;  %v233_v5 = vld [vmem:[%s220_s24 + $0x28] sm:$0xff]  ;;  %v234_v9 = vld [vmem:[%s220_s24 + $0x30] sm:$0xff]  ;;  %v243_v10 = vsel %vm236_vm0, %v230_v8, 0.0 }
  0x12   : > { %238 = vadd.xlane.f32.xlu0 %v237_v3  ;;  %241 = vadd.xlane.f32.xlu1 %v240_v4  ;;  %v249_v6 = vsel %vm236_vm0, %v232_v2, 0.0  ;;  %v252_v7 = vsel %vm236_vm0, %v233_v5, 0.0  ;;  %v255_v11 = vsel %vm236_vm0, %v234_v9, 0.0  ;;  %v231_v12 = vld [vmem:[%s220_s24 + $0x18] sm:$0xff] }
  0x13   : > { %v235_v13 = vld [vmem:[%s220_s24 + $0x38] sm:$0xff]  ;;  %v246_v14 = vsel %vm236_vm0, %v231_v12, 0.0 }
  0x14   : > { %v258_v15 = vsel %vm236_vm0, %v235_v13, 0.0 }
  0x16   : > { %250 = vadd.xlane.f32.xlu0 %v249_v6  ;;  %253 = vadd.xlane.f32.xlu1 %v252_v7 }
  0x1a   : > { %244 = vadd.xlane.f32.xlu0 %v243_v10  ;;  %256 = vadd.xlane.f32.xlu1 %v255_v11 }
  0x1e   : > { %247 = vadd.xlane.f32.xlu0 %v246_v14  ;;  %259 = vadd.xlane.f32.xlu1 %v258_v15 }
  0x9f   : > { %v239_v16 = vpop.xlane.xlu0 %238  ;;  %v242_v17 = vpop.xlane.xlu1 %241 }
  0xa0   : > { %v262_v18 = vmul.f32 0.03125, %v239_v16  ;;  %v263_v19 = vmul.f32 0.03125, %v242_v17 }
  0xa2   : > { %v784_v20 = vsub.f32 %v228_v0, %v262_v18  ;;  %v786_v21 = vsub.f32 %v229_v1, %v263_v19 }
  0xa3   : > { %v251_v22 = vpop.xlane.xlu0 %250  ;;  %v254_v23 = vpop.xlane.xlu1 %253 }
  0xa4   : > { %v266_v24 = vmul.f32 0.03125, %v251_v22  ;;  %v267_v25 = vmul.f32 0.03125, %v254_v23  ;;  %v278_v26 = vmul.f32 %v784_v20, %v784_v20  ;;  %v279_v27 = vmul.f32 %v786_v21, %v786_v21  ;;  %v625_v22 = vld [vmem:[%s880_s1] ss:$0 sm:$0xff] }
  0xa6   : > { %v792_v28 = vsub.f32 %v232_v2, %v266_v24  ;;  %v794_v29 = vsub.f32 %v233_v5, %v267_v25  ;;  %v286_v30 = vsel %vm236_vm0, %v278_v26, 0.0  ;;  %v289_v33 = vsel %vm236_vm0, %v279_v27, 0.0  ;;  %v626_v26 = vld [vmem:[%s881_s2] ss:$0 sm:$0xff] }
  0xa7   : > { %287 = vadd.xlane.f32.xlu0 %v286_v30  ;;  %v245_v31 = vpop.xlane.xlu0 %244  ;;  %v257_v32 = vpop.xlane.xlu1 %256 }
  0xa8   : > { %v264_v34 = vmul.f32 0.03125, %v245_v31  ;;  %v268_v35 = vmul.f32 0.03125, %v257_v32  ;;  %v282_v36 = vmul.f32 %v792_v28, %v792_v28  ;;  %v283_v37 = vmul.f32 %v794_v29, %v794_v29 }
  0xaa   : > { %v802_v38 = vsub.f32 %v230_v8, %v264_v34  ;;  %v804_v39 = vsub.f32 %v234_v9, %v268_v35  ;;  %v298_v40 = vsel %vm236_vm0, %v282_v36, 0.0  ;;  %v301_v43 = vsel %vm236_vm0, %v283_v37, 0.0 }
  0xab   : > { %290 = vadd.xlane.f32.xlu0 %v289_v33  ;;  %299 = vadd.xlane.f32.xlu1 %v298_v40  ;;  %v248_v41 = vpop.xlane.xlu0 %247  ;;  %v260_v42 = vpop.xlane.xlu1 %259 }
  0xac   : > { %v265_v44 = vmul.f32 0.03125, %v248_v41  ;;  %v269_v45 = vmul.f32 0.03125, %v260_v42  ;;  %v280_v46 = vmul.f32 %v802_v38, %v802_v38  ;;  %v284_v47 = vmul.f32 %v804_v39, %v804_v39 }
  0xae   : > { %v812_v48 = vsub.f32 %v231_v12, %v265_v44  ;;  %v814_v49 = vsub.f32 %v235_v13, %v269_v45  ;;  %v292_v50 = vsel %vm236_vm0, %v280_v46, 0.0  ;;  %v304_v51 = vsel %vm236_vm0, %v284_v47, 0.0 }
  0xaf   : > { %302 = vadd.xlane.f32.xlu1 %v301_v43  ;;  %293 = vadd.xlane.f32.xlu0 %v292_v50 }
  0xb0   : > { %v281_v52 = vmul.f32 %v812_v48, %v812_v48  ;;  %v285_v53 = vmul.f32 %v814_v49, %v814_v49 }
  0xb2   : > { %v295_v54 = vsel %vm236_vm0, %v281_v52, 0.0  ;;  %v307_v55 = vsel %vm236_vm0, %v285_v53, 0.0 }
  0xb3   : > { %305 = vadd.xlane.f32.xlu1 %v304_v51  ;;  %296 = vadd.xlane.f32.xlu0 %v295_v54 }
  0xb7   : > { %308 = vadd.xlane.f32.xlu1 %v307_v55 }
 0x134   : > { %v288_v62 = vpop.xlane.xlu0 %287 }
 0x135   : > { %v310_v63 = vmul.f32 0.03125, %v288_v62 }
 0x137   : > { %v318_v0 = vadd.f32 1e-05, %v310_v63 }
 0x138   : > { %v300_v1 = vpop.xlane.xlu1 %299  ;;  %v291_v2 = vpop.xlane.xlu0 %290 }
 0x139   : > { %690 = vrsqrt.f32 %v318_v0  ;;  %v314_v3 = vmul.f32 0.03125, %v300_v1  ;;  %v311_v4 = vmul.f32 0.03125, %v291_v2 }
 0x13b   : > { %v322_v5 = vadd.f32 1e-05, %v314_v3  ;;  %v319_v6 = vadd.f32 1e-05, %v311_v4 }
 0x13c   : > { %v303_v7 = vpop.xlane.xlu1 %302  ;;  %v294_v8 = vpop.xlane.xlu0 %293 }
 0x13d   : > { %692 = vrsqrt.f32 %v322_v5  ;;  %v315_v9 = vmul.f32 0.03125, %v303_v7  ;;  %v312_v10 = vmul.f32 0.03125, %v294_v8 }
 0x13e   : > { %694 = vrsqrt.f32 %v319_v6 }
 0x13f   : > { %v323_v11 = vadd.f32 1e-05, %v315_v9  ;;  %v320_v12 = vadd.f32 1e-05, %v312_v10 }
 0x140   : > { %v306_v13 = vpop.xlane.xlu1 %305  ;;  %v297_v14 = vpop.xlane.xlu0 %296 }
 0x141   : > { %696 = vrsqrt.f32 %v323_v11  ;;  %v316_v15 = vmul.f32 0.03125, %v306_v13  ;;  %v313_v16 = vmul.f32 0.03125, %v297_v14 }
 0x142   : > { %698 = vrsqrt.f32 %v320_v12 }
 0x143   : > { %v691_v17 = vpop.eup %690  ;;  %v324_v18 = vadd.f32 1e-05, %v316_v15  ;;  %v321_v19 = vadd.f32 1e-05, %v313_v16 }
 0x144   : > { %v309_v23 = vpop.xlane.xlu1 %308  ;;  %v334_v24 = vmul.f32 %v691_v17, %v784_v20 }
 0x145   : > { %700 = vrsqrt.f32 %v324_v18  ;;  %v317_v25 = vmul.f32 0.03125, %v309_v23 }
 0x146   : > { %702 = vrsqrt.f32 %v321_v19  ;;  %v349_v27 = vmul.f32 %v625_v22, %v334_v24 }
 0x147   : > { %v693_v30 = vpop.eup %692  ;;  %v325_v31 = vadd.f32 1e-05, %v317_v25 }
 0x148   : > { %v695_v32 = vpop.eup %694  ;;  %v364_v33 = vadd.f32 %v626_v26, %v349_v27  ;;  %v338_v34 = vmul.f32 %v693_v30, %v792_v28 }
 0x149   : > { %704 = vrsqrt.f32 %v325_v31  ;;  %v335_v35 = vmul.f32 %v695_v32, %v786_v21 }
 0x14a   : > { %658 = vmatprep.mubr.msk.f32.mxu0 %vm236_vm0, %v364_v33  ;;  %v353_v20 = vmul.f32 %v625_v22, %v338_v34 }
 0x14b   : > { %v697_v36 = vpop.eup %696  ;;  %v350_v37 = vmul.f32 %v625_v22, %v335_v35 }
 0x14c   : > { %v699_v40 = vpop.eup %698  ;;  %v368_v41 = vadd.f32 %v626_v26, %v353_v20  ;;  %v339_v42 = vmul.f32 %v697_v36, %v794_v29 }
 0x14d   : > { %v365_v43 = vadd.f32 %v626_v26, %v350_v37  ;;  %v336_v44 = vmul.f32 %v699_v40, %v802_v38 }
 0x14e   : > { %664 = vmatprep.mubr.msk.f32.mxu1 %vm236_vm0, %v368_v41  ;;  %v354_v45 = vmul.f32 %v625_v22, %v339_v42 }
 0x14f   : > { %v701_v46 = vpop.eup %700  ;;  %659 = vmatmul.mubr.msk.f32.vlgmr.msra.gmra.mrb[0].mxu0 %vm236_vm0, %v365_v43  ;;  %v351_v28 = vmul.f32 %v625_v22, %v336_v44 }
 0x150   : > { %v703_v21 = vpop.eup %702  ;;  %v369_v47 = vadd.f32 %v626_v26, %v354_v45  ;;  %v340_v50 = vmul.f32 %v701_v46, %v804_v39 }
 0x151   : > { %v366_v51 = vadd.f32 %v626_v26, %v351_v28  ;;  %v337_v52 = vmul.f32 %v703_v21, %v812_v48  ;;  %v627_v48 = vld [vmem:[%s883_s4] ss:$0 sm:$0xff] }
 0x152   : > { %665 = vmatmul.mubr.msk.f32.vlgmr.msra.gmra.mrb[0].mxu1 %vm236_vm0, %v369_v47  ;;  %v355_v29 = vmul.f32 %v625_v22, %v340_v50 }
 0x153   : > { %v705_v53 = vpop.eup %704  ;;  %661 = vmatprep.mubr.msk.f32.mxu0 %vm236_vm0, %v366_v51  ;;  %v352_v38 = vmul.f32 %v625_v22, %v337_v52 }
 0x154   : > { %v370_v54 = vadd.f32 %v626_v26, %v355_v29  ;;  %v341_v55 = vmul.f32 %v705_v53, %v814_v49 }
 0x155   : > { %v367_v56 = vadd.f32 %v626_v26, %v352_v38 }
 0x156   : > { %667 = vmatprep.mubr.msk.f32.mxu1 %vm236_vm0, %v370_v54  ;;  %v356_v57 = vmul.f32 %v625_v22, %v341_v55 }
 0x157   : > { %662 = vmatmul.mubr.msk.f32.gmra.mrb[2].mxu0 %vm236_vm0, %v367_v56 }
 0x158   : > { %v371_v39 = vadd.f32 %v626_v26, %v356_v57 }
 0x15a   : > { %668 = vmatmul.mubr.msk.f32.gmra.mrb[2].mxu1 %vm236_vm0, %v371_v39 }
 0x222   : > { %v660_v58 = vpop.f32.mrb[0].mxu0 }
 0x223   : > { %v479_v59 = vadd.f32 %v660_v58, %v627_v48  ;;  %v473_v60 = vpop.f32.mrb[1].mxu0 }
 0x224   : > { %v474_v61 = vadd.f32 %v627_v48, %v473_v60 }
 0x225   : > { %v521_v62 = vmul.f32 0.70710677, %v479_v59  ;;  %v666_v63 = vpop.f32.mrb[0].mxu1  ;;  %v513_v19 = vmul.f32 0.5, %v479_v59 }
 0x226   : > { %v520_v49 = vmul.f32 0.70710677, %v474_v61  ;;  %v499_v0 = vadd.f32 %v666_v63, %v627_v48  ;;  %v493_v1 = vpop.f32.mrb[1].mxu1  ;;  %v512_v23 = vmul.f32 0.5, %v474_v61 }
 0x227   : > { %706 = verf.f32 %v521_v62  ;;  %v494_v2 = vadd.f32 %v627_v48, %v493_v1 }
 0x228   : > { %708 = verf.f32 %v520_v49  ;;  %v525_v3 = vmul.f32 0.70710677, %v499_v0  ;;  %v517_v31 = vmul.f32 0.5, %v499_v0 }
 0x229   : > { %v524_v4 = vmul.f32 0.70710677, %v494_v2  ;;  %v516_v33 = vmul.f32 0.5, %v494_v2 }
 0x22a   : > { %710 = verf.f32 %v525_v3  ;;  %v663_v5 = vpop.f32.mrb[2].mxu0 }
 0x22b   : > { %712 = verf.f32 %v524_v4  ;;  %v489_v6 = vadd.f32 %v663_v5, %v627_v48  ;;  %v483_v7 = vpop.f32.mrb[3].mxu0 }
 0x22c   : > { %v484_v8 = vadd.f32 %v627_v48, %v483_v7 }
 0x22d   : > { %v523_v9 = vmul.f32 0.70710677, %v489_v6  ;;  %v669_v10 = vpop.f32.mrb[2].mxu1  ;;  %v515_v40 = vmul.f32 0.5, %v489_v6 }
 0x22e   : > { %v522_v11 = vmul.f32 0.70710677, %v484_v8  ;;  %v509_v12 = vadd.f32 %v669_v10, %v627_v48  ;;  %v503_v13 = vpop.f32.mrb[3].mxu1  ;;  %v514_v42 = vmul.f32 0.5, %v484_v8 }
 0x22f   : > { %714 = verf.f32 %v523_v9  ;;  %v504_v14 = vadd.f32 %v627_v48, %v503_v13 }
 0x230   : > { %716 = verf.f32 %v522_v11  ;;  %v527_v15 = vmul.f32 0.70710677, %v509_v12  ;;  %v519_v21 = vmul.f32 0.5, %v509_v12 }
 0x231   : > { %v707_v16 = vpop.eup %706  ;;  %v526_v17 = vmul.f32 0.70710677, %v504_v14  ;;  %v518_v50 = vmul.f32 0.5, %v504_v14 }
 0x232   : > { %v709_v18 = vpop.eup %708  ;;  %v537_v22 = vadd.f32 1.0, %v707_v16  ;;  %718 = verf.f32 %v527_v15 }
 0x233   : > { %v536_v24 = vadd.f32 1.0, %v709_v18  ;;  %720 = verf.f32 %v526_v17 }
 0x234   : > { %v711_v25 = vpop.eup %710  ;;  %v545_v26 = vmul.f32 %v537_v22, %v513_v19 }
 0x235   : > { %v713_v27 = vpop.eup %712  ;;  %v544_v30 = vmul.f32 %v536_v24, %v512_v23  ;;  %v541_v32 = vadd.f32 1.0, %v711_v25 }
 0x236   : > { %553 = vst [vmem:[%s866_s16 + $0x8] sm:$0xff] %v545_v26  ;;  %v540_v34 = vadd.f32 1.0, %v713_v27 }
 0x237   : > { %552 = vst [vmem:[%s866_s16] sm:$0xff] %v544_v30  ;;  %v549_v35 = vmul.f32 %v541_v32, %v517_v31 }
 0x238   : > { %v548_v20 = vmul.f32 %v540_v34, %v516_v33 }
 0x239   : > { %v715_v36 = vpop.eup %714  ;;  %557 = vst [vmem:[%s866_s16 + $0x28] sm:$0xff] %v549_v35 }
 0x23a   : > { %v717_v37 = vpop.eup %716  ;;  %556 = vst [vmem:[%s866_s16 + $0x20] sm:$0xff] %v548_v20  ;;  %v539_v41 = vadd.f32 1.0, %v715_v36 }
 0x23b   : > { %v538_v43 = vadd.f32 1.0, %v717_v37 }
 0x23c   : > { %v719_v44 = vpop.eup %718  ;;  %v547_v45 = vmul.f32 %v539_v41, %v515_v40 }
 0x23d   : > { %v721_v46 = vpop.eup %720  ;;  %v546_v28 = vmul.f32 %v538_v43, %v514_v42  ;;  %v543_v47 = vadd.f32 1.0, %v719_v44 }
 0x23e   : > { %555 = vst [vmem:[%s866_s16 + $0x18] sm:$0xff] %v547_v45  ;;  %v542_v51 = vadd.f32 1.0, %v721_v46 }
 0x23f   : > { %554 = vst [vmem:[%s866_s16 + $0x10] sm:$0xff] %v546_v28  ;;  %v551_v52 = vmul.f32 %v543_v47, %v519_v21 }
 0x240   : > { %v550_v29 = vmul.f32 %v542_v51, %v518_v50 }
 0x241   : > { %559 = vst [vmem:[%s866_s16 + $0x38] sm:$0xff] %v551_v52 }
 0x242   : > { %558 = vst [vmem:[%s866_s16 + $0x30] sm:$0xff] %v550_v29 }
 0x243 PF: > { %s15_s18 = sadd.s32 1, %s728_s18  }
 0x244   : > { %p12_p4 = scmp.ge.s32.totalorder %s15_s18, 4  }
 0x246   :  { %14 = sbr.rel (!%p12_p4) target bundleno = 1 (0x1), region = 70 }

// kernel: crossandoutput_forward.129
= control target key start
LH: loop header
LB: loop body
LE: loop exit
PB: predicated region body
PF: predicated region fallthrough
CT: control target
= control target key end

     0   :  { %s2139_s12 = smov 0   ;;  %s2454_s0 = inlined_call_operand.vmem [shape: f32[8,8,16,4], index: 0, kind: input, shape index: {}]   ;;  %s2455_s1 = inlined_call_operand.vmem [shape: f32[8,8,8,4], index: 1, kind: input, shape index: {}]   ;;  %s2456_s2 = inlined_call_operand.vmem [shape: f32[8,8,8,4], index: 2, kind: input, shape index: {}]   ;;  %s2457_s3 = inlined_call_operand.vmem [shape: f32[8,8,16,4], index: 3, kind: output, shape index: {}]  }
   0x1 LB: > { %s1852_s13 = sadd.s32 4294967295, %s2117_s12   ;;  %p1856_p0 = scmp.ge.s32.totalorder %s2117_s12, 1  ;;  %s2117_s12 = sphi %s2139_s12, %s13_s12  }
   0x2   : > { %p157_p1 = scmp.lt.s32.totalorder %s2117_s12, 9 }
   0x4   : > { %p158_p2 = pnand %p1856_p0, %p157_p1 }
   0x5   : > { %p191_p3 = scmp.lt.s32.totalorder (!%p158_p2), %s1852_s13, 7  ;;  %vm243_vm0 = vcmask (!%p158_p2), 31744   ;;  %vm932_vm1 = vcmask (!%p158_p2), 64512  }
   0x6   : > { %161 = sbr.rel (%p158_p2) target bundleno = 795 (0x31b), region = 32 }
   0xd   : > { %s2459_s13 = smov (!%p191_p3, %s1852_s13), 7 }
   0xe   : > { %s1907_s14 = sshll.u32 %s2459_s13, 7  ;;  %s1908_s15 = sshll.u32 %s2459_s13, 6 }
   0xf   : > { %s2156_s18 = scalar_lea.vmem %s2454_s0, %s1907_s14  ;;  %s2163_s21 = scalar_lea.vmem %s2455_s1, %s1908_s15 }
  0x10   : > { %v227_v0 = vld [vmem:[%s2163_s21] sm:$0xff]  ;;  %v228_v2 = vld [vmem:[%s2163_s21 + $0x8] sm:$0xff]  ;;  %v213_v3 = vld [vmem:[%s2156_s18 + $0x10] sm:$0xff]  ;;  %s2368_s24 = scalar_lea.vmem %s2456_s2, %s1908_s15  ;;  %s2417_s27 = scalar_lea.vmem %s2457_s3, %s1907_s14 }
  0x11   : > { %v211_v1 = vld [vmem:[%s2156_s18] sm:$0xff]  ;;  %1959 = vmatprep.subr.msk.mxu0 %vm243_vm0, %v227_v0  ;;  %1964 = vmatprep.subr.msk.mxu1 %vm243_vm0, %v228_v2  ;;  %v212_v4 = vld [vmem:[%s2156_s18 + $0x8] sm:$0xff]  ;;  %v230_v5 = vld [vmem:[%s2163_s21 + $0x18] sm:$0xff] }
  0x12   : > { %1961 = vmatprep.mubr.msk.f32.mxu0 %vm243_vm0, %v211_v1  ;;  %1960 = vmatpush3.xpose.msk.msra.mxu0 %vm243_vm0, %v227_v0  ;;  %v229_v6 = vld [vmem:[%s2163_s21 + $0x10] sm:$0xff]  ;;  %v214_v7 = vld [vmem:[%s2156_s18 + $0x18] sm:$0xff]  ;;  %v215_v9 = vld [vmem:[%s2156_s18 + $0x20] sm:$0xff] }
  0x13   : > { %1965 = vmatpush3.xpose.msk.msra.mxu1 %vm243_vm0, %v228_v2  ;;  %1966 = vmatprep.mubr.msk.f32.mxu1 %vm243_vm0, %v213_v3  ;;  %v217_v8 = vld [vmem:[%s2156_s18 + $0x30] sm:$0xff]  ;;  %v232_v10 = vld [vmem:[%s2163_s21 + $0x28] sm:$0xff]  ;;  %v231_v12 = vld [vmem:[%s2163_s21 + $0x20] sm:$0xff] }
  0x14   : > { %1974 = vmatprep.subr.msk.mxu1 %vm243_vm0, %v230_v5  ;;  %1969 = vmatprep.subr.msk.mxu0 %vm243_vm0, %v229_v6  ;;  %v216_v11 = vld [vmem:[%s2156_s18 + $0x28] sm:$0xff]  ;;  %v218_v13 = vld [vmem:[%s2156_s18 + $0x38] sm:$0xff]  ;;  %v221_v14 = vld [vmem:[%s2156_s18 + $0x50] sm:$0xff] }
  0x15   : > { %1962 = vmatmul.mubr.msk.f32.vlgmr.msra.gmra.mrb[0].mxu0 %vm243_vm0, %v212_v4  ;;  %v219_v15 = vld [vmem:[%s2156_s18 + $0x40] sm:$0xff]  ;;  %v234_v16 = vld [vmem:[%s2163_s21 + $0x38] sm:$0xff]  ;;  %v220_v17 = vld [vmem:[%s2156_s18 + $0x48] sm:$0xff] }
  0x16   : > { %1967 = vmatmul.mubr.msk.f32.vlgmr.msra.gmra.mrb[0].mxu1 %vm243_vm0, %v214_v7  ;;  %1970 = vmatpush3.xpose.msk.msra.mxu0 %vm243_vm0, %v229_v6  ;;  %v233_v18 = vld [vmem:[%s2163_s21 + $0x30] sm:$0xff]  ;;  %v222_v19 = vld [vmem:[%s2156_s18 + $0x58] sm:$0xff]  ;;  %v223_v21 = vld [vmem:[%s2156_s18 + $0x60] sm:$0xff] }
  0x17   : > { %1975 = vmatpush3.xpose.msk.msra.mxu1 %vm243_vm0, %v230_v5  ;;  %1976 = vmatprep.mubr.msk.f32.mxu1 %vm243_vm0, %v217_v8  ;;  %v225_v20 = vld [vmem:[%s2156_s18 + $0x70] sm:$0xff]  ;;  %v224_v22 = vld [vmem:[%s2156_s18 + $0x68] sm:$0xff]  ;;  %v226_v23 = vld [vmem:[%s2156_s18 + $0x78] sm:$0xff] }
  0x18   : > { %1971 = vmatprep.mubr.msk.f32.mxu0 %vm243_vm0, %v215_v9  ;;  %1984 = vmatprep.subr.msk.mxu1 %vm243_vm0, %v232_v10 }
  0x19   : > { %1972 = vmatmul.mubr.msk.f32.vlgmr.msra.gmra.mrb[2].mxu0 %vm243_vm0, %v216_v11  ;;  %1979 = vmatprep.subr.msk.mxu0 %vm243_vm0, %v231_v12 }
  0x1a   : > { %1977 = vmatmul.mubr.msk.f32.vlgmr.msra.gmra.mrb[2].mxu1 %vm243_vm0, %v218_v13  ;;  %1980 = vmatpush3.xpose.msk.msra.mxu0 %vm243_vm0, %v231_v12 }
  0x1b   : > { %1985 = vmatpush3.xpose.msk.msra.mxu1 %vm243_vm0, %v232_v10  ;;  %1986 = vmatprep.mubr.msk.f32.mxu1 %vm243_vm0, %v221_v14 }
  0x1c   : > { %1981 = vmatprep.mubr.msk.f32.mxu0 %vm243_vm0, %v219_v15  ;;  %1994 = vmatprep.subr.msk.mxu1 %vm243_vm0, %v234_v16 }
  0x1d   : > { %1982 = vmatmul.mubr.msk.f32.vlgmr.msra.gmra.mrb[4].mxu0 %vm243_vm0, %v220_v17  ;;  %1989 = vmatprep.subr.msk.mxu0 %vm243_vm0, %v233_v18 }
  0x1e   : > { %1987 = vmatmul.mubr.msk.f32.vlgmr.msra.gmra.mrb[4].mxu1 %vm243_vm0, %v222_v19  ;;  %1990 = vmatpush3.xpose.msk.msra.mxu0 %vm243_vm0, %v233_v18 }
  0x1f   : > { %1995 = vmatpush3.xpose.msk.msra.mxu1 %vm243_vm0, %v234_v16  ;;  %1996 = vmatprep.mubr.msk.f32.mxu1 %vm243_vm0, %v225_v20 }
  0x20   : > { %1991 = vmatprep.mubr.msk.f32.mxu0 %vm243_vm0, %v223_v21 }
  0x21   : > { %1992 = vmatmul.mubr.msk.f32.vlgmr.msra.gmra.mrb[6].mxu0 %vm243_vm0, %v224_v22 }
  0x22   : > { %1997 = vmatmul.mubr.msk.f32.vlgmr.msra.gmra.mrb[6].mxu1 %vm243_vm0, %v226_v23 }
  0xe8   : > { %v1963_v24 = vpop.f32.mrb[0].mxu0 }
  0xe9   : > { %v2221_v25 = vmul.f32 0.5, %v1963_v24  ;;  %v319_v26 = vpop.f32.mrb[1].mxu0  ;;  %v1968_v27 = vpop.f32.mrb[0].mxu1 }
  0xea   : > { %v2223_v28 = vmul.f32 0.5, %v319_v26  ;;  %v2225_v29 = vmul.f32 0.5, %v1968_v27  ;;  %v403_v30 = vpop.f32.mrb[1].mxu1 }
  0xeb   : > { %v2227_v31 = vmul.f32 0.5, %v403_v30  ;;  %v936_v32 = vsel %vm932_vm1, %v2221_v25, -inf }
  0xec   : > { %937 = vmax.xlane.f32.xlu1 %v936_v32  ;;  %v933_v33 = vsel %vm932_vm1, %v2223_v28, -inf  ;;  %v1973_v34 = vpop.f32.mrb[2].mxu0  ;;  %v942_v36 = vsel %vm932_vm1, %v2225_v29, -inf }
  0xed   : > { %934 = vmax.xlane.f32.xlu0 %v933_v33  ;;  %v1978_v35 = vpop.f32.mrb[2].mxu1  ;;  %v487_v37 = vpop.f32.mrb[3].mxu0  ;;  %v939_v39 = vsel %vm932_vm1, %v2227_v31, -inf  ;;  %v2239_v40 = vmul.f32 0.5, %v1973_v34 }
  0xee   : > { %v2235_v38 = vmul.f32 0.5, %v1978_v35  ;;  %v571_v41 = vpop.f32.mrb[3].mxu1  ;;  %v2245_v47 = vmul.f32 0.5, %v487_v37 }
  0xef   : > { %v2241_v43 = vmul.f32 0.5, %v571_v41  ;;  %v948_v48 = vsel %vm932_vm1, %v2239_v40, -inf }
  0xf0   : > { %943 = vmax.xlane.f32.xlu1 %v942_v36  ;;  %v1983_v42 = vpop.f32.mrb[4].mxu0  ;;  %v954_v44 = vsel %vm932_vm1, %v2235_v38, -inf  ;;  %v945_v55 = vsel %vm932_vm1, %v2245_v47, -inf }
  0xf1   : > { %940 = vmax.xlane.f32.xlu0 %v939_v39  ;;  %v1988_v45 = vpop.f32.mrb[4].mxu1  ;;  %v655_v46 = vpop.f32.mrb[5].mxu0  ;;  %v951_v52 = vsel %vm932_vm1, %v2241_v43, -inf  ;;  %v2255_v56 = vmul.f32 0.5, %v1983_v42 }
  0xf2   : > { %v739_v49 = vpop.f32.mrb[5].mxu1  ;;  %v2249_v51 = vmul.f32 0.5, %v1988_v45  ;;  %v2261_v60 = vmul.f32 0.5, %v655_v46 }
  0xf3   : > { %v2257_v58 = vmul.f32 0.5, %v739_v49  ;;  %v960_v61 = vsel %vm932_vm1, %v2255_v56, -inf }
  0xf4   : > { %955 = vmax.xlane.f32.xlu1 %v954_v44  ;;  %v1993_v50 = vpop.f32.mrb[6].mxu0  ;;  %v966_v59 = vsel %vm932_vm1, %v2249_v51, -inf  ;;  %v957_v0 = vsel %vm932_vm1, %v2261_v60, -inf }
  0xf5   : > { %949 = vmax.xlane.f32.xlu0 %v948_v48  ;;  %v1998_v53 = vpop.f32.mrb[6].mxu1  ;;  %v823_v54 = vpop.f32.mrb[7].mxu0  ;;  %v963_v63 = vsel %vm932_vm1, %v2257_v58, -inf  ;;  %v2279_v5 = vmul.f32 0.5, %v1993_v50 }
  0xf6   : > { %v907_v57 = vpop.f32.mrb[7].mxu1  ;;  %v2271_v1 = vmul.f32 0.5, %v823_v54  ;;  %v2273_v2 = vmul.f32 0.5, %v1998_v53 }
  0xf7   : > { %v2265_v62 = vmul.f32 0.5, %v907_v57  ;;  %v972_v7 = vsel %vm932_vm1, %v2279_v5, -inf }
  0xf8   : > { %952 = vmax.xlane.f32.xlu1 %v951_v52  ;;  %v969_v4 = vsel %vm932_vm1, %v2271_v1, -inf  ;;  %v978_v6 = vsel %vm932_vm1, %v2273_v2, -inf }
  0xf9   : > { %946 = vmax.xlane.f32.xlu0 %v945_v55  ;;  %v975_v3 = vsel %vm932_vm1, %v2265_v62, -inf }
  0xfc   : > { %967 = vmax.xlane.f32.xlu1 %v966_v59 }
  0xfd   : > { %961 = vmax.xlane.f32.xlu0 %v960_v61 }
 0x100   : > { %964 = vmax.xlane.f32.xlu1 %v963_v63 }
 0x101   : > { %958 = vmax.xlane.f32.xlu0 %v957_v0 }
 0x104   : > { %976 = vmax.xlane.f32.xlu1 %v975_v3 }
 0x105   : > { %970 = vmax.xlane.f32.xlu0 %v969_v4 }
 0x108   : > { %979 = vmax.xlane.f32.xlu1 %v978_v6 }
 0x109   : > { %973 = vmax.xlane.f32.xlu0 %v972_v7 }
 0x179   : > { %v938_v8 = vpop.xlane.xlu1 %937 }
 0x17a   : > { %v982_v9 = vsub.f32 %v2221_v25, %v938_v8  ;;  %v935_v10 = vpop.xlane.xlu0 %934 }
 0x17b   : > { %v981_v11 = vsub.f32 %v2223_v28, %v935_v10 }
 0x17c   : > { %v999_v12 = vmul.f32 1.442695, %v982_v9 }
 0x17d   : > { %v997_v13 = vmul.f32 1.442695, %v981_v11  ;;  %v944_v14 = vpop.xlane.xlu1 %943 }
 0x17e   : > { %2047 = vpow2.f32 %v999_v12  ;;  %v984_v15 = vsub.f32 %v2225_v29, %v944_v14  ;;  %v941_v16 = vpop.xlane.xlu0 %940 }
 0x17f   : > { %v983_v17 = vsub.f32 %v2227_v31, %v941_v16  ;;  %2049 = vpow2.f32 %v997_v13 }
 0x180   : > { %v1003_v18 = vmul.f32 1.442695, %v984_v15 }
 0x181   : > { %v1001_v19 = vmul.f32 1.442695, %v983_v17  ;;  %v956_v20 = vpop.xlane.xlu1 %955 }
 0x182   : > { %2051 = vpow2.f32 %v1003_v18  ;;  %v988_v21 = vsub.f32 %v2235_v38, %v956_v20  ;;  %v950_v22 = vpop.xlane.xlu0 %949 }
 0x183   : > { %v986_v23 = vsub.f32 %v2239_v40, %v950_v22  ;;  %2053 = vpow2.f32 %v1001_v19 }
 0x184   : > { %v1011_v24 = vmul.f32 1.442695, %v988_v21 }
 0x185   : > { %v1007_v25 = vmul.f32 1.442695, %v986_v23  ;;  %v953_v26 = vpop.xlane.xlu1 %952  ;;  %v235_v23 = vld [vmem:[%s2368_s24] sm:$0xff] }
 0x186   : > { %v987_v27 = vsub.f32 %v2241_v43, %v953_v26  ;;  %v947_v28 = vpop.xlane.xlu0 %946  ;;  %1999 = vmatprep.subr.mxu0 %v235_v23  ;;  %v237_v26 = vld [vmem:[%s2368_s24 + $0x10] sm:$0xff] }
 0x187   : > { %2055 = vpow2.f32 %v1007_v25  ;;  %v985_v29 = vsub.f32 %v2245_v47, %v947_v28  ;;  %2000 = vmatpush3.msra.mxu0 %v235_v23  ;;  %v236_v25 = vld [vmem:[%s2368_s24 + $0x8] sm:$0xff] }
 0x188   : > { %v2293_v30 = vpop.eup %2047  ;;  %2057 = vpow2.f32 %v1011_v24  ;;  %v1009_v31 = vmul.f32 1.442695, %v987_v27  ;;  %2004 = vmatprep.subr.mxu1 %v236_v25  ;;  %2009 = vmatprep.subr.mxu0 %v237_v26  ;;  %v238_v27 = vld [vmem:[%s2368_s24 + $0x18] sm:$0xff] }
 0x189   : > { %v1005_v32 = vmul.f32 1.442695, %v985_v29  ;;  %v968_v33 = vpop.xlane.xlu1 %967  ;;  %v1032_v34 = vsel %vm932_vm1, %v2293_v30, 0.0  ;;  %v2297_v35 = vpop.eup %2049  ;;  %2005 = vmatpush3.msra.mxu1 %v236_v25 }
 0x18a   : > { %v992_v36 = vsub.f32 %v2249_v51, %v968_v33  ;;  %v962_v37 = vpop.xlane.xlu0 %961  ;;  %1033 = vadd.xlane.f32.xlu0 %v1032_v34  ;;  %v1029_v44 = vsel %vm932_vm1, %v2297_v35, 0.0  ;;  %2014 = vmatprep.subr.mxu1 %v238_v27 }
 0x18b   : > { %2059 = vpow2.f32 %v1005_v32  ;;  %v990_v38 = vsub.f32 %v2255_v56, %v962_v37 }
 0x18c   : > { %v2301_v39 = vpop.eup %2051  ;;  %2061 = vpow2.f32 %v1009_v31  ;;  %v1019_v40 = vmul.f32 1.442695, %v992_v36 }
 0x18d   : > { %v1015_v41 = vmul.f32 1.442695, %v990_v38  ;;  %v965_v42 = vpop.xlane.xlu1 %964  ;;  %v1038_v43 = vsel %vm932_vm1, %v2301_v39, 0.0  ;;  %v2307_v45 = vpop.eup %2053 }
 0x18e   : > { %v991_v46 = vsub.f32 %v2257_v58, %v965_v42  ;;  %1039 = vadd.xlane.f32.xlu1 %v1038_v43  ;;  %v959_v47 = vpop.xlane.xlu0 %958  ;;  %1030 = vadd.xlane.f32.xlu0 %v1029_v44  ;;  %v1035_v53 = vsel %vm932_vm1, %v2307_v45, 0.0 }
 0x18f   : > { %2063 = vpow2.f32 %v1015_v41  ;;  %v989_v48 = vsub.f32 %v2261_v60, %v959_v47  ;;  %v239_v47 = vld [vmem:[%s2368_s24 + $0x20] sm:$0xff] }
 0x190   : > { %2065 = vpow2.f32 %v1019_v40  ;;  %v1017_v49 = vmul.f32 1.442695, %v991_v46 }
 0x191   : > { %v2311_v50 = vpop.eup %2055  ;;  %v1013_v51 = vmul.f32 1.442695, %v989_v48  ;;  %v977_v52 = vpop.xlane.xlu1 %976 }
 0x192   : > { %v2315_v54 = vpop.eup %2057  ;;  %v995_v55 = vsub.f32 %v2265_v62, %v977_v52  ;;  %1036 = vadd.xlane.f32.xlu1 %v1035_v53  ;;  %v971_v56 = vpop.xlane.xlu0 %970  ;;  %v1044_v57 = vsel %vm932_vm1, %v2311_v50, 0.0 }
 0x193   : > { %2067 = vpow2.f32 %v1013_v51  ;;  %v993_v58 = vsub.f32 %v2271_v1, %v971_v56  ;;  %1045 = vadd.xlane.f32.xlu0 %v1044_v57  ;;  %v1050_v0 = vsel %vm932_vm1, %v2315_v54, 0.0 }
 0x194   : > { %2069 = vpow2.f32 %v1017_v49  ;;  %v1025_v59 = vmul.f32 1.442695, %v995_v55 }
 0x195   : > { %v2321_v60 = vpop.eup %2059  ;;  %v1021_v61 = vmul.f32 1.442695, %v993_v58  ;;  %v980_v63 = vpop.xlane.xlu1 %979 }
 0x196   : > { %v2325_v3 = vpop.eup %2061  ;;  %v996_v62 = vsub.f32 %v2273_v2, %v980_v63  ;;  %1051 = vadd.xlane.f32.xlu1 %v1050_v0  ;;  %v974_v4 = vpop.xlane.xlu0 %973  ;;  %v1041_v6 = vsel %vm932_vm1, %v2321_v60, 0.0 }
 0x197   : > { %2071 = vpow2.f32 %v1021_v61  ;;  %v994_v1 = vsub.f32 %v2279_v5, %v974_v4  ;;  %1042 = vadd.xlane.f32.xlu0 %v1041_v6  ;;  %v1047_v10 = vsel %vm932_vm1, %v2325_v3, 0.0 }
 0x198   : > { %2073 = vpow2.f32 %v1025_v59  ;;  %v1027_v7 = vmul.f32 1.442695, %v996_v62  ;;  %v241_v59 = vld [vmem:[%s2368_s24 + $0x30] sm:$0xff] }
 0x199   : > { %v2331_v8 = vpop.eup %2063  ;;  %v1023_v9 = vmul.f32 1.442695, %v994_v1 }
 0x19a   : > { %v2335_v11 = vpop.eup %2065  ;;  %1048 = vadd.xlane.f32.xlu1 %v1047_v10  ;;  %v1056_v2 = vsel %vm932_vm1, %v2331_v8, 0.0 }
 0x19b   : > { %2075 = vpow2.f32 %v1023_v9  ;;  %1057 = vadd.xlane.f32.xlu0 %v1056_v2  ;;  %v1062_v5 = vsel %vm932_vm1, %v2335_v11, 0.0 }
 0x19c   : > { %2077 = vpow2.f32 %v1027_v7 }
 0x19d   : > { %v2339_v12 = vpop.eup %2067 }
 0x19e   : > { %v2343_v13 = vpop.eup %2069  ;;  %1063 = vadd.xlane.f32.xlu1 %v1062_v5  ;;  %v1053_v14 = vsel %vm932_vm1, %v2339_v12, 0.0 }
 0x19f   : > { %1054 = vadd.xlane.f32.xlu0 %v1053_v14  ;;  %v1059_v16 = vsel %vm932_vm1, %v2343_v13, 0.0 }
 0x1a1   : > { %v2347_v15 = vpop.eup %2071 }
 0x1a2   : > { %v2351_v17 = vpop.eup %2073  ;;  %1060 = vadd.xlane.f32.xlu1 %v1059_v16  ;;  %v1065_v18 = vsel %vm932_vm1, %v2347_v15, 0.0 }
 0x1a3   : > { %1066 = vadd.xlane.f32.xlu0 %v1065_v18  ;;  %v1071_v20 = vsel %vm932_vm1, %v2351_v17, 0.0 }
 0x1a5   : > { %v2355_v19 = vpop.eup %2075 }
 0x1a6   : > { %v2359_v21 = vpop.eup %2077  ;;  %1072 = vadd.xlane.f32.xlu1 %v1071_v20  ;;  %v1068_v22 = vsel %vm932_vm1, %v2355_v19, 0.0 }
 0x1a7   : > { %1069 = vadd.xlane.f32.xlu0 %v1068_v22  ;;  %v1074_v24 = vsel %vm932_vm1, %v2359_v21, 0.0 }
 0x1aa   : > { %1075 = vadd.xlane.f32.xlu1 %v1074_v24 }
 0x217   : > { %v1034_v28 = vpop.xlane.xlu0 %1033 }
 0x218   : > { %2079 = vrcp.f32 %v1034_v28 }
 0x21b   : > { %v1040_v29 = vpop.xlane.xlu1 %1039  ;;  %v1031_v31 = vpop.xlane.xlu0 %1030 }
 0x21c   : > { %2081 = vrcp.f32 %v1031_v31 }
 0x21d   : > { %2083 = vrcp.f32 %v1040_v29 }
 0x21f   : > { %v1037_v32 = vpop.xlane.xlu1 %1036 }
 0x220   : > { %2085 = vrcp.f32 %v1037_v32  ;;  %v1046_v33 = vpop.xlane.xlu0 %1045 }
 0x221   : > { %2087 = vrcp.f32 %v1046_v33 }
 0x222   : > { %v2080_v37 = vpop.eup %2079 }
 0x223   : > { %v1052_v34 = vpop.xlane.xlu1 %1051  ;;  %v1094_v44 = vmul.f32 %v2080_v37, %v2293_v30 }
 0x224   : > { %v1043_v36 = vpop.xlane.xlu0 %1042 }
 0x225   : > { %2089 = vrcp.f32 %v1043_v36 }
 0x226   : > { %v2082_v38 = vpop.eup %2081  ;;  %2091 = vrcp.f32 %v1052_v34 }
 0x227   : > { %v1049_v40 = vpop.xlane.xlu1 %1048  ;;  %v1093_v42 = vmul.f32 %v2082_v38, %v2297_v35  ;;  %v2084_v43 = vpop.eup %2083  ;;  %v240_v35 = vld [vmem:[%s2368_s24 + $0x28] sm:$0xff] }
 0x228   : > { %2093 = vrcp.f32 %v1049_v40  ;;  %v1058_v41 = vpop.xlane.xlu0 %1057  ;;  %v1096_v51 = vmul.f32 %v2084_v43, %v2301_v39 }
 0x229   : > { %2001 = vmatprep.mubr.msk.f32.mxu0 %vm932_vm1, %v1093_v42  ;;  %2095 = vrcp.f32 %v1058_v41 }
 0x22a   : > { %v2086_v46 = vpop.eup %2085  ;;  %2002 = vmatmul.mubr.msk.f32.vlgmr.msra.gmra.mrb[8].mxu0 %vm932_vm1, %v1094_v44 }
 0x22b   : > { %v1064_v48 = vpop.xlane.xlu1 %1063  ;;  %v1095_v49 = vmul.f32 %v2086_v46, %v2307_v45  ;;  %2010 = vmatpush3.msra.mxu0 %v237_v26  ;;  %v2088_v30 = vpop.eup %2087 }
 0x22c   : > { %v1055_v52 = vpop.xlane.xlu0 %1054  ;;  %2019 = vmatprep.subr.mxu0 %v239_v47  ;;  %v1098_v57 = vmul.f32 %v2088_v30, %v2311_v50  ;;  %v242_v50 = vld [vmem:[%s2368_s24 + $0x38] sm:$0xff] }
 0x22d   : > { %2097 = vrcp.f32 %v1055_v52  ;;  %2006 = vmatprep.mubr.msk.f32.mxu1 %vm932_vm1, %v1095_v49 }
 0x22e   : > { %2007 = vmatmul.mubr.msk.f32.vlgmr.msra.gmra.mrb[8].mxu1 %vm932_vm1, %v1096_v51  ;;  %2099 = vrcp.f32 %v1064_v48 }
 0x22f   : > { %v2090_v53 = vpop.eup %2089  ;;  %v1061_v55 = vpop.xlane.xlu1 %1060  ;;  %2015 = vmatpush3.msra.mxu1 %v238_v27 }
 0x230   : > { %2101 = vrcp.f32 %v1061_v55  ;;  %v1067_v45 = vpop.xlane.xlu0 %1066  ;;  %v1097_v39 = vmul.f32 %v2090_v53, %v2321_v60  ;;  %2024 = vmatprep.subr.mxu1 %v240_v35  ;;  %v2092_v56 = vpop.eup %2091 }
 0x231   : > { %2103 = vrcp.f32 %v1067_v45  ;;  %v1100_v0 = vmul.f32 %v2092_v56, %v2315_v54 }
 0x232   : > { %v2094_v58 = vpop.eup %2093  ;;  %2011 = vmatprep.mubr.msk.f32.mxu0 %vm932_vm1, %v1097_v39 }
 0x233   : > { %v1073_v61 = vpop.xlane.xlu1 %1072  ;;  %2012 = vmatmul.mubr.msk.f32.vlgmr.msra.gmra.mrb[10].mxu0 %vm932_vm1, %v1098_v57  ;;  %v1099_v63 = vmul.f32 %v2094_v58, %v2325_v3  ;;  %v2096_v60 = vpop.eup %2095 }
 0x234   : > { %2105 = vrcp.f32 %v1073_v61  ;;  %v1070_v62 = vpop.xlane.xlu0 %1069  ;;  %2020 = vmatpush3.msra.mxu0 %v239_v47  ;;  %v1102_v54 = vmul.f32 %v2096_v60, %v2331_v8 }
 0x235   : > { %2107 = vrcp.f32 %v1070_v62  ;;  %2016 = vmatprep.mubr.msk.f32.mxu1 %vm932_vm1, %v1099_v63  ;;  %2029 = vmatprep.subr.mxu0 %v241_v59 }
 0x236   : > { %2017 = vmatmul.mubr.msk.f32.vlgmr.msra.gmra.mrb[10].mxu1 %vm932_vm1, %v1100_v0 }
 0x237   : > { %v2098_v4 = vpop.eup %2097  ;;  %v1076_v6 = vpop.xlane.xlu1 %1075  ;;  %2025 = vmatpush3.msra.mxu1 %v240_v35 }
 0x238   : > { %2109 = vrcp.f32 %v1076_v6  ;;  %v1101_v1 = vmul.f32 %v2098_v4, %v2339_v12  ;;  %2034 = vmatprep.subr.mxu1 %v242_v50  ;;  %v2100_v3 = vpop.eup %2099 }
 0x239   : > { %v1104_v2 = vmul.f32 %v2100_v3, %v2335_v11 }
 0x23a   : > { %v2102_v7 = vpop.eup %2101  ;;  %2021 = vmatprep.mubr.msk.f32.mxu0 %vm932_vm1, %v1101_v1 }
 0x23b   : > { %v2104_v9 = vpop.eup %2103  ;;  %2022 = vmatmul.mubr.msk.f32.vlgmr.msra.gmra.mrb[12].mxu0 %vm932_vm1, %v1102_v54  ;;  %v1103_v10 = vmul.f32 %v2102_v7, %v2343_v13 }
 0x23c   : > { %v1105_v5 = vmul.f32 %v2104_v9, %v2347_v15  ;;  %2030 = vmatpush3.msra.mxu0 %v241_v59 }
 0x23d   : > { %2026 = vmatprep.mubr.msk.f32.mxu1 %vm932_vm1, %v1103_v10 }
 0x23e   : > { %v2106_v12 = vpop.eup %2105  ;;  %2027 = vmatmul.mubr.msk.f32.vlgmr.msra.gmra.mrb[12].mxu1 %vm932_vm1, %v1104_v2  ;;  %2031 = vmatprep.mubr.msk.f32.mxu0 %vm932_vm1, %v1105_v5 }
 0x23f   : > { %v2108_v8 = vpop.eup %2107  ;;  %2035 = vmatpush3.msra.mxu1 %v242_v50  ;;  %v1107_v14 = vmul.f32 %v2106_v12, %v2351_v17 }
 0x240   : > { %v1106_v16 = vmul.f32 %v2108_v8, %v2355_v19 }
 0x241   : > { %2036 = vmatprep.mubr.msk.f32.mxu1 %vm932_vm1, %v1107_v14 }
 0x242   : > { %v2110_v11 = vpop.eup %2109  ;;  %2032 = vmatmul.mubr.msk.f32.vlgmr.msra.gmra.mrb[14].mxu0 %vm932_vm1, %v1106_v16 }
 0x243   : > { %v1108_v13 = vmul.f32 %v2110_v11, %v2359_v21 }
 0x245   : > { %2037 = vmatmul.mubr.msk.f32.vlgmr.msra.gmra.mrb[14].mxu1 %vm932_vm1, %v1108_v13 }
 0x2fd   : > { %v2003_v15 = vpop.f32.mrb[8].mxu0 }
 0x2fe   : > { %1758 = vst.msk [vmem:[%s2417_s27 + $0x8] sm:$0xff] %vm243_vm0, %v2003_v15  ;;  %v1181_v17 = vpop.f32.mrb[9].mxu0 }
 0x2ff   : > { %1757 = vst.msk [vmem:[%s2417_s27] sm:$0xff] %vm243_vm0, %v1181_v17 }
 0x301   : > { %v2008_v18 = vpop.f32.mrb[8].mxu1 }
 0x302   : > { %1760 = vst.msk [vmem:[%s2417_s27 + $0x18] sm:$0xff] %vm243_vm0, %v2008_v18  ;;  %v1262_v19 = vpop.f32.mrb[9].mxu1 }
 0x303   : > { %1759 = vst.msk [vmem:[%s2417_s27 + $0x10] sm:$0xff] %vm243_vm0, %v1262_v19 }
 0x306   : > { %v2013_v20 = vpop.f32.mrb[10].mxu0 }
 0x307   : > { %1762 = vst.msk [vmem:[%s2417_s27 + $0x28] sm:$0xff] %vm243_vm0, %v2013_v20  ;;  %v1343_v21 = vpop.f32.mrb[11].mxu0 }
 0x308   : > { %1761 = vst.msk [vmem:[%s2417_s27 + $0x20] sm:$0xff] %vm243_vm0, %v1343_v21 }
 0x309   : > { %v2018_v22 = vpop.f32.mrb[10].mxu1 }
 0x30a   : > { %1764 = vst.msk [vmem:[%s2417_s27 + $0x38] sm:$0xff] %vm243_vm0, %v2018_v22  ;;  %v1424_v23 = vpop.f32.mrb[11].mxu1 }
 0x30b   : > { %1763 = vst.msk [vmem:[%s2417_s27 + $0x30] sm:$0xff] %vm243_vm0, %v1424_v23 }
 0x30e   : > { %v2023_v24 = vpop.f32.mrb[12].mxu0 }
 0x30f   : > { %1766 = vst.msk [vmem:[%s2417_s27 + $0x48] sm:$0xff] %vm243_vm0, %v2023_v24  ;;  %v1505_v25 = vpop.f32.mrb[13].mxu0 }
 0x310   : > { %1765 = vst.msk [vmem:[%s2417_s27 + $0x40] sm:$0xff] %vm243_vm0, %v1505_v25 }
 0x311   : > { %v2028_v26 = vpop.f32.mrb[12].mxu1 }
 0x312   : > { %1768 = vst.msk [vmem:[%s2417_s27 + $0x58] sm:$0xff] %vm243_vm0, %v2028_v26  ;;  %v1586_v27 = vpop.f32.mrb[13].mxu1 }
 0x313   : > { %1767 = vst.msk [vmem:[%s2417_s27 + $0x50] sm:$0xff] %vm243_vm0, %v1586_v27 }
 0x315   : > { %v2033_v28 = vpop.f32.mrb[14].mxu0 }
 0x316   : > { %1770 = vst.msk [vmem:[%s2417_s27 + $0x68] sm:$0xff] %vm243_vm0, %v2033_v28  ;;  %v1667_v29 = vpop.f32.mrb[15].mxu0 }
 0x317   : > { %1769 = vst.msk [vmem:[%s2417_s27 + $0x60] sm:$0xff] %vm243_vm0, %v1667_v29 }
 0x318   : > { %v2038_v31 = vpop.f32.mrb[14].mxu1 }
 0x319   : > { %1772 = vst.msk [vmem:[%s2417_s27 + $0x78] sm:$0xff] %vm243_vm0, %v2038_v31  ;;  %v1748_v32 = vpop.f32.mrb[15].mxu1 }
 0x31a   : > { %1771 = vst.msk [vmem:[%s2417_s27 + $0x70] sm:$0xff] %vm243_vm0, %v1748_v32 }
 0x31b PF: > { %s13_s12 = sadd.s32 1, %s2117_s12  }
 0x31c   : > { %p10_p4 = scmp.ge.s32.totalorder %s13_s12, 10  }
 0x31e   :  { %12 = sbr.rel (!%p10_p4) target bundleno = 1 (0x1), region = 68 }

// kernel: crossandoutput_forward.132
= control target key start
LH: loop header
LB: loop body
LE: loop exit
PB: predicated region body
PF: predicated region fallthrough
CT: control target
= control target key end

     0   :  { %s623_s15 = smov 0   ;;  %s737_s0 = inlined_call_operand.vmem [shape: f32[128,128], index: 0, kind: input, shape index: {}]   ;;  %s738_s1 = inlined_call_operand.vmem [shape: f32[128,32], index: 1, kind: input, shape index: {}]   ;;  %s739_s2 = inlined_call_operand.vmem [shape: f32[1,32], index: 2, kind: input, shape index: {}]   ;;  %s740_s3 = inlined_call_operand.vmem [shape: f32[128,32], index: 3, kind: input, shape index: {}]   ;;  %s741_s4 = inlined_call_operand.vmem [shape: f32[128,32], index: 4, kind: output, shape index: {}]  }
   0x1 LB: > { %s452_s16 = sadd.s32 4294967295, %s596_s15   ;;  %p456_p0 = scmp.ge.s32.totalorder %s596_s15, 1  ;;  %s596_s15 = sphi %s623_s15, %s14_s15  }
   0x2   : > { %p174_p1 = scmp.lt.s32.totalorder %s596_s15, 3 }
   0x4   : > { %p175_p2 = pnand %p456_p0, %p174_p1 }
   0x5   : > { %v231_v0 = vld [vmem:[%s738_s1] sm:$0xff] (!%p175_p2)  ;;  %v232_v1 = vld [vmem:[%s738_s1 + $0x8] sm:$0xff] (!%p175_p2)  ;;  %v233_v2 = vld [vmem:[%s738_s1 + $0x10] sm:$0xff] (!%p175_p2)  ;;  %s457_s23 = sshll.u32 (!%p175_p2), %s452_s16, 3  ;;  %vm375_vm0 = vcmask (!%p175_p2), 261120  }
   0x6   : > { %178 = sbr.rel (%p175_p2) target bundleno = 263 (0x107), region = 36  ;;  %v534_v3 = vpack.c.bf16 (!%p175_p2), %v232_v1, %v231_v0  ;;  %v234_v4 = vld [vmem:[%s738_s1 + $0x18] sm:$0xff] (!%p175_p2)  ;;  %p206_p3 = scmp.lt.s32.totalorder (!%p175_p2), %s457_s23, 15  ;;  %v235_v6 = vld [vmem:[%s738_s1 + $0x20] sm:$0xff] (!%p175_p2)  ;;  %v236_v7 = vld [vmem:[%s738_s1 + $0x28] sm:$0xff] (!%p175_p2) }
   0x7   : > { %v538_v5 = vpack.c.bf16 (!%p175_p2), %v234_v4, %v233_v2  ;;  %v542_v8 = vpack.c.bf16 (!%p175_p2), %v236_v7, %v235_v6  ;;  %v237_v9 = vld [vmem:[%s738_s1 + $0x30] sm:$0xff] (!%p175_p2)  ;;  %v238_v10 = vld [vmem:[%s738_s1 + $0x38] sm:$0xff] (!%p175_p2)  ;;  %v239_v14 = vld [vmem:[%s738_s1 + $0x40] sm:$0xff] (!%p175_p2) }
   0x8   : > { %535 = vmatprep.subr.bf16.mxu0 (!%p175_p2), %v534_v3  ;;  %566 = vmatprep.subr.bf16.mxu1 (!%p175_p2), %v534_v3  ;;  %v546_v13 = vpack.c.bf16 (!%p175_p2), %v238_v10, %v237_v9  ;;  %v240_v15 = vld [vmem:[%s738_s1 + $0x48] sm:$0xff] (!%p175_p2)  ;;  %v241_v17 = vld [vmem:[%s738_s1 + $0x50] sm:$0xff] (!%p175_p2)  ;;  %v242_v18 = vld [vmem:[%s738_s1 + $0x58] sm:$0xff] (!%p175_p2) }
   0x9   : > { %537 = vmatpush3.bf16.msra.mxu0 (!%p175_p2), %v534_v3  ;;  %574 = vmatpush3.bf16.msra.mxu1 (!%p175_p2), %v534_v3  ;;  %v550_v16 = vpack.c.bf16 (!%p175_p2), %v240_v15, %v239_v14  ;;  %v554_v19 = vpack.c.bf16 (!%p175_p2), %v242_v18, %v241_v17  ;;  %v243_v20 = vld [vmem:[%s738_s1 + $0x60] sm:$0xff] (!%p175_p2)  ;;  %v244_v21 = vld [vmem:[%s738_s1 + $0x68] sm:$0xff] (!%p175_p2)  ;;  %v245_v23 = vld [vmem:[%s738_s1 + $0x70] sm:$0xff] (!%p175_p2) }
   0xa   : > { %539 = vmatprep.subr.bf16.mxu0 (!%p175_p2), %v538_v5  ;;  %567 = vmatprep.subr.bf16.mxu1 (!%p175_p2), %v538_v5  ;;  %v558_v22 = vpack.c.bf16 (!%p175_p2), %v244_v21, %v243_v20  ;;  %v246_v24 = vld [vmem:[%s738_s1 + $0x78] sm:$0xff] (!%p175_p2)  ;;  %v463_v32 = vld [vmem:[%s739_s2] ss:$0 sm:$0xff] (!%p175_p2) }
   0xb   : > { %v562_v25 = vpack.c.bf16 (!%p175_p2), %v246_v24, %v245_v23 }
   0xd   : > { %s743_s23 = smov (!%p206_p3, %s457_s23), 15  ;;  %541 = vmatpush3.bf16.msra.mxu0 %v538_v5  ;;  %575 = vmatpush3.bf16.msra.mxu1 %v538_v5 }
   0xe   : > { %s649_s30 = sshll.u32 %s743_s23, 3  ;;  %543 = vmatprep.subr.bf16.mxu0 %v542_v8  ;;  %568 = vmatprep.subr.bf16.mxu1 %v542_v8 }
   0xf   : > { %s661_s11 = scalar_lea.vmem %s737_s0, %s649_s30  ;;  %s699_s6 = scalar_lea.vmem %s740_s3, %s649_s30 }
  0x10   : > { %v223_v11 = vld [vmem:[%s661_s11] sm:$0xff]  ;;  %v224_v26 = vld [vmem:[%s661_s11 + $0x8] sm:$0xff]  ;;  %v225_v28 = vld [vmem:[%s661_s11 + $0x10] sm:$0xff] }
  0x11   : > { %v227_v12 = vld [vmem:[%s661_s11 + $0x20] sm:$0xff]  ;;  %522 = vmatprep.mubr.f32.mxu0 %v223_v11  ;;  %545 = vmatpush3.bf16.msra.mxu0 %v542_v8  ;;  %v228_v27 = vld [vmem:[%s661_s11 + $0x28] sm:$0xff]  ;;  %v229_v29 = vld [vmem:[%s661_s11 + $0x30] sm:$0xff] }
  0x12   : > { %528 = vmatprep.mubr.f32.mxu1 %v227_v12  ;;  %576 = vmatpush3.bf16.msra.mxu1 %v542_v8  ;;  %v226_v30 = vld [vmem:[%s661_s11 + $0x18] sm:$0xff]  ;;  %v360_v34 = vld [vmem:[%s699_s6 + $0x8] sm:$0xff]  ;;  %v359_v40 = vld [vmem:[%s699_s6] sm:$0xff] }
  0x13   : > { %547 = vmatprep.subr.bf16.mxu0 %v546_v13  ;;  %569 = vmatprep.subr.bf16.mxu1 %v546_v13  ;;  %v230_v31 = vld [vmem:[%s661_s11 + $0x38] sm:$0xff]  ;;  %v364_v36 = vld [vmem:[%s699_s6 + $0x28] sm:$0xff]  ;;  %v363_v42 = vld [vmem:[%s699_s6 + $0x20] sm:$0xff]  ;;  %s712_s11 = scalar_lea.vmem %s741_s4, %s649_s30 }
  0x14   : > { %v362_v50 = vld [vmem:[%s699_s6 + $0x18] sm:$0xff]  ;;  %v361_v56 = vld [vmem:[%s699_s6 + $0x10] sm:$0xff] }
  0x15   : > { %549 = vmatpush3.bf16.msra.mxu0 %v546_v13  ;;  %v366_v52 = vld [vmem:[%s699_s6 + $0x38] sm:$0xff]  ;;  %v365_v58 = vld [vmem:[%s699_s6 + $0x30] sm:$0xff] }
  0x16   : > { %577 = vmatpush3.bf16.msra.mxu1 %v546_v13  ;;  %551 = vmatprep.subr.bf16.mxu0 %v550_v16 }
  0x17   : > { %570 = vmatprep.subr.bf16.mxu1 %v550_v16 }
  0x19   : > { %553 = vmatpush3.bf16.msra.mxu0 %v550_v16 }
  0x1a   : > { %578 = vmatpush3.bf16.msra.mxu1 %v550_v16  ;;  %555 = vmatprep.subr.bf16.mxu0 %v554_v19 }
  0x1b   : > { %571 = vmatprep.subr.bf16.mxu1 %v554_v19 }
  0x1d   : > { %557 = vmatpush3.bf16.msra.mxu0 %v554_v19 }
  0x1e   : > { %579 = vmatpush3.bf16.msra.mxu1 %v554_v19  ;;  %559 = vmatprep.subr.bf16.mxu0 %v558_v22 }
  0x1f   : > { %572 = vmatprep.subr.bf16.mxu1 %v558_v22 }
  0x21   : > { %561 = vmatpush3.bf16.msra.mxu0 %v558_v22 }
  0x22   : > { %580 = vmatpush3.bf16.msra.mxu1 %v558_v22  ;;  %563 = vmatprep.subr.bf16.mxu0 %v562_v25 }
  0x23   : > { %573 = vmatprep.subr.bf16.mxu1 %v562_v25 }
  0x25   : > { %565 = vmatpush3.bf16.msra.mxu0 %v562_v25 }
  0x26   : > { %581 = vmatpush3.bf16.msra.mxu1 %v562_v25 }
  0x28   : > { %523 = vmatmul.mubr.f32.vlgmr.msra.gmra.mrb[0].mxu0 %v224_v26 }
  0x29   : > { %529 = vmatmul.mubr.f32.vlgmr.msra.gmra.mrb[0].mxu1 %v228_v27  ;;  %525 = vmatprep.mubr.f32.mxu0 %v225_v28 }
  0x2a   : > { %531 = vmatprep.mubr.f32.mxu1 %v229_v29 }
  0x2c   : > { %526 = vmatmul.mubr.f32.gmra.mrb[2].mxu0 %v226_v30 }
  0x2d   : > { %532 = vmatmul.mubr.f32.gmra.mrb[2].mxu1 %v230_v31 }
  0xfb   : > { %v524_v33 = vpop.f32.mrb[0].mxu0 }
  0xfc   : > { %v530_v35 = vpop.f32.mrb[0].mxu1  ;;  %v326_v37 = vadd.f32 %v524_v33, %v463_v32  ;;  %v320_v39 = vpop.f32.mrb[1].mxu0 }
  0xfd   : > { %v346_v38 = vadd.f32 %v530_v35, %v463_v32  ;;  %v340_v41 = vpop.f32.mrb[1].mxu1  ;;  %v321_v43 = vadd.f32 %v463_v32, %v320_v39 }
  0xfe   : > { %v341_v44 = vadd.f32 %v463_v32, %v340_v41  ;;  %v368_v45 = vadd.f32 %v360_v34, %v326_v37 }
  0xff   : > { %v372_v46 = vadd.f32 %v364_v36, %v346_v38  ;;  %v367_v47 = vadd.f32 %v359_v40, %v321_v43  ;;  %v527_v49 = vpop.f32.mrb[2].mxu0 }
 0x100   : > { %v371_v48 = vadd.f32 %v363_v42, %v341_v44  ;;  %v533_v51 = vpop.f32.mrb[2].mxu1  ;;  %377 = vst.msk [vmem:[%s712_s11 + $0x8] sm:$0xff] %vm375_vm0, %v368_v45  ;;  %v336_v53 = vadd.f32 %v527_v49, %v463_v32  ;;  %v330_v55 = vpop.f32.mrb[3].mxu0 }
 0x101   : > { %381 = vst.msk [vmem:[%s712_s11 + $0x28] sm:$0xff] %vm375_vm0, %v372_v46  ;;  %v356_v54 = vadd.f32 %v533_v51, %v463_v32  ;;  %v350_v57 = vpop.f32.mrb[3].mxu1  ;;  %376 = vst.msk [vmem:[%s712_s11] sm:$0xff] %vm375_vm0, %v367_v47  ;;  %v331_v59 = vadd.f32 %v463_v32, %v330_v55 }
 0x102   : > { %380 = vst.msk [vmem:[%s712_s11 + $0x20] sm:$0xff] %vm375_vm0, %v371_v48  ;;  %v351_v60 = vadd.f32 %v463_v32, %v350_v57  ;;  %v370_v61 = vadd.f32 %v362_v50, %v336_v53 }
 0x103   : > { %v374_v62 = vadd.f32 %v366_v52, %v356_v54  ;;  %v369_v63 = vadd.f32 %v361_v56, %v331_v59 }
 0x104   : > { %v373_v0 = vadd.f32 %v365_v58, %v351_v60  ;;  %379 = vst.msk [vmem:[%s712_s11 + $0x18] sm:$0xff] %vm375_vm0, %v370_v61 }
 0x105   : > { %383 = vst.msk [vmem:[%s712_s11 + $0x38] sm:$0xff] %vm375_vm0, %v374_v62  ;;  %378 = vst.msk [vmem:[%s712_s11 + $0x10] sm:$0xff] %vm375_vm0, %v369_v63 }
 0x106   : > { %382 = vst.msk [vmem:[%s712_s11 + $0x30] sm:$0xff] %vm375_vm0, %v373_v0 }
 0x107 PF: > { %s14_s15 = sadd.s32 1, %s596_s15  }
 0x108   : > { %p11_p4 = scmp.ge.s32.totalorder %s14_s15, 4  }
 0x10a   :  { %13 = sbr.rel (!%p11_p4) target bundleno = 1 (0x1), region = 69 }

// kernel: crossandoutput_forward.150
= control target key start
LH: loop header
LB: loop body
LE: loop exit
PB: predicated region body
PF: predicated region fallthrough
CT: control target
= control target key end

     0   :  { %s840_s21 = smov 0   ;;  %s1016_s0 = inlined_call_operand.vmem [shape: f32[128,128], index: 0, kind: input, shape index: {}]   ;;  %s1017_s1 = inlined_call_operand.vmem [shape: f32[128,32], index: 1, kind: input, shape index: {}]   ;;  %s1018_s2 = inlined_call_operand.vmem [shape: f32[1,32], index: 2, kind: input, shape index: {}]   ;;  %s1019_s3 = inlined_call_operand.vmem [shape: f32[128,32], index: 3, kind: input, shape index: {}]   ;;  %s1020_s4 = inlined_call_operand.vmem [shape: f32[1,32], index: 4, kind: input, shape index: {}]   ;;  %s1021_s5 = inlined_call_operand.vmem [shape: f32[1,32], index: 5, kind: input, shape index: {}]   ;;  %s1022_s6 = inlined_call_operand.vmem [shape: f32[128,32], index: 6, kind: output, shape index: {}]  }
   0x1 LB: > { %s641_s22 = sadd.s32 4294967295, %s803_s21   ;;  %p645_p0 = scmp.ge.s32.totalorder %s803_s21, 1  ;;  %s803_s21 = sphi %s840_s21, %s16_s21  }
   0x2   : > { %p224_p1 = scmp.lt.s32.totalorder %s803_s21, 3 }
   0x4   : > { %p225_p2 = pnand %p645_p0, %p224_p1 }
   0x5   : > { %v285_v0 = vld [vmem:[%s1017_s1] sm:$0xff] (!%p225_p2)  ;;  %v286_v1 = vld [vmem:[%s1017_s1 + $0x8] sm:$0xff] (!%p225_p2)  ;;  %v287_v2 = vld [vmem:[%s1017_s1 + $0x10] sm:$0xff] (!%p225_p2)  ;;  %s646_s29 = sshll.u32 (!%p225_p2), %s641_s22, 3  ;;  %vm429_vm0 = vcmask (!%p225_p2), 261120  }
   0x6   : > { %228 = sbr.rel (%p225_p2) target bundleno = 586 (0x24a), region = 44  ;;  %v725_v3 = vpack.c.bf16 (!%p225_p2), %v286_v1, %v285_v0  ;;  %v288_v4 = vld [vmem:[%s1017_s1 + $0x18] sm:$0xff] (!%p225_p2)  ;;  %p260_p3 = scmp.lt.s32.totalorder (!%p225_p2), %s646_s29, 15  ;;  %v289_v6 = vld [vmem:[%s1017_s1 + $0x20] sm:$0xff] (!%p225_p2)  ;;  %v290_v7 = vld [vmem:[%s1017_s1 + $0x28] sm:$0xff] (!%p225_p2) }
   0x7   : > { %v729_v5 = vpack.c.bf16 (!%p225_p2), %v288_v4, %v287_v2  ;;  %v733_v8 = vpack.c.bf16 (!%p225_p2), %v290_v7, %v289_v6  ;;  %v291_v9 = vld [vmem:[%s1017_s1 + $0x30] sm:$0xff] (!%p225_p2)  ;;  %v292_v10 = vld [vmem:[%s1017_s1 + $0x38] sm:$0xff] (!%p225_p2)  ;;  %v293_v14 = vld [vmem:[%s1017_s1 + $0x40] sm:$0xff] (!%p225_p2) }
   0x8   : > { %726 = vmatprep.subr.bf16.mxu0 (!%p225_p2), %v725_v3  ;;  %757 = vmatprep.subr.bf16.mxu1 (!%p225_p2), %v725_v3  ;;  %v737_v13 = vpack.c.bf16 (!%p225_p2), %v292_v10, %v291_v9  ;;  %v294_v15 = vld [vmem:[%s1017_s1 + $0x48] sm:$0xff] (!%p225_p2)  ;;  %v295_v17 = vld [vmem:[%s1017_s1 + $0x50] sm:$0xff] (!%p225_p2)  ;;  %v296_v18 = vld [vmem:[%s1017_s1 + $0x58] sm:$0xff] (!%p225_p2) }
   0x9   : > { %728 = vmatpush3.bf16.msra.mxu0 (!%p225_p2), %v725_v3  ;;  %765 = vmatpush3.bf16.msra.mxu1 (!%p225_p2), %v725_v3  ;;  %v741_v16 = vpack.c.bf16 (!%p225_p2), %v294_v15, %v293_v14  ;;  %v745_v19 = vpack.c.bf16 (!%p225_p2), %v296_v18, %v295_v17  ;;  %v297_v20 = vld [vmem:[%s1017_s1 + $0x60] sm:$0xff] (!%p225_p2)  ;;  %v298_v21 = vld [vmem:[%s1017_s1 + $0x68] sm:$0xff] (!%p225_p2)  ;;  %v299_v23 = vld [vmem:[%s1017_s1 + $0x70] sm:$0xff] (!%p225_p2) }
   0xa   : > { %730 = vmatprep.subr.bf16.mxu0 (!%p225_p2), %v729_v5  ;;  %758 = vmatprep.subr.bf16.mxu1 (!%p225_p2), %v729_v5  ;;  %v749_v22 = vpack.c.bf16 (!%p225_p2), %v298_v21, %v297_v20  ;;  %v300_v24 = vld [vmem:[%s1017_s1 + $0x78] sm:$0xff] (!%p225_p2)  ;;  %v652_v32 = vld [vmem:[%s1018_s2] ss:$0 sm:$0xff] (!%p225_p2) }
   0xb   : > { %v753_v25 = vpack.c.bf16 (!%p225_p2), %v300_v24, %v299_v23 }
   0xd   : > { %s1024_s29 = smov (!%p260_p3, %s646_s29), 15  ;;  %732 = vmatpush3.bf16.msra.mxu0 %v729_v5  ;;  %766 = vmatpush3.bf16.msra.mxu1 %v729_v5 }
   0xe   : > { %s866_s12 = sshll.u32 %s1024_s29, 3  ;;  %734 = vmatprep.subr.bf16.mxu0 %v733_v8  ;;  %759 = vmatprep.subr.bf16.mxu1 %v733_v8 }
   0xf   : > { %s878_s19 = scalar_lea.vmem %s1016_s0, %s866_s12  ;;  %s916_s16 = scalar_lea.vmem %s1019_s3, %s866_s12 }
  0x10   : > { %v277_v11 = vld [vmem:[%s878_s19] sm:$0xff]  ;;  %v278_v26 = vld [vmem:[%s878_s19 + $0x8] sm:$0xff]  ;;  %v279_v28 = vld [vmem:[%s878_s19 + $0x10] sm:$0xff]  ;;  %s988_s26 = scalar_lea.vmem %s1022_s6, %s866_s12 }
  0x11   : > { %v281_v12 = vld [vmem:[%s878_s19 + $0x20] sm:$0xff]  ;;  %713 = vmatprep.mubr.f32.mxu0 %v277_v11  ;;  %736 = vmatpush3.bf16.msra.mxu0 %v733_v8  ;;  %v282_v27 = vld [vmem:[%s878_s19 + $0x28] sm:$0xff]  ;;  %v283_v29 = vld [vmem:[%s878_s19 + $0x30] sm:$0xff] }
  0x12   : > { %719 = vmatprep.mubr.f32.mxu1 %v281_v12  ;;  %767 = vmatpush3.bf16.msra.mxu1 %v733_v8  ;;  %v280_v30 = vld [vmem:[%s878_s19 + $0x18] sm:$0xff]  ;;  %v418_v35 = vld [vmem:[%s916_s16 + $0x28] sm:$0xff]  ;;  %v413_v42 = vld [vmem:[%s916_s16] sm:$0xff] }
  0x13   : > { %738 = vmatprep.subr.bf16.mxu0 %v737_v13  ;;  %760 = vmatprep.subr.bf16.mxu1 %v737_v13  ;;  %v284_v31 = vld [vmem:[%s878_s19 + $0x38] sm:$0xff]  ;;  %v414_v36 = vld [vmem:[%s916_s16 + $0x8] sm:$0xff]  ;;  %v415_v55 = vld [vmem:[%s916_s16 + $0x10] sm:$0xff] }
  0x14   : > { %v416_v47 = vld [vmem:[%s916_s16 + $0x18] sm:$0xff]  ;;  %v417_v57 = vld [vmem:[%s916_s16 + $0x20] sm:$0xff]  ;;  %v419_v63 = vld [vmem:[%s916_s16 + $0x30] sm:$0xff] }
  0x15   : > { %740 = vmatpush3.bf16.msra.mxu0 %v737_v13  ;;  %v420_v62 = vld [vmem:[%s916_s16 + $0x38] sm:$0xff] }
  0x16   : > { %768 = vmatpush3.bf16.msra.mxu1 %v737_v13  ;;  %742 = vmatprep.subr.bf16.mxu0 %v741_v16 }
  0x17   : > { %761 = vmatprep.subr.bf16.mxu1 %v741_v16 }
  0x19   : > { %744 = vmatpush3.bf16.msra.mxu0 %v741_v16 }
  0x1a   : > { %769 = vmatpush3.bf16.msra.mxu1 %v741_v16  ;;  %746 = vmatprep.subr.bf16.mxu0 %v745_v19 }
  0x1b   : > { %762 = vmatprep.subr.bf16.mxu1 %v745_v19 }
  0x1d   : > { %748 = vmatpush3.bf16.msra.mxu0 %v745_v19 }
  0x1e   : > { %770 = vmatpush3.bf16.msra.mxu1 %v745_v19  ;;  %750 = vmatprep.subr.bf16.mxu0 %v749_v22 }
  0x1f   : > { %763 = vmatprep.subr.bf16.mxu1 %v749_v22 }
  0x21   : > { %752 = vmatpush3.bf16.msra.mxu0 %v749_v22 }
  0x22   : > { %771 = vmatpush3.bf16.msra.mxu1 %v749_v22  ;;  %754 = vmatprep.subr.bf16.mxu0 %v753_v25 }
  0x23   : > { %764 = vmatprep.subr.bf16.mxu1 %v753_v25 }
  0x25   : > { %756 = vmatpush3.bf16.msra.mxu0 %v753_v25 }
  0x26   : > { %772 = vmatpush3.bf16.msra.mxu1 %v753_v25 }
  0x28   : > { %714 = vmatmul.mubr.f32.vlgmr.msra.gmra.mrb[0].mxu0 %v278_v26 }
  0x29   : > { %720 = vmatmul.mubr.f32.vlgmr.msra.gmra.mrb[0].mxu1 %v282_v27  ;;  %716 = vmatprep.mubr.f32.mxu0 %v279_v28 }
  0x2a   : > { %722 = vmatprep.mubr.f32.mxu1 %v283_v29 }
  0x2c   : > { %717 = vmatmul.mubr.f32.gmra.mrb[2].mxu0 %v280_v30 }
  0x2d   : > { %723 = vmatmul.mubr.f32.gmra.mrb[2].mxu1 %v284_v31 }
  0xfb   : > { %v715_v33 = vpop.f32.mrb[0].mxu0 }
  0xfc   : > { %v721_v34 = vpop.f32.mrb[0].mxu1  ;;  %v380_v37 = vadd.f32 %v715_v33, %v652_v32  ;;  %v374_v39 = vpop.f32.mrb[1].mxu0 }
  0xfd   : > { %v400_v38 = vadd.f32 %v721_v34, %v652_v32  ;;  %v394_v40 = vpop.f32.mrb[1].mxu1  ;;  %v375_v41 = vadd.f32 %v652_v32, %v374_v39 }
  0xfe   : > { %v422_v44 = vadd.f32 %v414_v36, %v380_v37  ;;  %v395_v46 = vadd.f32 %v652_v32, %v394_v40 }
  0xff   : > { %v426_v43 = vadd.f32 %v418_v35, %v400_v38  ;;  %v718_v45 = vpop.f32.mrb[2].mxu0  ;;  %v421_v53 = vadd.f32 %v413_v42, %v375_v41 }
 0x100   : > { %v724_v48 = vpop.f32.mrb[2].mxu1  ;;  %v390_v49 = vadd.f32 %v718_v45, %v652_v32  ;;  %v433_v51 = vsel %vm429_vm0, %v422_v44, 0.0  ;;  %v384_v52 = vpop.f32.mrb[3].mxu0  ;;  %v425_v2 = vadd.f32 %v417_v57, %v395_v46 }
 0x101   : > { %v445_v50 = vsel %vm429_vm0, %v426_v43, 0.0  ;;  %v404_v54 = vpop.f32.mrb[3].mxu1  ;;  %434 = vadd.xlane.f32.xlu0 %v433_v51  ;;  %v385_v56 = vadd.f32 %v652_v32, %v384_v52  ;;  %v410_v59 = vadd.f32 %v724_v48, %v652_v32  ;;  %v430_v1 = vsel %vm429_vm0, %v421_v53, 0.0 }
 0x102   : > { %446 = vadd.xlane.f32.xlu1 %v445_v50  ;;  %v424_v58 = vadd.f32 %v416_v47, %v390_v49  ;;  %v405_v60 = vadd.f32 %v652_v32, %v404_v54  ;;  %v442_v6 = vsel %vm429_vm0, %v425_v2, 0.0 }
 0x103   : > { %v423_v61 = vadd.f32 %v415_v55, %v385_v56  ;;  %v428_v4 = vadd.f32 %v420_v62, %v410_v59 }
 0x104   : > { %v439_v0 = vsel %vm429_vm0, %v424_v58, 0.0  ;;  %v427_v5 = vadd.f32 %v419_v63, %v405_v60 }
 0x105   : > { %431 = vadd.xlane.f32.xlu0 %v430_v1  ;;  %v436_v3 = vsel %vm429_vm0, %v423_v61, 0.0  ;;  %v451_v7 = vsel %vm429_vm0, %v428_v4, 0.0 }
 0x106   : > { %440 = vadd.xlane.f32.xlu1 %v439_v0  ;;  %v448_v8 = vsel %vm429_vm0, %v427_v5, 0.0 }
 0x109   : > { %443 = vadd.xlane.f32.xlu0 %v442_v6 }
 0x10a   : > { %437 = vadd.xlane.f32.xlu1 %v436_v3 }
 0x10d   : > { %449 = vadd.xlane.f32.xlu0 %v448_v8 }
 0x10e   : > { %452 = vadd.xlane.f32.xlu1 %v451_v7 }
 0x18e   : > { %v435_v10 = vpop.xlane.xlu0 %434 }
 0x18f   : > { %v447_v9 = vpop.xlane.xlu1 %446  ;;  %v456_v12 = vmul.f32 0.03125, %v435_v10  ;;  %v654_v10 = vld [vmem:[%s1021_s5] ss:$0 sm:$0xff] }
 0x190   : > { %v460_v11 = vmul.f32 0.03125, %v447_v9 }
 0x191   : > { %v939_v14 = vsub.f32 %v422_v44, %v456_v12 }
 0x192   : > { %v937_v13 = vsub.f32 %v426_v43, %v460_v11  ;;  %v432_v16 = vpop.xlane.xlu0 %431 }
 0x193   : > { %v441_v15 = vpop.xlane.xlu1 %440  ;;  %v455_v18 = vmul.f32 0.03125, %v432_v16  ;;  %v472_v19 = vmul.f32 %v939_v14, %v939_v14 }
 0x194   : > { %v458_v17 = vmul.f32 0.03125, %v441_v15  ;;  %v476_v23 = vmul.f32 %v937_v13, %v937_v13 }
 0x195   : > { %v945_v21 = vsub.f32 %v421_v53, %v455_v18  ;;  %v482_v22 = vsel %vm429_vm0, %v472_v19, 0.0 }
 0x196   : > { %v943_v20 = vsub.f32 %v424_v58, %v458_v17  ;;  %483 = vadd.xlane.f32.xlu1 %v482_v22  ;;  %v444_v25 = vpop.xlane.xlu0 %443  ;;  %v494_v32 = vsel %vm429_vm0, %v476_v23, 0.0 }
 0x197   : > { %v438_v24 = vpop.xlane.xlu1 %437  ;;  %v459_v27 = vmul.f32 0.03125, %v444_v25  ;;  %v471_v28 = vmul.f32 %v945_v21, %v945_v21 }
 0x198   : > { %v457_v26 = vmul.f32 0.03125, %v438_v24  ;;  %v474_v29 = vmul.f32 %v943_v20, %v943_v20 }
 0x199   : > { %v956_v31 = vsub.f32 %v425_v2, %v459_v27  ;;  %v479_v33 = vsel %vm429_vm0, %v471_v28, 0.0 }
 0x19a   : > { %v954_v30 = vsub.f32 %v423_v61, %v457_v26  ;;  %495 = vadd.xlane.f32.xlu1 %v494_v32  ;;  %480 = vadd.xlane.f32.xlu0 %v479_v33  ;;  %v450_v35 = vpop.xlane.xlu0 %449  ;;  %v488_v39 = vsel %vm429_vm0, %v474_v29, 0.0 }
 0x19b   : > { %v453_v34 = vpop.xlane.xlu1 %452  ;;  %v461_v37 = vmul.f32 0.03125, %v450_v35  ;;  %v475_v38 = vmul.f32 %v956_v31, %v956_v31 }
 0x19c   : > { %v462_v36 = vmul.f32 0.03125, %v453_v34  ;;  %v473_v43 = vmul.f32 %v954_v30, %v954_v30 }
 0x19d   : > { %v965_v41 = vsub.f32 %v427_v5, %v461_v37  ;;  %v491_v42 = vsel %vm429_vm0, %v475_v38, 0.0  ;;  %v653_v5 = vld [vmem:[%s1020_s4] ss:$0 sm:$0xff] }
 0x19e   : > { %v963_v40 = vsub.f32 %v428_v4, %v462_v36  ;;  %489 = vadd.xlane.f32.xlu1 %v488_v39  ;;  %492 = vadd.xlane.f32.xlu0 %v491_v42  ;;  %v485_v46 = vsel %vm429_vm0, %v473_v43, 0.0 }
 0x19f   : > { %v477_v47 = vmul.f32 %v965_v41, %v965_v41 }
 0x1a0   : > { %v478_v44 = vmul.f32 %v963_v40, %v963_v40 }
 0x1a1   : > { %v497_v48 = vsel %vm429_vm0, %v477_v47, 0.0 }
 0x1a2   : > { %v500_v45 = vsel %vm429_vm0, %v478_v44, 0.0  ;;  %486 = vadd.xlane.f32.xlu0 %v485_v46 }
 0x1a3   : > { %501 = vadd.xlane.f32.xlu1 %v500_v45 }
 0x1a6   : > { %498 = vadd.xlane.f32.xlu0 %v497_v48 }
 0x223   : > { %v484_v49 = vpop.xlane.xlu1 %483 }
 0x224   : > { %v504_v50 = vmul.f32 0.03125, %v484_v49 }
 0x226   : > { %v512_v51 = vadd.f32 1e-05, %v504_v50 }
 0x227   : > { %v496_v52 = vpop.xlane.xlu1 %495  ;;  %v481_v53 = vpop.xlane.xlu0 %480 }
 0x228   : > { %781 = vrsqrt.f32 %v512_v51  ;;  %v508_v54 = vmul.f32 0.03125, %v496_v52  ;;  %v503_v55 = vmul.f32 0.03125, %v481_v53 }
 0x22a   : > { %v516_v56 = vadd.f32 1e-05, %v508_v54  ;;  %v511_v57 = vadd.f32 1e-05, %v503_v55 }
 0x22b   : > { %v490_v58 = vpop.xlane.xlu1 %489  ;;  %v493_v59 = vpop.xlane.xlu0 %492 }
 0x22c   : > { %783 = vrsqrt.f32 %v516_v56  ;;  %v506_v60 = vmul.f32 0.03125, %v490_v58  ;;  %v507_v61 = vmul.f32 0.03125, %v493_v59 }
 0x22d   : > { %785 = vrsqrt.f32 %v511_v57 }
 0x22e   : > { %v514_v62 = vadd.f32 1e-05, %v506_v60  ;;  %v515_v63 = vadd.f32 1e-05, %v507_v61 }
 0x22f   : > { %v487_v1 = vpop.xlane.xlu0 %486 }
 0x230   : > { %v502_v0 = vpop.xlane.xlu1 %501  ;;  %787 = vrsqrt.f32 %v514_v62  ;;  %v505_v3 = vmul.f32 0.03125, %v487_v1 }
 0x231   : > { %v510_v2 = vmul.f32 0.03125, %v502_v0  ;;  %789 = vrsqrt.f32 %v515_v63 }
 0x232   : > { %v782_v4 = vpop.eup %781  ;;  %v513_v7 = vadd.f32 1e-05, %v505_v3 }
 0x233   : > { %v518_v6 = vadd.f32 1e-05, %v510_v2  ;;  %v528_v8 = vmul.f32 %v782_v4, %v939_v14  ;;  %v499_v9 = vpop.xlane.xlu0 %498 }
 0x234   : > { %v509_v11 = vmul.f32 0.03125, %v499_v9 }
 0x235   : > { %791 = vrsqrt.f32 %v518_v6  ;;  %v543_v12 = vmul.f32 %v653_v5, %v528_v8 }
 0x236   : > { %793 = vrsqrt.f32 %v513_v7  ;;  %v784_v15 = vpop.eup %783  ;;  %v517_v16 = vadd.f32 1e-05, %v509_v11 }
 0x237   : > { %v786_v17 = vpop.eup %785  ;;  %v558_v14 = vadd.f32 %v654_v10, %v543_v12  ;;  %v532_v18 = vmul.f32 %v784_v15, %v937_v13 }
 0x238   : > { %v527_v19 = vmul.f32 %v786_v17, %v945_v21  ;;  %795 = vrsqrt.f32 %v517_v16 }
 0x239   : > { %566 = vst.msk [vmem:[%s988_s26 + $0x8] sm:$0xff] %vm429_vm0, %v558_v14  ;;  %v547_v22 = vmul.f32 %v653_v5, %v532_v18 }
 0x23a   : > { %v788_v23 = vpop.eup %787  ;;  %v542_v24 = vmul.f32 %v653_v5, %v527_v19 }
 0x23b   : > { %v790_v25 = vpop.eup %789  ;;  %v562_v26 = vadd.f32 %v654_v10, %v547_v22  ;;  %v530_v27 = vmul.f32 %v788_v23, %v943_v20 }
 0x23c   : > { %v557_v28 = vadd.f32 %v654_v10, %v542_v24  ;;  %v531_v29 = vmul.f32 %v790_v25, %v956_v31 }
 0x23d   : > { %570 = vst.msk [vmem:[%s988_s26 + $0x28] sm:$0xff] %vm429_vm0, %v562_v26  ;;  %v545_v13 = vmul.f32 %v653_v5, %v530_v27 }
 0x23e   : > { %565 = vst.msk [vmem:[%s988_s26] sm:$0xff] %vm429_vm0, %v557_v28  ;;  %v546_v21 = vmul.f32 %v653_v5, %v531_v29 }
 0x23f   : > { %v792_v32 = vpop.eup %791  ;;  %v560_v34 = vadd.f32 %v654_v10, %v545_v13 }
 0x240   : > { %v794_v33 = vpop.eup %793  ;;  %v534_v35 = vmul.f32 %v792_v32, %v963_v40  ;;  %v561_v36 = vadd.f32 %v654_v10, %v546_v21 }
 0x241   : > { %v529_v20 = vmul.f32 %v794_v33, %v954_v30  ;;  %568 = vst.msk [vmem:[%s988_s26 + $0x18] sm:$0xff] %vm429_vm0, %v560_v34 }
 0x242   : > { %v549_v31 = vmul.f32 %v653_v5, %v534_v35  ;;  %v796_v37 = vpop.eup %795  ;;  %569 = vst.msk [vmem:[%s988_s26 + $0x20] sm:$0xff] %vm429_vm0, %v561_v36 }
 0x243   : > { %v544_v38 = vmul.f32 %v653_v5, %v529_v20  ;;  %v533_v42 = vmul.f32 %v796_v37, %v965_v41 }
 0x244   : > { %v564_v39 = vadd.f32 %v654_v10, %v549_v31 }
 0x245   : > { %v559_v43 = vadd.f32 %v654_v10, %v544_v38  ;;  %v548_v44 = vmul.f32 %v653_v5, %v533_v42 }
 0x246   : > { %572 = vst.msk [vmem:[%s988_s26 + $0x38] sm:$0xff] %vm429_vm0, %v564_v39 }
 0x247   : > { %567 = vst.msk [vmem:[%s988_s26 + $0x10] sm:$0xff] %vm429_vm0, %v559_v43  ;;  %v563_v40 = vadd.f32 %v654_v10, %v548_v44 }
 0x249   : > { %571 = vst.msk [vmem:[%s988_s26 + $0x30] sm:$0xff] %vm429_vm0, %v563_v40 }
 0x24a PF: > { %s16_s21 = sadd.s32 1, %s803_s21  }
 0x24b   : > { %p13_p4 = scmp.ge.s32.totalorder %s16_s21, 4  }
 0x24d   :  { %15 = sbr.rel (!%p13_p4) target bundleno = 1 (0x1), region = 77 }

// kernel: crossandoutput_forward.155
= control target key start
LH: loop header
LB: loop body
LE: loop exit
PB: predicated region body
PF: predicated region fallthrough
CT: control target
= control target key end

     0   :  { %s488_s12 = smov 0   ;;  %s536_s0 = inlined_call_operand.vmem [shape: f32[128,32], index: 0, kind: input, shape index: {}]   ;;  %s537_s1 = inlined_call_operand.vmem [shape: f32[32,64], index: 1, kind: input, shape index: {}]   ;;  %s538_s2 = inlined_call_operand.vmem [shape: f32[1,64], index: 2, kind: input, shape index: {}]   ;;  %s539_s3 = inlined_call_operand.vmem [shape: f32[128,64], index: 3, kind: output, shape index: {}]  }
   0x1 LB: > { %s388_s13 = sadd.s32 4294967295, %s466_s12   ;;  %p392_p0 = scmp.ge.s32.totalorder %s466_s12, 1  ;;  %s466_s12 = sphi %s488_s12, %s13_s12  }
   0x2   : > { %p138_p1 = scmp.lt.s32.totalorder %s466_s12, 3 }
   0x4   : > { %p139_p2 = pnand %p392_p0, %p138_p1 }
   0x5   : > { %v182_v0 = vld [vmem:[%s537_s1] sm:$0xff] (!%p139_p2)  ;;  %v183_v1 = vld [vmem:[%s537_s1 + $0x8] sm:$0xff] (!%p139_p2)  ;;  %v184_v2 = vld [vmem:[%s537_s1 + $0x10] sm:$0xff] (!%p139_p2)  ;;  %s393_s20 = sshll.u32 (!%p139_p2), %s388_s13, 3  ;;  %vm193_vm0 = vcmask (!%p139_p2), 261120   ;;  %vm323_vm1 = vcmask (!%p139_p2), 523264  }
   0x6   : > { %142 = sbr.rel (%p139_p2) target bundleno = 239 (0xef), region = 32  ;;  %v440_v3 = vpack.c.bf16 (!%p139_p2), %v183_v1, %v182_v0  ;;  %v185_v4 = vld [vmem:[%s537_s1 + $0x18] sm:$0xff] (!%p139_p2)  ;;  %p163_p3 = scmp.lt.s32.totalorder (!%p139_p2), %s393_s20, 15  ;;  %v397_v14 = vld [vmem:[%s538_s2] ss:$0 sm:$0xff] (!%p139_p2) }
   0x7   : > { %v444_v5 = vpack.c.bf16 (!%p139_p2), %v185_v4, %v184_v2 }
   0x8   : > { %441 = vmatprep.subr.bf16.mxu0 (!%p139_p2), %v440_v3  ;;  %448 = vmatprep.subr.bf16.mxu1 (!%p139_p2), %v440_v3 }
   0x9   : > { %443 = vmatpush3.bf16.msra.mxu0 (!%p139_p2), %v440_v3  ;;  %450 = vmatpush3.bf16.msra.mxu1 (!%p139_p2), %v440_v3 }
   0xa   : > { %445 = vmatprep.subr.bf16.mxu0 (!%p139_p2), %v444_v5  ;;  %449 = vmatprep.subr.bf16.mxu1 (!%p139_p2), %v444_v5 }
   0xd   : > { %s541_s20 = smov (!%p163_p3, %s393_s20), 15  ;;  %447 = vmatpush3.bf16.msra.mxu0 %v444_v5  ;;  %451 = vmatpush3.bf16.msra.mxu1 %v444_v5 }
   0xe   : > { %s394_s23 = sshll.u32 %s541_s20, 3 }
   0xf   : > { %s166_s26 = scalar_lea.vmem %s536_s0, %s394_s23  ;;  %s172_s4 = scalar_lea.vmem %s539_s3, %s394_s23 }
  0x10   : > { %v174_v6 = vld [vmem:[%s166_s26] sm:$0xff]  ;;  %v175_v8 = vld [vmem:[%s166_s26 + $0x8] sm:$0xff]  ;;  %v176_v10 = vld [vmem:[%s166_s26 + $0x10] sm:$0xff] }
  0x11   : > { %v178_v7 = vld [vmem:[%s166_s26 + $0x20] sm:$0xff]  ;;  %v179_v9 = vld [vmem:[%s166_s26 + $0x28] sm:$0xff]  ;;  %428 = vmatprep.mubr.msk.f32.mxu0 %vm193_vm0, %v174_v6  ;;  %v180_v11 = vld [vmem:[%s166_s26 + $0x30] sm:$0xff] }
  0x12   : > { %434 = vmatprep.mubr.msk.f32.mxu1 %vm193_vm0, %v178_v7  ;;  %429 = vmatmul.mubr.msk.f32.vlgmr.msra.gmra.mrb[0].mxu0 %vm193_vm0, %v175_v8  ;;  %v177_v12 = vld [vmem:[%s166_s26 + $0x18] sm:$0xff] }
  0x13   : > { %435 = vmatmul.mubr.msk.f32.vlgmr.msra.gmra.mrb[0].mxu1 %vm193_vm0, %v179_v9  ;;  %431 = vmatprep.mubr.msk.f32.mxu0 %vm193_vm0, %v176_v10  ;;  %v181_v13 = vld [vmem:[%s166_s26 + $0x38] sm:$0xff] }
  0x14   : > { %437 = vmatprep.mubr.msk.f32.mxu1 %vm193_vm0, %v180_v11 }
  0x16   : > { %432 = vmatmul.mubr.msk.f32.gmra.mrb[2].mxu0 %vm193_vm0, %v177_v12 }
  0x17   : > { %438 = vmatmul.mubr.msk.f32.gmra.mrb[2].mxu1 %vm193_vm0, %v181_v13 }
  0xe5   : > { %v430_v15 = vpop.f32.mrb[0].mxu0 }
  0xe6   : > { %v436_v16 = vpop.f32.mrb[0].mxu1  ;;  %v290_v17 = vadd.f32 %v430_v15, %v397_v14  ;;  %v284_v19 = vpop.f32.mrb[1].mxu0 }
  0xe7   : > { %v310_v18 = vadd.f32 %v436_v16, %v397_v14  ;;  %v304_v20 = vpop.f32.mrb[1].mxu1  ;;  %v285_v21 = vadd.f32 %v397_v14, %v284_v19 }
  0xe8   : > { %v305_v22 = vadd.f32 %v397_v14, %v304_v20  ;;  %325 = vst.msk [vmem:[%s172_s4 + $0x8] sm:$0xff] %vm323_vm1, %v290_v17 }
  0xe9   : > { %329 = vst.msk [vmem:[%s172_s4 + $0x28] sm:$0xff] %vm323_vm1, %v310_v18  ;;  %324 = vst.msk [vmem:[%s172_s4] sm:$0xff] %vm323_vm1, %v285_v21  ;;  %v433_v23 = vpop.f32.mrb[2].mxu0 }
  0xea   : > { %328 = vst.msk [vmem:[%s172_s4 + $0x20] sm:$0xff] %vm323_vm1, %v305_v22  ;;  %v439_v24 = vpop.f32.mrb[2].mxu1  ;;  %v300_v25 = vadd.f32 %v433_v23, %v397_v14  ;;  %v294_v27 = vpop.f32.mrb[3].mxu0 }
  0xeb   : > { %v320_v26 = vadd.f32 %v439_v24, %v397_v14  ;;  %v314_v28 = vpop.f32.mrb[3].mxu1  ;;  %v295_v29 = vadd.f32 %v397_v14, %v294_v27 }
  0xec   : > { %v315_v30 = vadd.f32 %v397_v14, %v314_v28  ;;  %327 = vst.msk [vmem:[%s172_s4 + $0x18] sm:$0xff] %vm323_vm1, %v300_v25 }
  0xed   : > { %331 = vst.msk [vmem:[%s172_s4 + $0x38] sm:$0xff] %vm323_vm1, %v320_v26  ;;  %326 = vst.msk [vmem:[%s172_s4 + $0x10] sm:$0xff] %vm323_vm1, %v295_v29 }
  0xee   : > { %330 = vst.msk [vmem:[%s172_s4 + $0x30] sm:$0xff] %vm323_vm1, %v315_v30 }
  0xef PF: > { %s13_s12 = sadd.s32 1, %s466_s12  }
  0xf0   : > { %p10_p4 = scmp.ge.s32.totalorder %s13_s12, 4  }
  0xf2   :  { %12 = sbr.rel (!%p10_p4) target bundleno = 1 (0x1), region = 62 }

// kernel: crossandoutput_forward.178
= control target key start
LH: loop header
LB: loop body
LE: loop exit
PB: predicated region body
PF: predicated region fallthrough
CT: control target
= control target key end

     0   :  { %s488_s12 = smov 0   ;;  %s536_s0 = inlined_call_operand.vmem [shape: f32[128,32], index: 0, kind: input, shape index: {}]   ;;  %s537_s1 = inlined_call_operand.vmem [shape: f32[32,96], index: 1, kind: input, shape index: {}]   ;;  %s538_s2 = inlined_call_operand.vmem [shape: f32[1,96], index: 2, kind: input, shape index: {}]   ;;  %s539_s3 = inlined_call_operand.vmem [shape: f32[128,96], index: 3, kind: output, shape index: {}]  }
   0x1 LB: > { %s388_s13 = sadd.s32 4294967295, %s466_s12   ;;  %p392_p0 = scmp.ge.s32.totalorder %s466_s12, 1  ;;  %s466_s12 = sphi %s488_s12, %s13_s12  }
   0x2   : > { %p138_p1 = scmp.lt.s32.totalorder %s466_s12, 3 }
   0x4   : > { %p139_p2 = pnand %p392_p0, %p138_p1 }
   0x5   : > { %v182_v0 = vld [vmem:[%s537_s1] sm:$0xff] (!%p139_p2)  ;;  %v183_v1 = vld [vmem:[%s537_s1 + $0x8] sm:$0xff] (!%p139_p2)  ;;  %v184_v2 = vld [vmem:[%s537_s1 + $0x10] sm:$0xff] (!%p139_p2)  ;;  %s393_s20 = sshll.u32 (!%p139_p2), %s388_s13, 3  ;;  %vm193_vm0 = vcmask (!%p139_p2), 261120   ;;  %vm323_vm1 = vcmask (!%p139_p2), 785408  }
   0x6   : > { %142 = sbr.rel (%p139_p2) target bundleno = 239 (0xef), region = 32  ;;  %v440_v3 = vpack.c.bf16 (!%p139_p2), %v183_v1, %v182_v0  ;;  %v185_v4 = vld [vmem:[%s537_s1 + $0x18] sm:$0xff] (!%p139_p2)  ;;  %p163_p3 = scmp.lt.s32.totalorder (!%p139_p2), %s393_s20, 15  ;;  %v397_v14 = vld [vmem:[%s538_s2] ss:$0 sm:$0xff] (!%p139_p2) }
   0x7   : > { %v444_v5 = vpack.c.bf16 (!%p139_p2), %v185_v4, %v184_v2 }
   0x8   : > { %441 = vmatprep.subr.bf16.mxu0 (!%p139_p2), %v440_v3  ;;  %448 = vmatprep.subr.bf16.mxu1 (!%p139_p2), %v440_v3 }
   0x9   : > { %443 = vmatpush3.bf16.msra.mxu0 (!%p139_p2), %v440_v3  ;;  %450 = vmatpush3.bf16.msra.mxu1 (!%p139_p2), %v440_v3 }
   0xa   : > { %445 = vmatprep.subr.bf16.mxu0 (!%p139_p2), %v444_v5  ;;  %449 = vmatprep.subr.bf16.mxu1 (!%p139_p2), %v444_v5 }
   0xd   : > { %s541_s20 = smov (!%p163_p3, %s393_s20), 15  ;;  %447 = vmatpush3.bf16.msra.mxu0 %v444_v5  ;;  %451 = vmatpush3.bf16.msra.mxu1 %v444_v5 }
   0xe   : > { %s394_s23 = sshll.u32 %s541_s20, 3 }
   0xf   : > { %s166_s26 = scalar_lea.vmem %s536_s0, %s394_s23  ;;  %s172_s4 = scalar_lea.vmem %s539_s3, %s394_s23 }
  0x10   : > { %v174_v6 = vld [vmem:[%s166_s26] sm:$0xff]  ;;  %v175_v8 = vld [vmem:[%s166_s26 + $0x8] sm:$0xff]  ;;  %v176_v10 = vld [vmem:[%s166_s26 + $0x10] sm:$0xff] }
  0x11   : > { %v178_v7 = vld [vmem:[%s166_s26 + $0x20] sm:$0xff]  ;;  %v179_v9 = vld [vmem:[%s166_s26 + $0x28] sm:$0xff]  ;;  %428 = vmatprep.mubr.msk.f32.mxu0 %vm193_vm0, %v174_v6  ;;  %v180_v11 = vld [vmem:[%s166_s26 + $0x30] sm:$0xff] }
  0x12   : > { %434 = vmatprep.mubr.msk.f32.mxu1 %vm193_vm0, %v178_v7  ;;  %429 = vmatmul.mubr.msk.f32.vlgmr.msra.gmra.mrb[0].mxu0 %vm193_vm0, %v175_v8  ;;  %v177_v12 = vld [vmem:[%s166_s26 + $0x18] sm:$0xff] }
  0x13   : > { %435 = vmatmul.mubr.msk.f32.vlgmr.msra.gmra.mrb[0].mxu1 %vm193_vm0, %v179_v9  ;;  %431 = vmatprep.mubr.msk.f32.mxu0 %vm193_vm0, %v176_v10  ;;  %v181_v13 = vld [vmem:[%s166_s26 + $0x38] sm:$0xff] }
  0x14   : > { %437 = vmatprep.mubr.msk.f32.mxu1 %vm193_vm0, %v180_v11 }
  0x16   : > { %432 = vmatmul.mubr.msk.f32.gmra.mrb[2].mxu0 %vm193_vm0, %v177_v12 }
  0x17   : > { %438 = vmatmul.mubr.msk.f32.gmra.mrb[2].mxu1 %vm193_vm0, %v181_v13 }
  0xe5   : > { %v430_v15 = vpop.f32.mrb[0].mxu0 }
  0xe6   : > { %v436_v16 = vpop.f32.mrb[0].mxu1  ;;  %v290_v17 = vadd.f32 %v430_v15, %v397_v14  ;;  %v284_v19 = vpop.f32.mrb[1].mxu0 }
  0xe7   : > { %v310_v18 = vadd.f32 %v436_v16, %v397_v14  ;;  %v304_v20 = vpop.f32.mrb[1].mxu1  ;;  %v285_v21 = vadd.f32 %v397_v14, %v284_v19 }
  0xe8   : > { %v305_v22 = vadd.f32 %v397_v14, %v304_v20  ;;  %325 = vst.msk [vmem:[%s172_s4 + $0x8] sm:$0xff] %vm323_vm1, %v290_v17 }
  0xe9   : > { %329 = vst.msk [vmem:[%s172_s4 + $0x28] sm:$0xff] %vm323_vm1, %v310_v18  ;;  %324 = vst.msk [vmem:[%s172_s4] sm:$0xff] %vm323_vm1, %v285_v21  ;;  %v433_v23 = vpop.f32.mrb[2].mxu0 }
  0xea   : > { %328 = vst.msk [vmem:[%s172_s4 + $0x20] sm:$0xff] %vm323_vm1, %v305_v22  ;;  %v439_v24 = vpop.f32.mrb[2].mxu1  ;;  %v300_v25 = vadd.f32 %v433_v23, %v397_v14  ;;  %v294_v27 = vpop.f32.mrb[3].mxu0 }
  0xeb   : > { %v320_v26 = vadd.f32 %v439_v24, %v397_v14  ;;  %v314_v28 = vpop.f32.mrb[3].mxu1  ;;  %v295_v29 = vadd.f32 %v397_v14, %v294_v27 }
  0xec   : > { %v315_v30 = vadd.f32 %v397_v14, %v314_v28  ;;  %327 = vst.msk [vmem:[%s172_s4 + $0x18] sm:$0xff] %vm323_vm1, %v300_v25 }
  0xed   : > { %331 = vst.msk [vmem:[%s172_s4 + $0x38] sm:$0xff] %vm323_vm1, %v320_v26  ;;  %326 = vst.msk [vmem:[%s172_s4 + $0x10] sm:$0xff] %vm323_vm1, %v295_v29 }
  0xee   : > { %330 = vst.msk [vmem:[%s172_s4 + $0x30] sm:$0xff] %vm323_vm1, %v315_v30 }
  0xef PF: > { %s13_s12 = sadd.s32 1, %s466_s12  }
  0xf0   : > { %p10_p4 = scmp.ge.s32.totalorder %s13_s12, 4  }
  0xf2   :  { %12 = sbr.rel (!%p10_p4) target bundleno = 1 (0x1), region = 62 }

// kernel: crossandoutput_forward.181
= control target key start
LH: loop header
LB: loop body
LE: loop exit
PB: predicated region body
PF: predicated region fallthrough
CT: control target
= control target key end

     0   :  { %s543_s12 = smov 0   ;;  %s600_s0 = inlined_call_operand.vmem [shape: f32[128,32], index: 0, kind: input, shape index: {}]   ;;  %s601_s1 = inlined_call_operand.vmem [shape: f32[32,128], index: 1, kind: input, shape index: {}]   ;;  %s602_s2 = inlined_call_operand.vmem [shape: f32[1,128], index: 2, kind: input, shape index: {}]   ;;  %s603_s3 = inlined_call_operand.vmem [shape: f32[128,128], index: 3, kind: output, shape index: {}]  }
   0x1 LB: > { %s427_s13 = sadd.s32 4294967295, %s521_s12   ;;  %p431_p0 = scmp.ge.s32.totalorder %s521_s12, 1  ;;  %s521_s12 = sphi %s543_s12, %s13_s12  }
   0x2   : > { %p138_p1 = scmp.lt.s32.totalorder %s521_s12, 3 }
   0x4   : > { %p139_p2 = pnand %p431_p0, %p138_p1 }
   0x5   : > { %v182_v0 = vld [vmem:[%s601_s1] sm:$0xff] (!%p139_p2)  ;;  %v183_v1 = vld [vmem:[%s601_s1 + $0x8] sm:$0xff] (!%p139_p2)  ;;  %v184_v2 = vld [vmem:[%s601_s1 + $0x10] sm:$0xff] (!%p139_p2)  ;;  %s432_s20 = sshll.u32 (!%p139_p2), %s427_s13, 3  ;;  %vm193_vm0 = vcmask (!%p139_p2), 261120  }
   0x6   : > { %142 = sbr.rel (%p139_p2) target bundleno = 257 (0x101), region = 32  ;;  %v479_v3 = vpack.c.bf16 (!%p139_p2), %v183_v1, %v182_v0  ;;  %v185_v4 = vld [vmem:[%s601_s1 + $0x18] sm:$0xff] (!%p139_p2)  ;;  %p163_p3 = scmp.lt.s32.totalorder (!%p139_p2), %s432_s20, 15  ;;  %v436_v14 = vld [vmem:[%s602_s2] ss:$0 sm:$0xff] (!%p139_p2) }
   0x7   : > { %v483_v5 = vpack.c.bf16 (!%p139_p2), %v185_v4, %v184_v2 }
   0x8   : > { %480 = vmatprep.subr.bf16.mxu0 (!%p139_p2), %v479_v3  ;;  %487 = vmatprep.subr.bf16.mxu1 (!%p139_p2), %v479_v3 }
   0x9   : > { %482 = vmatpush3.bf16.msra.mxu0 (!%p139_p2), %v479_v3  ;;  %489 = vmatpush3.bf16.msra.mxu1 (!%p139_p2), %v479_v3 }
   0xa   : > { %484 = vmatprep.subr.bf16.mxu0 (!%p139_p2), %v483_v5  ;;  %488 = vmatprep.subr.bf16.mxu1 (!%p139_p2), %v483_v5 }
   0xd   : > { %s605_s20 = smov (!%p163_p3, %s432_s20), 15  ;;  %486 = vmatpush3.bf16.msra.mxu0 %v483_v5  ;;  %490 = vmatpush3.bf16.msra.mxu1 %v483_v5 }
   0xe   : > { %s433_s23 = sshll.u32 %s605_s20, 3 }
   0xf   : > { %s166_s26 = scalar_lea.vmem %s600_s0, %s433_s23  ;;  %s587_s4 = scalar_lea.vmem %s603_s3, %s433_s23 }
  0x10   : > { %v174_v6 = vld [vmem:[%s166_s26] sm:$0xff]  ;;  %v175_v8 = vld [vmem:[%s166_s26 + $0x8] sm:$0xff]  ;;  %v176_v10 = vld [vmem:[%s166_s26 + $0x10] sm:$0xff] }
  0x11   : > { %v178_v7 = vld [vmem:[%s166_s26 + $0x20] sm:$0xff]  ;;  %v179_v9 = vld [vmem:[%s166_s26 + $0x28] sm:$0xff]  ;;  %467 = vmatprep.mubr.msk.f32.mxu0 %vm193_vm0, %v174_v6  ;;  %v180_v11 = vld [vmem:[%s166_s26 + $0x30] sm:$0xff] }
  0x12   : > { %473 = vmatprep.mubr.msk.f32.mxu1 %vm193_vm0, %v178_v7  ;;  %468 = vmatmul.mubr.msk.f32.vlgmr.msra.gmra.mrb[0].mxu0 %vm193_vm0, %v175_v8  ;;  %v177_v12 = vld [vmem:[%s166_s26 + $0x18] sm:$0xff] }
  0x13   : > { %474 = vmatmul.mubr.msk.f32.vlgmr.msra.gmra.mrb[0].mxu1 %vm193_vm0, %v179_v9  ;;  %470 = vmatprep.mubr.msk.f32.mxu0 %vm193_vm0, %v176_v10  ;;  %v181_v13 = vld [vmem:[%s166_s26 + $0x38] sm:$0xff] }
  0x14   : > { %476 = vmatprep.mubr.msk.f32.mxu1 %vm193_vm0, %v180_v11 }
  0x16   : > { %471 = vmatmul.mubr.msk.f32.gmra.mrb[2].mxu0 %vm193_vm0, %v177_v12 }
  0x17   : > { %477 = vmatmul.mubr.msk.f32.gmra.mrb[2].mxu1 %vm193_vm0, %v181_v13 }
  0xe5   : > { %v469_v15 = vpop.f32.mrb[0].mxu0 }
  0xe6   : > { %v475_v16 = vpop.f32.mrb[0].mxu1  ;;  %v290_v17 = vadd.f32 %v469_v15, %v436_v14  ;;  %v284_v19 = vpop.f32.mrb[1].mxu0 }
  0xe7   : > { %v310_v18 = vadd.f32 %v475_v16, %v436_v14  ;;  %v304_v20 = vpop.f32.mrb[1].mxu1  ;;  %v285_v21 = vadd.f32 %v436_v14, %v284_v19 }
  0xe8   : > { %v305_v22 = vadd.f32 %v436_v14, %v304_v20  ;;  %v332_v23 = vmul.f32 0.70710677, %v290_v17  ;;  %v324_v41 = vmul.f32 0.5, %v290_v17 }
  0xe9   : > { %v336_v24 = vmul.f32 0.70710677, %v310_v18  ;;  %v331_v25 = vmul.f32 0.70710677, %v285_v21  ;;  %v472_v27 = vpop.f32.mrb[2].mxu0  ;;  %v328_v44 = vmul.f32 0.5, %v310_v18 }
  0xea   : > { %v335_v26 = vmul.f32 0.70710677, %v305_v22  ;;  %499 = verf.f32 %v332_v23  ;;  %v478_v28 = vpop.f32.mrb[2].mxu1  ;;  %v300_v29 = vadd.f32 %v472_v27, %v436_v14  ;;  %v294_v31 = vpop.f32.mrb[3].mxu0  ;;  %v323_v48 = vmul.f32 0.5, %v285_v21 }
  0xeb   : > { %501 = verf.f32 %v336_v24  ;;  %v320_v30 = vadd.f32 %v478_v28, %v436_v14  ;;  %v314_v32 = vpop.f32.mrb[3].mxu1  ;;  %v295_v33 = vadd.f32 %v436_v14, %v294_v31  ;;  %v327_v51 = vmul.f32 0.5, %v305_v22 }
  0xec   : > { %503 = verf.f32 %v331_v25  ;;  %v315_v34 = vadd.f32 %v436_v14, %v314_v32  ;;  %v334_v35 = vmul.f32 0.70710677, %v300_v29  ;;  %v326_v57 = vmul.f32 0.5, %v300_v29 }
  0xed   : > { %505 = verf.f32 %v335_v26  ;;  %v338_v36 = vmul.f32 0.70710677, %v320_v30  ;;  %v333_v37 = vmul.f32 0.70710677, %v295_v33  ;;  %v330_v60 = vmul.f32 0.5, %v320_v30 }
  0xee   : > { %507 = verf.f32 %v334_v35  ;;  %v337_v38 = vmul.f32 0.70710677, %v315_v34  ;;  %v325_v0 = vmul.f32 0.5, %v295_v33  ;;  %v329_v3 = vmul.f32 0.5, %v315_v34 }
  0xef   : > { %509 = verf.f32 %v338_v36 }
  0xf0   : > { %511 = verf.f32 %v333_v37 }
  0xf1   : > { %513 = verf.f32 %v337_v38 }
  0xf4   : > { %v500_v39 = vpop.eup %499 }
  0xf5   : > { %v502_v40 = vpop.eup %501  ;;  %v348_v42 = vadd.f32 1.0, %v500_v39 }
  0xf6   : > { %v504_v43 = vpop.eup %503  ;;  %v352_v45 = vadd.f32 1.0, %v502_v40 }
  0xf7   : > { %v506_v46 = vpop.eup %505  ;;  %v356_v47 = vmul.f32 %v348_v42, %v324_v41  ;;  %v347_v49 = vadd.f32 1.0, %v504_v43 }
  0xf8   : > { %v360_v50 = vmul.f32 %v352_v45, %v328_v44  ;;  %v351_v52 = vadd.f32 1.0, %v506_v46  ;;  %v508_v53 = vpop.eup %507 }
  0xf9   : > { %364 = vst [vmem:[%s587_s4 + $0x8] sm:$0xff] %v356_v47  ;;  %v355_v54 = vmul.f32 %v347_v49, %v323_v48  ;;  %v510_v55 = vpop.eup %509  ;;  %v350_v58 = vadd.f32 1.0, %v508_v53 }
  0xfa   : > { %368 = vst [vmem:[%s587_s4 + $0x28] sm:$0xff] %v360_v50  ;;  %v359_v56 = vmul.f32 %v351_v52, %v327_v51  ;;  %v512_v59 = vpop.eup %511  ;;  %v354_v61 = vadd.f32 1.0, %v510_v55 }
  0xfb   : > { %363 = vst [vmem:[%s587_s4] sm:$0xff] %v355_v54  ;;  %v514_v62 = vpop.eup %513  ;;  %v358_v63 = vmul.f32 %v350_v58, %v326_v57  ;;  %v349_v1 = vadd.f32 1.0, %v512_v59 }
  0xfc   : > { %367 = vst [vmem:[%s587_s4 + $0x20] sm:$0xff] %v359_v56  ;;  %v362_v2 = vmul.f32 %v354_v61, %v330_v60  ;;  %v353_v4 = vadd.f32 1.0, %v514_v62 }
  0xfd   : > { %366 = vst [vmem:[%s587_s4 + $0x18] sm:$0xff] %v358_v63  ;;  %v357_v5 = vmul.f32 %v349_v1, %v325_v0 }
  0xfe   : > { %370 = vst [vmem:[%s587_s4 + $0x38] sm:$0xff] %v362_v2  ;;  %v361_v6 = vmul.f32 %v353_v4, %v329_v3 }
  0xff   : > { %365 = vst [vmem:[%s587_s4 + $0x10] sm:$0xff] %v357_v5 }
 0x100   : > { %369 = vst [vmem:[%s587_s4 + $0x30] sm:$0xff] %v361_v6 }
 0x101 PF: > { %s13_s12 = sadd.s32 1, %s521_s12  }
 0x102   : > { %p10_p4 = scmp.ge.s32.totalorder %s13_s12, 4  }
 0x104   :  { %12 = sbr.rel (!%p10_p4) target bundleno = 1 (0x1), region = 62 }

// kernel: crossandoutput_forward.180
= control target key start
LH: loop header
LB: loop body
LE: loop exit
PB: predicated region body
PF: predicated region fallthrough
CT: control target
= control target key end

     0   :  { %s788_s21 = smov 0   ;;  %s926_s0 = inlined_call_operand.vmem [shape: f32[128,32], index: 0, kind: input, shape index: {}]   ;;  %s927_s1 = inlined_call_operand.vmem [shape: f32[32,32], index: 1, kind: input, shape index: {}]   ;;  %s928_s2 = inlined_call_operand.vmem [shape: f32[1,32], index: 2, kind: input, shape index: {}]   ;;  %s929_s3 = inlined_call_operand.vmem [shape: f32[128,32], index: 3, kind: input, shape index: {}]   ;;  %s930_s4 = inlined_call_operand.vmem [shape: f32[1,32], index: 4, kind: input, shape index: {}]   ;;  %s931_s5 = inlined_call_operand.vmem [shape: f32[1,32], index: 5, kind: input, shape index: {}]   ;;  %s932_s6 = inlined_call_operand.vmem [shape: f32[128,32], index: 6, kind: output, shape index: {}]  }
   0x1 LB: > { %s653_s22 = sadd.s32 4294967295, %s751_s21   ;;  %p657_p0 = scmp.ge.s32.totalorder %s751_s21, 1  ;;  %s751_s21 = sphi %s788_s21, %s16_s21  }
   0x2   : > { %p224_p1 = scmp.lt.s32.totalorder %s751_s21, 3 }
   0x4   : > { %p225_p2 = pnand %p657_p0, %p224_p1 }
   0x5   : > { %v285_v0 = vld [vmem:[%s927_s1] sm:$0xff] (!%p225_p2)  ;;  %v286_v1 = vld [vmem:[%s927_s1 + $0x8] sm:$0xff] (!%p225_p2)  ;;  %v287_v2 = vld [vmem:[%s927_s1 + $0x10] sm:$0xff] (!%p225_p2)  ;;  %s658_s29 = sshll.u32 (!%p225_p2), %s653_s22, 3  ;;  %vm296_vm0 = vcmask (!%p225_p2), 261120  }
   0x6   : > { %228 = sbr.rel (%p225_p2) target bundleno = 564 (0x234), region = 44  ;;  %v709_v3 = vpack.c.bf16 (!%p225_p2), %v286_v1, %v285_v0  ;;  %v288_v4 = vld [vmem:[%s927_s1 + $0x18] sm:$0xff] (!%p225_p2)  ;;  %p260_p3 = scmp.lt.s32.totalorder (!%p225_p2), %s658_s29, 15  ;;  %v664_v14 = vld [vmem:[%s928_s2] ss:$0 sm:$0xff] (!%p225_p2) }
   0x7   : > { %v713_v5 = vpack.c.bf16 (!%p225_p2), %v288_v4, %v287_v2 }
   0x8   : > { %710 = vmatprep.subr.bf16.mxu0 (!%p225_p2), %v709_v3  ;;  %717 = vmatprep.subr.bf16.mxu1 (!%p225_p2), %v709_v3 }
   0x9   : > { %712 = vmatpush3.bf16.msra.mxu0 (!%p225_p2), %v709_v3  ;;  %719 = vmatpush3.bf16.msra.mxu1 (!%p225_p2), %v709_v3 }
   0xa   : > { %714 = vmatprep.subr.bf16.mxu0 (!%p225_p2), %v713_v5  ;;  %718 = vmatprep.subr.bf16.mxu1 (!%p225_p2), %v713_v5 }
   0xd   : > { %s934_s29 = smov (!%p260_p3, %s658_s29), 15  ;;  %716 = vmatpush3.bf16.msra.mxu0 %v713_v5  ;;  %720 = vmatpush3.bf16.msra.mxu1 %v713_v5 }
   0xe   : > { %s808_s8 = sshll.u32 %s934_s29, 3 }
   0xf   : > { %s263_s11 = scalar_lea.vmem %s926_s0, %s808_s8  ;;  %s826_s14 = scalar_lea.vmem %s929_s3, %s808_s8 }
  0x10   : > { %v277_v6 = vld [vmem:[%s263_s11] sm:$0xff]  ;;  %v278_v8 = vld [vmem:[%s263_s11 + $0x8] sm:$0xff]  ;;  %v279_v10 = vld [vmem:[%s263_s11 + $0x10] sm:$0xff]  ;;  %s898_s24 = scalar_lea.vmem %s932_s6, %s808_s8 }
  0x11   : > { %v281_v7 = vld [vmem:[%s263_s11 + $0x20] sm:$0xff]  ;;  %v282_v9 = vld [vmem:[%s263_s11 + $0x28] sm:$0xff]  ;;  %697 = vmatprep.mubr.msk.f32.mxu0 %vm296_vm0, %v277_v6  ;;  %v283_v11 = vld [vmem:[%s263_s11 + $0x30] sm:$0xff] }
  0x12   : > { %703 = vmatprep.mubr.msk.f32.mxu1 %vm296_vm0, %v281_v7  ;;  %698 = vmatmul.mubr.msk.f32.vlgmr.msra.gmra.mrb[0].mxu0 %vm296_vm0, %v278_v8  ;;  %v280_v12 = vld [vmem:[%s263_s11 + $0x18] sm:$0xff]  ;;  %v431_v17 = vld [vmem:[%s826_s14 + $0x28] sm:$0xff]  ;;  %v426_v24 = vld [vmem:[%s826_s14] sm:$0xff] }
  0x13   : > { %704 = vmatmul.mubr.msk.f32.vlgmr.msra.gmra.mrb[0].mxu1 %vm296_vm0, %v282_v9  ;;  %700 = vmatprep.mubr.msk.f32.mxu0 %vm296_vm0, %v279_v10  ;;  %v284_v13 = vld [vmem:[%s263_s11 + $0x38] sm:$0xff]  ;;  %v427_v18 = vld [vmem:[%s826_s14 + $0x8] sm:$0xff]  ;;  %v428_v37 = vld [vmem:[%s826_s14 + $0x10] sm:$0xff] }
  0x14   : > { %706 = vmatprep.mubr.msk.f32.mxu1 %vm296_vm0, %v283_v11  ;;  %v429_v29 = vld [vmem:[%s826_s14 + $0x18] sm:$0xff]  ;;  %v430_v39 = vld [vmem:[%s826_s14 + $0x20] sm:$0xff]  ;;  %v432_v45 = vld [vmem:[%s826_s14 + $0x30] sm:$0xff] }
  0x15   : > { %v433_v44 = vld [vmem:[%s826_s14 + $0x38] sm:$0xff] }
  0x16   : > { %701 = vmatmul.mubr.msk.f32.gmra.mrb[2].mxu0 %vm296_vm0, %v280_v12 }
  0x17   : > { %707 = vmatmul.mubr.msk.f32.gmra.mrb[2].mxu1 %vm296_vm0, %v284_v13 }
  0xe5   : > { %v699_v15 = vpop.f32.mrb[0].mxu0 }
  0xe6   : > { %v705_v16 = vpop.f32.mrb[0].mxu1  ;;  %v393_v19 = vadd.f32 %v699_v15, %v664_v14  ;;  %v387_v21 = vpop.f32.mrb[1].mxu0 }
  0xe7   : > { %v413_v20 = vadd.f32 %v705_v16, %v664_v14  ;;  %v407_v22 = vpop.f32.mrb[1].mxu1  ;;  %v388_v23 = vadd.f32 %v664_v14, %v387_v21 }
  0xe8   : > { %v435_v26 = vadd.f32 %v427_v18, %v393_v19  ;;  %v408_v28 = vadd.f32 %v664_v14, %v407_v22 }
  0xe9   : > { %v439_v25 = vadd.f32 %v431_v17, %v413_v20  ;;  %v702_v27 = vpop.f32.mrb[2].mxu0  ;;  %v434_v35 = vadd.f32 %v426_v24, %v388_v23 }
  0xea   : > { %v708_v30 = vpop.f32.mrb[2].mxu1  ;;  %v403_v31 = vadd.f32 %v702_v27, %v664_v14  ;;  %v445_v33 = vsel %vm296_vm0, %v435_v26, 0.0  ;;  %v397_v34 = vpop.f32.mrb[3].mxu0  ;;  %v438_v48 = vadd.f32 %v430_v39, %v408_v28 }
  0xeb   : > { %v457_v32 = vsel %vm296_vm0, %v439_v25, 0.0  ;;  %v417_v36 = vpop.f32.mrb[3].mxu1  ;;  %446 = vadd.xlane.f32.xlu0 %v445_v33  ;;  %v398_v38 = vadd.f32 %v664_v14, %v397_v34  ;;  %v423_v41 = vadd.f32 %v708_v30, %v664_v14  ;;  %v442_v47 = vsel %vm296_vm0, %v434_v35, 0.0 }
  0xec   : > { %458 = vadd.xlane.f32.xlu1 %v457_v32  ;;  %v437_v40 = vadd.f32 %v429_v29, %v403_v31  ;;  %v418_v42 = vadd.f32 %v664_v14, %v417_v36  ;;  %v454_v52 = vsel %vm296_vm0, %v438_v48, 0.0 }
  0xed   : > { %v436_v43 = vadd.f32 %v428_v37, %v398_v38  ;;  %v441_v50 = vadd.f32 %v433_v44, %v423_v41 }
  0xee   : > { %v451_v46 = vsel %vm296_vm0, %v437_v40, 0.0  ;;  %v440_v51 = vadd.f32 %v432_v45, %v418_v42 }
  0xef   : > { %443 = vadd.xlane.f32.xlu0 %v442_v47  ;;  %v448_v49 = vsel %vm296_vm0, %v436_v43, 0.0  ;;  %v463_v53 = vsel %vm296_vm0, %v441_v50, 0.0 }
  0xf0   : > { %452 = vadd.xlane.f32.xlu1 %v451_v46  ;;  %v460_v54 = vsel %vm296_vm0, %v440_v51, 0.0 }
  0xf3   : > { %455 = vadd.xlane.f32.xlu0 %v454_v52 }
  0xf4   : > { %449 = vadd.xlane.f32.xlu1 %v448_v49 }
  0xf7   : > { %461 = vadd.xlane.f32.xlu0 %v460_v54 }
  0xf8   : > { %464 = vadd.xlane.f32.xlu1 %v463_v53 }
 0x178   : > { %v447_v56 = vpop.xlane.xlu0 %446 }
 0x179   : > { %v459_v55 = vpop.xlane.xlu1 %458  ;;  %v468_v58 = vmul.f32 0.03125, %v447_v56  ;;  %v674_v56 = vld [vmem:[%s931_s5] ss:$0 sm:$0xff] }
 0x17a   : > { %v472_v57 = vmul.f32 0.03125, %v459_v55 }
 0x17b   : > { %v849_v60 = vsub.f32 %v435_v26, %v468_v58 }
 0x17c   : > { %v847_v59 = vsub.f32 %v439_v25, %v472_v57  ;;  %v444_v62 = vpop.xlane.xlu0 %443 }
 0x17d   : > { %v453_v61 = vpop.xlane.xlu1 %452  ;;  %v467_v0 = vmul.f32 0.03125, %v444_v62  ;;  %v484_v1 = vmul.f32 %v849_v60, %v849_v60 }
 0x17e   : > { %v470_v63 = vmul.f32 0.03125, %v453_v61  ;;  %v488_v5 = vmul.f32 %v847_v59, %v847_v59 }
 0x17f   : > { %v855_v3 = vsub.f32 %v434_v35, %v467_v0  ;;  %v494_v4 = vsel %vm296_vm0, %v484_v1, 0.0 }
 0x180   : > { %v853_v2 = vsub.f32 %v437_v40, %v470_v63  ;;  %495 = vadd.xlane.f32.xlu1 %v494_v4  ;;  %v456_v7 = vpop.xlane.xlu0 %455  ;;  %v506_v14 = vsel %vm296_vm0, %v488_v5, 0.0 }
 0x181   : > { %v450_v6 = vpop.xlane.xlu1 %449  ;;  %v471_v9 = vmul.f32 0.03125, %v456_v7  ;;  %v483_v10 = vmul.f32 %v855_v3, %v855_v3 }
 0x182   : > { %v469_v8 = vmul.f32 0.03125, %v450_v6  ;;  %v486_v11 = vmul.f32 %v853_v2, %v853_v2 }
 0x183   : > { %v866_v13 = vsub.f32 %v438_v48, %v471_v9  ;;  %v491_v15 = vsel %vm296_vm0, %v483_v10, 0.0 }
 0x184   : > { %v864_v12 = vsub.f32 %v436_v43, %v469_v8  ;;  %507 = vadd.xlane.f32.xlu1 %v506_v14  ;;  %492 = vadd.xlane.f32.xlu0 %v491_v15  ;;  %v462_v17 = vpop.xlane.xlu0 %461  ;;  %v500_v21 = vsel %vm296_vm0, %v486_v11, 0.0 }
 0x185   : > { %v465_v16 = vpop.xlane.xlu1 %464  ;;  %v473_v19 = vmul.f32 0.03125, %v462_v17  ;;  %v487_v20 = vmul.f32 %v866_v13, %v866_v13 }
 0x186   : > { %v474_v18 = vmul.f32 0.03125, %v465_v16  ;;  %v485_v25 = vmul.f32 %v864_v12, %v864_v12 }
 0x187   : > { %v875_v23 = vsub.f32 %v440_v51, %v473_v19  ;;  %v503_v24 = vsel %vm296_vm0, %v487_v20, 0.0  ;;  %v673_v51 = vld [vmem:[%s930_s4] ss:$0 sm:$0xff] }
 0x188   : > { %v873_v22 = vsub.f32 %v441_v50, %v474_v18  ;;  %501 = vadd.xlane.f32.xlu1 %v500_v21  ;;  %504 = vadd.xlane.f32.xlu0 %v503_v24  ;;  %v497_v28 = vsel %vm296_vm0, %v485_v25, 0.0 }
 0x189   : > { %v489_v29 = vmul.f32 %v875_v23, %v875_v23 }
 0x18a   : > { %v490_v26 = vmul.f32 %v873_v22, %v873_v22 }
 0x18b   : > { %v509_v30 = vsel %vm296_vm0, %v489_v29, 0.0 }
 0x18c   : > { %v512_v27 = vsel %vm296_vm0, %v490_v26, 0.0  ;;  %498 = vadd.xlane.f32.xlu0 %v497_v28 }
 0x18d   : > { %513 = vadd.xlane.f32.xlu1 %v512_v27 }
 0x190   : > { %510 = vadd.xlane.f32.xlu0 %v509_v30 }
 0x20d   : > { %v496_v31 = vpop.xlane.xlu1 %495 }
 0x20e   : > { %v516_v32 = vmul.f32 0.03125, %v496_v31 }
 0x210   : > { %v524_v33 = vadd.f32 1e-05, %v516_v32 }
 0x211   : > { %v508_v34 = vpop.xlane.xlu1 %507  ;;  %v493_v35 = vpop.xlane.xlu0 %492 }
 0x212   : > { %729 = vrsqrt.f32 %v524_v33  ;;  %v520_v36 = vmul.f32 0.03125, %v508_v34  ;;  %v515_v37 = vmul.f32 0.03125, %v493_v35 }
 0x214   : > { %v528_v38 = vadd.f32 1e-05, %v520_v36  ;;  %v523_v39 = vadd.f32 1e-05, %v515_v37 }
 0x215   : > { %v502_v40 = vpop.xlane.xlu1 %501  ;;  %v505_v41 = vpop.xlane.xlu0 %504 }
 0x216   : > { %731 = vrsqrt.f32 %v528_v38  ;;  %v518_v42 = vmul.f32 0.03125, %v502_v40  ;;  %v519_v43 = vmul.f32 0.03125, %v505_v41 }
 0x217   : > { %733 = vrsqrt.f32 %v523_v39 }
 0x218   : > { %v526_v44 = vadd.f32 1e-05, %v518_v42  ;;  %v527_v45 = vadd.f32 1e-05, %v519_v43 }
 0x219   : > { %v499_v47 = vpop.xlane.xlu0 %498 }
 0x21a   : > { %v514_v46 = vpop.xlane.xlu1 %513  ;;  %735 = vrsqrt.f32 %v526_v44  ;;  %v517_v49 = vmul.f32 0.03125, %v499_v47 }
 0x21b   : > { %v522_v48 = vmul.f32 0.03125, %v514_v46  ;;  %737 = vrsqrt.f32 %v527_v45 }
 0x21c   : > { %v730_v50 = vpop.eup %729  ;;  %v525_v53 = vadd.f32 1e-05, %v517_v49 }
 0x21d   : > { %v530_v52 = vadd.f32 1e-05, %v522_v48  ;;  %v540_v54 = vmul.f32 %v730_v50, %v849_v60  ;;  %v511_v55 = vpop.xlane.xlu0 %510 }
 0x21e   : > { %v521_v57 = vmul.f32 0.03125, %v511_v55 }
 0x21f   : > { %739 = vrsqrt.f32 %v530_v52  ;;  %v555_v58 = vmul.f32 %v673_v51, %v540_v54 }
 0x220   : > { %741 = vrsqrt.f32 %v525_v53  ;;  %v732_v61 = vpop.eup %731  ;;  %v529_v62 = vadd.f32 1e-05, %v521_v57 }
 0x221   : > { %v734_v63 = vpop.eup %733  ;;  %v570_v60 = vadd.f32 %v674_v56, %v555_v58  ;;  %v544_v0 = vmul.f32 %v732_v61, %v847_v59 }
 0x222   : > { %v539_v1 = vmul.f32 %v734_v63, %v855_v3  ;;  %743 = vrsqrt.f32 %v529_v62 }
 0x223   : > { %578 = vst.msk [vmem:[%s898_s24 + $0x8] sm:$0xff] %vm296_vm0, %v570_v60  ;;  %v559_v4 = vmul.f32 %v673_v51, %v544_v0 }
 0x224   : > { %v736_v5 = vpop.eup %735  ;;  %v554_v6 = vmul.f32 %v673_v51, %v539_v1 }
 0x225   : > { %v738_v7 = vpop.eup %737  ;;  %v574_v8 = vadd.f32 %v674_v56, %v559_v4  ;;  %v542_v9 = vmul.f32 %v736_v5, %v853_v2 }
 0x226   : > { %v569_v10 = vadd.f32 %v674_v56, %v554_v6  ;;  %v543_v11 = vmul.f32 %v738_v7, %v866_v13 }
 0x227   : > { %582 = vst.msk [vmem:[%s898_s24 + $0x28] sm:$0xff] %vm296_vm0, %v574_v8  ;;  %v557_v59 = vmul.f32 %v673_v51, %v542_v9 }
 0x228   : > { %577 = vst.msk [vmem:[%s898_s24] sm:$0xff] %vm296_vm0, %v569_v10  ;;  %v558_v3 = vmul.f32 %v673_v51, %v543_v11 }
 0x229   : > { %v740_v14 = vpop.eup %739  ;;  %v572_v16 = vadd.f32 %v674_v56, %v557_v59 }
 0x22a   : > { %v742_v15 = vpop.eup %741  ;;  %v546_v17 = vmul.f32 %v740_v14, %v873_v22  ;;  %v573_v18 = vadd.f32 %v674_v56, %v558_v3 }
 0x22b   : > { %v541_v2 = vmul.f32 %v742_v15, %v864_v12  ;;  %580 = vst.msk [vmem:[%s898_s24 + $0x18] sm:$0xff] %vm296_vm0, %v572_v16 }
 0x22c   : > { %v561_v13 = vmul.f32 %v673_v51, %v546_v17  ;;  %v744_v19 = vpop.eup %743  ;;  %581 = vst.msk [vmem:[%s898_s24 + $0x20] sm:$0xff] %vm296_vm0, %v573_v18 }
 0x22d   : > { %v556_v20 = vmul.f32 %v673_v51, %v541_v2  ;;  %v545_v24 = vmul.f32 %v744_v19, %v875_v23 }
 0x22e   : > { %v576_v21 = vadd.f32 %v674_v56, %v561_v13 }
 0x22f   : > { %v571_v25 = vadd.f32 %v674_v56, %v556_v20  ;;  %v560_v26 = vmul.f32 %v673_v51, %v545_v24 }
 0x230   : > { %584 = vst.msk [vmem:[%s898_s24 + $0x38] sm:$0xff] %vm296_vm0, %v576_v21 }
 0x231   : > { %579 = vst.msk [vmem:[%s898_s24 + $0x10] sm:$0xff] %vm296_vm0, %v571_v25  ;;  %v575_v22 = vadd.f32 %v674_v56, %v560_v26 }
 0x233   : > { %583 = vst.msk [vmem:[%s898_s24 + $0x30] sm:$0xff] %vm296_vm0, %v575_v22 }
 0x234 PF: > { %s16_s21 = sadd.s32 1, %s751_s21  }
 0x235   : > { %p13_p4 = scmp.ge.s32.totalorder %s16_s21, 4  }
 0x237   :  { %15 = sbr.rel (!%p13_p4) target bundleno = 1 (0x1), region = 77 }

// kernel: crossandoutput_forward.193
= control target key start
LH: loop header
LB: loop body
LE: loop exit
PB: predicated region body
PF: predicated region fallthrough
CT: control target
= control target key end

     0   :  { %12 = vsyncpa [#allocation4], 0  ;;  %s1138_s0 = inlined_call_operand.vmem [shape: f32[4,16,2,32], index: 0, kind: input, shape index: {}]   ;;  %s1139_s1 = inlined_call_operand.vmem [shape: f32[4], index: 1, kind: input, shape index: {}]   ;;  %s1140_s2 = inlined_call_operand.vmem [shape: f32[32,128], index: 2, kind: input, shape index: {}]   ;;  %s1141_s3 = inlined_call_operand.vmem [shape: f32[1,128], index: 3, kind: input, shape index: {}]   ;;  %s1142_s4 = inlined_call_operand.vmem [shape: f32[1,128], index: 4, kind: input, shape index: {}]   ;;  %s1143_s5 = inlined_call_operand.vmem [shape: f32[16,8], index: 5, kind: input, shape index: {}]   ;;  %s1144_s6 = inlined_call_operand.vmem [shape: f32[1,8], index: 6, kind: input, shape index: {}]   ;;  %s1145_s7 = inlined_call_operand.hbm [shape: f32[4,1,8], index: 7, kind: output, shape index: {}]  }
   0x1   :  { %13 = vsyncpa [#allocation3], 0 }
   0x2   :  { %15 = vsyncpa [#allocation3 + $0x1], 0  ;;  %s902_s24 = smov 0   ;;  %s904_s25 = smov 0  }
   0x3   :  { %s906_s26 = smov 0   ;;  %s908_s27 = smov 0  }
   0x4 LB: > { %s923_s28 = sadd.s32 4294967295, %s858_s27   ;;  %s683_s29 = sadd.s32 4294967294, %s858_s27   ;;  %s858_s27 = sphi %s908_s27, %s1152_s27   ;;  %s854_s26 = sphi %s906_s26, %s1151_s26   ;;  %s850_s25 = sphi %s904_s25, %s1150_s25   ;;  %s846_s24 = sphi %s902_s24, %s1149_s24  }
   0x5   : > { %s927_s30 = sadd.s32 1, %s858_s27   ;;  %s180_s8 = sadd.s32 1, %s854_s26 }
   0x6   : > { %s177_s9 = ssub.s32 %s858_s27, %s927_s30  ;;  %p190_p0 = scmp.ne.s32.totalorder %s854_s26, %s850_s25 }
   0x7   : > { %p178_p1 = scmp.eq.s32.totalorder %s177_s9, 0  ;;  %p191_p2 = scmp.eq.s32.totalorder %s923_s28, 3 }
   0x8   : > { %p196_p3 = scmp.ne.s32.totalorder %s850_s25, %s846_s24  ;;  %p197_p4 = scmp.eq.s32.totalorder %s683_s29, 3 }
   0x9   : > { %s938_s10 = scalar_select %p178_p1, %s854_s26, %s180_s8  }
   0xa   : > { %p940_p5 = por %p191_p2, %p190_p0  ;;  %p944_p6 = por %p197_p4, %p196_p3 }
   0xb   : > { %p684_p7 = scmp.ge.s32.totalorder %s858_s27, 1  ;;  %p204_p8 = scmp.lt.s32.totalorder %s858_s27, 5 }
   0xc   : > { %p741_p9 = scmp.eq.s32.totalorder %s923_s28, 0  ;;  %s217_s16 = sshll.u32 %s1139_s1, 4  ;;  %s218_s16 = int_to_ptr.vmem [resolvable:$true] %s217_s16 }
   0xd   : > { %p951_p10 = pnand %p684_p7, %p204_p8  ;;  %s777_s17 = scalar_lea.vmem %s218_s16, 16 }
   0xe   : > { %p778_p13 = scmp.ne.s32.totalorder %s218_s16, %s777_s17  ;;  %p785_p3 = scmp.lt.s32.totalorder %s218_s16, %s218_s16 }
   0xf   : > { %p733_p11 = pneg %p951_p10  ;;  %p786_p4 = scmp.lt.s32.totalorder %s777_s17, %s777_s17 }
  0x11   : > { %p734_p12 = pnand %p741_p9, %p733_p11  ;;  %p787_p7 = por %p786_p4, %p785_p3 }
  0x13   : > { %p779_p0 = pneg %p734_p12 }
  0x15   : > { %p780_p1 = pnand %p779_p0, %p778_p13 }
  0x17   : > { %p781_p2 = pneg %p780_p1 }
  0x19   : > { %p788_p8 = pnand %p787_p7, %p781_p2 }
  0x1b   : > { %791 = shalt.err (!%p788_p8)
}
  0x1c   : > { %s860_s18 = smov [#allocation2]   ;;  %253 = sbr.rel (%p951_p10) target bundleno = 478 (0x1de), region = 48 }
  0x1d   : > { %736 = dma.vmem_to_smem (!%p734_p12), %s218_s16, 16, %s860_s18, [#allocation4]  }
  0x23   : > { %837 = dma.done.wait (%p741_p9), [#allocation4], 16  }
  0x24   : > { %839 = vsyncadd (%p741_p9), [#allocation4], 4294967280 }
  0x25   : > { %259 = sfence }
  0x26   : > { %v424_v0 = vld [vmem:[%s1140_s2] sm:$0xff]  ;;  %v425_v1 = vld [vmem:[%s1140_s2 + $0x8] sm:$0xff]  ;;  %v426_v2 = vld [vmem:[%s1140_s2 + $0x10] sm:$0xff]  ;;  %p285_p10 = scmp.lt.s32.totalorder %s923_s28, 3  ;;  %s306_s8 = sld [smem:[#allocation2]]  ;;  %vm452_vm0 = vcmask 1041409  }
  0x27   : > { %v719_v3 = vpack.c.bf16 %v425_v1, %v424_v0  ;;  %v427_v4 = vld [vmem:[%s1140_s2 + $0x18] sm:$0xff]  ;;  %s691_s14 = sld [smem:[#allocation2 + $0x1]]  ;;  %s987_s20 = sld [smem:[#allocation2 + $0x2]]  ;;  %vm455_vm1 = vcmask 1042434   ;;  %vm458_vm2 = vcmask 1043459   ;;  %vm461_vm3 = vcmask 1044484  }
  0x28   : > { %v723_v5 = vpack.c.bf16 %v427_v4, %v426_v2  ;;  %s286_s15 = scalar_select %p285_p10, %s923_s28, 3  ;;  %vm464_vm4 = vcmask 1045509   ;;  %vm467_vm5 = vcmask 1046534   ;;  %vm470_vm6 = vcmask 1047559  }
  0x29   : > { %720 = vmatprep.subr.bf16.mxu0 %v719_v3  ;;  %vm486_vm7 = vcmask 261120   ;;  %vm589_vm8 = vcmask 64512   ;;  %vm601_vm9 = vcmask 57344  }
  0x2a   : > { %722 = vmatpush3.bf16.msra.mxu0 %v719_v3  ;;  %s701_s16 = sshll.u32 %s286_s15, 5 }
  0x2b   : > { %724 = vmatprep.subr.bf16.mxu0 %v723_v5  ;;  %s985_s19 = scalar_lea.vmem %s1138_s0, %s701_s16  ;;  %s283_s16 = sand.u32 1, %s850_s25  }
  0x2c   : > { %v290_v6 = vld [vmem:[%s985_s19] sm:$0x3]  ;;  %v291_v7 = vld [vmem:[%s985_s19 + $0x2] sm:$0x3]  ;;  %v292_v8 = vld [vmem:[%s985_s19 + $0x4] sm:$0x3]  ;;  %v992_v9 = vstv %s306_s8 }
  0x2d   : > { %v293_v10 = vld [vmem:[%s985_s19 + $0x6] sm:$0x3]  ;;  %v294_v11 = vld [vmem:[%s985_s19 + $0x8] sm:$0x3]  ;;  %v295_v12 = vld [vmem:[%s985_s19 + $0xa] sm:$0x3]  ;;  %v308_v13 = vmul.f32 %v992_v9, %v290_v6  ;;  %v309_v14 = vmul.f32 %v992_v9, %v291_v7  ;;  %v310_v15 = vmul.f32 %v992_v9, %v292_v8  ;;  %v1000_v16 = vstv %s691_s14 }
  0x2e   : > { %726 = vmatpush3.bf16.msra.mxu0 %v723_v5  ;;  %v296_v17 = vld [vmem:[%s985_s19 + $0xc] sm:$0x3]  ;;  %v297_v18 = vld [vmem:[%s985_s19 + $0xe] sm:$0x3]  ;;  %v311_v19 = vmul.f32 %v992_v9, %v293_v10  ;;  %v312_v20 = vmul.f32 %v992_v9, %v294_v11  ;;  %v313_v21 = vmul.f32 %v992_v9, %v295_v12  ;;  %v326_v22 = vmul.f32 %v1000_v16, %v290_v6  ;;  %v298_v47 = vld [vmem:[%s985_s19 + $0x10] sm:$0x3] }
  0x2f   : > { %v314_v23 = vmul.f32 %v992_v9, %v296_v17  ;;  %v315_v24 = vmul.f32 %v992_v9, %v297_v18  ;;  %v327_v25 = vmul.f32 %v1000_v16, %v291_v7  ;;  %v328_v26 = vmul.f32 %v1000_v16, %v292_v8  ;;  %v299_v48 = vld [vmem:[%s985_s19 + $0x12] sm:$0x3]  ;;  %v300_v61 = vld [vmem:[%s985_s19 + $0x14] sm:$0x3]  ;;  %v301_v62 = vld [vmem:[%s985_s19 + $0x16] sm:$0x3] }
  0x30   : > { %v329_v27 = vmul.f32 %v1000_v16, %v293_v10  ;;  %v330_v28 = vmul.f32 %v1000_v16, %v294_v11  ;;  %v331_v29 = vmul.f32 %v1000_v16, %v295_v12  ;;  %v332_v30 = vmul.f32 %v1000_v16, %v296_v17  ;;  %v302_v2 = vld [vmem:[%s985_s19 + $0x18] sm:$0x3]  ;;  %v303_v8 = vld [vmem:[%s985_s19 + $0x1a] sm:$0x3]  ;;  %v304_v11 = vld [vmem:[%s985_s19 + $0x1c] sm:$0x3] }
  0x31   : > { %v333_v31 = vmul.f32 %v1000_v16, %v297_v18  ;;  %v358_v32 = vrot.slane %v326_v22, 1  ;;  %v359_v33 = vrot.slane %v327_v25, 1  ;;  %v360_v34 = vrot.slane %v328_v26, 1  ;;  %v305_v12 = vld [vmem:[%s985_s19 + $0x1e] sm:$0x3]  ;;  %s697_s8 = sld [smem:[#allocation2 + $0x3]] }
  0x32   : > { %v361_v35 = vrot.slane %v329_v27, 1  ;;  %v362_v36 = vrot.slane %v330_v28, 1  ;;  %v363_v37 = vrot.slane %v331_v29, 1  ;;  %v364_v38 = vrot.slane %v332_v30, 1  ;;  %s698_s19 = sshll.u32 %s923_s28, 4  ;;  %s861_s28 = smov [#allocation5]  }
  0x33   : > { %v365_v39 = vrot.slane %v333_v31, 1  ;;  %v390_v40 = vadd.f32 %v358_v32, %v308_v13  ;;  %v391_v41 = vadd.f32 %v359_v33, %v309_v14  ;;  %v392_v42 = vadd.f32 %v360_v34, %v310_v15  ;;  %s1096_s29 = scalar_lea.hbm %s1145_s7, %s698_s19  ;;  %s796_s13 = sshll.u32 %s861_s28, 4  ;;  %s797_s13 = int_to_ptr.vmem [resolvable:$false] %s796_s13 }
  0x34   : > { %v393_v43 = vadd.f32 %v361_v35, %v311_v19  ;;  %v394_v44 = vadd.f32 %v362_v36, %v312_v20  ;;  %v395_v45 = vadd.f32 %v363_v37, %v313_v21  ;;  %v396_v46 = vadd.f32 %v364_v38, %v314_v23  ;;  %s798_s14 = scalar_lea.vmem %s797_s13, 32 }
  0x35   : > { %v397_v49 = vadd.f32 %v365_v39, %v315_v24  ;;  %v1020_v50 = vstv %s987_s20  ;;  %v316_v51 = vmul.f32 %v992_v9, %v298_v47  ;;  %v317_v52 = vmul.f32 %v992_v9, %v299_v48  ;;  %s284_s20 = scalar_lea.vmem [#allocation5], %s283_s16 }
  0x36   : > { %v408_v53 = vadd.f32 %v1020_v50, %v390_v40  ;;  %v409_v54 = vadd.f32 %v1020_v50, %v391_v41  ;;  %v410_v55 = vadd.f32 %v1020_v50, %v392_v42  ;;  %v411_v56 = vadd.f32 %v1020_v50, %v393_v43  ;;  %s616_s21 = sshll.u32 %s284_s20, 4  ;;  %s1098_s21 = int_to_ptr.vmem [resolvable:$true] %s616_s21 }
  0x37   : > { %v412_v57 = vadd.f32 %v1020_v50, %v394_v44  ;;  %v413_v58 = vadd.f32 %v1020_v50, %v395_v45  ;;  %v414_v59 = vadd.f32 %v1020_v50, %v396_v46  ;;  %v415_v60 = vadd.f32 %v1020_v50, %v397_v49  ;;  %s792_s9 = scalar_lea.vmem %s1098_s21, 16  ;;  %p799_p13 = scmp.lt.s32.totalorder %s1098_s21, %s797_s13 }
  0x38   : > { %v451_v63 = vrot.slane %v409_v54, 7  ;;  %v454_v0 = vrot.slane %v410_v55, 6  ;;  %v457_v1 = vrot.slane %v411_v56, 5  ;;  %v318_v3 = vmul.f32 %v992_v9, %v300_v61  ;;  %p793_p9 = scmp.ne.s32.totalorder %s1098_s21, %s792_s9  ;;  %p800_p0 = scmp.lt.s32.totalorder %s798_s14, %s792_s9 }
  0x39   : > { %v460_v4 = vrot.slane %v412_v57, 4  ;;  %v463_v5 = vrot.slane %v413_v58, 3  ;;  %v466_v6 = vrot.slane %v414_v59, 2  ;;  %v469_v7 = vrot.slane %v415_v60, 1 }
  0x3a   : > { %v453_v10 = vsel %vm452_vm0, %v451_v63, %v408_v53  ;;  %v319_v13 = vmul.f32 %v992_v9, %v301_v62  ;;  %v320_v14 = vmul.f32 %v992_v9, %v302_v2  ;;  %v321_v15 = vmul.f32 %v992_v9, %v303_v8  ;;  %p794_p11 = pnand %p793_p9, %p940_p5  ;;  %p801_p1 = por %p800_p0, %p799_p13 }
  0x3b   : > { %v456_v17 = vsel %vm455_vm1, %v454_v0, %v453_v10  ;;  %v322_v18 = vmul.f32 %v992_v9, %v304_v11  ;;  %v323_v19 = vmul.f32 %v992_v9, %v305_v12  ;;  %v334_v20 = vmul.f32 %v1000_v16, %v298_v47 }
  0x3c   : > { %v459_v21 = vsel %vm458_vm2, %v457_v1, %v456_v17  ;;  %v335_v22 = vmul.f32 %v1000_v16, %v299_v48  ;;  %v336_v23 = vmul.f32 %v1000_v16, %v300_v61  ;;  %v337_v24 = vmul.f32 %v1000_v16, %v301_v62  ;;  %p795_p12 = pneg %p794_p11 }
  0x3d   : > { %v462_v25 = vsel %vm461_vm3, %v460_v4, %v459_v21  ;;  %v338_v26 = vmul.f32 %v1000_v16, %v302_v2  ;;  %v339_v27 = vmul.f32 %v1000_v16, %v303_v8  ;;  %v340_v28 = vmul.f32 %v1000_v16, %v304_v11  ;;  %v696_v11 = vld [vmem:[%s1142_s4] ss:$0 sm:$0xff]  ;;  %v586_v21 = vld [vmem:[%s1143_s5 + $0x8] sm:$0xff] }
  0x3e   : > { %v465_v9 = vsel %vm464_vm4, %v463_v5, %v462_v25  ;;  %v341_v29 = vmul.f32 %v1000_v16, %v305_v12  ;;  %v366_v30 = vrot.slane %v334_v20, 1  ;;  %v367_v31 = vrot.slane %v335_v22, 1  ;;  %v693_v5 = vld [vmem:[%s1141_s3] ss:$0 sm:$0xff]  ;;  %p802_p2 = pnand %p801_p1, %p795_p12 }
  0x3f   : > { %v468_v32 = vsel %vm467_vm5, %v466_v6, %v465_v9  ;;  %v368_v33 = vrot.slane %v336_v23, 1  ;;  %v369_v34 = vrot.slane %v337_v24, 1  ;;  %v370_v35 = vrot.slane %v338_v26, 1  ;;  %v585_v20 = vld [vmem:[%s1143_s5] sm:$0xff] }
  0x40   : > { %v471_v36 = vsel %vm470_vm6, %v469_v7, %v468_v32  ;;  %v371_v37 = vrot.slane %v339_v27, 1  ;;  %v372_v38 = vrot.slane %v340_v28, 1  ;;  %v373_v39 = vrot.slane %v341_v29, 1 }
  0x41   : > { %716 = vmatprep.mubr.msk.f32.mxu0 %vm486_vm7, %v471_v36  ;;  %v398_v40 = vadd.f32 %v366_v30, %v316_v51  ;;  %v399_v41 = vadd.f32 %v367_v31, %v317_v52  ;;  %v400_v42 = vadd.f32 %v368_v33, %v318_v3  ;;  %v401_v43 = vadd.f32 %v369_v34, %v319_v13  ;;  %v599_v33 = vld [vmem:[%s1144_s6] sm:$0x1] }
  0x42   : > { %v402_v44 = vadd.f32 %v370_v35, %v320_v14  ;;  %v403_v16 = vadd.f32 %v371_v37, %v321_v15  ;;  %v404_v45 = vadd.f32 %v372_v38, %v322_v18  ;;  %v405_v46 = vadd.f32 %v373_v39, %v323_v19 }
  0x43   : > { %v416_v47 = vadd.f32 %v1020_v50, %v398_v40  ;;  %v417_v48 = vadd.f32 %v1020_v50, %v399_v41  ;;  %v418_v49 = vadd.f32 %v1020_v50, %v400_v42  ;;  %v419_v53 = vadd.f32 %v1020_v50, %v401_v43 }
  0x44   : > { %v420_v54 = vadd.f32 %v1020_v50, %v402_v44  ;;  %v421_v55 = vadd.f32 %v1020_v50, %v403_v16  ;;  %v422_v51 = vadd.f32 %v1020_v50, %v404_v45  ;;  %v423_v52 = vadd.f32 %v1020_v50, %v405_v46 }
  0x45   : > { %v472_v56 = vrot.slane %v417_v48, 7  ;;  %v474_v57 = vrot.slane %v418_v49, 6  ;;  %v476_v58 = vrot.slane %v419_v53, 5  ;;  %v582_v17 = vstv %s697_s8  ;;  %s604_s8 = scalar_lea.sflag [#allocation3], %s283_s16 }
  0x46   : > { %v478_v59 = vrot.slane %v420_v54, 4  ;;  %v480_v61 = vrot.slane %v421_v55, 3  ;;  %v482_v63 = vrot.slane %v422_v51, 2  ;;  %v484_v1 = vrot.slane %v423_v52, 1 }
  0x47   : > { %v473_v60 = vsel %vm452_vm0, %v472_v56, %v416_v47 }
  0x48   : > { %v475_v62 = vsel %vm455_vm1, %v474_v57, %v473_v60 }
  0x49   : > { %v477_v0 = vsel %vm458_vm2, %v476_v58, %v475_v62 }
  0x4a   : > { %v479_v2 = vsel %vm461_vm3, %v478_v59, %v477_v0 }
  0x4b   : > { %v481_v3 = vsel %vm464_vm4, %v480_v61, %v479_v2 }
  0x4c   : > { %v483_v4 = vsel %vm467_vm5, %v482_v63, %v481_v3 }
  0x4d   : > { %v485_v50 = vsel %vm470_vm6, %v484_v1, %v483_v4 }
  0x4e   : > { %717 = vmatmul.mubr.msk.f32.vlgmr.msra.gmra.mrb[0].mxu0 %vm486_vm7, %v485_v50 }
 0x121   : > { %v718_v6 = vpop.f32.mrb[0].mxu0 }
 0x122   : > { %v557_v7 = vpop.f32.mrb[1].mxu0  ;;  %v563_v8 = vadd.f32 %v718_v6, %v693_v5 }
 0x123   : > { %v558_v10 = vadd.f32 %v693_v5, %v557_v7 }
 0x124   : > { %v567_v13 = vmax.f32 %v563_v8, 0.0 }
 0x125   : > { %v566_v12 = vmax.f32 %v558_v10, 0.0 }
 0x126   : > { %v576_v15 = vmul.f32 %v696_v11, %v567_v13 }
 0x127   : > { %v575_v14 = vmul.f32 %v696_v11, %v566_v12 }
 0x129   : > { %577 = vadd.xlane.f32.xlu0 %v575_v14 }
 0x12d   : > { %579 = vadd.xlane.f32.xlu0 %v576_v15 }
 0x1b6   : > { %v578_v18 = vpop.xlane.xlu0 %577 }
 0x1b7   : > { %v583_v19 = vadd.f32 %v582_v17, %v578_v18 }
 0x1b9   : > { %v587_v23 = vmul.f32 %v585_v20, %v583_v19 }
 0x1ba   : > { %v580_v22 = vpop.xlane.xlu0 %579 }
 0x1bb   : > { %v584_v24 = vadd.f32 %v582_v17, %v580_v22  ;;  %v590_v26 = vsel %vm589_vm8, %v587_v23, 0.0 }
 0x1bd   : > { %v588_v25 = vmul.f32 %v586_v21, %v584_v24 }
 0x1bf   : > { %v591_v27 = vsel %vm589_vm8, %v588_v25, 0.0 }
 0x1c0   : > { %v592_v28 = vadd.f32 %v591_v27, %v590_v26 }
 0x1c2   : > { %v593_v9 = vrot.slane %v592_v28, 4 }
 0x1c4   : > { %v594_v29 = vadd.f32 %v593_v9, %v592_v28 }
 0x1c6   : > { %v595_v30 = vrot.slane %v594_v29, 2 }
 0x1c8   : > { %v596_v31 = vadd.f32 %v595_v30, %v594_v29 }
 0x1ca   : > { %v597_v32 = vrot.slane %v596_v31, 1 }
 0x1cc   : > { %v598_v34 = vadd.f32 %v597_v32, %v596_v31 }
 0x1ce   : > { %v600_v35 = vadd.f32 %v599_v33, %v598_v34 }
 0x1d0   : > { %602 = vst.msk [vmem:[%s284_s20] sm:$0x1] %vm601_vm9, %v600_v35 }
 0x1d1   : > { %805 = shalt.err (!%p802_p2)
}
 0x1d2   : > { %s806_s15 = scalar_lea.hbm %s1096_s29, 16  ;;  %s810_s18 = scalar_lea.hbm %s1145_s7, 64 }
 0x1d3   : > { %p807_p3 = scmp.ne.s32.totalorder %s1096_s29, %s806_s15  ;;  %p811_p8 = scmp.lt.u32.totalorder %s1096_s29, %s1145_s7 }
 0x1d4   : > { %p812_p10 = scmp.lt.u32.totalorder %s810_s18, %s806_s15  ;;  %p814_p11 = scmp.lt.u32.totalorder %s806_s15, %s1096_s29 }
 0x1d5   : > { %p808_p4 = pnand %p807_p3, %p940_p5 }
 0x1d6   : > { %p813_p9 = por %p812_p10, %p811_p8 }
 0x1d7   : > { %p809_p7 = pneg %p808_p4 }
 0x1d8   : > { %p815_p12 = por %p814_p11, %p813_p9 }
 0x1da   : > { %p816_p13 = pnand %p815_p12, %p809_p7 }
 0x1dc   : > { %819 = shalt.err (!%p816_p13)
}
 0x1dd   : > { %731 = dma.vmem_to_hbm [thread:$0]  (%p940_p5), %s1098_s21, 16, %s1096_s29, %s604_s8  }
 0x1de PF: > { %p743_p0 = scmp.ge.s32.totalorder %s858_s27, 2  ;;  %s628_s22 = sand.u32 1, %s846_s24  }
 0x1df   : > { %s629_s23 = scalar_lea.sflag [#allocation3], %s628_s22 }
 0x1e0   : > { %p738_p1 = pnand %p743_p0, %p944_p6 }
 0x1e2   : > { %841 = dma.done.wait (!%p738_p1), %s629_s23, 16  }
 0x1e3   : > { %843 = vsyncadd (!%p738_p1), %s629_s23, 4294967280  ;;  %p18_p2 = scmp.ge.s32.totalorder %s927_s30, 6   ;;  %s1149_s24 = smov %s850_s25 }
 0x1e4   : > { %s1150_s25 = smov %s854_s26  ;;  %s1151_s26 = smov %s938_s10 }
 0x1e5   : > { %s1152_s27 = smov %s927_s30  ;;  %20 = sbr.rel (!%p18_p2) target bundleno = 4 (0x4), region = 88 }
 0x1ec   :  { %633 = vsyncpa [#allocation3], 1 }
 0x1ed   :  { %635 = vsyncpa [#allocation3 + $0x1], 1 }
 0x1ee   :  { %636 = vsyncpa [#allocation4], 1 }
 0x1ef   :  { %638 = vsyncpa [#allocation4 + $0x1], 1 }

// kernel: crossandoutput_forward.179
= control target key start
LH: loop header
LB: loop body
LE: loop exit
PB: predicated region body
PF: predicated region fallthrough
CT: control target
= control target key end

     0   :  { %s5099_s12 = smov 0   ;;  %s6382_s0 = inlined_call_operand.vmem [shape: f32[2,8,64,4], index: 0, kind: input, shape index: {}]   ;;  %s6383_s1 = inlined_call_operand.vmem [shape: f32[2,8,64,4], index: 1, kind: input, shape index: {}]   ;;  %s6384_s2 = inlined_call_operand.vmem [shape: f32[2,8,64,4], index: 2, kind: input, shape index: {}]   ;;  %s6385_s3 = inlined_call_operand.vmem [shape: f32[2,8,64,4], index: 3, kind: output, shape index: {}]  }
   0x1 LB: > { %s3572_s13 = sadd.s32 4294967295, %s5077_s12   ;;  %p3576_p0 = scmp.ge.s32.totalorder %s5077_s12, 1  ;;  %s5077_s12 = sphi %s5099_s12, %s13_s12  }
   0x2   : > { %p157_p1 = scmp.lt.s32.totalorder %s5077_s12, 3 }
   0x4   : > { %p158_p2 = pnand %p3576_p0, %p157_p1 }
   0x6   : > { %161 = sbr.rel (%p158_p2) target bundleno = 925 (0x39d), region = 32 }
   0xd   : > { %p191_p3 = scmp.lt.s32.totalorder %s3572_s13, 1  ;;  %vm403_vm0 = vcmask 31744   ;;  %vm1692_vm2 = vcmask 523264  }
   0xe   : > { %vm5117_vm1 = vmpackc.low %vm403_vm0, %vm403_vm0 }
   0xf   : > { %s6485_s13 = smov (!%p191_p3, %s3572_s13), 1 }
  0x10   : > { %s5107_s14 = sshll.u32 %s6485_s13, 9 }
  0x11   : > { %s5113_s17 = scalar_lea.vmem %s6383_s1, %s5107_s14  ;;  %s5133_s20 = scalar_lea.vmem %s6382_s0, %s5107_s14 }
  0x12   : > { %v275_v1 = vld [vmem:[%s5113_s17] sm:$0xff]  ;;  %v276_v2 = vld [vmem:[%s5113_s17 + $0x8] sm:$0xff]  ;;  %v277_v6 = vld [vmem:[%s5113_s17 + $0x10] sm:$0xff]  ;;  %s5753_s23 = scalar_lea.vmem %s6384_s2, %s5107_s14  ;;  %s6249_s26 = scalar_lea.vmem %s6385_s3, %s5107_s14 }
  0x13   : > { %v283_v3 = vld [vmem:[%s5113_s17 + $0x40] sm:$0xff]  ;;  %v4487_v4 = vpack.c.bf16 %v276_v2, %v275_v1  ;;  %v284_v5 = vld [vmem:[%s5113_s17 + $0x48] sm:$0xff]  ;;  %v278_v7 = vld [vmem:[%s5113_s17 + $0x18] sm:$0xff] }
  0x14   : > { %v4511_v8 = vpack.c.bf16 %v284_v5, %v283_v3  ;;  %v4493_v9 = vpack.c.bf16 %v278_v7, %v277_v6  ;;  %v285_v10 = vld [vmem:[%s5113_s17 + $0x50] sm:$0xff]  ;;  %v286_v11 = vld [vmem:[%s5113_s17 + $0x58] sm:$0xff]  ;;  %v211_v13 = vld [vmem:[%s5133_s20] sm:$0xff] }
  0x15   : > { %4489 = vmatprep.subr.msk.bf16.mxu0 %vm5117_vm1, %v4487_v4  ;;  %v4517_v12 = vpack.c.bf16 %v286_v11, %v285_v10  ;;  %v279_v14 = vld [vmem:[%s5113_s17 + $0x20] sm:$0xff]  ;;  %v280_v15 = vld [vmem:[%s5113_s17 + $0x28] sm:$0xff]  ;;  %4055 = vmatprep.mubr.msk.f32.mxu0 %vm403_vm0, %v211_v13  ;;  %v281_v21 = vld [vmem:[%s5113_s17 + $0x30] sm:$0xff] }
  0x16   : > { %4513 = vmatprep.subr.msk.bf16.mxu1 %vm5117_vm1, %v4511_v8  ;;  %4492 = vmatpush3.bf16.xpose.msk.msra.mxu0 %vm5117_vm1, %v4487_v4  ;;  %v219_v16 = vld [vmem:[%s5133_s20 + $0x40] sm:$0xff]  ;;  %v288_v18 = vld [vmem:[%s5113_s17 + $0x68] sm:$0xff]  ;;  %v4499_v19 = vpack.c.bf16 %v280_v15, %v279_v14  ;;  %v282_v22 = vld [vmem:[%s5113_s17 + $0x38] sm:$0xff] }
  0x17   : > { %4516 = vmatpush3.bf16.xpose.msk.msra.mxu1 %vm5117_vm1, %v4511_v8  ;;  %4495 = vmatprep.subr.msk.bf16.mxu0 %vm5117_vm1, %v4493_v9  ;;  %v287_v17 = vld [vmem:[%s5113_s17 + $0x60] sm:$0xff]  ;;  %v289_v23 = vld [vmem:[%s5113_s17 + $0x70] sm:$0xff]  ;;  %v290_v24 = vld [vmem:[%s5113_s17 + $0x78] sm:$0xff]  ;;  %v4505_v25 = vpack.c.bf16 %v282_v22, %v281_v21 }
  0x18   : > { %4519 = vmatprep.subr.msk.bf16.mxu1 %vm5117_vm1, %v4517_v12  ;;  %4083 = vmatprep.mubr.msk.f32.mxu1 %vm403_vm0, %v219_v16  ;;  %v4523_v20 = vpack.c.bf16 %v288_v18, %v287_v17  ;;  %v4529_v26 = vpack.c.bf16 %v290_v24, %v289_v23  ;;  %v291_v27 = vld [vmem:[%s5113_s17 + $0x80] sm:$0xff]  ;;  %v292_v28 = vld [vmem:[%s5113_s17 + $0x88] sm:$0xff]  ;;  %v293_v33 = vld [vmem:[%s5113_s17 + $0x90] sm:$0xff] }
  0x19   : > { %v299_v29 = vld [vmem:[%s5113_s17 + $0xc0] sm:$0xff]  ;;  %v300_v30 = vld [vmem:[%s5113_s17 + $0xc8] sm:$0xff]  ;;  %v4535_v31 = vpack.c.bf16 %v292_v28, %v291_v27  ;;  %v294_v34 = vld [vmem:[%s5113_s17 + $0x98] sm:$0xff] }
  0x1a   : > { %v4559_v32 = vpack.c.bf16 %v300_v30, %v299_v29  ;;  %v212_v35 = vld [vmem:[%s5133_s20 + $0x8] sm:$0xff]  ;;  %v301_v36 = vld [vmem:[%s5113_s17 + $0xd0] sm:$0xff]  ;;  %v302_v37 = vld [vmem:[%s5113_s17 + $0xd8] sm:$0xff]  ;;  %v4541_v40 = vpack.c.bf16 %v294_v34, %v293_v33 }
  0x1b   : > { %v220_v38 = vld [vmem:[%s5133_s20 + $0x48] sm:$0xff]  ;;  %v213_v39 = vld [vmem:[%s5133_s20 + $0x10] sm:$0xff]  ;;  %v4565_v42 = vpack.c.bf16 %v302_v37, %v301_v36  ;;  %v214_v43 = vld [vmem:[%s5133_s20 + $0x18] sm:$0xff] }
  0x1c   : > { %v221_v41 = vld [vmem:[%s5133_s20 + $0x50] sm:$0xff]  ;;  %v222_v44 = vld [vmem:[%s5133_s20 + $0x58] sm:$0xff]  ;;  %v215_v45 = vld [vmem:[%s5133_s20 + $0x20] sm:$0xff] }
  0x1d   : > { %v223_v46 = vld [vmem:[%s5133_s20 + $0x60] sm:$0xff]  ;;  %v296_v48 = vld [vmem:[%s5113_s17 + $0xa8] sm:$0xff]  ;;  %v217_v55 = vld [vmem:[%s5133_s20 + $0x30] sm:$0xff] }
  0x1e   : > { %4498 = vmatpush3.bf16.xpose.msk.msra.mxu0 %vm5117_vm1, %v4493_v9  ;;  %v295_v47 = vld [vmem:[%s5113_s17 + $0xa0] sm:$0xff]  ;;  %v304_v50 = vld [vmem:[%s5113_s17 + $0xe8] sm:$0xff]  ;;  %v225_v56 = vld [vmem:[%s5133_s20 + $0x70] sm:$0xff] }
  0x1f   : > { %4522 = vmatpush3.bf16.xpose.msk.msra.mxu1 %vm5117_vm1, %v4517_v12  ;;  %4501 = vmatprep.subr.msk.bf16.mxu0 %vm5117_vm1, %v4499_v19  ;;  %v303_v49 = vld [vmem:[%s5113_s17 + $0xe0] sm:$0xff]  ;;  %v216_v51 = vld [vmem:[%s5133_s20 + $0x28] sm:$0xff]  ;;  %v4547_v53 = vpack.c.bf16 %v296_v48, %v295_v47  ;;  %v218_v57 = vld [vmem:[%s5133_s20 + $0x38] sm:$0xff] }
  0x20   : > { %4525 = vmatprep.subr.msk.bf16.mxu1 %vm5117_vm1, %v4523_v20  ;;  %v224_v52 = vld [vmem:[%s5133_s20 + $0x68] sm:$0xff]  ;;  %v4571_v54 = vpack.c.bf16 %v304_v50, %v303_v49  ;;  %v226_v58 = vld [vmem:[%s5133_s20 + $0x78] sm:$0xff]  ;;  %v227_v59 = vld [vmem:[%s5133_s20 + $0x80] sm:$0xff] }
  0x21   : > { %v297_v60 = vld [vmem:[%s5113_s17 + $0xb0] sm:$0xff]  ;;  %v298_v61 = vld [vmem:[%s5113_s17 + $0xb8] sm:$0xff]  ;;  %v235_v62 = vld [vmem:[%s5133_s20 + $0xc0] sm:$0xff] }
  0x22   : > { %v305_v63 = vld [vmem:[%s5113_s17 + $0xf0] sm:$0xff]  ;;  %v306_v1 = vld [vmem:[%s5113_s17 + $0xf8] sm:$0xff]  ;;  %v4553_v2 = vpack.c.bf16 %v298_v61, %v297_v60  ;;  %v307_v4 = vld [vmem:[%s5113_s17 + $0x100] sm:$0xff] }
  0x23   : > { %v4577_v3 = vpack.c.bf16 %v306_v1, %v305_v63  ;;  %v308_v5 = vld [vmem:[%s5113_s17 + $0x108] sm:$0xff]  ;;  %v315_v6 = vld [vmem:[%s5113_s17 + $0x140] sm:$0xff]  ;;  %v309_v10 = vld [vmem:[%s5113_s17 + $0x110] sm:$0xff] }
  0x24   : > { %v316_v7 = vld [vmem:[%s5113_s17 + $0x148] sm:$0xff]  ;;  %v4583_v8 = vpack.c.bf16 %v308_v5, %v307_v4  ;;  %v310_v11 = vld [vmem:[%s5113_s17 + $0x118] sm:$0xff]  ;;  %v317_v13 = vld [vmem:[%s5113_s17 + $0x150] sm:$0xff] }
  0x25   : > { %v4607_v9 = vpack.c.bf16 %v316_v7, %v315_v6  ;;  %v228_v12 = vld [vmem:[%s5133_s20 + $0x88] sm:$0xff]  ;;  %v318_v14 = vld [vmem:[%s5113_s17 + $0x158] sm:$0xff]  ;;  %v229_v16 = vld [vmem:[%s5133_s20 + $0x90] sm:$0xff]  ;;  %v4589_v17 = vpack.c.bf16 %v310_v11, %v309_v10 }
  0x26   : > { %4504 = vmatpush3.bf16.xpose.msk.msra.mxu0 %vm5117_vm1, %v4499_v19  ;;  %v236_v15 = vld [vmem:[%s5133_s20 + $0xc8] sm:$0xff]  ;;  %v237_v18 = vld [vmem:[%s5133_s20 + $0xd0] sm:$0xff]  ;;  %v4613_v19 = vpack.c.bf16 %v318_v14, %v317_v13  ;;  %v238_v21 = vld [vmem:[%s5133_s20 + $0xd8] sm:$0xff] }
  0x27   : > { %4528 = vmatpush3.bf16.xpose.msk.msra.mxu1 %vm5117_vm1, %v4523_v20  ;;  %4507 = vmatprep.subr.msk.bf16.mxu0 %vm5117_vm1, %v4505_v25  ;;  %v230_v20 = vld [vmem:[%s5133_s20 + $0x98] sm:$0xff]  ;;  %v231_v22 = vld [vmem:[%s5133_s20 + $0xa0] sm:$0xff]  ;;  %v320_v27 = vld [vmem:[%s5113_s17 + $0x168] sm:$0xff] }
  0x28   : > { %4531 = vmatprep.subr.msk.bf16.mxu1 %vm5117_vm1, %v4529_v26  ;;  %v239_v23 = vld [vmem:[%s5133_s20 + $0xe0] sm:$0xff]  ;;  %v232_v28 = vld [vmem:[%s5133_s20 + $0xa8] sm:$0xff]  ;;  %v241_v33 = vld [vmem:[%s5133_s20 + $0xf0] sm:$0xff] }
  0x29   : > { %v311_v24 = vld [vmem:[%s5113_s17 + $0x120] sm:$0xff]  ;;  %v240_v29 = vld [vmem:[%s5133_s20 + $0xe8] sm:$0xff]  ;;  %v234_v34 = vld [vmem:[%s5133_s20 + $0xb8] sm:$0xff] }
  0x2a   : > { %v243_v36 = vld [vmem:[%s5133_s20 + $0x100] sm:$0xff]  ;;  %v313_v37 = vld [vmem:[%s5113_s17 + $0x130] sm:$0xff]  ;;  %v332_v47 = vld [vmem:[%s5113_s17 + $0x1c8] sm:$0xff] }
  0x2b   : > { %v325_v50 = vld [vmem:[%s5113_s17 + $0x190] sm:$0xff]  ;;  %v246_v60 = vld [vmem:[%s5133_s20 + $0x118] sm:$0xff]  ;;  %v255_v63 = vld [vmem:[%s5133_s20 + $0x160] sm:$0xff] }
  0x2c   : > { %v254_v61 = vld [vmem:[%s5133_s20 + $0x158] sm:$0xff]  ;;  %v327_v1 = vld [vmem:[%s5113_s17 + $0x1a0] sm:$0xff]  ;;  %v336_v4 = vld [vmem:[%s5113_s17 + $0x1e8] sm:$0xff] }
  0x2d   : > { %v248_v5 = vld [vmem:[%s5133_s20 + $0x128] sm:$0xff]  ;;  %v257_v10 = vld [vmem:[%s5133_s20 + $0x170] sm:$0xff]  ;;  %v250_v11 = vld [vmem:[%s5133_s20 + $0x138] sm:$0xff] }
  0x2e   : > { %4510 = vmatpush3.bf16.xpose.msk.msra.mxu0 %vm5117_vm1, %v4505_v25  ;;  %v312_v25 = vld [vmem:[%s5113_s17 + $0x128] sm:$0xff]  ;;  %v259_v13 = vld [vmem:[%s5133_s20 + $0x180] sm:$0xff]  ;;  %v329_v14 = vld [vmem:[%s5113_s17 + $0x1b0] sm:$0xff] }
  0x2f   : > { %4534 = vmatpush3.bf16.xpose.msk.msra.mxu1 %vm5117_vm1, %v4529_v26  ;;  %4537 = vmatprep.subr.msk.bf16.mxu0 %vm5117_vm1, %v4535_v31  ;;  %v319_v26 = vld [vmem:[%s5113_s17 + $0x160] sm:$0xff]  ;;  %v4595_v30 = vpack.c.bf16 %v312_v25, %v311_v24  ;;  %v256_v6 = vld [vmem:[%s5133_s20 + $0x168] sm:$0xff]  ;;  %v269_v24 = vld [vmem:[%s5133_s20 + $0x1d0] sm:$0xff] }
  0x30   : > { %4561 = vmatprep.subr.msk.bf16.mxu1 %vm5117_vm1, %v4559_v32  ;;  %v262_v25 = vld [vmem:[%s5133_s20 + $0x198] sm:$0xff] }
  0x31   : > { %v270_v0 = vld [vmem:[%s5133_s20 + $0x1d8] sm:$0xff] }
  0x35   : > { %4056 = vmatmul.mubr.msk.f32.vlgmr.msra.gmra.mrb[0].mxu0 %vm403_vm0, %v212_v35  ;;  %v242_v35 = vld [vmem:[%s5133_s20 + $0xf8] sm:$0xff] }
  0x36   : > { %4084 = vmatmul.mubr.msk.f32.vlgmr.msra.gmra.mrb[0].mxu1 %vm403_vm0, %v220_v38  ;;  %4540 = vmatpush3.bf16.xpose.msk.msra.mxu0 %vm5117_vm1, %v4535_v31  ;;  %v4619_v31 = vpack.c.bf16 %v320_v27, %v319_v26  ;;  %v314_v38 = vld [vmem:[%s5113_s17 + $0x138] sm:$0xff]  ;;  %v263_v26 = vld [vmem:[%s5133_s20 + $0x1a0] sm:$0xff] }
  0x37   : > { %4564 = vmatpush3.bf16.xpose.msk.msra.mxu1 %vm5117_vm1, %v4559_v32  ;;  %4058 = vmatprep.mubr.msk.f32.mxu0 %vm403_vm0, %v213_v39  ;;  %v233_v32 = vld [vmem:[%s5133_s20 + $0xb0] sm:$0xff]  ;;  %v251_v39 = vld [vmem:[%s5133_s20 + $0x140] sm:$0xff] }
  0x38   : > { %4086 = vmatprep.mubr.msk.f32.mxu1 %vm403_vm0, %v221_v41  ;;  %4543 = vmatprep.subr.msk.bf16.mxu0 %vm5117_vm1, %v4541_v40  ;;  %v322_v41 = vld [vmem:[%s5113_s17 + $0x178] sm:$0xff]  ;;  %v271_v27 = vld [vmem:[%s5133_s20 + $0x1e0] sm:$0xff] }
  0x39   : > { %4059 = vmatmul.mubr.msk.f32.gmra.mrb[2].mxu0 %vm403_vm0, %v214_v43  ;;  %4567 = vmatprep.subr.msk.bf16.mxu1 %vm5117_vm1, %v4565_v42 }
  0x3a   : > { %4087 = vmatmul.mubr.msk.f32.gmra.mrb[2].mxu1 %vm403_vm0, %v222_v44  ;;  %4061 = vmatprep.mubr.msk.f32.mxu0 %vm403_vm0, %v215_v45  ;;  %v323_v44 = vld [vmem:[%s5113_s17 + $0x180] sm:$0xff]  ;;  %v324_v45 = vld [vmem:[%s5113_s17 + $0x188] sm:$0xff] }
  0x3b   : > { %4089 = vmatprep.mubr.msk.f32.mxu1 %vm403_vm0, %v223_v46  ;;  %v331_v46 = vld [vmem:[%s5113_s17 + $0x1c0] sm:$0xff]  ;;  %v4631_v48 = vpack.c.bf16 %v324_v45, %v323_v44 }
  0x3c   : > { %v4655_v49 = vpack.c.bf16 %v332_v47, %v331_v46 }
  0x3d   : > { %4062 = vmatmul.mubr.msk.f32.gmra.mrb[4].mxu0 %vm403_vm0, %v216_v51  ;;  %v326_v51 = vld [vmem:[%s5113_s17 + $0x198] sm:$0xff] }
  0x3e   : > { %4546 = vmatpush3.bf16.xpose.msk.msra.mxu0 %vm5117_vm1, %v4541_v40  ;;  %4090 = vmatmul.mubr.msk.f32.gmra.mrb[4].mxu1 %vm403_vm0, %v224_v52  ;;  %v321_v40 = vld [vmem:[%s5113_s17 + $0x170] sm:$0xff]  ;;  %v244_v52 = vld [vmem:[%s5133_s20 + $0x108] sm:$0xff] }
  0x3f   : > { %4570 = vmatpush3.bf16.xpose.msk.msra.mxu1 %vm5117_vm1, %v4565_v42  ;;  %4549 = vmatprep.subr.msk.bf16.mxu0 %vm5117_vm1, %v4547_v53  ;;  %v4601_v42 = vpack.c.bf16 %v314_v38, %v313_v37  ;;  %v4625_v43 = vpack.c.bf16 %v322_v41, %v321_v40 }
  0x40   : > { %4573 = vmatprep.subr.msk.bf16.mxu1 %vm5117_vm1, %v4571_v54  ;;  %4064 = vmatprep.mubr.msk.f32.mxu0 %vm403_vm0, %v217_v55  ;;  %v252_v55 = vld [vmem:[%s5133_s20 + $0x148] sm:$0xff] }
  0x41   : > { %4092 = vmatprep.mubr.msk.f32.mxu1 %vm403_vm0, %v225_v56  ;;  %4065 = vmatmul.mubr.msk.f32.gmra.mrb[6].mxu0 %vm403_vm0, %v218_v57  ;;  %v245_v56 = vld [vmem:[%s5133_s20 + $0x110] sm:$0xff]  ;;  %v4637_v57 = vpack.c.bf16 %v326_v51, %v325_v50 }
  0x42   : > { %4093 = vmatmul.mubr.msk.f32.gmra.mrb[6].mxu1 %vm403_vm0, %v226_v58  ;;  %4111 = vmatprep.mubr.msk.f32.mxu0 %vm403_vm0, %v227_v59  ;;  %v253_v58 = vld [vmem:[%s5133_s20 + $0x150] sm:$0xff] }
  0x43   : > { %4139 = vmatprep.mubr.msk.f32.mxu1 %vm403_vm0, %v235_v62  ;;  %v247_v62 = vld [vmem:[%s5133_s20 + $0x120] sm:$0xff] }
  0x46   : > { %4552 = vmatpush3.bf16.xpose.msk.msra.mxu0 %vm5117_vm1, %v4547_v53  ;;  %v333_v53 = vld [vmem:[%s5113_s17 + $0x1d0] sm:$0xff] }
  0x47   : > { %4576 = vmatpush3.bf16.xpose.msk.msra.mxu1 %vm5117_vm1, %v4571_v54  ;;  %4555 = vmatprep.subr.msk.bf16.mxu0 %vm5117_vm1, %v4553_v2  ;;  %v334_v54 = vld [vmem:[%s5113_s17 + $0x1d8] sm:$0xff] }
  0x48   : > { %4579 = vmatprep.subr.msk.bf16.mxu1 %vm5117_vm1, %v4577_v3  ;;  %v4661_v59 = vpack.c.bf16 %v334_v54, %v333_v53 }
  0x4e   : > { %4558 = vmatpush3.bf16.xpose.msk.msra.mxu0 %vm5117_vm1, %v4553_v2  ;;  %v328_v2 = vld [vmem:[%s5113_s17 + $0x1a8] sm:$0xff] }
  0x4f   : > { %4582 = vmatpush3.bf16.xpose.msk.msra.mxu1 %vm5117_vm1, %v4577_v3  ;;  %4585 = vmatprep.subr.msk.bf16.mxu0 %vm5117_vm1, %v4583_v8  ;;  %v335_v3 = vld [vmem:[%s5113_s17 + $0x1e0] sm:$0xff]  ;;  %v4643_v7 = vpack.c.bf16 %v328_v2, %v327_v1 }
  0x50   : > { %4609 = vmatprep.subr.msk.bf16.mxu1 %vm5117_vm1, %v4607_v9 }
  0x55   : > { %4112 = vmatmul.mubr.msk.f32.vlgmr.msra.gmra.mrb[8].mxu0 %vm403_vm0, %v228_v12  ;;  %v258_v12 = vld [vmem:[%s5133_s20 + $0x178] sm:$0xff] }
  0x56   : > { %4140 = vmatmul.mubr.msk.f32.vlgmr.msra.gmra.mrb[8].mxu1 %vm403_vm0, %v236_v15  ;;  %4588 = vmatpush3.bf16.xpose.msk.msra.mxu0 %vm5117_vm1, %v4583_v8  ;;  %v4667_v8 = vpack.c.bf16 %v336_v4, %v335_v3  ;;  %v330_v15 = vld [vmem:[%s5113_s17 + $0x1b8] sm:$0xff] }
  0x57   : > { %4612 = vmatpush3.bf16.xpose.msk.msra.mxu1 %vm5117_vm1, %v4607_v9  ;;  %4114 = vmatprep.mubr.msk.f32.mxu0 %vm403_vm0, %v229_v16  ;;  %v249_v9 = vld [vmem:[%s5133_s20 + $0x130] sm:$0xff]  ;;  %v267_v16 = vld [vmem:[%s5133_s20 + $0x1c0] sm:$0xff] }
  0x58   : > { %4142 = vmatprep.mubr.msk.f32.mxu1 %vm403_vm0, %v237_v18  ;;  %4591 = vmatprep.subr.msk.bf16.mxu0 %vm5117_vm1, %v4589_v17  ;;  %v338_v18 = vld [vmem:[%s5113_s17 + $0x1f8] sm:$0xff] }
  0x59   : > { %4115 = vmatmul.mubr.msk.f32.gmra.mrb[10].mxu0 %vm403_vm0, %v230_v20  ;;  %4615 = vmatprep.subr.msk.bf16.mxu1 %vm5117_vm1, %v4613_v19 }
  0x5a   : > { %4143 = vmatmul.mubr.msk.f32.gmra.mrb[10].mxu1 %vm403_vm0, %v238_v21  ;;  %4117 = vmatprep.mubr.msk.f32.mxu0 %vm403_vm0, %v231_v22  ;;  %v260_v21 = vld [vmem:[%s5133_s20 + $0x188] sm:$0xff] }
  0x5b   : > { %4145 = vmatprep.mubr.msk.f32.mxu1 %vm403_vm0, %v239_v23  ;;  %v268_v22 = vld [vmem:[%s5133_s20 + $0x1c8] sm:$0xff]  ;;  %v261_v23 = vld [vmem:[%s5133_s20 + $0x190] sm:$0xff] }
  0x5d   : > { %4118 = vmatmul.mubr.msk.f32.gmra.mrb[12].mxu0 %vm403_vm0, %v232_v28  ;;  %v264_v28 = vld [vmem:[%s5133_s20 + $0x1a8] sm:$0xff] }
  0x5e   : > { %4594 = vmatpush3.bf16.xpose.msk.msra.mxu0 %vm5117_vm1, %v4589_v17  ;;  %4146 = vmatmul.mubr.msk.f32.gmra.mrb[12].mxu1 %vm403_vm0, %v240_v29  ;;  %v337_v17 = vld [vmem:[%s5113_s17 + $0x1f0] sm:$0xff]  ;;  %v272_v29 = vld [vmem:[%s5133_s20 + $0x1e8] sm:$0xff] }
  0x5f   : > { %4618 = vmatpush3.bf16.xpose.msk.msra.mxu1 %vm5117_vm1, %v4613_v19  ;;  %4597 = vmatprep.subr.msk.bf16.mxu0 %vm5117_vm1, %v4595_v30  ;;  %v4649_v19 = vpack.c.bf16 %v330_v15, %v329_v14  ;;  %v4673_v20 = vpack.c.bf16 %v338_v18, %v337_v17 }
  0x60   : > { %4621 = vmatprep.subr.msk.bf16.mxu1 %vm5117_vm1, %v4619_v31  ;;  %4120 = vmatprep.mubr.msk.f32.mxu0 %vm403_vm0, %v233_v32  ;;  %v266_v32 = vld [vmem:[%s5133_s20 + $0x1b8] sm:$0xff] }
  0x61   : > { %4148 = vmatprep.mubr.msk.f32.mxu1 %vm403_vm0, %v241_v33  ;;  %4121 = vmatmul.mubr.msk.f32.gmra.mrb[14].mxu0 %vm403_vm0, %v234_v34  ;;  %v274_v33 = vld [vmem:[%s5133_s20 + $0x1f8] sm:$0xff] }
  0x62   : > { %4149 = vmatmul.mubr.msk.f32.gmra.mrb[14].mxu1 %vm403_vm0, %v242_v35  ;;  %4167 = vmatprep.mubr.msk.f32.mxu0 %vm403_vm0, %v243_v36 }
  0x63   : > { %4195 = vmatprep.mubr.msk.f32.mxu1 %vm403_vm0, %v251_v39 }
  0x66   : > { %4600 = vmatpush3.bf16.xpose.msk.msra.mxu0 %vm5117_vm1, %v4595_v30  ;;  %v265_v30 = vld [vmem:[%s5133_s20 + $0x1b0] sm:$0xff] }
  0x67   : > { %4624 = vmatpush3.bf16.xpose.msk.msra.mxu1 %vm5117_vm1, %v4619_v31  ;;  %4603 = vmatprep.subr.msk.bf16.mxu0 %vm5117_vm1, %v4601_v42  ;;  %v273_v31 = vld [vmem:[%s5133_s20 + $0x1f0] sm:$0xff] }
  0x68   : > { %4627 = vmatprep.subr.msk.bf16.mxu1 %vm5117_vm1, %v4625_v43 }
  0x6e   : > { %4606 = vmatpush3.bf16.xpose.msk.msra.mxu0 %vm5117_vm1, %v4601_v42 }
  0x6f   : > { %4630 = vmatpush3.bf16.xpose.msk.msra.mxu1 %vm5117_vm1, %v4625_v43  ;;  %4633 = vmatprep.subr.msk.bf16.mxu0 %vm5117_vm1, %v4631_v48 }
  0x70   : > { %4657 = vmatprep.subr.msk.bf16.mxu1 %vm5117_vm1, %v4655_v49 }
  0x75   : > { %4168 = vmatmul.mubr.msk.f32.vlgmr.msra.gmra.mrb[16].mxu0 %vm403_vm0, %v244_v52 }
  0x76   : > { %4196 = vmatmul.mubr.msk.f32.vlgmr.msra.gmra.mrb[16].mxu1 %vm403_vm0, %v252_v55  ;;  %4636 = vmatpush3.bf16.xpose.msk.msra.mxu0 %vm5117_vm1, %v4631_v48 }
  0x77   : > { %4660 = vmatpush3.bf16.xpose.msk.msra.mxu1 %vm5117_vm1, %v4655_v49  ;;  %4170 = vmatprep.mubr.msk.f32.mxu0 %vm403_vm0, %v245_v56 }
  0x78   : > { %4198 = vmatprep.mubr.msk.f32.mxu1 %vm403_vm0, %v253_v58  ;;  %4639 = vmatprep.subr.msk.bf16.mxu0 %vm5117_vm1, %v4637_v57 }
  0x79   : > { %4171 = vmatmul.mubr.msk.f32.gmra.mrb[18].mxu0 %vm403_vm0, %v246_v60  ;;  %4663 = vmatprep.subr.msk.bf16.mxu1 %vm5117_vm1, %v4661_v59 }
  0x7a   : > { %4199 = vmatmul.mubr.msk.f32.gmra.mrb[18].mxu1 %vm403_vm0, %v254_v61  ;;  %4173 = vmatprep.mubr.msk.f32.mxu0 %vm403_vm0, %v247_v62 }
  0x7b   : > { %4201 = vmatprep.mubr.msk.f32.mxu1 %vm403_vm0, %v255_v63 }
  0x7d   : > { %4174 = vmatmul.mubr.msk.f32.gmra.mrb[20].mxu0 %vm403_vm0, %v248_v5 }
  0x7e   : > { %4642 = vmatpush3.bf16.xpose.msk.msra.mxu0 %vm5117_vm1, %v4637_v57  ;;  %4202 = vmatmul.mubr.msk.f32.gmra.mrb[20].mxu1 %vm403_vm0, %v256_v6 }
  0x7f   : > { %4666 = vmatpush3.bf16.xpose.msk.msra.mxu1 %vm5117_vm1, %v4661_v59  ;;  %4645 = vmatprep.subr.msk.bf16.mxu0 %vm5117_vm1, %v4643_v7 }
  0x80   : > { %4669 = vmatprep.subr.msk.bf16.mxu1 %vm5117_vm1, %v4667_v8  ;;  %4176 = vmatprep.mubr.msk.f32.mxu0 %vm403_vm0, %v249_v9 }
  0x81   : > { %4204 = vmatprep.mubr.msk.f32.mxu1 %vm403_vm0, %v257_v10  ;;  %4177 = vmatmul.mubr.msk.f32.gmra.mrb[22].mxu0 %vm403_vm0, %v250_v11 }
  0x82   : > { %4205 = vmatmul.mubr.msk.f32.gmra.mrb[22].mxu1 %vm403_vm0, %v258_v12  ;;  %4223 = vmatprep.mubr.msk.f32.mxu0 %vm403_vm0, %v259_v13 }
  0x83   : > { %4251 = vmatprep.mubr.msk.f32.mxu1 %vm403_vm0, %v267_v16 }
  0x86   : > { %4648 = vmatpush3.bf16.xpose.msk.msra.mxu0 %vm5117_vm1, %v4643_v7 }
  0x87   : > { %4672 = vmatpush3.bf16.xpose.msk.msra.mxu1 %vm5117_vm1, %v4667_v8  ;;  %4651 = vmatprep.subr.msk.bf16.mxu0 %vm5117_vm1, %v4649_v19 }
  0x88   : > { %4675 = vmatprep.subr.msk.bf16.mxu1 %vm5117_vm1, %v4673_v20 }
  0x8e   : > { %4654 = vmatpush3.bf16.xpose.msk.msra.mxu0 %vm5117_vm1, %v4649_v19 }
  0x8f   : > { %4678 = vmatpush3.bf16.xpose.msk.msra.mxu1 %vm5117_vm1, %v4673_v20 }
  0x95   : > { %4224 = vmatmul.mubr.msk.f32.vlgmr.msra.gmra.mrb[24].mxu0 %vm403_vm0, %v260_v21 }
  0x96   : > { %4252 = vmatmul.mubr.msk.f32.vlgmr.msra.gmra.mrb[24].mxu1 %vm403_vm0, %v268_v22  ;;  %4226 = vmatprep.mubr.msk.f32.mxu0 %vm403_vm0, %v261_v23 }
  0x97   : > { %4254 = vmatprep.mubr.msk.f32.mxu1 %vm403_vm0, %v269_v24 }
  0x99   : > { %4227 = vmatmul.mubr.msk.f32.gmra.mrb[26].mxu0 %vm403_vm0, %v262_v25 }
  0x9a   : > { %4255 = vmatmul.mubr.msk.f32.gmra.mrb[26].mxu1 %vm403_vm0, %v270_v0  ;;  %4229 = vmatprep.mubr.msk.f32.mxu0 %vm403_vm0, %v263_v26 }
  0x9b   : > { %4257 = vmatprep.mubr.msk.f32.mxu1 %vm403_vm0, %v271_v27 }
  0x9d   : > { %4230 = vmatmul.mubr.msk.f32.gmra.mrb[28].mxu0 %vm403_vm0, %v264_v28 }
  0x9e   : > { %4258 = vmatmul.mubr.msk.f32.gmra.mrb[28].mxu1 %vm403_vm0, %v272_v29  ;;  %4232 = vmatprep.mubr.msk.f32.mxu0 %vm403_vm0, %v265_v30 }
  0x9f   : > { %4260 = vmatprep.mubr.msk.f32.mxu1 %vm403_vm0, %v273_v31 }
  0xa1   : > { %4233 = vmatmul.mubr.msk.f32.gmra.mrb[30].mxu0 %vm403_vm0, %v266_v32 }
  0xa2   : > { %4261 = vmatmul.mubr.msk.f32.gmra.mrb[30].mxu1 %vm403_vm0, %v274_v33 }
 0x108   : > { %v4057_v34 = vpop.f32.mrb[0].mxu0 }
 0x109   : > { %v5447_v35 = vmul.f32 0.5, %v4057_v34  ;;  %v518_v36 = vpop.f32.mrb[1].mxu0  ;;  %v4085_v37 = vpop.f32.mrb[0].mxu1 }
 0x10a   : > { %v5449_v38 = vmul.f32 0.5, %v518_v36  ;;  %v671_v39 = vpop.f32.mrb[1].mxu1  ;;  %v5451_v40 = vmul.f32 0.5, %v4085_v37 }
 0x10b   : > { %v1696_v41 = vsel %vm1692_vm2, %v5447_v35, -inf  ;;  %v5455_v42 = vmul.f32 0.5, %v671_v39 }
 0x10c   : > { %1697 = vmax.xlane.f32.xlu1 %v1696_v41  ;;  %v1693_v43 = vsel %vm1692_vm2, %v5449_v38, -inf  ;;  %v4060_v44 = vpop.f32.mrb[2].mxu0  ;;  %v1720_v50 = vsel %vm1692_vm2, %v5451_v40, -inf }
 0x10d   : > { %1694 = vmax.xlane.f32.xlu0 %v1693_v43  ;;  %v4088_v45 = vpop.f32.mrb[2].mxu1  ;;  %v528_v46 = vpop.f32.mrb[3].mxu0  ;;  %v5461_v48 = vmul.f32 0.5, %v4060_v44  ;;  %v1717_v51 = vsel %vm1692_vm2, %v5455_v42, -inf }
 0x10e   : > { %v5459_v47 = vmul.f32 0.5, %v4088_v45  ;;  %v681_v49 = vpop.f32.mrb[3].mxu1  ;;  %v5473_v59 = vmul.f32 0.5, %v528_v46 }
 0x10f   : > { %v1702_v56 = vsel %vm1692_vm2, %v5461_v48, -inf  ;;  %v5471_v58 = vmul.f32 0.5, %v681_v49 }
 0x110   : > { %1721 = vmax.xlane.f32.xlu1 %v1720_v50  ;;  %v4063_v52 = vpop.f32.mrb[4].mxu0  ;;  %v1726_v53 = vsel %vm1692_vm2, %v5459_v47, -inf  ;;  %v1699_v4 = vsel %vm1692_vm2, %v5473_v59, -inf }
 0x111   : > { %1718 = vmax.xlane.f32.xlu0 %v1717_v51  ;;  %v4091_v54 = vpop.f32.mrb[4].mxu1  ;;  %v538_v55 = vpop.f32.mrb[5].mxu0  ;;  %v5477_v1 = vmul.f32 0.5, %v4063_v52  ;;  %v1723_v3 = vsel %vm1692_vm2, %v5471_v58, -inf }
 0x112   : > { %v691_v57 = vpop.f32.mrb[5].mxu1  ;;  %v5475_v61 = vmul.f32 0.5, %v4091_v54  ;;  %v5489_v8 = vmul.f32 0.5, %v538_v55 }
 0x113   : > { %v1708_v6 = vsel %vm1692_vm2, %v5477_v1, -inf  ;;  %v5487_v7 = vmul.f32 0.5, %v691_v57 }
 0x114   : > { %1727 = vmax.xlane.f32.xlu1 %v1726_v53  ;;  %v4066_v60 = vpop.f32.mrb[6].mxu0  ;;  %v1732_v5 = vsel %vm1692_vm2, %v5475_v61, -inf  ;;  %v1705_v12 = vsel %vm1692_vm2, %v5489_v8, -inf }
 0x115   : > { %1703 = vmax.xlane.f32.xlu0 %v1702_v56  ;;  %v4094_v62 = vpop.f32.mrb[6].mxu1  ;;  %v548_v63 = vpop.f32.mrb[7].mxu0  ;;  %v5493_v10 = vmul.f32 0.5, %v4066_v60  ;;  %v1729_v11 = vsel %vm1692_vm2, %v5487_v7, -inf }
 0x116   : > { %v701_v2 = vpop.f32.mrb[7].mxu1  ;;  %v5491_v9 = vmul.f32 0.5, %v4094_v62  ;;  %v5505_v16 = vmul.f32 0.5, %v548_v63 }
 0x117   : > { %v1714_v14 = vsel %vm1692_vm2, %v5493_v10, -inf  ;;  %v5503_v15 = vmul.f32 0.5, %v701_v2 }
 0x118   : > { %1724 = vmax.xlane.f32.xlu1 %v1723_v3  ;;  %v1738_v13 = vsel %vm1692_vm2, %v5491_v9, -inf  ;;  %v1711_v19 = vsel %vm1692_vm2, %v5505_v16, -inf }
 0x119   : > { %1700 = vmax.xlane.f32.xlu0 %v1699_v4  ;;  %v1735_v17 = vsel %vm1692_vm2, %v5503_v15, -inf }
 0x11c   : > { %1733 = vmax.xlane.f32.xlu1 %v1732_v5 }
 0x11d   : > { %1709 = vmax.xlane.f32.xlu0 %v1708_v6 }
 0x120   : > { %1730 = vmax.xlane.f32.xlu1 %v1729_v11 }
 0x121   : > { %1706 = vmax.xlane.f32.xlu0 %v1705_v12 }
 0x124   : > { %1739 = vmax.xlane.f32.xlu1 %v1738_v13 }
 0x125   : > { %1715 = vmax.xlane.f32.xlu0 %v1714_v14 }
 0x128   : > { %1736 = vmax.xlane.f32.xlu1 %v1735_v17  ;;  %v4113_v18 = vpop.f32.mrb[8].mxu0 }
 0x129   : > { %v4141_v20 = vpop.f32.mrb[8].mxu1  ;;  %v5511_v21 = vmul.f32 0.5, %v4113_v18  ;;  %1712 = vmax.xlane.f32.xlu0 %v1711_v19  ;;  %v824_v22 = vpop.f32.mrb[9].mxu0 }
 0x12a   : > { %v5513_v23 = vmul.f32 0.5, %v4141_v20  ;;  %v977_v24 = vpop.f32.mrb[9].mxu1  ;;  %v5519_v26 = vmul.f32 0.5, %v824_v22 }
 0x12b   : > { %v1744_v25 = vsel %vm1692_vm2, %v5511_v21, -inf  ;;  %v5517_v0 = vmul.f32 0.5, %v977_v24 }
 0x12c   : > { %v1768_v27 = vsel %vm1692_vm2, %v5513_v23, -inf  ;;  %v4116_v28 = vpop.f32.mrb[10].mxu0  ;;  %v1741_v36 = vsel %vm1692_vm2, %v5519_v26, -inf }
 0x12d   : > { %1769 = vmax.xlane.f32.xlu1 %v1768_v27  ;;  %1745 = vmax.xlane.f32.xlu0 %v1744_v25  ;;  %v4144_v29 = vpop.f32.mrb[10].mxu1  ;;  %v834_v30 = vpop.f32.mrb[11].mxu0  ;;  %v5525_v32 = vmul.f32 0.5, %v4116_v28  ;;  %v1765_v34 = vsel %vm1692_vm2, %v5517_v0, -inf }
 0x12e   : > { %v5523_v31 = vmul.f32 0.5, %v4144_v29  ;;  %v987_v33 = vpop.f32.mrb[11].mxu1  ;;  %v5537_v49 = vmul.f32 0.5, %v834_v30 }
 0x12f   : > { %v1750_v44 = vsel %vm1692_vm2, %v5525_v32, -inf  ;;  %v5535_v46 = vmul.f32 0.5, %v987_v33 }
 0x130   : > { %v4119_v37 = vpop.f32.mrb[12].mxu0  ;;  %v1774_v43 = vsel %vm1692_vm2, %v5523_v31, -inf  ;;  %v1747_v57 = vsel %vm1692_vm2, %v5537_v49, -inf }
 0x131   : > { %1766 = vmax.xlane.f32.xlu1 %v1765_v34  ;;  %1742 = vmax.xlane.f32.xlu0 %v1741_v36  ;;  %v4147_v39 = vpop.f32.mrb[12].mxu1  ;;  %v844_v41 = vpop.f32.mrb[13].mxu0  ;;  %v5541_v54 = vmul.f32 0.5, %v4119_v37  ;;  %v1771_v56 = vsel %vm1692_vm2, %v5535_v46, -inf }
 0x132   : > { %v997_v45 = vpop.f32.mrb[13].mxu1  ;;  %v5539_v53 = vmul.f32 0.5, %v4147_v39  ;;  %v5553_v2 = vmul.f32 0.5, %v844_v41 }
 0x133   : > { %v1756_v62 = vsel %vm1692_vm2, %v5541_v54, -inf  ;;  %v5551_v63 = vmul.f32 0.5, %v997_v45 }
 0x134   : > { %v4122_v50 = vpop.f32.mrb[14].mxu0  ;;  %v1780_v60 = vsel %vm1692_vm2, %v5539_v53, -inf  ;;  %v1753_v6 = vsel %vm1692_vm2, %v5553_v2, -inf }
 0x135   : > { %1775 = vmax.xlane.f32.xlu1 %v1774_v43  ;;  %1751 = vmax.xlane.f32.xlu0 %v1750_v44  ;;  %v4150_v51 = vpop.f32.mrb[14].mxu1  ;;  %v854_v52 = vpop.f32.mrb[15].mxu0  ;;  %v5557_v4 = vmul.f32 0.5, %v4122_v50  ;;  %v1777_v5 = vsel %vm1692_vm2, %v5551_v63, -inf }
 0x136   : > { %v1007_v55 = vpop.f32.mrb[15].mxu1  ;;  %v5555_v3 = vmul.f32 0.5, %v4150_v51  ;;  %v5569_v14 = vmul.f32 0.5, %v854_v52 }
 0x137   : > { %v1762_v12 = vsel %vm1692_vm2, %v5557_v4, -inf  ;;  %v5567_v13 = vmul.f32 0.5, %v1007_v55 }
 0x138   : > { %v1786_v11 = vsel %vm1692_vm2, %v5555_v3, -inf  ;;  %v1759_v19 = vsel %vm1692_vm2, %v5569_v14, -inf }
 0x139   : > { %1772 = vmax.xlane.f32.xlu1 %v1771_v56  ;;  %1748 = vmax.xlane.f32.xlu0 %v1747_v57  ;;  %v1783_v17 = vsel %vm1692_vm2, %v5567_v13, -inf }
 0x13d   : > { %1781 = vmax.xlane.f32.xlu1 %v1780_v60  ;;  %1757 = vmax.xlane.f32.xlu0 %v1756_v62 }
 0x141   : > { %1778 = vmax.xlane.f32.xlu1 %v1777_v5  ;;  %1754 = vmax.xlane.f32.xlu0 %v1753_v6 }
 0x145   : > { %1787 = vmax.xlane.f32.xlu1 %v1786_v11  ;;  %1763 = vmax.xlane.f32.xlu0 %v1762_v12 }
 0x148   : > { %v4169_v18 = vpop.f32.mrb[16].mxu0 }
 0x149   : > { %v4197_v20 = vpop.f32.mrb[16].mxu1  ;;  %1784 = vmax.xlane.f32.xlu1 %v1783_v17  ;;  %v5575_v22 = vmul.f32 0.5, %v4169_v18  ;;  %1760 = vmax.xlane.f32.xlu0 %v1759_v19  ;;  %v1130_v24 = vpop.f32.mrb[17].mxu0 }
 0x14a   : > { %v5577_v25 = vmul.f32 0.5, %v4197_v20  ;;  %v1283_v27 = vpop.f32.mrb[17].mxu1  ;;  %v5583_v30 = vmul.f32 0.5, %v1130_v24 }
 0x14b   : > { %v1792_v28 = vsel %vm1692_vm2, %v5575_v22, -inf  ;;  %v5581_v29 = vmul.f32 0.5, %v1283_v27 }
 0x14c   : > { %v1816_v33 = vsel %vm1692_vm2, %v5577_v25, -inf  ;;  %v4172_v34 = vpop.f32.mrb[18].mxu0  ;;  %v1789_v45 = vsel %vm1692_vm2, %v5583_v30, -inf }
 0x14d   : > { %1817 = vmax.xlane.f32.xlu1 %v1816_v33  ;;  %1793 = vmax.xlane.f32.xlu0 %v1792_v28  ;;  %v4200_v36 = vpop.f32.mrb[18].mxu1  ;;  %v1140_v37 = vpop.f32.mrb[19].mxu0  ;;  %v5589_v41 = vmul.f32 0.5, %v4172_v34  ;;  %v1813_v44 = vsel %vm1692_vm2, %v5581_v29, -inf }
 0x14e   : > { %v5587_v39 = vmul.f32 0.5, %v4200_v36  ;;  %v1293_v43 = vpop.f32.mrb[19].mxu1  ;;  %v5601_v62 = vmul.f32 0.5, %v1140_v37 }
 0x14f   : > { %v1798_v56 = vsel %vm1692_vm2, %v5589_v41, -inf  ;;  %v5599_v60 = vmul.f32 0.5, %v1293_v43 }
 0x150   : > { %v4175_v50 = vpop.f32.mrb[20].mxu0  ;;  %v1822_v55 = vsel %vm1692_vm2, %v5587_v39, -inf  ;;  %v1795_v20 = vsel %vm1692_vm2, %v5601_v62, -inf }
 0x151   : > { %1814 = vmax.xlane.f32.xlu1 %v1813_v44  ;;  %1790 = vmax.xlane.f32.xlu0 %v1789_v45  ;;  %v4203_v51 = vpop.f32.mrb[20].mxu1  ;;  %v1150_v52 = vpop.f32.mrb[21].mxu0  ;;  %v5605_v17 = vmul.f32 0.5, %v4175_v50  ;;  %v1819_v19 = vsel %vm1692_vm2, %v5599_v60, -inf }
 0x152   : > { %v1303_v57 = vpop.f32.mrb[21].mxu1  ;;  %v5603_v12 = vmul.f32 0.5, %v4203_v51  ;;  %v5617_v33 = vmul.f32 0.5, %v1150_v52 }
 0x153   : > { %v1804_v27 = vsel %vm1692_vm2, %v5605_v17, -inf  ;;  %v5615_v28 = vmul.f32 0.5, %v1303_v57 }
 0x154   : > { %v4178_v5 = vpop.f32.mrb[22].mxu0  ;;  %v1828_v24 = vsel %vm1692_vm2, %v5603_v12, -inf  ;;  %v1801_v43 = vsel %vm1692_vm2, %v5617_v33, -inf }
 0x155   : > { %1823 = vmax.xlane.f32.xlu1 %v1822_v55  ;;  %1799 = vmax.xlane.f32.xlu0 %v1798_v56  ;;  %v4206_v6 = vpop.f32.mrb[22].mxu1  ;;  %v1160_v11 = vpop.f32.mrb[23].mxu0  ;;  %v5621_v36 = vmul.f32 0.5, %v4178_v5  ;;  %v1825_v37 = vsel %vm1692_vm2, %v5615_v28, -inf }
 0x156   : > { %v1313_v18 = vpop.f32.mrb[23].mxu1  ;;  %v5619_v34 = vmul.f32 0.5, %v4206_v6  ;;  %v5633_v51 = vmul.f32 0.5, %v1160_v11 }
 0x157   : > { %v1810_v45 = vsel %vm1692_vm2, %v5621_v36, -inf  ;;  %v5631_v50 = vmul.f32 0.5, %v1313_v18 }
 0x158   : > { %v1834_v44 = vsel %vm1692_vm2, %v5619_v34, -inf  ;;  %6421 = vst [vmem:[#allocation3_spill] sm:$0xff] %v5633_v51  ;;  %v1807_v56 = vsel %vm1692_vm2, %v5633_v51, -inf }
 0x159   : > { %1820 = vmax.xlane.f32.xlu1 %v1819_v19  ;;  %1796 = vmax.xlane.f32.xlu0 %v1795_v20  ;;  %6420 = vst [vmem:[#allocation2_spill] sm:$0xff] %v5631_v50  ;;  %v1831_v52 = vsel %vm1692_vm2, %v5631_v50, -inf }
 0x15d   : > { %1829 = vmax.xlane.f32.xlu1 %v1828_v24  ;;  %1805 = vmax.xlane.f32.xlu0 %v1804_v27 }
 0x161   : > { %1826 = vmax.xlane.f32.xlu1 %v1825_v37  ;;  %1802 = vmax.xlane.f32.xlu0 %v1801_v43 }
 0x165   : > { %1835 = vmax.xlane.f32.xlu1 %v1834_v44  ;;  %1811 = vmax.xlane.f32.xlu0 %v1810_v45 }
 0x168   : > { %v4225_v55 = vpop.f32.mrb[24].mxu0 }
 0x169   : > { %v4253_v57 = vpop.f32.mrb[24].mxu1  ;;  %1832 = vmax.xlane.f32.xlu1 %v1831_v52  ;;  %v5639_v5 = vmul.f32 0.5, %v4225_v55  ;;  %1808 = vmax.xlane.f32.xlu0 %v1807_v56  ;;  %v1436_v6 = vpop.f32.mrb[25].mxu0 }
 0x16a   : > { %v5641_v19 = vmul.f32 0.5, %v4253_v57  ;;  %v1589_v18 = vpop.f32.mrb[25].mxu1  ;;  %v5647_v24 = vmul.f32 0.5, %v1436_v6 }
 0x16b   : > { %6422 = vst [vmem:[#allocation4_spill] sm:$0xff] %v5639_v5  ;;  %v1840_v11 = vsel %vm1692_vm2, %v5639_v5, -inf  ;;  %v5645_v20 = vmul.f32 0.5, %v1589_v18 }
 0x16c   : > { %6423 = vst [vmem:[#allocation5_spill] sm:$0xff] %v5641_v19  ;;  %6425 = vst [vmem:[#allocation7_spill] sm:$0xff] %v5647_v24  ;;  %v1864_v27 = vsel %vm1692_vm2, %v5641_v19, -inf  ;;  %v4228_v37 = vpop.f32.mrb[26].mxu0  ;;  %v1837_v57 = vsel %vm1692_vm2, %v5647_v24, -inf }
 0x16d   : > { %6424 = vst [vmem:[#allocation6_spill] sm:$0xff] %v5645_v20  ;;  %1865 = vmax.xlane.f32.xlu1 %v1864_v27  ;;  %1841 = vmax.xlane.f32.xlu0 %v1840_v11  ;;  %v4256_v43 = vpop.f32.mrb[26].mxu1  ;;  %v1446_v44 = vpop.f32.mrb[27].mxu0  ;;  %v5653_v52 = vmul.f32 0.5, %v4228_v37  ;;  %v1861_v56 = vsel %vm1692_vm2, %v5645_v20, -inf }
 0x16e   : > { %v5651_v45 = vmul.f32 0.5, %v4256_v43  ;;  %v1599_v55 = vpop.f32.mrb[27].mxu1  ;;  %v5665_v19 = vmul.f32 0.5, %v1446_v44 }
 0x16f   : > { %6427 = vst [vmem:[#allocation9_spill] sm:$0xff] %v5653_v52  ;;  %v1846_v27 = vsel %vm1692_vm2, %v5653_v52, -inf  ;;  %v5663_v43 = vmul.f32 0.5, %v1599_v55 }
 0x170   : > { %6426 = vst [vmem:[#allocation8_spill] sm:$0xff] %v5651_v45  ;;  %v4231_v6 = vpop.f32.mrb[28].mxu0  ;;  %v1870_v11 = vsel %vm1692_vm2, %v5651_v45, -inf  ;;  %v1843_v52 = vsel %vm1692_vm2, %v5665_v19, -inf }
 0x171   : > { %1862 = vmax.xlane.f32.xlu1 %v1861_v56  ;;  %1838 = vmax.xlane.f32.xlu0 %v1837_v57  ;;  %v4259_v18 = vpop.f32.mrb[28].mxu1  ;;  %v1456_v5 = vpop.f32.mrb[29].mxu0  ;;  %v5669_v57 = vmul.f32 0.5, %v4231_v6  ;;  %v1867_v45 = vsel %vm1692_vm2, %v5663_v43, -inf }
 0x172   : > { %v1609_v37 = vpop.f32.mrb[29].mxu1  ;;  %v5667_v56 = vmul.f32 0.5, %v4259_v18  ;;  %v5681_v18 = vmul.f32 0.5, %v1456_v5 }
 0x173   : > { %v1852_v55 = vsel %vm1692_vm2, %v5669_v57, -inf }
 0x174   : > { %v4234_v20 = vpop.f32.mrb[30].mxu0  ;;  %v1876_v44 = vsel %vm1692_vm2, %v5667_v56, -inf  ;;  %6429 = vst [vmem:[#allocation11_spill] sm:$0xff] %v5681_v18 }
 0x175   : > { %1871 = vmax.xlane.f32.xlu1 %v1870_v11  ;;  %1847 = vmax.xlane.f32.xlu0 %v1846_v27  ;;  %v4262_v24 = vpop.f32.mrb[30].mxu1  ;;  %v1466_v51 = vpop.f32.mrb[31].mxu0  ;;  %v5679_v11 = vmul.f32 0.5, %v1609_v37  ;;  %v5685_v27 = vmul.f32 0.5, %v4234_v20 }
 0x176   : > { %v1619_v50 = vpop.f32.mrb[31].mxu1  ;;  %v5683_v6 = vmul.f32 0.5, %v4262_v24  ;;  %v5697_v24 = vmul.f32 0.5, %v1466_v51 }
 0x177   : > { %6428 = vst [vmem:[#allocation10_spill] sm:$0xff] %v5679_v11  ;;  %6431 = vst [vmem:[#allocation13_spill] sm:$0xff] %v5685_v27  ;;  %v1858_v5 = vsel %vm1692_vm2, %v5685_v27, -inf }
 0x178   : > { %6430 = vst [vmem:[#allocation12_spill] sm:$0xff] %v5683_v6  ;;  %v1882_v37 = vsel %vm1692_vm2, %v5683_v6, -inf  ;;  %6433 = vst [vmem:[#allocation15_spill] sm:$0xff] %v5697_v24 }
 0x179   : > { %1868 = vmax.xlane.f32.xlu1 %v1867_v45  ;;  %1844 = vmax.xlane.f32.xlu0 %v1843_v52  ;;  %v1873_v45 = vsel %vm1692_vm2, %v5679_v11, -inf  ;;  %v1849_v52 = vsel %vm1692_vm2, %v5681_v18, -inf }
 0x17d   : > { %1877 = vmax.xlane.f32.xlu1 %v1876_v44  ;;  %1853 = vmax.xlane.f32.xlu0 %v1852_v55  ;;  %v5695_v44 = vmul.f32 0.5, %v1619_v50  ;;  %v1855_v55 = vsel %vm1692_vm2, %v5697_v24, -inf }
 0x17f   : > { %6432 = vst [vmem:[#allocation14_spill] sm:$0xff] %v5695_v44  ;;  %v1879_v20 = vsel %vm1692_vm2, %v5695_v44, -inf }
 0x181   : > { %1874 = vmax.xlane.f32.xlu1 %v1873_v45  ;;  %1850 = vmax.xlane.f32.xlu0 %v1849_v52 }
 0x185   : > { %1883 = vmax.xlane.f32.xlu1 %v1882_v37  ;;  %1859 = vmax.xlane.f32.xlu0 %v1858_v5 }
 0x189   : > { %1880 = vmax.xlane.f32.xlu1 %v1879_v20  ;;  %1856 = vmax.xlane.f32.xlu0 %v1855_v55 }
 0x199   : > { %v1698_v45 = vpop.xlane.xlu1 %1697 }
 0x19a   : > { %v1886_v52 = vsub.f32 %v5447_v35, %v1698_v45  ;;  %v1695_v6 = vpop.xlane.xlu0 %1694 }
 0x19b   : > { %v1885_v27 = vsub.f32 %v5449_v38, %v1695_v6 }
 0x19c   : > { %v1951_v50 = vmul.f32 1.442695, %v1886_v52 }
 0x19d   : > { %v1949_v18 = vmul.f32 1.442695, %v1885_v27  ;;  %v1722_v51 = vpop.xlane.xlu1 %1721 }
 0x19e   : > { %4815 = vpow2.f32 %v1951_v50  ;;  %v1894_v37 = vsub.f32 %v5451_v40, %v1722_v51  ;;  %v1719_v5 = vpop.xlane.xlu0 %1718 }
 0x19f   : > { %v1893_v44 = vsub.f32 %v5455_v42, %v1719_v5  ;;  %4817 = vpow2.f32 %v1949_v18 }
 0x1a0   : > { %v1967_v11 = vmul.f32 1.442695, %v1894_v37 }
 0x1a1   : > { %v1965_v24 = vmul.f32 1.442695, %v1893_v44  ;;  %v1728_v20 = vpop.xlane.xlu1 %1727 }
 0x1a2   : > { %4819 = vpow2.f32 %v1967_v11  ;;  %v1896_v55 = vsub.f32 %v5459_v47, %v1728_v20  ;;  %v1704_v35 = vpop.xlane.xlu0 %1703 }
 0x1a3   : > { %v1888_v45 = vsub.f32 %v5461_v48, %v1704_v35  ;;  %4821 = vpow2.f32 %v1965_v24 }
 0x1a4   : > { %v1971_v38 = vmul.f32 1.442695, %v1896_v55 }
 0x1a5   : > { %v1955_v6 = vmul.f32 1.442695, %v1888_v45  ;;  %v1725_v27 = vpop.xlane.xlu1 %1724 }
 0x1a6   : > { %v1895_v52 = vsub.f32 %v5471_v58, %v1725_v27  ;;  %v1701_v40 = vpop.xlane.xlu0 %1700 }
 0x1a7   : > { %4823 = vpow2.f32 %v1955_v6  ;;  %v1887_v42 = vsub.f32 %v5473_v59, %v1701_v40 }
 0x1a8   : > { %v5711_v18 = vpop.eup %4815  ;;  %4825 = vpow2.f32 %v1971_v38  ;;  %v1969_v44 = vmul.f32 1.442695, %v1895_v52 }
 0x1a9   : > { %v1953_v11 = vmul.f32 1.442695, %v1887_v42  ;;  %v1734_v50 = vpop.xlane.xlu1 %1733  ;;  %v2080_v47 = vsel %vm1692_vm2, %v5711_v18, 0.0  ;;  %v5715_v48 = vpop.eup %4817 }
 0x1aa   : > { %v1898_v24 = vsub.f32 %v5475_v61, %v1734_v50  ;;  %v1710_v51 = vpop.xlane.xlu0 %1709  ;;  %2081 = vadd.xlane.f32.xlu0 %v2080_v47  ;;  %v2077_v35 = vsel %vm1692_vm2, %v5715_v48, 0.0 }
 0x1ab   : > { %4827 = vpow2.f32 %v1953_v11  ;;  %v1890_v58 = vsub.f32 %v5477_v1, %v1710_v51 }
 0x1ac   : > { %v5719_v37 = vpop.eup %4819  ;;  %4829 = vpow2.f32 %v1969_v44  ;;  %v1975_v59 = vmul.f32 1.442695, %v1898_v24 }
 0x1ad   : > { %v1959_v5 = vmul.f32 1.442695, %v1890_v58  ;;  %v1731_v20 = vpop.xlane.xlu1 %1730  ;;  %v2104_v55 = vsel %vm1692_vm2, %v5719_v37, 0.0  ;;  %v5725_v45 = vpop.eup %4821 }
 0x1ae   : > { %v1897_v61 = vsub.f32 %v5487_v7, %v1731_v20  ;;  %2105 = vadd.xlane.f32.xlu1 %v2104_v55  ;;  %v1707_v38 = vpop.xlane.xlu0 %1706  ;;  %2078 = vadd.xlane.f32.xlu0 %v2077_v35  ;;  %v2101_v42 = vsel %vm1692_vm2, %v5725_v45, 0.0 }
 0x1af   : > { %4831 = vpow2.f32 %v1959_v5  ;;  %v1889_v1 = vsub.f32 %v5489_v8, %v1707_v38 }
 0x1b0   : > { %4833 = vpow2.f32 %v1975_v59  ;;  %v1973_v6 = vmul.f32 1.442695, %v1897_v61  ;;  %v339_v61 = vld [vmem:[%s5753_s23] sm:$0xff] }
 0x1b1   : > { %v5729_v27 = vpop.eup %4823  ;;  %v1957_v52 = vmul.f32 1.442695, %v1889_v1  ;;  %v1740_v40 = vpop.xlane.xlu1 %1739 }
 0x1b2   : > { %v5733_v44 = vpop.eup %4825  ;;  %v1900_v11 = vsub.f32 %v5491_v9, %v1740_v40  ;;  %2102 = vadd.xlane.f32.xlu1 %v2101_v42  ;;  %v1716_v7 = vpop.xlane.xlu0 %1715  ;;  %v2086_v50 = vsel %vm1692_vm2, %v5729_v27, 0.0 }
 0x1b3   : > { %4835 = vpow2.f32 %v1957_v52  ;;  %v1892_v8 = vsub.f32 %v5493_v10, %v1716_v7  ;;  %2087 = vadd.xlane.f32.xlu0 %v2086_v50  ;;  %v2110_v59 = vsel %vm1692_vm2, %v5733_v44, 0.0 }
 0x1b4   : > { %4837 = vpow2.f32 %v1973_v6  ;;  %v1979_v47 = vmul.f32 1.442695, %v1900_v11 }
 0x1b5   : > { %v5739_v24 = vpop.eup %4827  ;;  %v1963_v51 = vmul.f32 1.442695, %v1892_v8  ;;  %v1737_v58 = vpop.xlane.xlu1 %1736  ;;  %v341_v8 = vld [vmem:[%s5753_s23 + $0x10] sm:$0xff] }
 0x1b6   : > { %v5743_v9 = vpop.eup %4829  ;;  %v1899_v5 = vsub.f32 %v5503_v15, %v1737_v58  ;;  %2111 = vadd.xlane.f32.xlu1 %v2110_v59  ;;  %v1713_v20 = vpop.xlane.xlu0 %1712  ;;  %v2083_v10 = vsel %vm1692_vm2, %v5739_v24, 0.0  ;;  %v340_v15 = vld [vmem:[%s5753_s23 + $0x8] sm:$0xff] }
 0x1b7   : > { %4839 = vpow2.f32 %v1963_v51  ;;  %v1891_v55 = vsub.f32 %v5505_v16, %v1713_v20  ;;  %2084 = vadd.xlane.f32.xlu0 %v2083_v10  ;;  %v2107_v16 = vsel %vm1692_vm2, %v5743_v9, 0.0  ;;  %v4679_v6 = vpack.c.bf16 %v340_v15, %v339_v61  ;;  %v347_v51 = vld [vmem:[%s5753_s23 + $0x40] sm:$0xff] }
 0x1b8   : > { %4841 = vpow2.f32 %v1979_v47  ;;  %v1977_v35 = vmul.f32 1.442695, %v1899_v5  ;;  %v342_v47 = vld [vmem:[%s5753_s23 + $0x18] sm:$0xff] }
 0x1b9   : > { %v5757_v38 = vpop.eup %4831  ;;  %v1961_v1 = vmul.f32 1.442695, %v1891_v55  ;;  %4680 = vmatprep.subr.bf16.mxu0 %v4679_v6  ;;  %v4683_v10 = vpack.c.bf16 %v342_v47, %v341_v8  ;;  %v348_v55 = vld [vmem:[%s5753_s23 + $0x48] sm:$0xff]  ;;  %v350_v47 = vld [vmem:[%s5753_s23 + $0x58] sm:$0xff] }
 0x1ba   : > { %v5761_v52 = vpop.eup %4833  ;;  %v1770_v40 = vpop.xlane.xlu1 %1769  ;;  %2108 = vadd.xlane.f32.xlu1 %v2107_v16  ;;  %v2092_v11 = vsel %vm1692_vm2, %v5757_v38, 0.0  ;;  %4682 = vmatpush3.bf16.msra.mxu0 %v4679_v6  ;;  %v4695_v15 = vpack.c.bf16 %v348_v55, %v347_v51  ;;  %v343_v6 = vld [vmem:[%s5753_s23 + $0x20] sm:$0xff] }
 0x1bb   : > { %v1746_v42 = vpop.xlane.xlu0 %1745  ;;  %4843 = vpow2.f32 %v1961_v1  ;;  %v1910_v7 = vsub.f32 %v5513_v23, %v1770_v40  ;;  %2093 = vadd.xlane.f32.xlu0 %v2092_v11  ;;  %v2116_v20 = vsel %vm1692_vm2, %v5761_v52, 0.0  ;;  %4684 = vmatprep.subr.bf16.mxu0 %v4683_v10  ;;  %v344_v40 = vld [vmem:[%s5753_s23 + $0x28] sm:$0xff] }
 0x1bc   : > { %v1902_v50 = vsub.f32 %v5511_v21, %v1746_v42  ;;  %4845 = vpow2.f32 %v1977_v35  ;;  %4696 = vmatprep.subr.bf16.mxu1 %v4695_v15  ;;  %v349_v42 = vld [vmem:[%s5753_s23 + $0x50] sm:$0xff] }
 0x1bd   : > { %v5770_v58 = vpop.eup %4835  ;;  %v1999_v59 = vmul.f32 1.442695, %v1910_v7  ;;  %4698 = vmatpush3.bf16.msra.mxu1 %v4695_v15 }
 0x1be   : > { %v1983_v5 = vmul.f32 1.442695, %v1902_v50  ;;  %v5775_v23 = vpop.eup %4837  ;;  %v1767_v21 = vpop.xlane.xlu1 %1766  ;;  %2117 = vadd.xlane.f32.xlu1 %v2116_v20  ;;  %v2089_v61 = vsel %vm1692_vm2, %v5770_v58, 0.0  ;;  %4686 = vmatpush3.bf16.msra.mxu0 %v4683_v10  ;;  %v4699_v20 = vpack.c.bf16 %v350_v47, %v349_v42 }
 0x1bf   : > { %v1743_v35 = vpop.xlane.xlu0 %1742  ;;  %4847 = vpow2.f32 %v1999_v59  ;;  %v1909_v1 = vsub.f32 %v5517_v0, %v1767_v21  ;;  %2090 = vadd.xlane.f32.xlu0 %v2089_v61  ;;  %v2113_v8 = vsel %vm1692_vm2, %v5775_v23, 0.0  ;;  %v4687_v0 = vpack.c.bf16 %v344_v40, %v343_v6  ;;  %v345_v21 = vld [vmem:[%s5753_s23 + $0x30] sm:$0xff]  ;;  %v351_v61 = vld [vmem:[%s5753_s23 + $0x60] sm:$0xff]  ;;  %v352_v40 = vld [vmem:[%s5753_s23 + $0x68] sm:$0xff] }
 0x1c0   : > { %v1901_v16 = vsub.f32 %v5519_v26, %v1743_v35  ;;  %4849 = vpow2.f32 %v1983_v5  ;;  %4700 = vmatprep.subr.bf16.mxu1 %v4699_v20  ;;  %v346_v35 = vld [vmem:[%s5753_s23 + $0x38] sm:$0xff] }
 0x1c1   : > { %v5784_v11 = vpop.eup %4839  ;;  %v1997_v7 = vmul.f32 1.442695, %v1909_v1  ;;  %4688 = vmatprep.subr.bf16.mxu0 %v4687_v0  ;;  %4702 = vmatpush3.bf16.msra.mxu1 %v4699_v20 }
 0x1c2   : > { %v1981_v50 = vmul.f32 1.442695, %v1901_v16  ;;  %v5789_v26 = vpop.eup %4841  ;;  %v1776_v51 = vpop.xlane.xlu1 %1775  ;;  %2114 = vadd.xlane.f32.xlu1 %v2113_v8  ;;  %v2098_v5 = vsel %vm1692_vm2, %v5784_v11, 0.0  ;;  %4690 = vmatpush3.bf16.msra.mxu0 %v4687_v0  ;;  %v4703_v8 = vpack.c.bf16 %v352_v40, %v351_v61 }
 0x1c3   : > { %v1752_v59 = vpop.xlane.xlu0 %1751  ;;  %4851 = vpow2.f32 %v1997_v7  ;;  %v1912_v10 = vsub.f32 %v5523_v31, %v1776_v51  ;;  %2099 = vadd.xlane.f32.xlu0 %v2098_v5  ;;  %v2122_v6 = vsel %vm1692_vm2, %v5789_v26, 0.0  ;;  %v4691_v31 = vpack.c.bf16 %v346_v35, %v345_v21  ;;  %v353_v51 = vld [vmem:[%s5753_s23 + $0x70] sm:$0xff] }
 0x1c4   : > { %v1904_v55 = vsub.f32 %v5525_v32, %v1752_v59  ;;  %4853 = vpow2.f32 %v1981_v50  ;;  %4704 = vmatprep.subr.bf16.mxu1 %v4703_v8  ;;  %v354_v59 = vld [vmem:[%s5753_s23 + $0x78] sm:$0xff] }
 0x1c5   : > { %v5798_v15 = vpop.eup %4843  ;;  %v2003_v1 = vmul.f32 1.442695, %v1912_v10  ;;  %4692 = vmatprep.subr.bf16.mxu0 %v4691_v31  ;;  %4706 = vmatpush3.bf16.msra.mxu1 %v4703_v8  ;;  %v4707_v21 = vpack.c.bf16 %v354_v59, %v353_v51 }
 0x1c6   : > { %v1987_v16 = vmul.f32 1.442695, %v1904_v55  ;;  %v5803_v32 = vpop.eup %4845  ;;  %v1773_v42 = vpop.xlane.xlu1 %1772  ;;  %2123 = vadd.xlane.f32.xlu1 %v2122_v6  ;;  %v2095_v50 = vsel %vm1692_vm2, %v5798_v15, 0.0  ;;  %4694 = vmatpush3.bf16.msra.mxu0 %v4691_v31 }
 0x1c7   : > { %v1749_v7 = vpop.xlane.xlu0 %1748  ;;  %4855 = vpow2.f32 %v2003_v1  ;;  %v1911_v0 = vsub.f32 %v5535_v46, %v1773_v42  ;;  %2096 = vadd.xlane.f32.xlu0 %v2095_v50  ;;  %v2119_v55 = vsel %vm1692_vm2, %v5803_v32, 0.0  ;;  %4708 = vmatprep.subr.bf16.mxu1 %v4707_v21 }
 0x1c8   : > { %v1903_v47 = vsub.f32 %v5537_v49, %v1749_v7  ;;  %4857 = vpow2.f32 %v1987_v16 }
 0x1c9   : > { %v5811_v5 = vpop.eup %4847  ;;  %v2001_v20 = vmul.f32 1.442695, %v1911_v0  ;;  %4710 = vmatpush3.bf16.msra.mxu1 %v4707_v21 }
 0x1ca   : > { %v1985_v10 = vmul.f32 1.442695, %v1903_v47  ;;  %v5815_v35 = vpop.eup %4849  ;;  %v1782_v46 = vpop.xlane.xlu1 %1781  ;;  %2120 = vadd.xlane.f32.xlu1 %v2119_v55  ;;  %v2152_v42 = vsel %vm1692_vm2, %v5811_v5, 0.0 }
 0x1cb   : > { %v1758_v49 = vpop.xlane.xlu0 %1757  ;;  %4859 = vpow2.f32 %v2001_v20  ;;  %v1914_v61 = vsub.f32 %v5539_v53, %v1782_v46  ;;  %v2128_v16 = vsel %vm1692_vm2, %v5815_v35, 0.0 }
 0x1cc   : > { %v1906_v1 = vsub.f32 %v5541_v54, %v1758_v49  ;;  %4861 = vpow2.f32 %v1985_v10  ;;  %2129 = vadd.xlane.f32.xlu0 %v2128_v16 }
 0x1cd   : > { %v5821_v6 = vpop.eup %4851  ;;  %v2007_v31 = vmul.f32 1.442695, %v1914_v61 }
 0x1ce   : > { %v1991_v40 = vmul.f32 1.442695, %v1906_v1  ;;  %v5825_v7 = vpop.eup %4853  ;;  %v1779_v50 = vpop.xlane.xlu1 %1778  ;;  %2153 = vadd.xlane.f32.xlu1 %v2152_v42  ;;  %v2149_v20 = vsel %vm1692_vm2, %v5821_v6, 0.0 }
 0x1cf   : > { %v1755_v53 = vpop.xlane.xlu0 %1754  ;;  %4863 = vpow2.f32 %v2007_v31  ;;  %v1913_v54 = vsub.f32 %v5551_v63, %v1779_v50  ;;  %v2125_v0 = vsel %vm1692_vm2, %v5825_v7, 0.0 }
 0x1d0   : > { %v1905_v8 = vsub.f32 %v5553_v2, %v1755_v53  ;;  %4865 = vpow2.f32 %v1991_v40  ;;  %2126 = vadd.xlane.f32.xlu0 %v2125_v0 }
 0x1d1   : > { %v5831_v47 = vpop.eup %4855  ;;  %v2005_v51 = vmul.f32 1.442695, %v1913_v54 }
 0x1d2   : > { %v1989_v59 = vmul.f32 1.442695, %v1905_v8  ;;  %v5835_v10 = vpop.eup %4857  ;;  %v1788_v55 = vpop.xlane.xlu1 %1787  ;;  %2150 = vadd.xlane.f32.xlu1 %v2149_v20  ;;  %v2158_v16 = vsel %vm1692_vm2, %v5831_v47, 0.0 }
 0x1d3   : > { %v1764_v21 = vpop.xlane.xlu0 %1763  ;;  %4867 = vpow2.f32 %v2005_v51  ;;  %v1916_v63 = vsub.f32 %v5555_v3, %v1788_v55  ;;  %v2134_v46 = vsel %vm1692_vm2, %v5835_v10, 0.0  ;;  %v355_v51 = vld [vmem:[%s5753_s23 + $0x80] sm:$0xff] }
 0x1d4   : > { %v1908_v2 = vsub.f32 %v5557_v4, %v1764_v21  ;;  %4869 = vpow2.f32 %v1989_v59  ;;  %2135 = vadd.xlane.f32.xlu0 %v2134_v46  ;;  %v356_v59 = vld [vmem:[%s5753_s23 + $0x88] sm:$0xff]  ;;  %v363_v46 = vld [vmem:[%s5753_s23 + $0xc0] sm:$0xff] }
 0x1d5   : > { %v5841_v49 = vpop.eup %4859  ;;  %v2011_v61 = vmul.f32 1.442695, %v1916_v63  ;;  %v5859_v55 = vpack.c.bf16 %v356_v59, %v355_v51 }
 0x1d6   : > { %v1995_v1 = vmul.f32 1.442695, %v1908_v2  ;;  %v5845_v31 = vpop.eup %4861  ;;  %v1785_v40 = vpop.xlane.xlu1 %1784  ;;  %2159 = vadd.xlane.f32.xlu1 %v2158_v16  ;;  %v2155_v53 = vsel %vm1692_vm2, %v5841_v49, 0.0 }
 0x1d7   : > { %v1761_v3 = vpop.xlane.xlu0 %1760  ;;  %4871 = vpow2.f32 %v2011_v61  ;;  %v1915_v4 = vsub.f32 %v5567_v13, %v1785_v40  ;;  %v2131_v50 = vsel %vm1692_vm2, %v5845_v31, 0.0  ;;  %4712 = vmatprep.subr.bf16.mxu0 %v5859_v55  ;;  %v364_v61 = vld [vmem:[%s5753_s23 + $0xc8] sm:$0xff] }
 0x1d8   : > { %v1907_v42 = vsub.f32 %v5569_v14, %v1761_v3  ;;  %4873 = vpow2.f32 %v1995_v1  ;;  %2132 = vadd.xlane.f32.xlu0 %v2131_v50 }
 0x1d9   : > { %v5853_v54 = vpop.eup %4863  ;;  %v2009_v8 = vmul.f32 1.442695, %v1915_v4  ;;  %v5872_v4 = vpack.c.bf16 %v364_v61, %v363_v46 }
 0x1da   : > { %v1993_v0 = vmul.f32 1.442695, %v1907_v42  ;;  %v5857_v20 = vpop.eup %4865  ;;  %v1818_v13 = vpop.xlane.xlu1 %1817  ;;  %2156 = vadd.xlane.f32.xlu1 %v2155_v53  ;;  %v2164_v3 = vsel %vm1692_vm2, %v5853_v54, 0.0 }
 0x1db   : > { %v1794_v14 = vpop.xlane.xlu0 %1793  ;;  %4875 = vpow2.f32 %v2009_v8  ;;  %v1926_v21 = vsub.f32 %v5577_v25, %v1818_v13  ;;  %v2140_v2 = vsel %vm1692_vm2, %v5857_v20, 0.0  ;;  %4728 = vmatprep.subr.bf16.mxu1 %v5872_v4 }
 0x1dc   : > { %v1918_v63 = vsub.f32 %v5575_v22, %v1794_v14  ;;  %4877 = vpow2.f32 %v1993_v0  ;;  %2141 = vadd.xlane.f32.xlu0 %v2140_v2 }
 0x1dd   : > { %v5868_v1 = vpop.eup %4867  ;;  %v2031_v16 = vmul.f32 1.442695, %v1926_v21 }
 0x1de   : > { %v2015_v40 = vmul.f32 1.442695, %v1918_v63  ;;  %v5874_v25 = vpop.eup %4869  ;;  %v1815_v22 = vpop.xlane.xlu1 %1814  ;;  %2165 = vadd.xlane.f32.xlu1 %v2164_v3  ;;  %v2161_v13 = vsel %vm1692_vm2, %v5868_v1, 0.0 }
 0x1df   : > { %v1791_v42 = vpop.xlane.xlu0 %1790  ;;  %4879 = vpow2.f32 %v2031_v16  ;;  %v1925_v50 = vsub.f32 %v5581_v29, %v1815_v22  ;;  %v2137_v8 = vsel %vm1692_vm2, %v5874_v25, 0.0 }
 0x1e0   : > { %v1917_v53 = vsub.f32 %v5583_v30, %v1791_v42  ;;  %4881 = vpow2.f32 %v2015_v40  ;;  %2138 = vadd.xlane.f32.xlu0 %v2137_v8 }
 0x1e1   : > { %v5881_v0 = vpop.eup %4871  ;;  %v2029_v51 = vmul.f32 1.442695, %v1925_v50 }
 0x1e2   : > { %v2013_v59 = vmul.f32 1.442695, %v1917_v53  ;;  %v5885_v14 = vpop.eup %4873  ;;  %v1824_v21 = vpop.xlane.xlu1 %1823  ;;  %2162 = vadd.xlane.f32.xlu1 %v2161_v13  ;;  %v2170_v40 = vsel %vm1692_vm2, %v5881_v0, 0.0 }
 0x1e3   : > { %v1800_v29 = vpop.xlane.xlu0 %1799  ;;  %4883 = vpow2.f32 %v2029_v51  ;;  %v1928_v30 = vsub.f32 %v5587_v39, %v1824_v21  ;;  %v2146_v2 = vsel %vm1692_vm2, %v5885_v14, 0.0 }
 0x1e4   : > { %v1920_v63 = vsub.f32 %v5589_v41, %v1800_v29  ;;  %4885 = vpow2.f32 %v2013_v59  ;;  %2147 = vadd.xlane.f32.xlu0 %v2146_v2 }
 0x1e5   : > { %v5891_v46 = vpop.eup %4875  ;;  %v2035_v61 = vmul.f32 1.442695, %v1928_v30 }
 0x1e6   : > { %v2019_v16 = vmul.f32 1.442695, %v1920_v63  ;;  %v5895_v3 = vpop.eup %4877  ;;  %v1821_v22 = vpop.xlane.xlu1 %1820  ;;  %2171 = vadd.xlane.f32.xlu1 %v2170_v40  ;;  %v2167_v59 = vsel %vm1692_vm2, %v5891_v46, 0.0 }
 0x1e7   : > { %v1797_v42 = vpop.xlane.xlu0 %1796  ;;  %4887 = vpow2.f32 %v2035_v61  ;;  %v1927_v39 = vsub.f32 %v5599_v60, %v1821_v22  ;;  %v2143_v50 = vsel %vm1692_vm2, %v5895_v3, 0.0 }
 0x1e8   : > { %v1919_v41 = vsub.f32 %v5601_v62, %v1797_v42  ;;  %4889 = vpow2.f32 %v2019_v16  ;;  %2144 = vadd.xlane.f32.xlu0 %v2143_v50 }
 0x1e9   : > { %v5901_v53 = vpop.eup %4879  ;;  %v2033_v8 = vmul.f32 1.442695, %v1927_v39 }
 0x1ea   : > { %v2017_v51 = vmul.f32 1.442695, %v1919_v41  ;;  %v5905_v13 = vpop.eup %4881  ;;  %v1830_v21 = vpop.xlane.xlu1 %1829  ;;  %2168 = vadd.xlane.f32.xlu1 %v2167_v59  ;;  %v2200_v16 = vsel %vm1692_vm2, %v5901_v53, 0.0 }
 0x1eb   : > { %v1806_v29 = vpop.xlane.xlu0 %1805  ;;  %4891 = vpow2.f32 %v2033_v8  ;;  %v1930_v60 = vsub.f32 %v5603_v12, %v1830_v21  ;;  %v2176_v30 = vsel %vm1692_vm2, %v5905_v13, 0.0 }
 0x1ec   : > { %v1922_v62 = vsub.f32 %v5605_v17, %v1806_v29  ;;  %4893 = vpow2.f32 %v2017_v51  ;;  %2177 = vadd.xlane.f32.xlu0 %v2176_v30 }
 0x1ed   : > { %v5911_v63 = vpop.eup %4883  ;;  %v2039_v2 = vmul.f32 1.442695, %v1930_v60 }
 0x1ee   : > { %v2023_v61 = vmul.f32 1.442695, %v1922_v62  ;;  %v5915_v40 = vpop.eup %4885  ;;  %v1827_v22 = vpop.xlane.xlu1 %1826  ;;  %2201 = vadd.xlane.f32.xlu1 %v2200_v16  ;;  %v2197_v51 = vsel %vm1692_vm2, %v5911_v63, 0.0 }
 0x1ef   : > { %v1803_v42 = vpop.xlane.xlu0 %1802  ;;  %4895 = vpow2.f32 %v2039_v2  ;;  %v1929_v12 = vsub.f32 %v5615_v28, %v1827_v22  ;;  %v2173_v39 = vsel %vm1692_vm2, %v5915_v40, 0.0 }
 0x1f0   : > { %v1921_v17 = vsub.f32 %v5617_v33, %v1803_v42  ;;  %4897 = vpow2.f32 %v2023_v61  ;;  %2174 = vadd.xlane.f32.xlu0 %v2173_v39 }
 0x1f1   : > { %v5921_v41 = vpop.eup %4887  ;;  %v2037_v50 = vmul.f32 1.442695, %v1929_v12  ;;  %v6435_v12 = vld [vmem:[#allocation3_spill] sm:$0xff] }
 0x1f2   : > { %v2021_v8 = vmul.f32 1.442695, %v1921_v17  ;;  %v5925_v59 = vpop.eup %4889  ;;  %v1836_v21 = vpop.xlane.xlu1 %1835  ;;  %2198 = vadd.xlane.f32.xlu1 %v2197_v51  ;;  %v2206_v61 = vsel %vm1692_vm2, %v5921_v41, 0.0 }
 0x1f3   : > { %v1812_v29 = vpop.xlane.xlu0 %1811  ;;  %4899 = vpow2.f32 %v2037_v50  ;;  %v1932_v28 = vsub.f32 %v5619_v34, %v1836_v21  ;;  %v2182_v60 = vsel %vm1692_vm2, %v5925_v59, 0.0  ;;  %v6434_v34 = vld [vmem:[#allocation2_spill] sm:$0xff] }
 0x1f4   : > { %v1924_v33 = vsub.f32 %v5621_v36, %v1812_v29  ;;  %4901 = vpow2.f32 %v2021_v8  ;;  %2183 = vadd.xlane.f32.xlu0 %v2182_v60  ;;  %v6438_v60 = vld [vmem:[#allocation5_spill] sm:$0xff] }
 0x1f5   : > { %v5931_v62 = vpop.eup %4891  ;;  %v2043_v30 = vmul.f32 1.442695, %v1932_v28 }
 0x1f6   : > { %v2027_v2 = vmul.f32 1.442695, %v1924_v33  ;;  %v5935_v16 = vpop.eup %4893  ;;  %v1833_v22 = vpop.xlane.xlu1 %1832  ;;  %2207 = vadd.xlane.f32.xlu1 %v2206_v61  ;;  %v2203_v21 = vsel %vm1692_vm2, %v5931_v62, 0.0  ;;  %v6439_v61 = vld [vmem:[#allocation4_spill] sm:$0xff] }
 0x1f7   : > { %v1809_v42 = vpop.xlane.xlu0 %1808  ;;  %4903 = vpow2.f32 %v2043_v30  ;;  %v1931_v36 = vsub.f32 %v6434_v34, %v1833_v22  ;;  %v2179_v39 = vsel %vm1692_vm2, %v5935_v16, 0.0 }
 0x1f8   : > { %v1923_v17 = vsub.f32 %v6435_v12, %v1809_v42  ;;  %4905 = vpow2.f32 %v2027_v2  ;;  %2180 = vadd.xlane.f32.xlu0 %v2179_v39 }
 0x1f9   : > { %v5941_v50 = vpop.eup %4895  ;;  %v2041_v8 = vmul.f32 1.442695, %v1931_v36 }
 0x1fa   : > { %6436 = vst [vmem:[#allocation2_spill] sm:$0xff] %v5941_v50  ;;  %v2025_v51 = vmul.f32 1.442695, %v1923_v17  ;;  %v5945_v29 = vpop.eup %4897  ;;  %v1866_v28 = vpop.xlane.xlu1 %1865  ;;  %2204 = vadd.xlane.f32.xlu1 %v2203_v21  ;;  %v2212_v12 = vsel %vm1692_vm2, %v5941_v50, 0.0  ;;  %v6441_v21 = vld [vmem:[#allocation6_spill] sm:$0xff] }
 0x1fb   : > { %6437 = vst [vmem:[#allocation3_spill] sm:$0xff] %v5945_v29  ;;  %v1842_v33 = vpop.xlane.xlu0 %1841  ;;  %4907 = vpow2.f32 %v2041_v8  ;;  %v1942_v30 = vsub.f32 %v6438_v60, %v1866_v28  ;;  %v2188_v2 = vsel %vm1692_vm2, %v5945_v29, 0.0 }
 0x1fc   : > { %v1934_v22 = vsub.f32 %v6439_v61, %v1842_v33  ;;  %4909 = vpow2.f32 %v2025_v51  ;;  %2189 = vadd.xlane.f32.xlu0 %v2188_v2  ;;  %v6442_v33 = vld [vmem:[#allocation7_spill] sm:$0xff] }
 0x1fd   : > { %v5951_v42 = vpop.eup %4899  ;;  %v2063_v34 = vmul.f32 1.442695, %v1942_v30 }
 0x1fe   : > { %6440 = vst [vmem:[#allocation5_spill] sm:$0xff] %v5951_v42  ;;  %v2047_v36 = vmul.f32 1.442695, %v1934_v22  ;;  %v5955_v17 = vpop.eup %4901  ;;  %v1863_v39 = vpop.xlane.xlu1 %1862  ;;  %2213 = vadd.xlane.f32.xlu1 %v2212_v12  ;;  %v2209_v2 = vsel %vm1692_vm2, %v5951_v42, 0.0 }
 0x1ff   : > { %v1839_v8 = vpop.xlane.xlu0 %1838  ;;  %4911 = vpow2.f32 %v2063_v34  ;;  %v1941_v28 = vsub.f32 %v6441_v21, %v1863_v39  ;;  %v2185_v51 = vsel %vm1692_vm2, %v5955_v17, 0.0  ;;  %v6444_v39 = vld [vmem:[#allocation8_spill] sm:$0xff]  ;;  %v6445_v21 = vld [vmem:[#allocation9_spill] sm:$0xff] }
 0x200   : > { %v1933_v60 = vsub.f32 %v6442_v33, %v1839_v8  ;;  %4913 = vpow2.f32 %v2047_v36  ;;  %2186 = vadd.xlane.f32.xlu0 %v2185_v51 }
 0x201   : > { %v5961_v30 = vpop.eup %4903  ;;  %v2061_v61 = vmul.f32 1.442695, %v1941_v28 }
 0x202   : > { %6443 = vst [vmem:[#allocation4_spill] sm:$0xff] %v5961_v30  ;;  %v2045_v22 = vmul.f32 1.442695, %v1933_v60  ;;  %v5965_v50 = vpop.eup %4905  ;;  %v1872_v12 = vpop.xlane.xlu1 %1871  ;;  %2210 = vadd.xlane.f32.xlu1 %v2209_v2  ;;  %v2218_v42 = vsel %vm1692_vm2, %v5961_v30, 0.0  ;;  %v6458_v30 = vld [vmem:[#allocation15_spill] sm:$0xff] }
 0x203   : > { %v1848_v34 = vpop.xlane.xlu0 %1847  ;;  %4915 = vpow2.f32 %v2061_v61  ;;  %v1944_v8 = vsub.f32 %v6444_v39, %v1872_v12  ;;  %v2194_v36 = vsel %vm1692_vm2, %v5965_v50, 0.0 }
 0x204   : > { %v1936_v33 = vsub.f32 %v6445_v21, %v1848_v34  ;;  %4917 = vpow2.f32 %v2045_v22  ;;  %2195 = vadd.xlane.f32.xlu0 %v2194_v36 }
 0x205   : > { %v5971_v28 = vpop.eup %4907  ;;  %v2067_v60 = vmul.f32 1.442695, %v1944_v8 }
 0x206   : > { %6446 = vst [vmem:[#allocation6_spill] sm:$0xff] %v5971_v28  ;;  %v2051_v51 = vmul.f32 1.442695, %v1936_v33  ;;  %v5975_v29 = vpop.eup %4909  ;;  %v1869_v2 = vpop.xlane.xlu1 %1868  ;;  %2219 = vadd.xlane.f32.xlu1 %v2218_v42  ;;  %v2215_v33 = vsel %vm1692_vm2, %v5971_v28, 0.0 }
 0x207   : > { %v1845_v61 = vpop.xlane.xlu0 %1844  ;;  %4919 = vpow2.f32 %v2067_v60  ;;  %v1943_v12 = vsub.f32 %v5663_v43, %v1869_v2  ;;  %v2191_v22 = vsel %vm1692_vm2, %v5975_v29, 0.0 }
 0x208   : > { %v1935_v34 = vsub.f32 %v5665_v19, %v1845_v61  ;;  %4921 = vpow2.f32 %v2051_v51  ;;  %2192 = vadd.xlane.f32.xlu0 %v2191_v22 }
 0x209   : > { %v5981_v39 = vpop.eup %4911  ;;  %v2065_v8 = vmul.f32 1.442695, %v1943_v12 }
 0x20a   : > { %6447 = vst [vmem:[#allocation7_spill] sm:$0xff] %v5981_v39  ;;  %v2049_v21 = vmul.f32 1.442695, %v1935_v34  ;;  %v5985_v36 = vpop.eup %4913  ;;  %v1878_v42 = vpop.xlane.xlu1 %1877  ;;  %2216 = vadd.xlane.f32.xlu1 %v2215_v33  ;;  %v2248_v34 = vsel %vm1692_vm2, %v5981_v39, 0.0 }
 0x20b   : > { %6448 = vst [vmem:[#allocation8_spill] sm:$0xff] %v5985_v36  ;;  %v1854_v60 = vpop.xlane.xlu0 %1853  ;;  %4923 = vpow2.f32 %v2065_v8  ;;  %v1946_v19 = vsub.f32 %v5667_v56, %v1878_v42  ;;  %v2224_v51 = vsel %vm1692_vm2, %v5985_v36, 0.0  ;;  %v6451_v56 = vld [vmem:[#allocation10_spill] sm:$0xff]  ;;  %v6452_v42 = vld [vmem:[#allocation11_spill] sm:$0xff] }
 0x20c   : > { %v1938_v43 = vsub.f32 %v5669_v57, %v1854_v60  ;;  %4925 = vpow2.f32 %v2049_v21  ;;  %2225 = vadd.xlane.f32.xlu0 %v2224_v51 }
 0x20d   : > { %v5991_v2 = vpop.eup %4915  ;;  %v2071_v61 = vmul.f32 1.442695, %v1946_v19 }
 0x20e   : > { %6449 = vst [vmem:[#allocation9_spill] sm:$0xff] %v5991_v2  ;;  %v2055_v12 = vmul.f32 1.442695, %v1938_v43  ;;  %v5995_v22 = vpop.eup %4917  ;;  %v1875_v33 = vpop.xlane.xlu1 %1874  ;;  %2249 = vadd.xlane.f32.xlu1 %v2248_v34  ;;  %v2245_v39 = vsel %vm1692_vm2, %v5991_v2, 0.0 }
 0x20f   : > { %6450 = vst [vmem:[#allocation16_spill] sm:$0xff] %v5995_v22  ;;  %v1851_v8 = vpop.xlane.xlu0 %1850  ;;  %4927 = vpow2.f32 %v2071_v61  ;;  %v1945_v57 = vsub.f32 %v6451_v56, %v1875_v33  ;;  %v2221_v21 = vsel %vm1692_vm2, %v5995_v22, 0.0 }
 0x210   : > { %v1937_v60 = vsub.f32 %v6452_v42, %v1851_v8  ;;  %4929 = vpow2.f32 %v2055_v12  ;;  %2222 = vadd.xlane.f32.xlu0 %v2221_v21  ;;  %v6455_v8 = vld [vmem:[#allocation12_spill] sm:$0xff] }
 0x211   : > { %v6001_v19 = vpop.eup %4919  ;;  %v2069_v43 = vmul.f32 1.442695, %v1945_v57 }
 0x212   : > { %6453 = vst [vmem:[#allocation10_spill] sm:$0xff] %v6001_v19  ;;  %v2053_v51 = vmul.f32 1.442695, %v1937_v60  ;;  %v6005_v36 = vpop.eup %4921  ;;  %v1884_v34 = vpop.xlane.xlu1 %1883  ;;  %2246 = vadd.xlane.f32.xlu1 %v2245_v39  ;;  %v2254_v57 = vsel %vm1692_vm2, %v6001_v19, 0.0  ;;  %v6456_v60 = vld [vmem:[#allocation13_spill] sm:$0xff] }
 0x213   : > { %6454 = vst [vmem:[#allocation11_spill] sm:$0xff] %v6005_v36  ;;  %v1860_v61 = vpop.xlane.xlu0 %1859  ;;  %4931 = vpow2.f32 %v2069_v43  ;;  %v2230_v33 = vsel %vm1692_vm2, %v6005_v36, 0.0  ;;  %v1948_v12 = vsub.f32 %v6455_v8, %v1884_v34  ;;  %v6457_v43 = vld [vmem:[#allocation14_spill] sm:$0xff] }
 0x214   : > { %4933 = vpow2.f32 %v2053_v51  ;;  %2231 = vadd.xlane.f32.xlu0 %v2230_v33  ;;  %v1940_v21 = vsub.f32 %v6456_v60, %v1860_v61 }
 0x215   : > { %v6010_v56 = vpop.eup %4923  ;;  %v2075_v34 = vmul.f32 1.442695, %v1948_v12 }
 0x216   : > { %v6014_v42 = vpop.eup %4925  ;;  %v1881_v2 = vpop.xlane.xlu1 %1880  ;;  %2255 = vadd.xlane.f32.xlu1 %v2254_v57  ;;  %v2251_v28 = vsel %vm1692_vm2, %v6010_v56, 0.0  ;;  %v2059_v57 = vmul.f32 1.442695, %v1940_v21 }
 0x217   : > { %v1857_v39 = vpop.xlane.xlu0 %1856  ;;  %v1947_v22 = vsub.f32 %v6457_v43, %v1881_v2  ;;  %v2227_v51 = vsel %vm1692_vm2, %v6014_v42, 0.0 }
 0x218   : > { %v1939_v36 = vsub.f32 %v6458_v30, %v1857_v39  ;;  %2228 = vadd.xlane.f32.xlu0 %v2227_v51 }
 0x219   : > { %v6021_v33 = vpop.eup %4927  ;;  %v2073_v8 = vmul.f32 1.442695, %v1947_v22 }
 0x21a   : > { %6459 = vst [vmem:[#allocation12_spill] sm:$0xff] %v6021_v33  ;;  %v2057_v19 = vmul.f32 1.442695, %v1939_v36  ;;  %v6025_v61 = vpop.eup %4929  ;;  %2252 = vadd.xlane.f32.xlu1 %v2251_v28  ;;  %v2260_v22 = vsel %vm1692_vm2, %v6021_v33, 0.0  ;;  %v366_v33 = vld [vmem:[%s5753_s23 + $0xd8] sm:$0xff] }
 0x21b   : > { %6460 = vst [vmem:[#allocation13_spill] sm:$0xff] %v6025_v61  ;;  %4935 = vpow2.f32 %v2073_v8  ;;  %v2236_v30 = vsel %vm1692_vm2, %v6025_v61, 0.0  ;;  %v360_v61 = vld [vmem:[%s5753_s23 + $0xa8] sm:$0xff] }
 0x21c   : > { %4937 = vpow2.f32 %v2057_v19  ;;  %2237 = vadd.xlane.f32.xlu0 %v2236_v30 }
 0x21d   : > { %v6029_v2 = vpop.eup %4931  ;;  %4939 = vpow2.f32 %v2075_v34 }
 0x21e   : > { %6461 = vst [vmem:[#allocation14_spill] sm:$0xff] %v6029_v2  ;;  %v6033_v36 = vpop.eup %4933  ;;  %4941 = vpow2.f32 %v2059_v57  ;;  %2261 = vadd.xlane.f32.xlu1 %v2260_v22  ;;  %v2257_v28 = vsel %vm1692_vm2, %v6029_v2, 0.0 }
 0x21f   : > { %v2233_v12 = vsel %vm1692_vm2, %v6033_v36, 0.0 }
 0x220   : > { %2234 = vadd.xlane.f32.xlu0 %v2233_v12 }
 0x222   : > { %2258 = vadd.xlane.f32.xlu1 %v2257_v28 }
 0x225   : > { %v6039_v19 = vpop.eup %4935 }
 0x226   : > { %6462 = vst [vmem:[#allocation15_spill] sm:$0xff] %v6039_v19  ;;  %v6041_v60 = vpop.eup %4937  ;;  %v2263_v21 = vsel %vm1692_vm2, %v6039_v19, 0.0 }
 0x227   : > { %6463 = vst [vmem:[#allocation17_spill] sm:$0xff] %v6041_v60  ;;  %v6045_v39 = vpop.eup %4939  ;;  %2264 = vadd.xlane.f32.xlu1 %v2263_v21  ;;  %v2239_v43 = vsel %vm1692_vm2, %v6041_v60, 0.0 }
 0x228   : > { %6464 = vst [vmem:[#allocation18_spill] sm:$0xff] %v6045_v39  ;;  %v6049_v51 = vpop.eup %4941  ;;  %2240 = vadd.xlane.f32.xlu0 %v2239_v43  ;;  %v2266_v34 = vsel %vm1692_vm2, %v6045_v39, 0.0 }
 0x229   : > { %6465 = vst [vmem:[#allocation19_spill] sm:$0xff] %v6049_v51  ;;  %v2242_v8 = vsel %vm1692_vm2, %v6049_v51, 0.0  ;;  %v357_v51 = vld [vmem:[%s5753_s23 + $0x90] sm:$0xff] }
 0x22b   : > { %2267 = vadd.xlane.f32.xlu1 %v2266_v34 }
 0x22c   : > { %2243 = vadd.xlane.f32.xlu0 %v2242_v8  ;;  %v358_v8 = vld [vmem:[%s5753_s23 + $0x98] sm:$0xff] }
 0x22d   : > { %v4715_v19 = vpack.c.bf16 %v358_v8, %v357_v51  ;;  %v368_v8 = vld [vmem:[%s5753_s23 + $0xe8] sm:$0xff] }
 0x237   : > { %v2082_v57 = vpop.xlane.xlu0 %2081 }
 0x238   : > { %4943 = vrcp.f32 %v2082_v57 }
 0x23b   : > { %v2106_v30 = vpop.xlane.xlu1 %2105  ;;  %v2079_v22 = vpop.xlane.xlu0 %2078 }
 0x23c   : > { %4945 = vrcp.f32 %v2079_v22 }
 0x23d   : > { %4947 = vrcp.f32 %v2106_v30 }
 0x23f   : > { %v2103_v12 = vpop.xlane.xlu1 %2102 }
 0x240   : > { %4949 = vrcp.f32 %v2103_v12  ;;  %v2088_v28 = vpop.xlane.xlu0 %2087 }
 0x241   : > { %4951 = vrcp.f32 %v2088_v28  ;;  %v365_v28 = vld [vmem:[%s5753_s23 + $0xd0] sm:$0xff] }
 0x242   : > { %v4944_v34 = vpop.eup %4943  ;;  %v4731_v51 = vpack.c.bf16 %v366_v33, %v365_v28 }
 0x243   : > { %v2112_v21 = vpop.xlane.xlu1 %2111  ;;  %v2334_v12 = vmul.f32 %v4944_v34, %v5711_v18  ;;  %v367_v34 = vld [vmem:[%s5753_s23 + $0xe0] sm:$0xff] }
 0x244   : > { %v2085_v43 = vpop.xlane.xlu0 %2084 }
 0x245   : > { %4953 = vrcp.f32 %v2085_v43  ;;  %v359_v43 = vld [vmem:[%s5753_s23 + $0xa0] sm:$0xff] }
 0x246   : > { %v4946_v39 = vpop.eup %4945  ;;  %4955 = vrcp.f32 %v2112_v21  ;;  %v4719_v21 = vpack.c.bf16 %v360_v61, %v359_v43  ;;  %v4735_v61 = vpack.c.bf16 %v368_v8, %v367_v34  ;;  %v369_v43 = vld [vmem:[%s5753_s23 + $0xf0] sm:$0xff] }
 0x247   : > { %v2109_v60 = vpop.xlane.xlu1 %2108  ;;  %v2333_v30 = vmul.f32 %v4946_v39, %v5715_v48  ;;  %v4948_v22 = vpop.eup %4947 }
 0x248   : > { %4957 = vrcp.f32 %v2109_v60  ;;  %v2094_v57 = vpop.xlane.xlu0 %2093  ;;  %v2342_v39 = vmul.f32 %v4948_v22, %v5719_v37 }
 0x249   : > { %4279 = vmatprep.mubr.msk.f32.mxu0 %vm1692_vm2, %v2333_v30  ;;  %4959 = vrcp.f32 %v2094_v57 }
 0x24a   : > { %v4950_v2 = vpop.eup %4949  ;;  %4280 = vmatmul.mubr.msk.f32.vlgmr.msra.gmra.mrb[32].mxu0 %vm1692_vm2, %v2334_v12  ;;  %v361_v12 = vld [vmem:[%s5753_s23 + $0xb0] sm:$0xff] }
 0x24b   : > { %v2118_v60 = vpop.xlane.xlu1 %2117  ;;  %v2341_v48 = vmul.f32 %v4950_v2, %v5725_v45  ;;  %4714 = vmatpush3.bf16.msra.mxu0 %v5859_v55  ;;  %v4952_v30 = vpop.eup %4951  ;;  %v362_v45 = vld [vmem:[%s5753_s23 + $0xb8] sm:$0xff] }
 0x24c   : > { %v2091_v18 = vpop.xlane.xlu0 %2090  ;;  %4716 = vmatprep.subr.bf16.mxu0 %v4715_v19  ;;  %v2336_v22 = vmul.f32 %v4952_v30, %v5729_v27  ;;  %v4723_v28 = vpack.c.bf16 %v362_v45, %v361_v12  ;;  %v379_v30 = vld [vmem:[%s5753_s23 + $0x140] sm:$0xff]  ;;  %v380_v12 = vld [vmem:[%s5753_s23 + $0x148] sm:$0xff] }
 0x24d   : > { %4961 = vrcp.f32 %v2091_v18  ;;  %4307 = vmatprep.mubr.msk.f32.mxu1 %vm1692_vm2, %v2341_v48  ;;  %v370_v48 = vld [vmem:[%s5753_s23 + $0xf8] sm:$0xff] }
 0x24e   : > { %4308 = vmatmul.mubr.msk.f32.vlgmr.msra.gmra.mrb[32].mxu1 %vm1692_vm2, %v2342_v39  ;;  %4963 = vrcp.f32 %v2118_v60  ;;  %v371_v39 = vld [vmem:[%s5753_s23 + $0x100] sm:$0xff]  ;;  %v4739_v34 = vpack.c.bf16 %v370_v48, %v369_v43 }
 0x24f   : > { %v4954_v37 = vpop.eup %4953  ;;  %v2115_v2 = vpop.xlane.xlu1 %2114  ;;  %4730 = vmatpush3.bf16.msra.mxu1 %v5872_v4  ;;  %4718 = vmatpush3.bf16.msra.mxu0 %v4715_v19  ;;  %v372_v4 = vld [vmem:[%s5753_s23 + $0x108] sm:$0xff] }
 0x250   : > { %4965 = vrcp.f32 %v2115_v2  ;;  %v2100_v55 = vpop.xlane.xlu0 %2099  ;;  %v2335_v33 = vmul.f32 %v4954_v37, %v5739_v24  ;;  %4732 = vmatprep.subr.bf16.mxu1 %v4731_v51  ;;  %v4956_v57 = vpop.eup %4955  ;;  %4720 = vmatprep.subr.bf16.mxu0 %v4719_v21  ;;  %v6086_v8 = vpack.c.bf16 %v372_v4, %v371_v39 }
 0x251   : > { %4967 = vrcp.f32 %v2100_v55  ;;  %v2344_v27 = vmul.f32 %v4956_v57, %v5733_v44 }
 0x252   : > { %v4958_v60 = vpop.eup %4957  ;;  %4282 = vmatprep.mubr.msk.f32.mxu0 %vm1692_vm2, %v2335_v33 }
 0x253   : > { %v2124_v18 = vpop.xlane.xlu1 %2123  ;;  %4283 = vmatmul.mubr.msk.f32.gmra.mrb[34].mxu0 %vm1692_vm2, %v2336_v22  ;;  %v2343_v24 = vmul.f32 %v4958_v60, %v5743_v9  ;;  %4734 = vmatpush3.bf16.msra.mxu1 %v4731_v51  ;;  %v4960_v45 = vpop.eup %4959 }
 0x254   : > { %v2097_v19 = vpop.xlane.xlu0 %2096  ;;  %4722 = vmatpush3.bf16.msra.mxu0 %v4719_v21  ;;  %4736 = vmatprep.subr.bf16.mxu1 %v4735_v61  ;;  %v6092_v21 = vpack.c.bf16 %v380_v12, %v379_v30  ;;  %v2338_v55 = vmul.f32 %v4960_v45, %v5757_v38  ;;  %v381_v45 = vld [vmem:[%s5753_s23 + $0x150] sm:$0xff] }
 0x255   : > { %4969 = vrcp.f32 %v2097_v19  ;;  %4310 = vmatprep.mubr.msk.f32.mxu1 %vm1692_vm2, %v2343_v24  ;;  %4724 = vmatprep.subr.bf16.mxu0 %v4723_v28 }
 0x256   : > { %4311 = vmatmul.mubr.msk.f32.gmra.mrb[34].mxu1 %vm1692_vm2, %v2344_v27  ;;  %4971 = vrcp.f32 %v2124_v18  ;;  %v373_v27 = vld [vmem:[%s5753_s23 + $0x110] sm:$0xff] }
 0x257   : > { %v4962_v9 = vpop.eup %4961  ;;  %v2121_v51 = vpop.xlane.xlu1 %2120  ;;  %4738 = vmatpush3.bf16.msra.mxu1 %v4735_v61 }
 0x258   : > { %4973 = vrcp.f32 %v2121_v51  ;;  %v2337_v44 = vmul.f32 %v4962_v9, %v5770_v58  ;;  %4726 = vmatpush3.bf16.msra.mxu0 %v4723_v28  ;;  %4740 = vmatprep.subr.bf16.mxu1 %v4739_v34  ;;  %v4964_v37 = vpop.eup %4963  ;;  %v382_v9 = vld [vmem:[%s5753_s23 + $0x158] sm:$0xff] }
 0x259   : > { %v2130_v2 = vpop.xlane.xlu0 %2129  ;;  %4744 = vmatprep.subr.bf16.mxu0 %v6086_v8  ;;  %v2346_v58 = vmul.f32 %v4964_v37, %v5761_v52 }
 0x25a   : > { %v4966_v33 = vpop.eup %4965  ;;  %4285 = vmatprep.mubr.msk.f32.mxu0 %vm1692_vm2, %v2337_v44  ;;  %4975 = vrcp.f32 %v2130_v2 }
 0x25b   : > { %v2154_v57 = vpop.xlane.xlu1 %2153  ;;  %4286 = vmatmul.mubr.msk.f32.gmra.mrb[36].mxu0 %vm1692_vm2, %v2338_v55  ;;  %v2345_v61 = vmul.f32 %v4966_v33, %v5775_v23  ;;  %4742 = vmatpush3.bf16.msra.mxu1 %v4739_v34  ;;  %v4968_v38 = vpop.eup %4967  ;;  %v374_v34 = vld [vmem:[%s5753_s23 + $0x118] sm:$0xff]  ;;  %v375_v33 = vld [vmem:[%s5753_s23 + $0x120] sm:$0xff] }
 0x25c   : > { %4760 = vmatprep.subr.bf16.mxu1 %v6092_v21  ;;  %v2340_v52 = vmul.f32 %v4968_v38, %v5784_v11  ;;  %v4747_v37 = vpack.c.bf16 %v374_v34, %v373_v27  ;;  %v388_v27 = vld [vmem:[%s5753_s23 + $0x188] sm:$0xff] }
 0x25d   : > { %v2127_v22 = vpop.xlane.xlu0 %2126  ;;  %4313 = vmatprep.mubr.msk.f32.mxu1 %vm1692_vm2, %v2345_v61 }
 0x25e   : > { %4977 = vrcp.f32 %v2127_v22  ;;  %4314 = vmatmul.mubr.msk.f32.gmra.mrb[36].mxu1 %vm1692_vm2, %v2346_v58  ;;  %v384_v22 = vld [vmem:[%s5753_s23 + $0x168] sm:$0xff] }
 0x25f   : > { %v4970_v28 = vpop.eup %4969  ;;  %4979 = vrcp.f32 %v2154_v57  ;;  %v2151_v43 = vpop.xlane.xlu1 %2150  ;;  %v376_v57 = vld [vmem:[%s5753_s23 + $0x128] sm:$0xff] }
 0x260   : > { %4981 = vrcp.f32 %v2151_v43  ;;  %v2339_v48 = vmul.f32 %v4970_v28, %v5798_v15  ;;  %v4972_v23 = vpop.eup %4971  ;;  %v377_v28 = vld [vmem:[%s5753_s23 + $0x130] sm:$0xff]  ;;  %v378_v43 = vld [vmem:[%s5753_s23 + $0x138] sm:$0xff] }
 0x261   : > { %v2136_v60 = vpop.xlane.xlu0 %2135  ;;  %v2348_v24 = vmul.f32 %v4972_v23, %v5789_v26 }
 0x262   : > { %v4974_v39 = vpop.eup %4973  ;;  %4288 = vmatprep.mubr.msk.f32.mxu0 %vm1692_vm2, %v2339_v48  ;;  %4983 = vrcp.f32 %v2136_v60 }
 0x263   : > { %v2160_v4 = vpop.xlane.xlu1 %2159  ;;  %4289 = vmatmul.mubr.msk.f32.gmra.mrb[38].mxu0 %vm1692_vm2, %v2340_v52  ;;  %v2347_v18 = vmul.f32 %v4974_v39, %v5803_v32  ;;  %v385_v39 = vld [vmem:[%s5753_s23 + $0x170] sm:$0xff] }
 0x264   : > { %v4976_v11 = vpop.eup %4975 }
 0x265   : > { %v2133_v15 = vpop.xlane.xlu0 %2132  ;;  %4316 = vmatprep.mubr.msk.f32.mxu1 %vm1692_vm2, %v2347_v18  ;;  %v2350_v44 = vmul.f32 %v4976_v11, %v5815_v35  ;;  %v383_v35 = vld [vmem:[%s5753_s23 + $0x160] sm:$0xff] }
 0x266   : > { %4985 = vrcp.f32 %v2133_v15  ;;  %4317 = vmatmul.mubr.msk.f32.gmra.mrb[38].mxu1 %vm1692_vm2, %v2348_v24 }
 0x267   : > { %4987 = vrcp.f32 %v2160_v4  ;;  %v2157_v19 = vpop.xlane.xlu1 %2156  ;;  %v386_v4 = vld [vmem:[%s5753_s23 + $0x178] sm:$0xff] }
 0x268   : > { %v4978_v30 = vpop.eup %4977  ;;  %4989 = vrcp.f32 %v2157_v19  ;;  %v387_v19 = vld [vmem:[%s5753_s23 + $0x180] sm:$0xff]  ;;  %v4771_v34 = vpack.c.bf16 %v386_v4, %v385_v39 }
 0x269   : > { %v4980_v32 = vpop.eup %4979  ;;  %v2142_v26 = vpop.xlane.xlu0 %2141  ;;  %v2349_v12 = vmul.f32 %v4978_v30, %v5825_v7  ;;  %v4763_v7 = vpack.c.bf16 %v382_v9, %v381_v45  ;;  %v395_v30 = vld [vmem:[%s5753_s23 + $0x1c0] sm:$0xff] }
 0x26a   : > { %v4982_v51 = vpop.eup %4981  ;;  %v2358_v61 = vmul.f32 %v4980_v32, %v5811_v5  ;;  %4991 = vrcp.f32 %v2142_v26  ;;  %v396_v32 = vld [vmem:[%s5753_s23 + $0x1c8] sm:$0xff] }
 0x26b   : > { %4335 = vmatprep.mubr.msk.f32.mxu0 %vm1692_vm2, %v2349_v12  ;;  %v2166_v2 = vpop.xlane.xlu1 %2165  ;;  %v2357_v55 = vmul.f32 %v4982_v51, %v5821_v6  ;;  %v4751_v6 = vpack.c.bf16 %v376_v57, %v375_v33  ;;  %v6147_v45 = vpack.c.bf16 %v396_v32, %v395_v30  ;;  %v394_v30 = vld [vmem:[%s5753_s23 + $0x1b8] sm:$0xff] }
 0x26c   : > { %4336 = vmatmul.mubr.msk.f32.vlgmr.msra.gmra.mrb[40].mxu0 %vm1692_vm2, %v2350_v44  ;;  %v4984_v5 = vpop.eup %4983 }
 0x26d   : > { %v2139_v58 = vpop.xlane.xlu0 %2138  ;;  %4363 = vmatprep.mubr.msk.f32.mxu1 %vm1692_vm2, %v2357_v55  ;;  %4746 = vmatpush3.bf16.msra.mxu0 %v6086_v8  ;;  %v4767_v8 = vpack.c.bf16 %v384_v22, %v383_v35  ;;  %v2352_v24 = vmul.f32 %v4984_v5, %v5835_v10 }
 0x26e   : > { %4993 = vrcp.f32 %v2139_v58  ;;  %4364 = vmatmul.mubr.msk.f32.vlgmr.msra.gmra.mrb[40].mxu1 %vm1692_vm2, %v2358_v61  ;;  %4748 = vmatprep.subr.bf16.mxu0 %v4747_v37 }
 0x26f   : > { %4995 = vrcp.f32 %v2166_v2  ;;  %v2163_v38 = vpop.xlane.xlu1 %2162  ;;  %4762 = vmatpush3.bf16.msra.mxu1 %v6092_v21  ;;  %v4755_v21 = vpack.c.bf16 %v378_v43, %v377_v28  ;;  %v389_v43 = vld [vmem:[%s5753_s23 + $0x190] sm:$0xff] }
 0x270   : > { %v4986_v48 = vpop.eup %4985  ;;  %4997 = vrcp.f32 %v2163_v38  ;;  %4764 = vmatprep.subr.bf16.mxu1 %v4763_v7 }
 0x271   : > { %v4988_v23 = vpop.eup %4987  ;;  %v2148_v60 = vpop.xlane.xlu0 %2147  ;;  %v2351_v52 = vmul.f32 %v4986_v48, %v5845_v31  ;;  %4750 = vmatpush3.bf16.msra.mxu0 %v4747_v37 }
 0x272   : > { %v4990_v18 = vpop.eup %4989  ;;  %4752 = vmatprep.subr.bf16.mxu0 %v4751_v6  ;;  %v2360_v31 = vmul.f32 %v4988_v23, %v5831_v47  ;;  %4999 = vrcp.f32 %v2148_v60  ;;  %v397_v60 = vld [vmem:[%s5753_s23 + $0x1d0] sm:$0xff] }
 0x273   : > { %4338 = vmatprep.mubr.msk.f32.mxu0 %vm1692_vm2, %v2351_v52  ;;  %v2172_v15 = vpop.xlane.xlu1 %2171  ;;  %v2359_v11 = vmul.f32 %v4990_v18, %v5841_v49  ;;  %4766 = vmatpush3.bf16.msra.mxu1 %v4763_v7  ;;  %v6145_v49 = vpack.c.bf16 %v388_v27, %v387_v19  ;;  %v398_v52 = vld [vmem:[%s5753_s23 + $0x1d8] sm:$0xff] }
 0x274   : > { %4339 = vmatmul.mubr.msk.f32.gmra.mrb[42].mxu0 %vm1692_vm2, %v2352_v24  ;;  %4768 = vmatprep.subr.bf16.mxu1 %v4767_v8  ;;  %v4992_v26 = vpop.eup %4991 }
 0x275   : > { %v2145_v10 = vpop.xlane.xlu0 %2144  ;;  %4366 = vmatprep.mubr.msk.f32.mxu1 %vm1692_vm2, %v2359_v11  ;;  %4754 = vmatpush3.bf16.msra.mxu0 %v4751_v6  ;;  %v2354_v2 = vmul.f32 %v4992_v26, %v5857_v20  ;;  %v392_v11 = vld [vmem:[%s5753_s23 + $0x1a8] sm:$0xff] }
 0x276   : > { %5001 = vrcp.f32 %v2145_v10  ;;  %4367 = vmatmul.mubr.msk.f32.gmra.mrb[42].mxu1 %vm1692_vm2, %v2360_v31  ;;  %4756 = vmatprep.subr.bf16.mxu0 %v4755_v21  ;;  %v400_v31 = vld [vmem:[%s5753_s23 + $0x1e8] sm:$0xff]  ;;  %v393_v10 = vld [vmem:[%s5753_s23 + $0x1b0] sm:$0xff] }
 0x277   : > { %5003 = vrcp.f32 %v2172_v15  ;;  %v2169_v12 = vpop.xlane.xlu1 %2168  ;;  %4770 = vmatpush3.bf16.msra.mxu1 %v4767_v8  ;;  %v391_v15 = vld [vmem:[%s5753_s23 + $0x1a0] sm:$0xff] }
 0x278   : > { %v4994_v47 = vpop.eup %4993  ;;  %5005 = vrcp.f32 %v2169_v12  ;;  %4772 = vmatprep.subr.bf16.mxu1 %v4771_v34 }
 0x279   : > { %v4996_v9 = vpop.eup %4995  ;;  %v2178_v51 = vpop.xlane.xlu0 %2177  ;;  %v2353_v44 = vmul.f32 %v4994_v47, %v5874_v25  ;;  %4758 = vmatpush3.bf16.msra.mxu0 %v4755_v21 }
 0x27a   : > { %v4998_v37 = vpop.eup %4997  ;;  %4776 = vmatprep.subr.bf16.mxu0 %v6145_v49  ;;  %v2362_v57 = vmul.f32 %v4996_v9, %v5853_v54  ;;  %5007 = vrcp.f32 %v2178_v51  ;;  %v401_v9 = vld [vmem:[%s5753_s23 + $0x1f0] sm:$0xff]  ;;  %v402_v51 = vld [vmem:[%s5753_s23 + $0x1f8] sm:$0xff] }
 0x27b   : > { %4341 = vmatprep.mubr.msk.f32.mxu0 %vm1692_vm2, %v2353_v44  ;;  %v2202_v55 = vpop.xlane.xlu1 %2201  ;;  %v2361_v33 = vmul.f32 %v4998_v37, %v5868_v1  ;;  %4774 = vmatpush3.bf16.msra.mxu1 %v4771_v34 }
 0x27c   : > { %4342 = vmatmul.mubr.msk.f32.gmra.mrb[44].mxu0 %vm1692_vm2, %v2354_v2  ;;  %4792 = vmatprep.subr.bf16.mxu1 %v6147_v45  ;;  %v5000_v20 = vpop.eup %4999  ;;  %v4787_v2 = vpack.c.bf16 %v394_v30, %v393_v10 }
 0x27d   : > { %v2175_v25 = vpop.xlane.xlu0 %2174  ;;  %4369 = vmatprep.mubr.msk.f32.mxu1 %vm1692_vm2, %v2361_v33  ;;  %v2356_v22 = vmul.f32 %v5000_v20, %v5885_v14 }
 0x27e   : > { %5009 = vrcp.f32 %v2175_v25  ;;  %4370 = vmatmul.mubr.msk.f32.gmra.mrb[44].mxu1 %vm1692_vm2, %v2362_v57 }
 0x27f   : > { %5011 = vrcp.f32 %v2202_v55  ;;  %v2199_v61 = vpop.xlane.xlu1 %2198 }
 0x280   : > { %v5002_v7 = vpop.eup %5001  ;;  %5013 = vrcp.f32 %v2199_v61 }
 0x281   : > { %v5004_v1 = vpop.eup %5003  ;;  %v2184_v58 = vpop.xlane.xlu0 %2183  ;;  %v2355_v35 = vmul.f32 %v5002_v7, %v5895_v3 }
 0x282   : > { %v5006_v54 = vpop.eup %5005  ;;  %v2364_v38 = vmul.f32 %v5004_v1, %v5881_v0  ;;  %5015 = vrcp.f32 %v2184_v58  ;;  %v6466_v1 = vld [vmem:[#allocation3_spill] sm:$0xff] }
 0x283   : > { %4344 = vmatprep.mubr.msk.f32.mxu0 %vm1692_vm2, %v2355_v35  ;;  %v2208_v6 = vpop.xlane.xlu1 %2207  ;;  %v2363_v5 = vmul.f32 %v5006_v54, %v5891_v46  ;;  %v390_v46 = vld [vmem:[%s5753_s23 + $0x198] sm:$0xff] }
 0x284   : > { %4345 = vmatmul.mubr.msk.f32.gmra.mrb[46].mxu0 %vm1692_vm2, %v2356_v22  ;;  %v5008_v3 = vpop.eup %5007  ;;  %v4779_v18 = vpack.c.bf16 %v390_v46, %v389_v43  ;;  %v6467_v54 = vld [vmem:[#allocation5_spill] sm:$0xff] }
 0x285   : > { %v2181_v28 = vpop.xlane.xlu0 %2180  ;;  %4372 = vmatprep.mubr.msk.f32.mxu1 %vm1692_vm2, %v2363_v5  ;;  %v2366_v4 = vmul.f32 %v5008_v3, %v5905_v13  ;;  %v399_v13 = vld [vmem:[%s5753_s23 + $0x1e0] sm:$0xff] }
 0x286   : > { %5017 = vrcp.f32 %v2181_v28  ;;  %4373 = vmatmul.mubr.msk.f32.gmra.mrb[46].mxu1 %vm1692_vm2, %v2364_v38 }
 0x287   : > { %5019 = vrcp.f32 %v2208_v6  ;;  %v2205_v14 = vpop.xlane.xlu1 %2204  ;;  %v6468_v6 = vld [vmem:[#allocation2_spill] sm:$0xff] }
 0x288   : > { %v5010_v48 = vpop.eup %5009  ;;  %5021 = vrcp.f32 %v2205_v14 }
 0x289   : > { %v5012_v8 = vpop.eup %5011  ;;  %v2190_v0 = vpop.xlane.xlu0 %2189  ;;  %v2365_v23 = vmul.f32 %v5010_v48, %v5915_v40  ;;  %v4795_v40 = vpack.c.bf16 %v398_v52, %v397_v60  ;;  %v6470_v52 = vld [vmem:[#allocation4_spill] sm:$0xff] }
 0x28a   : > { %v5014_v39 = vpop.eup %5013  ;;  %v2374_v19 = vmul.f32 %v5012_v8, %v5901_v53  ;;  %5023 = vrcp.f32 %v2190_v0 }
 0x28b   : > { %4391 = vmatprep.mubr.msk.f32.mxu0 %vm1692_vm2, %v2365_v23  ;;  %v2214_v24 = vpop.xlane.xlu1 %2213  ;;  %v2373_v21 = vmul.f32 %v5014_v39, %v5911_v63  ;;  %v4783_v63 = vpack.c.bf16 %v392_v11, %v391_v15  ;;  %v6469_v23 = vld [vmem:[#allocation6_spill] sm:$0xff]  ;;  %v6471_v15 = vld [vmem:[#allocation16_spill] sm:$0xff] }
 0x28c   : > { %4392 = vmatmul.mubr.msk.f32.vlgmr.msra.gmra.mrb[48].mxu0 %vm1692_vm2, %v2366_v4  ;;  %v5016_v53 = vpop.eup %5015 }
 0x28d   : > { %v2187_v27 = vpop.xlane.xlu0 %2186  ;;  %4419 = vmatprep.mubr.msk.f32.mxu1 %vm1692_vm2, %v2373_v21  ;;  %4778 = vmatpush3.bf16.msra.mxu0 %v6145_v49  ;;  %v4799_v49 = vpack.c.bf16 %v400_v31, %v399_v13  ;;  %v2368_v37 = vmul.f32 %v5016_v53, %v5925_v59  ;;  %v6473_v31 = vld [vmem:[#allocation9_spill] sm:$0xff]  ;;  %v6474_v53 = vld [vmem:[#allocation7_spill] sm:$0xff] }
 0x28e   : > { %5025 = vrcp.f32 %v2187_v27  ;;  %4420 = vmatmul.mubr.msk.f32.vlgmr.msra.gmra.mrb[48].mxu1 %vm1692_vm2, %v2374_v19  ;;  %4780 = vmatprep.subr.bf16.mxu0 %v4779_v18 }
 0x28f   : > { %5027 = vrcp.f32 %v2214_v24  ;;  %v2211_v34 = vpop.xlane.xlu1 %2210  ;;  %4794 = vmatpush3.bf16.msra.mxu1 %v6147_v45 }
 0x290   : > { %v5018_v32 = vpop.eup %5017  ;;  %5029 = vrcp.f32 %v2211_v34  ;;  %4796 = vmatprep.subr.bf16.mxu1 %v4795_v40 }
 0x291   : > { %v5020_v26 = vpop.eup %5019  ;;  %v2196_v12 = vpop.xlane.xlu0 %2195  ;;  %v2367_v47 = vmul.f32 %v5018_v32, %v5935_v16  ;;  %4782 = vmatpush3.bf16.msra.mxu0 %v4779_v18  ;;  %v4803_v16 = vpack.c.bf16 %v402_v51, %v401_v9  ;;  %v6475_v9 = vld [vmem:[#allocation11_spill] sm:$0xff] }
 0x292   : > { %v5022_v44 = vpop.eup %5021  ;;  %4784 = vmatprep.subr.bf16.mxu0 %v4783_v63  ;;  %v2376_v33 = vmul.f32 %v5020_v26, %v5921_v41  ;;  %5031 = vrcp.f32 %v2196_v12 }
 0x293   : > { %4394 = vmatprep.mubr.msk.f32.mxu0 %vm1692_vm2, %v2367_v47  ;;  %v2220_v45 = vpop.xlane.xlu1 %2219  ;;  %v2375_v55 = vmul.f32 %v5022_v44, %v5931_v62  ;;  %4798 = vmatpush3.bf16.msra.mxu1 %v4795_v40  ;;  %v6472_v40 = vld [vmem:[#allocation8_spill] sm:$0xff] }
 0x294   : > { %4395 = vmatmul.mubr.msk.f32.gmra.mrb[50].mxu0 %vm1692_vm2, %v2368_v37  ;;  %4800 = vmatprep.subr.bf16.mxu1 %v4799_v49  ;;  %v5024_v59 = vpop.eup %5023 }
 0x295   : > { %v2193_v57 = vpop.xlane.xlu0 %2192  ;;  %4422 = vmatprep.mubr.msk.f32.mxu1 %vm1692_vm2, %v2375_v55  ;;  %4786 = vmatpush3.bf16.msra.mxu0 %v4783_v63  ;;  %v2370_v58 = vmul.f32 %v5024_v59, %v6466_v1 }
 0x296   : > { %5033 = vrcp.f32 %v2193_v57  ;;  %4423 = vmatmul.mubr.msk.f32.gmra.mrb[50].mxu1 %vm1692_vm2, %v2376_v33  ;;  %4788 = vmatprep.subr.bf16.mxu0 %v4787_v2 }
 0x297   : > { %5035 = vrcp.f32 %v2220_v45  ;;  %v2217_v25 = vpop.xlane.xlu1 %2216  ;;  %4802 = vmatpush3.bf16.msra.mxu1 %v4799_v49 }
 0x298   : > { %v5026_v62 = vpop.eup %5025  ;;  %5037 = vrcp.f32 %v2217_v25  ;;  %4804 = vmatprep.subr.bf16.mxu1 %v4803_v16 }
 0x299   : > { %v5028_v20 = vpop.eup %5027  ;;  %v2226_v41 = vpop.xlane.xlu0 %2225  ;;  %v2369_v61 = vmul.f32 %v5026_v62, %v5955_v17  ;;  %4790 = vmatpush3.bf16.msra.mxu0 %v4787_v2  ;;  %v6476_v2 = vld [vmem:[#allocation10_spill] sm:$0xff]  ;;  %v6477_v62 = vld [vmem:[#allocation13_spill] sm:$0xff] }
 0x29a   : > { %v5030_v7 = vpop.eup %5029  ;;  %v2378_v5 = vmul.f32 %v5028_v20, %v6468_v6  ;;  %5039 = vrcp.f32 %v2226_v41  ;;  %v6478_v41 = vld [vmem:[#allocation14_spill] sm:$0xff] }
 0x29b   : > { %4397 = vmatprep.mubr.msk.f32.mxu0 %vm1692_vm2, %v2369_v61  ;;  %v2250_v35 = vpop.xlane.xlu1 %2249  ;;  %v2377_v22 = vmul.f32 %v5030_v7, %v6467_v54  ;;  %4806 = vmatpush3.bf16.msra.mxu1 %v4803_v16  ;;  %v6479_v7 = vld [vmem:[#allocation12_spill] sm:$0xff] }
 0x29c   : > { %4398 = vmatmul.mubr.msk.f32.gmra.mrb[52].mxu0 %vm1692_vm2, %v2370_v58  ;;  %v5032_v17 = vpop.eup %5031 }
 0x29d   : > { %v2223_v38 = vpop.xlane.xlu0 %2222  ;;  %4425 = vmatprep.mubr.msk.f32.mxu1 %vm1692_vm2, %v2377_v22  ;;  %v2372_v8 = vmul.f32 %v5032_v17, %v5965_v50  ;;  %v6481_v22 = vld [vmem:[#allocation17_spill] sm:$0xff]  ;;  %v6482_v17 = vld [vmem:[#allocation18_spill] sm:$0xff] }
 0x29e   : > { %5041 = vrcp.f32 %v2223_v38  ;;  %4426 = vmatmul.mubr.msk.f32.gmra.mrb[52].mxu1 %vm1692_vm2, %v2378_v5 }
 0x29f   : > { %5043 = vrcp.f32 %v2250_v35  ;;  %v2247_v28 = vpop.xlane.xlu1 %2246 }
 0x2a0   : > { %v5034_v3 = vpop.eup %5033  ;;  %5045 = vrcp.f32 %v2247_v28 }
 0x2a1   : > { %v5036_v14 = vpop.eup %5035  ;;  %v2232_v43 = vpop.xlane.xlu0 %2231  ;;  %v2371_v46 = vmul.f32 %v5034_v3, %v5975_v29  ;;  %v6483_v3 = vld [vmem:[#allocation19_spill] sm:$0xff] }
 0x2a2   : > { %v5038_v48 = vpop.eup %5037  ;;  %v2380_v39 = vmul.f32 %v5036_v14, %v6470_v52  ;;  %5047 = vrcp.f32 %v2232_v43 }
 0x2a3   : > { %4400 = vmatprep.mubr.msk.f32.mxu0 %vm1692_vm2, %v2371_v46  ;;  %v2256_v0 = vpop.xlane.xlu1 %2255  ;;  %v2379_v60 = vmul.f32 %v5038_v48, %v6469_v23 }
 0x2a4   : > { %4401 = vmatmul.mubr.msk.f32.gmra.mrb[54].mxu0 %vm1692_vm2, %v2372_v8  ;;  %v5040_v29 = vpop.eup %5039 }
 0x2a5   : > { %v2229_v4 = vpop.xlane.xlu0 %2228  ;;  %4428 = vmatprep.mubr.msk.f32.mxu1 %vm1692_vm2, %v2379_v60  ;;  %v2382_v27 = vmul.f32 %v5040_v29, %v6472_v40 }
 0x2a6   : > { %5049 = vrcp.f32 %v2229_v4  ;;  %4429 = vmatmul.mubr.msk.f32.gmra.mrb[54].mxu1 %vm1692_vm2, %v2380_v39 }
 0x2a7   : > { %5051 = vrcp.f32 %v2256_v0  ;;  %v2253_v18 = vpop.xlane.xlu1 %2252 }
 0x2a8   : > { %v5042_v50 = vpop.eup %5041  ;;  %5053 = vrcp.f32 %v2253_v18 }
 0x2a9   : > { %v5044_v24 = vpop.eup %5043  ;;  %v2238_v21 = vpop.xlane.xlu0 %2237  ;;  %v2381_v11 = vmul.f32 %v5042_v50, %v6471_v15 }
 0x2aa   : > { %v5046_v19 = vpop.eup %5045  ;;  %v2390_v34 = vmul.f32 %v5044_v24, %v6474_v53  ;;  %5055 = vrcp.f32 %v2238_v21 }
 0x2ab   : > { %4447 = vmatprep.mubr.msk.f32.mxu0 %vm1692_vm2, %v2381_v11  ;;  %v2262_v13 = vpop.xlane.xlu1 %2261  ;;  %v2389_v63 = vmul.f32 %v5046_v19, %v6473_v31 }
 0x2ac   : > { %4448 = vmatmul.mubr.msk.f32.vlgmr.msra.gmra.mrb[56].mxu0 %vm1692_vm2, %v2382_v27  ;;  %v5048_v30 = vpop.eup %5047 }
 0x2ad   : > { %v2235_v10 = vpop.xlane.xlu0 %2234  ;;  %4475 = vmatprep.mubr.msk.f32.mxu1 %vm1692_vm2, %v2389_v63  ;;  %v2384_v51 = vmul.f32 %v5048_v30, %v6475_v9 }
 0x2ae   : > { %5057 = vrcp.f32 %v2235_v10  ;;  %4476 = vmatmul.mubr.msk.f32.vlgmr.msra.gmra.mrb[56].mxu1 %vm1692_vm2, %v2390_v34 }
 0x2af   : > { %5059 = vrcp.f32 %v2262_v13  ;;  %v2259_v32 = vpop.xlane.xlu1 %2258 }
 0x2b0   : > { %v5050_v49 = vpop.eup %5049  ;;  %5061 = vrcp.f32 %v2259_v32 }
 0x2b1   : > { %v5052_v26 = vpop.eup %5051  ;;  %v2383_v12 = vmul.f32 %v5050_v49, %v6014_v42 }
 0x2b2   : > { %v5054_v47 = vpop.eup %5053  ;;  %v2392_v45 = vmul.f32 %v5052_v26, %v6476_v2 }
 0x2b3   : > { %4450 = vmatprep.mubr.msk.f32.mxu0 %vm1692_vm2, %v2383_v12  ;;  %v2391_v44 = vmul.f32 %v5054_v47, %v6010_v56 }
 0x2b4   : > { %v2265_v37 = vpop.xlane.xlu1 %2264  ;;  %4451 = vmatmul.mubr.msk.f32.gmra.mrb[58].mxu0 %vm1692_vm2, %v2384_v51  ;;  %v5056_v42 = vpop.eup %5055 }
 0x2b5   : > { %5063 = vrcp.f32 %v2265_v37  ;;  %v2241_v55 = vpop.xlane.xlu0 %2240  ;;  %4478 = vmatprep.mubr.msk.f32.mxu1 %vm1692_vm2, %v2391_v44  ;;  %v2386_v20 = vmul.f32 %v5056_v42, %v6477_v62 }
 0x2b6   : > { %5065 = vrcp.f32 %v2241_v55  ;;  %4479 = vmatmul.mubr.msk.f32.gmra.mrb[58].mxu1 %vm1692_vm2, %v2392_v45 }
 0x2b8   : > { %v5058_v33 = vpop.eup %5057  ;;  %v2268_v16 = vpop.xlane.xlu1 %2267 }
 0x2b9   : > { %v5060_v57 = vpop.eup %5059  ;;  %5067 = vrcp.f32 %v2268_v16  ;;  %v2244_v59 = vpop.xlane.xlu0 %2243  ;;  %v2385_v56 = vmul.f32 %v5058_v33, %v6033_v36  ;;  %v6480_v36 = vld [vmem:[#allocation15_spill] sm:$0xff] }
 0x2ba   : > { %v5062_v25 = vpop.eup %5061  ;;  %5069 = vrcp.f32 %v2244_v59  ;;  %v2394_v1 = vmul.f32 %v5060_v57, %v6479_v7 }
 0x2bb   : > { %4453 = vmatprep.mubr.msk.f32.mxu0 %vm1692_vm2, %v2385_v56  ;;  %v2393_v61 = vmul.f32 %v5062_v25, %v6478_v41 }
 0x2bc   : > { %4454 = vmatmul.mubr.msk.f32.gmra.mrb[60].mxu0 %vm1692_vm2, %v2386_v20 }
 0x2bd   : > { %4481 = vmatprep.mubr.msk.f32.mxu1 %vm1692_vm2, %v2393_v61 }
 0x2be   : > { %4482 = vmatmul.mubr.msk.f32.gmra.mrb[60].mxu1 %vm1692_vm2, %v2394_v1 }
 0x2bf   : > { %v5064_v58 = vpop.eup %5063 }
 0x2c0   : > { %v5066_v35 = vpop.eup %5065  ;;  %v2395_v54 = vmul.f32 %v5064_v58, %v6480_v36 }
 0x2c1   : > { %v2387_v6 = vmul.f32 %v5066_v35, %v6481_v22 }
 0x2c2   : > { %4484 = vmatprep.mubr.msk.f32.mxu1 %vm1692_vm2, %v2395_v54 }
 0x2c3   : > { %v5068_v5 = vpop.eup %5067  ;;  %4456 = vmatprep.mubr.msk.f32.mxu0 %vm1692_vm2, %v2387_v6 }
 0x2c4   : > { %v5070_v38 = vpop.eup %5069  ;;  %v2396_v28 = vmul.f32 %v5068_v5, %v6482_v17 }
 0x2c5   : > { %v2388_v14 = vmul.f32 %v5070_v38, %v6483_v3 }
 0x2c6   : > { %4485 = vmatmul.mubr.msk.f32.gmra.mrb[62].mxu1 %vm1692_vm2, %v2396_v28 }
 0x2c7   : > { %4457 = vmatmul.mubr.msk.f32.gmra.mrb[62].mxu0 %vm1692_vm2, %v2388_v14 }
 0x31d   : > { %v4281_v43 = vpop.f32.mrb[32].mxu0 }
 0x31e   : > { %3430 = vst.msk [vmem:[%s6249_s26 + $0x8] sm:$0xff] %vm403_vm0, %v4281_v43  ;;  %v2487_v46 = vpop.f32.mrb[33].mxu0 }
 0x31f   : > { %3429 = vst.msk [vmem:[%s6249_s26] sm:$0xff] %vm403_vm0, %v2487_v46 }
 0x321   : > { %v4309_v48 = vpop.f32.mrb[32].mxu1 }
 0x322   : > { %3438 = vst.msk [vmem:[%s6249_s26 + $0x48] sm:$0xff] %vm403_vm0, %v4309_v48  ;;  %v2616_v8 = vpop.f32.mrb[33].mxu1 }
 0x323   : > { %3437 = vst.msk [vmem:[%s6249_s26 + $0x40] sm:$0xff] %vm403_vm0, %v2616_v8 }
 0x326   : > { %v4284_v0 = vpop.f32.mrb[34].mxu0 }
 0x327   : > { %3432 = vst.msk [vmem:[%s6249_s26 + $0x18] sm:$0xff] %vm403_vm0, %v4284_v0  ;;  %v2497_v23 = vpop.f32.mrb[35].mxu0 }
 0x328   : > { %3431 = vst.msk [vmem:[%s6249_s26 + $0x10] sm:$0xff] %vm403_vm0, %v2497_v23 }
 0x329   : > { %v4312_v60 = vpop.f32.mrb[34].mxu1 }
 0x32a   : > { %3440 = vst.msk [vmem:[%s6249_s26 + $0x58] sm:$0xff] %vm403_vm0, %v4312_v60  ;;  %v2626_v52 = vpop.f32.mrb[35].mxu1 }
 0x32b   : > { %3439 = vst.msk [vmem:[%s6249_s26 + $0x50] sm:$0xff] %vm403_vm0, %v2626_v52 }
 0x32e   : > { %v4287_v39 = vpop.f32.mrb[36].mxu0 }
 0x32f   : > { %3434 = vst.msk [vmem:[%s6249_s26 + $0x28] sm:$0xff] %vm403_vm0, %v4287_v39  ;;  %v2507_v4 = vpop.f32.mrb[37].mxu0 }
 0x330   : > { %3433 = vst.msk [vmem:[%s6249_s26 + $0x20] sm:$0xff] %vm403_vm0, %v2507_v4 }
 0x331   : > { %v4315_v29 = vpop.f32.mrb[36].mxu1 }
 0x332   : > { %3442 = vst.msk [vmem:[%s6249_s26 + $0x68] sm:$0xff] %vm403_vm0, %v4315_v29  ;;  %v2636_v18 = vpop.f32.mrb[37].mxu1 }
 0x333   : > { %3441 = vst.msk [vmem:[%s6249_s26 + $0x60] sm:$0xff] %vm403_vm0, %v2636_v18 }
 0x336   : > { %v4290_v50 = vpop.f32.mrb[38].mxu0 }
 0x337   : > { %3436 = vst.msk [vmem:[%s6249_s26 + $0x38] sm:$0xff] %vm403_vm0, %v4290_v50  ;;  %v2517_v24 = vpop.f32.mrb[39].mxu0 }
 0x338   : > { %3435 = vst.msk [vmem:[%s6249_s26 + $0x30] sm:$0xff] %vm403_vm0, %v2517_v24 }
 0x339   : > { %v4318_v21 = vpop.f32.mrb[38].mxu1 }
 0x33a   : > { %3444 = vst.msk [vmem:[%s6249_s26 + $0x78] sm:$0xff] %vm403_vm0, %v4318_v21  ;;  %v2646_v15 = vpop.f32.mrb[39].mxu1 }
 0x33b   : > { %3443 = vst.msk [vmem:[%s6249_s26 + $0x70] sm:$0xff] %vm403_vm0, %v2646_v15 }
 0x33f   : > { %v4337_v11 = vpop.f32.mrb[40].mxu0 }
 0x340   : > { %3446 = vst.msk [vmem:[%s6249_s26 + $0x88] sm:$0xff] %vm403_vm0, %v4337_v11  ;;  %v2745_v19 = vpop.f32.mrb[41].mxu0 }
 0x341   : > { %3445 = vst.msk [vmem:[%s6249_s26 + $0x80] sm:$0xff] %vm403_vm0, %v2745_v19  ;;  %v4365_v40 = vpop.f32.mrb[40].mxu1 }
 0x342   : > { %3454 = vst.msk [vmem:[%s6249_s26 + $0xc8] sm:$0xff] %vm403_vm0, %v4365_v40  ;;  %v2874_v27 = vpop.f32.mrb[41].mxu1 }
 0x343   : > { %3453 = vst.msk [vmem:[%s6249_s26 + $0xc0] sm:$0xff] %vm403_vm0, %v2874_v27 }
 0x347   : > { %v4340_v13 = vpop.f32.mrb[42].mxu0 }
 0x348   : > { %3448 = vst.msk [vmem:[%s6249_s26 + $0x98] sm:$0xff] %vm403_vm0, %v4340_v13  ;;  %v2755_v31 = vpop.f32.mrb[43].mxu0 }
 0x349   : > { %3447 = vst.msk [vmem:[%s6249_s26 + $0x90] sm:$0xff] %vm403_vm0, %v2755_v31  ;;  %v4368_v63 = vpop.f32.mrb[42].mxu1 }
 0x34a   : > { %3456 = vst.msk [vmem:[%s6249_s26 + $0xd8] sm:$0xff] %vm403_vm0, %v4368_v63  ;;  %v2884_v53 = vpop.f32.mrb[43].mxu1 }
 0x34b   : > { %3455 = vst.msk [vmem:[%s6249_s26 + $0xd0] sm:$0xff] %vm403_vm0, %v2884_v53 }
 0x34f   : > { %v4343_v34 = vpop.f32.mrb[44].mxu0 }
 0x350   : > { %3450 = vst.msk [vmem:[%s6249_s26 + $0xa8] sm:$0xff] %vm403_vm0, %v4343_v34  ;;  %v2765_v10 = vpop.f32.mrb[45].mxu0 }
 0x351   : > { %3449 = vst.msk [vmem:[%s6249_s26 + $0xa0] sm:$0xff] %vm403_vm0, %v2765_v10  ;;  %v4371_v30 = vpop.f32.mrb[44].mxu1 }
 0x352   : > { %3458 = vst.msk [vmem:[%s6249_s26 + $0xe8] sm:$0xff] %vm403_vm0, %v4371_v30  ;;  %v2894_v32 = vpop.f32.mrb[45].mxu1 }
 0x353   : > { %3457 = vst.msk [vmem:[%s6249_s26 + $0xe0] sm:$0xff] %vm403_vm0, %v2894_v32 }
 0x357   : > { %v4346_v49 = vpop.f32.mrb[46].mxu0 }
 0x358   : > { %3452 = vst.msk [vmem:[%s6249_s26 + $0xb8] sm:$0xff] %vm403_vm0, %v4346_v49  ;;  %v2775_v26 = vpop.f32.mrb[47].mxu0 }
 0x359   : > { %3451 = vst.msk [vmem:[%s6249_s26 + $0xb0] sm:$0xff] %vm403_vm0, %v2775_v26  ;;  %v4374_v12 = vpop.f32.mrb[46].mxu1 }
 0x35a   : > { %3460 = vst.msk [vmem:[%s6249_s26 + $0xf8] sm:$0xff] %vm403_vm0, %v4374_v12  ;;  %v2904_v47 = vpop.f32.mrb[47].mxu1 }
 0x35b   : > { %3459 = vst.msk [vmem:[%s6249_s26 + $0xf0] sm:$0xff] %vm403_vm0, %v2904_v47 }
 0x35f   : > { %v4393_v9 = vpop.f32.mrb[48].mxu0 }
 0x360   : > { %3462 = vst.msk [vmem:[%s6249_s26 + $0x108] sm:$0xff] %vm403_vm0, %v4393_v9  ;;  %v3003_v51 = vpop.f32.mrb[49].mxu0 }
 0x361   : > { %3461 = vst.msk [vmem:[%s6249_s26 + $0x100] sm:$0xff] %vm403_vm0, %v3003_v51  ;;  %v4421_v44 = vpop.f32.mrb[48].mxu1 }
 0x362   : > { %3470 = vst.msk [vmem:[%s6249_s26 + $0x148] sm:$0xff] %vm403_vm0, %v4421_v44  ;;  %v3132_v37 = vpop.f32.mrb[49].mxu1 }
 0x363   : > { %3469 = vst.msk [vmem:[%s6249_s26 + $0x140] sm:$0xff] %vm403_vm0, %v3132_v37 }
 0x367   : > { %v4396_v2 = vpop.f32.mrb[50].mxu0 }
 0x368   : > { %3464 = vst.msk [vmem:[%s6249_s26 + $0x118] sm:$0xff] %vm403_vm0, %v4396_v2  ;;  %v3013_v45 = vpop.f32.mrb[51].mxu0 }
 0x369   : > { %3463 = vst.msk [vmem:[%s6249_s26 + $0x110] sm:$0xff] %vm403_vm0, %v3013_v45  ;;  %v4424_v55 = vpop.f32.mrb[50].mxu1 }
 0x36a   : > { %3472 = vst.msk [vmem:[%s6249_s26 + $0x158] sm:$0xff] %vm403_vm0, %v4424_v55  ;;  %v3142_v42 = vpop.f32.mrb[51].mxu1 }
 0x36b   : > { %3471 = vst.msk [vmem:[%s6249_s26 + $0x150] sm:$0xff] %vm403_vm0, %v3142_v42 }
 0x36f   : > { %v4399_v33 = vpop.f32.mrb[52].mxu0 }
 0x370   : > { %3466 = vst.msk [vmem:[%s6249_s26 + $0x128] sm:$0xff] %vm403_vm0, %v4399_v33  ;;  %v3023_v16 = vpop.f32.mrb[53].mxu0 }
 0x371   : > { %3465 = vst.msk [vmem:[%s6249_s26 + $0x120] sm:$0xff] %vm403_vm0, %v3023_v16  ;;  %v4427_v57 = vpop.f32.mrb[52].mxu1 }
 0x372   : > { %3474 = vst.msk [vmem:[%s6249_s26 + $0x168] sm:$0xff] %vm403_vm0, %v4427_v57  ;;  %v3152_v59 = vpop.f32.mrb[53].mxu1 }
 0x373   : > { %3473 = vst.msk [vmem:[%s6249_s26 + $0x160] sm:$0xff] %vm403_vm0, %v3152_v59 }
 0x377   : > { %v4402_v56 = vpop.f32.mrb[54].mxu0 }
 0x378   : > { %3468 = vst.msk [vmem:[%s6249_s26 + $0x138] sm:$0xff] %vm403_vm0, %v4402_v56  ;;  %v3033_v25 = vpop.f32.mrb[55].mxu0 }
 0x379   : > { %3467 = vst.msk [vmem:[%s6249_s26 + $0x130] sm:$0xff] %vm403_vm0, %v3033_v25  ;;  %v4430_v62 = vpop.f32.mrb[54].mxu1 }
 0x37a   : > { %3476 = vst.msk [vmem:[%s6249_s26 + $0x178] sm:$0xff] %vm403_vm0, %v4430_v62  ;;  %v3162_v20 = vpop.f32.mrb[55].mxu1 }
 0x37b   : > { %3475 = vst.msk [vmem:[%s6249_s26 + $0x170] sm:$0xff] %vm403_vm0, %v3162_v20 }
 0x37f   : > { %v4449_v41 = vpop.f32.mrb[56].mxu0 }
 0x380   : > { %3478 = vst.msk [vmem:[%s6249_s26 + $0x188] sm:$0xff] %vm403_vm0, %v4449_v41  ;;  %v3261_v61 = vpop.f32.mrb[57].mxu0 }
 0x381   : > { %3477 = vst.msk [vmem:[%s6249_s26 + $0x180] sm:$0xff] %vm403_vm0, %v3261_v61  ;;  %v4477_v7 = vpop.f32.mrb[56].mxu1 }
 0x382   : > { %3486 = vst.msk [vmem:[%s6249_s26 + $0x1c8] sm:$0xff] %vm403_vm0, %v4477_v7  ;;  %v3390_v1 = vpop.f32.mrb[57].mxu1 }
 0x383   : > { %3485 = vst.msk [vmem:[%s6249_s26 + $0x1c0] sm:$0xff] %vm403_vm0, %v3390_v1 }
 0x387   : > { %v4452_v58 = vpop.f32.mrb[58].mxu0 }
 0x388   : > { %3480 = vst.msk [vmem:[%s6249_s26 + $0x198] sm:$0xff] %vm403_vm0, %v4452_v58  ;;  %v3271_v35 = vpop.f32.mrb[59].mxu0 }
 0x389   : > { %3479 = vst.msk [vmem:[%s6249_s26 + $0x190] sm:$0xff] %vm403_vm0, %v3271_v35  ;;  %v4480_v36 = vpop.f32.mrb[58].mxu1 }
 0x38a   : > { %3488 = vst.msk [vmem:[%s6249_s26 + $0x1d8] sm:$0xff] %vm403_vm0, %v4480_v36  ;;  %v3400_v54 = vpop.f32.mrb[59].mxu1 }
 0x38b   : > { %3487 = vst.msk [vmem:[%s6249_s26 + $0x1d0] sm:$0xff] %vm403_vm0, %v3400_v54 }
 0x38f   : > { %v4455_v22 = vpop.f32.mrb[60].mxu0 }
 0x390   : > { %3482 = vst.msk [vmem:[%s6249_s26 + $0x1a8] sm:$0xff] %vm403_vm0, %v4455_v22  ;;  %v3281_v6 = vpop.f32.mrb[61].mxu0 }
 0x391   : > { %3481 = vst.msk [vmem:[%s6249_s26 + $0x1a0] sm:$0xff] %vm403_vm0, %v3281_v6  ;;  %v4483_v5 = vpop.f32.mrb[60].mxu1 }
 0x392   : > { %3490 = vst.msk [vmem:[%s6249_s26 + $0x1e8] sm:$0xff] %vm403_vm0, %v4483_v5  ;;  %v3410_v38 = vpop.f32.mrb[61].mxu1 }
 0x393   : > { %3489 = vst.msk [vmem:[%s6249_s26 + $0x1e0] sm:$0xff] %vm403_vm0, %v3410_v38 }
 0x399   : > { %v4486_v17 = vpop.f32.mrb[62].mxu1 }
 0x39a   : > { %3492 = vst.msk [vmem:[%s6249_s26 + $0x1f8] sm:$0xff] %vm403_vm0, %v4486_v17  ;;  %v4458_v28 = vpop.f32.mrb[62].mxu0  ;;  %v3420_v3 = vpop.f32.mrb[63].mxu1 }
 0x39b   : > { %3484 = vst.msk [vmem:[%s6249_s26 + $0x1b8] sm:$0xff] %vm403_vm0, %v4458_v28  ;;  %3491 = vst.msk [vmem:[%s6249_s26 + $0x1f0] sm:$0xff] %vm403_vm0, %v3420_v3  ;;  %v3291_v14 = vpop.f32.mrb[63].mxu0 }
 0x39c   : > { %3483 = vst.msk [vmem:[%s6249_s26 + $0x1b0] sm:$0xff] %vm403_vm0, %v3291_v14 }
 0x39d PF: > { %s13_s12 = sadd.s32 1, %s5077_s12  }
 0x39e   : > { %p10_p4 = scmp.ge.s32.totalorder %s13_s12, 4  }
 0x3a0   :  { %12 = sbr.rel (!%p10_p4) target bundleno = 1 (0x1), region = 68 }

</bundles_post_ra>
